<compile_context>
chip_gen: v5e
topology: v5e:2x2
jax: 0.10.0
libtpu: 0.0.40
codegen_flags: <defaults>
</compile_context>

<pallas_src>
import functools
import math

import jax
import jax.numpy as jnp
from jax.experimental import pallas as pl
from jax.experimental.pallas import tpu as pltpu


# ----------------------------- kernel helpers ------------------------------

def _bf16_dot(a, b):
    """MXU matmul with bf16 operands and f32 accumulation."""
    return jnp.dot(a.astype(jnp.bfloat16), b.astype(jnp.bfloat16),
                   preferred_element_type=jnp.float32)


def _layernorm(x, g, b, eps):
    """LayerNorm with f32 statistics (x is f32)."""
    mean = jnp.mean(x, axis=-1, keepdims=True)
    xc = x - mean
    var = jnp.mean(xc * xc, axis=-1, keepdims=True)
    return xc * jax.lax.rsqrt(var + eps) * g + b


# ------------------------------ fused kernel -------------------------------

def _tower_kernel(xyz_ref,
                  pre_w1_ref, pre_b1_ref, pre_w2_ref, pre_b2_ref,
                  pre_w3_ref, pre_b3_ref,
                  wqkv_ref, bqkv_ref, wo_ref, bo_ref,
                  ln1_g_ref, ln1_b_ref, w1_ref, b1_ref, w2_ref, b2_ref,
                  ln2_g_ref, ln2_b_ref,
                  head_w_ref, head_b_ref,
                  enc_ref, hid_ref, head_ref,
                  *, nhead, nlayers, eps):
    """Whole ThreeDETRVisionTower forward for ONE batch element, all in VMEM."""
    # ---- pre-encoder MLP: [P, 8(xyz pad)] -> 64 -> 128 -> 256 ------------
    xyz = xyz_ref[0]                                             # [P, 8] f32
    h = jnp.maximum(_bf16_dot(xyz, pre_w1_ref[...]) + pre_b1_ref[...], 0.0)
    h = jnp.maximum(_bf16_dot(h, pre_w2_ref[...]) + pre_b2_ref[...], 0.0)
    x = _bf16_dot(h, pre_w3_ref[...]) + pre_b3_ref[...]          # [P, D] f32

    d_model = x.shape[-1]
    hd = d_model // nhead

    # ---- transformer encoder (post-norm, relu FFN), statically unrolled ---
    for l in range(nlayers):
        # fused QKV projection (1/sqrt(hd) folded into the Q block)
        qkv = _bf16_dot(x, wqkv_ref[l]) + bqkv_ref[l]            # [P, 3D]
        q = qkv[:, :d_model]
        k = qkv[:, d_model:2 * d_model]
        v = qkv[:, 2 * d_model:]

        # per-head attention (static unrolled; H=4, hd=64, P small)
        heads = []
        for hh in range(nhead):
            sl = slice(hh * hd, (hh + 1) * hd)
            qh = q[:, sl].astype(jnp.bfloat16)
            kh = k[:, sl].astype(jnp.bfloat16)
            vh = v[:, sl].astype(jnp.bfloat16)
            s = jax.lax.dot_general(qh, kh, (((1,), (1,)), ((), ())),
                                    preferred_element_type=jnp.float32)  # [P,P]
            m = jnp.max(s, axis=-1, keepdims=True)
            p = jnp.exp(s - m)
            denom = jnp.sum(p, axis=-1, keepdims=True)
            p = p * pl.reciprocal(denom, approx=True)   # EUP; fine for inference
            heads.append(_bf16_dot(p, vh))                       # [P, hd]
        attn = jnp.concatenate(heads, axis=-1)                   # [P, D]

        # output projection + residual + LN1
        attn = _bf16_dot(attn, wo_ref[l]) + bo_ref[l]
        h1 = _layernorm(x + attn, ln1_g_ref[l], ln1_b_ref[l], eps)

        # FFN + residual + LN2
        ff = jnp.maximum(_bf16_dot(h1, w1_ref[l]) + b1_ref[l], 0.0)
        ff = _bf16_dot(ff, w2_ref[l]) + b2_ref[l]
        x = _layernorm(h1 + ff, ln2_g_ref[l], ln2_b_ref[l], eps)

        if l == nlayers - 2:                 # hidden_states[-2] of the encoder
            hid_ref[0] = x.astype(hid_ref.dtype)

    enc_ref[0] = x.astype(enc_ref.dtype)                         # last layer

    # ---- fused box-prediction heads: lane-dense [D, 128]-padded matmul ----
    y = _bf16_dot(x, head_w_ref[...]) + head_b_ref[...]
    head_ref[0] = y.astype(head_ref.dtype)


# ------------------------------ model wrapper -------------------------------

class ThreeDETRVisionTowerPallas:
    """Synthetic, deterministic re-implementation of ThreeDETRVisionTower.forward."""

    HIDDEN = 256      # self.hidden_size in the PyTorch module
    NHEAD = 4
    FFN = 128
    ENC_LAYERS = 3
    NUM_SEM_CLS = 18  # ScanNet DatasetConfig
    HEAD_OUT = 3 + 3 + NUM_SEM_CLS   # center + size + cls
    HEAD_PAD = 128                   # lane-dense padded head output width

    def __init__(self, num_preenc_points=16, seed=0):
        self.P = num_preenc_points
        key = jax.random.PRNGKey(seed)
        keys = iter(jax.random.split(key, 64))
        D, F, H, L = self.HIDDEN, self.FFN, self.NHEAD, self.ENC_LAYERS
        hd = D // H
        scale = 1.0 / math.sqrt(hd)

        def _w(k, fi, fo):
            return jax.random.normal(k, (fi, fo), jnp.float32) * 0.02

        # pre-encoder MLP (simplified PointNet set-abstraction): 3 -> 64 -> 128 -> 256
        # TODO(synk): farthest-point sampling + ball-query grouping + neighborhood
        #             max-pool of the real PointnetSAModuleVotes pre-encoder.
        self.pre_w1 = jnp.pad(_w(next(keys), 3, 64), ((0, 5), (0, 0))).astype(jnp.bfloat16)
        self.pre_b1 = jnp.zeros((1, 64), jnp.float32)
        self.pre_w2 = _w(next(keys), 64, 128).astype(jnp.bfloat16)
        self.pre_b2 = jnp.zeros((1, 128), jnp.float32)
        self.pre_w3 = _w(next(keys), 128, D).astype(jnp.bfloat16)
        self.pre_b3 = jnp.zeros((1, D), jnp.float32)

        # transformer encoder layers, stacked along a leading layer axis
        wqkv_l, wo_l, w1_l, w2_l = [], [], [], []
        for _ in range(L):
            wq = _w(next(keys), D, D) * scale      # 1/sqrt(head_dim) folded into Q
            wk = _w(next(keys), D, D)
            wv = _w(next(keys), D, D)
            wqkv_l.append(jnp.concatenate([wq, wk, wv], axis=1))
            wo_l.append(_w(next(keys), D, D))
            w1_l.append(_w(next(keys), D, F))
            w2_l.append(_w(next(keys), F, D))
        self.wqkv = jnp.stack(wqkv_l).astype(jnp.bfloat16)     # [L, D, 3D]
        self.bqkv = jnp.zeros((L, 1, 3 * D), jnp.float32)
        self.wo = jnp.stack(wo_l).astype(jnp.bfloat16)         # [L, D, D]
        self.bo = jnp.zeros((L, 1, D), jnp.float32)
        self.ln1_g = jnp.ones((L, 1, D), jnp.float32)
        self.ln1_b = jnp.zeros((L, 1, D), jnp.float32)
        self.w1 = jnp.stack(w1_l).astype(jnp.bfloat16)         # [L, D, F]
        self.b1 = jnp.zeros((L, 1, F), jnp.float32)
        self.w2 = jnp.stack(w2_l).astype(jnp.bfloat16)         # [L, F, D]
        self.b2 = jnp.zeros((L, 1, D), jnp.float32)
        self.ln2_g = jnp.ones((L, 1, D), jnp.float32)
        self.ln2_b = jnp.zeros((L, 1, D), jnp.float32)

        # simplified box-prediction heads, fused + padded to a lane-dense width
        # TODO(synk): full 3DETR decoder (query FPS embedding, 8 decoder layers,
        #             aux_outputs) has no compact equivalent here; heads only.
        head_w = jnp.concatenate([_w(next(keys), D, 3),
                                  _w(next(keys), D, 3),
                                  _w(next(keys), D, self.NUM_SEM_CLS)], axis=1)
        head_w = jnp.pad(head_w, ((0, 0), (0, self.HEAD_PAD - self.HEAD_OUT)))
        self.head_w = head_w.astype(jnp.bfloat16)
        self.head_b = jnp.zeros((1, self.HEAD_PAD), jnp.float32)

    # --------------------------------- forward ----------------------------------

    def __call__(self, point_cloud):
        # point_cloud: [B, N, C>=3] -> xyz only, float32 (matches reference)
        point_cloud = point_cloud.astype(jnp.float32)[:, :, :3]
        B, N, _ = point_cloud.shape
        P, D = self.P, self.HIDDEN

        # pre-encoder seed points: strided subsampling of P points
        # TODO(synk): replace strided sampling with farthest point sampling.
        stride = max(N // P, 1)
        enc_xyz = point_cloud[:, ::stride, :][:, :P, :]              # [B, P, 3]

        # pad xyz contraction dim 3 -> 8 once (sublane-friendly matmul operand)
        xyz_pad = jnp.pad(enc_xyz, ((0, 0), (0, 0), (0, 5)))         # [B, P, 8]

        weight_args = (self.pre_w1, self.pre_b1, self.pre_w2, self.pre_b2,
                       self.pre_w3, self.pre_b3,
                       self.wqkv, self.bqkv, self.wo, self.bo,
                       self.ln1_g, self.ln1_b, self.w1, self.b1,
                       self.w2, self.b2, self.ln2_g, self.ln2_b,
                       self.head_w, self.head_b)

        def _const_spec(a):
            if a.ndim == 2:
                return pl.BlockSpec(a.shape, lambda b: (0, 0))
            return pl.BlockSpec(a.shape, lambda b: (0, 0, 0))

        kernel = functools.partial(_tower_kernel, nhead=self.NHEAD,
                                   nlayers=self.ENC_LAYERS, eps=1e-5)

        enc_features, hidden, head_out = pl.pallas_call(
            kernel,
            out_shape=(jax.ShapeDtypeStruct((B, P, D), jnp.float32),
                       jax.ShapeDtypeStruct((B, P, D), jnp.float32),
                       jax.ShapeDtypeStruct((B, P, self.HEAD_PAD), jnp.float32)),
            grid=(B,),
            in_specs=[pl.BlockSpec((1, P, 8), lambda b: (b, 0, 0))]
                     + [_const_spec(a) for a in weight_args],
            out_specs=(pl.BlockSpec((1, P, D), lambda b: (b, 0, 0)),
                       pl.BlockSpec((1, P, D), lambda b: (b, 0, 0)),
                       pl.BlockSpec((1, P, self.HEAD_PAD), lambda b: (b, 0, 0))),
            compiler_params=pltpu.CompilerParams(
                dimension_semantics=("parallel",)),
        )(xyz_pad, *weight_args)

        # enc_features.permute(1, 0, 2) of seq-first == batch-first; already there.
        # hidden_states[-2] is returned seq-first [P, B, D]: one transpose, at the end.
        hidden = hidden.transpose(1, 0, 2)                           # [P, B, D]

        # slice the lane-dense padded head output here (cheap, outside the kernel)
        center_off = head_out[:, :, 0:3]
        size_raw = head_out[:, :, 3:6]
        cls_logits = head_out[:, :, 6:6 + self.NUM_SEM_CLS]

        box_predictions = {
            "outputs": {
                "center_unnormalized": enc_xyz + center_off,
                "size_unnormalized": jax.nn.softplus(size_raw),
                "sem_cls_logits": cls_logits,
            }
        }
        return box_predictions, enc_features, hidden


# ----------------------------------- main ------------------------------------

if __name__ == "__main__":
    key = jax.random.PRNGKey(0)
    B, N, C = 2, 64, 6                      # small point cloud: xyz + rgb
    point_cloud = jax.random.normal(key, (B, N, C), jnp.float32)

    tower = ThreeDETRVisionTowerPallas(num_preenc_points=16, seed=0)
    forward = jax.jit(tower.__call__)
    box_predictions, enc_features, hidden_states = forward(point_cloud)

    jax.block_until_ready((box_predictions, enc_features, hidden_states))

    assert enc_features.shape == (B, 16, 256)
    assert hidden_states.shape == (16, B, 256)
    assert box_predictions["outputs"]["center_unnormalized"].shape == (B, 16, 3)
    assert box_predictions["outputs"]["size_unnormalized"].shape == (B, 16, 3)
    assert box_predictions["outputs"]["sem_cls_logits"].shape == (B, 16, 18)
    print("KERNEL_OK")
</pallas_src>

<mosaic_0001>
module attributes {stable_mosaic.version = 11 : i64} {
  func.func @_tower_kernel(%arg0: i32, %arg1: memref<1x16x8xf32, #tpu.memory_space<vmem>>, %arg2: memref<8x64xbf16, #tpu.memory_space<vmem>>, %arg3: memref<1x64xf32, #tpu.memory_space<vmem>>, %arg4: memref<64x128xbf16, #tpu.memory_space<vmem>>, %arg5: memref<1x128xf32, #tpu.memory_space<vmem>>, %arg6: memref<128x256xbf16, #tpu.memory_space<vmem>>, %arg7: memref<1x256xf32, #tpu.memory_space<vmem>>, %arg8: memref<3x256x768xbf16, #tpu.memory_space<vmem>>, %arg9: memref<3x1x768xf32, #tpu.memory_space<vmem>>, %arg10: memref<3x256x256xbf16, #tpu.memory_space<vmem>>, %arg11: memref<3x1x256xf32, #tpu.memory_space<vmem>>, %arg12: memref<3x1x256xf32, #tpu.memory_space<vmem>>, %arg13: memref<3x1x256xf32, #tpu.memory_space<vmem>>, %arg14: memref<3x256x128xbf16, #tpu.memory_space<vmem>>, %arg15: memref<3x1x128xf32, #tpu.memory_space<vmem>>, %arg16: memref<3x128x256xbf16, #tpu.memory_space<vmem>>, %arg17: memref<3x1x256xf32, #tpu.memory_space<vmem>>, %arg18: memref<3x1x256xf32, #tpu.memory_space<vmem>>, %arg19: memref<3x1x256xf32, #tpu.memory_space<vmem>>, %arg20: memref<256x128xbf16, #tpu.memory_space<vmem>>, %arg21: memref<1x128xf32, #tpu.memory_space<vmem>>, %arg22: memref<1x16x256xf32, #tpu.memory_space<vmem>>, %arg23: memref<1x16x256xf32, #tpu.memory_space<vmem>>, %arg24: memref<1x16x128xf32, #tpu.memory_space<vmem>>) attributes {dimension_semantics = [#tpu.dimension_semantics<parallel>], iteration_bounds = array<i64: 2>, scalar_prefetch = 0 : i64, scratch_operands = 0 : i64, tpu.core_type = #tpu.core_type<tc>, window_params = [{transform_indices = @transform_0, window_bounds = array<i64: 1, 16, 8>}, {pipeline_mode = #tpu.pipeline_mode<synchronous>, transform_indices = @transform_1, window_bounds = array<i64: 8, 64>}, {pipeline_mode = #tpu.pipeline_mode<synchronous>, transform_indices = @transform_2, window_bounds = array<i64: 1, 64>}, {pipeline_mode = #tpu.pipeline_mode<synchronous>, transform_indices = @transform_3, window_bounds = array<i64: 64, 128>}, {pipeline_mode = #tpu.pipeline_mode<synchronous>, transform_indices = @transform_4, window_bounds = array<i64: 1, 128>}, {pipeline_mode = #tpu.pipeline_mode<synchronous>, transform_indices = @transform_5, window_bounds = array<i64: 128, 256>}, {pipeline_mode = #tpu.pipeline_mode<synchronous>, transform_indices = @transform_6, window_bounds = array<i64: 1, 256>}, {pipeline_mode = #tpu.pipeline_mode<synchronous>, transform_indices = @transform_7, window_bounds = array<i64: 3, 256, 768>}, {pipeline_mode = #tpu.pipeline_mode<synchronous>, transform_indices = @transform_8, window_bounds = array<i64: 3, 1, 768>}, {pipeline_mode = #tpu.pipeline_mode<synchronous>, transform_indices = @transform_9, window_bounds = array<i64: 3, 256, 256>}, {pipeline_mode = #tpu.pipeline_mode<synchronous>, transform_indices = @transform_10, window_bounds = array<i64: 3, 1, 256>}, {pipeline_mode = #tpu.pipeline_mode<synchronous>, transform_indices = @transform_11, window_bounds = array<i64: 3, 1, 256>}, {pipeline_mode = #tpu.pipeline_mode<synchronous>, transform_indices = @transform_12, window_bounds = array<i64: 3, 1, 256>}, {pipeline_mode = #tpu.pipeline_mode<synchronous>, transform_indices = @transform_13, window_bounds = array<i64: 3, 256, 128>}, {pipeline_mode = #tpu.pipeline_mode<synchronous>, transform_indices = @transform_14, window_bounds = array<i64: 3, 1, 128>}, {pipeline_mode = #tpu.pipeline_mode<synchronous>, transform_indices = @transform_15, window_bounds = array<i64: 3, 128, 256>}, {pipeline_mode = #tpu.pipeline_mode<synchronous>, transform_indices = @transform_16, window_bounds = array<i64: 3, 1, 256>}, {pipeline_mode = #tpu.pipeline_mode<synchronous>, transform_indices = @transform_17, window_bounds = array<i64: 3, 1, 256>}, {pipeline_mode = #tpu.pipeline_mode<synchronous>, transform_indices = @transform_18, window_bounds = array<i64: 3, 1, 256>}, {pipeline_mode = #tpu.pipeline_mode<synchronous>, transform_indices = @transform_19, window_bounds = array<i64: 256, 128>}, {pipeline_mode = #tpu.pipeline_mode<synchronous>, transform_indices = @transform_20, window_bounds = array<i64: 1, 128>}, {transform_indices = @transform_21, window_bounds = array<i64: 1, 16, 256>}, {transform_indices = @transform_22, window_bounds = array<i64: 1, 16, 256>}, {transform_indices = @transform_23, window_bounds = array<i64: 1, 16, 128>}]} {
    %c0 = arith.constant 0 : index
    %c0_0 = arith.constant 0 : index
    %c0_1 = arith.constant 0 : index
    %0 = vector.load %arg1[%c0, %c0_0, %c0_1] : memref<1x16x8xf32, #tpu.memory_space<vmem>>, vector<1x16x8xf32>
    %1 = vector.shape_cast %0 : vector<1x16x8xf32> to vector<16x8xf32>
    %c0_2 = arith.constant 0 : index
    %c0_3 = arith.constant 0 : index
    %2 = vector.load %arg2[%c0_2, %c0_3] : memref<8x64xbf16, #tpu.memory_space<vmem>>, vector<8x64xbf16>
    %3 = arith.truncf %1 : vector<16x8xf32> to vector<16x8xbf16>
    %cst = arith.constant dense<0.000000e+00> : vector<16x64xf32>
    %4 = tpu.matmul %3, %2, %cst {dimension_numbers = #tpu.dot_dimension_numbers<[1], [0], [0], [1], [0, 0, 1, 1], [], []>} : vector<16x8xbf16>, vector<8x64xbf16>, vector<16x64xf32> -> vector<16x64xf32>
    %c0_4 = arith.constant 0 : index
    %c0_5 = arith.constant 0 : index
    %5 = vector.load %arg3[%c0_4, %c0_5] : memref<1x64xf32, #tpu.memory_space<vmem>>, vector<1x64xf32>
    %6 = vector.broadcast %5 : vector<1x64xf32> to vector<16x64xf32>
    %7 = arith.addf %4, %6 : vector<16x64xf32>
    %cst_6 = arith.constant 0.000000e+00 : f32
    %8 = vector.broadcast %cst_6 : f32 to vector<16x64xf32>
    %9 = arith.maximumf %7, %8 : vector<16x64xf32>
    %c0_7 = arith.constant 0 : index
    %c0_8 = arith.constant 0 : index
    %10 = vector.load %arg4[%c0_7, %c0_8] : memref<64x128xbf16, #tpu.memory_space<vmem>>, vector<64x128xbf16>
    %11 = arith.truncf %9 : vector<16x64xf32> to vector<16x64xbf16>
    %cst_9 = arith.constant dense<0.000000e+00> : vector<16x128xf32>
    %12 = tpu.matmul %11, %10, %cst_9 {dimension_numbers = #tpu.dot_dimension_numbers<[1], [0], [0], [1], [0, 0, 1, 1], [], []>} : vector<16x64xbf16>, vector<64x128xbf16>, vector<16x128xf32> -> vector<16x128xf32>
    %c0_10 = arith.constant 0 : index
    %c0_11 = arith.constant 0 : index
    %13 = vector.load %arg5[%c0_10, %c0_11] : memref<1x128xf32, #tpu.memory_space<vmem>>, vector<1x128xf32>
    %14 = vector.broadcast %13 : vector<1x128xf32> to vector<16x128xf32>
    %15 = arith.addf %12, %14 : vector<16x128xf32>
    %cst_12 = arith.constant 0.000000e+00 : f32
    %16 = vector.broadcast %cst_12 : f32 to vector<16x128xf32>
    %17 = arith.maximumf %15, %16 : vector<16x128xf32>
    %c0_13 = arith.constant 0 : index
    %c0_14 = arith.constant 0 : index
    %18 = vector.load %arg6[%c0_13, %c0_14] : memref<128x256xbf16, #tpu.memory_space<vmem>>, vector<128x256xbf16>
    %19 = arith.truncf %17 : vector<16x128xf32> to vector<16x128xbf16>
    %cst_15 = arith.constant dense<0.000000e+00> : vector<16x256xf32>
    %20 = tpu.matmul %19, %18, %cst_15 {dimension_numbers = #tpu.dot_dimension_numbers<[1], [0], [0], [1], [0, 0, 1, 1], [], []>} : vector<16x128xbf16>, vector<128x256xbf16>, vector<16x256xf32> -> vector<16x256xf32>
    %c0_16 = arith.constant 0 : index
    %c0_17 = arith.constant 0 : index
    %21 = vector.load %arg7[%c0_16, %c0_17] : memref<1x256xf32, #tpu.memory_space<vmem>>, vector<1x256xf32>
    %22 = vector.broadcast %21 : vector<1x256xf32> to vector<16x256xf32>
    %23 = arith.addf %20, %22 : vector<16x256xf32>
    %c0_18 = arith.constant 0 : index
    %c0_19 = arith.constant 0 : index
    %c0_20 = arith.constant 0 : index
    %24 = vector.load %arg8[%c0_18, %c0_19, %c0_20] : memref<3x256x768xbf16, #tpu.memory_space<vmem>>, vector<1x256x768xbf16>
    %25 = vector.shape_cast %24 : vector<1x256x768xbf16> to vector<256x768xbf16>
    %26 = arith.truncf %23 : vector<16x256xf32> to vector<16x256xbf16>
    %cst_21 = arith.constant dense<0.000000e+00> : vector<16x768xf32>
    %27 = tpu.matmul %26, %25, %cst_21 {dimension_numbers = #tpu.dot_dimension_numbers<[1], [0], [0], [1], [0, 0, 1, 1], [], []>} : vector<16x256xbf16>, vector<256x768xbf16>, vector<16x768xf32> -> vector<16x768xf32>
    %c0_22 = arith.constant 0 : index
    %c0_23 = arith.constant 0 : index
    %c0_24 = arith.constant 0 : index
    %28 = vector.load %arg9[%c0_22, %c0_23, %c0_24] : memref<3x1x768xf32, #tpu.memory_space<vmem>>, vector<1x1x768xf32>
    %29 = vector.shape_cast %28 : vector<1x1x768xf32> to vector<1x768xf32>
    %30 = vector.broadcast %29 : vector<1x768xf32> to vector<16x768xf32>
    %31 = arith.addf %27, %30 : vector<16x768xf32>
    %32 = vector.extract_strided_slice %31 {offsets = [0, 0], sizes = [16, 256], strides = [1, 1]} : vector<16x768xf32> to vector<16x256xf32>
    %33 = vector.extract_strided_slice %31 {offsets = [0, 256], sizes = [16, 256], strides = [1, 1]} : vector<16x768xf32> to vector<16x256xf32>
    %34 = vector.extract_strided_slice %31 {offsets = [0, 512], sizes = [16, 256], strides = [1, 1]} : vector<16x768xf32> to vector<16x256xf32>
    %35 = vector.extract_strided_slice %32 {offsets = [0, 0], sizes = [16, 64], strides = [1, 1]} : vector<16x256xf32> to vector<16x64xf32>
    %36 = arith.truncf %35 : vector<16x64xf32> to vector<16x64xbf16>
    %37 = vector.extract_strided_slice %33 {offsets = [0, 0], sizes = [16, 64], strides = [1, 1]} : vector<16x256xf32> to vector<16x64xf32>
    %38 = arith.truncf %37 : vector<16x64xf32> to vector<16x64xbf16>
    %39 = vector.extract_strided_slice %34 {offsets = [0, 0], sizes = [16, 64], strides = [1, 1]} : vector<16x256xf32> to vector<16x64xf32>
    %40 = arith.truncf %39 : vector<16x64xf32> to vector<16x64xbf16>
    %cst_25 = arith.constant dense<0.000000e+00> : vector<16x16xf32>
    %41 = tpu.matmul %36, %38, %cst_25 {dimension_numbers = #tpu.dot_dimension_numbers<[1], [1], [0], [0], [0, 0, 1, 0], [], []>} : vector<16x64xbf16>, vector<16x64xbf16>, vector<16x16xf32> -> vector<16x16xf32>
    %cst_26 = arith.constant dense<0xFF800000> : vector<16xf32>
    %42 = vector.multi_reduction <maximumf>, %41, %cst_26 [1] : vector<16x16xf32> to vector<16xf32>
    %43 = vector.shape_cast %42 : vector<16xf32> to vector<16x1xf32>
    %44 = vector.broadcast %43 : vector<16x1xf32> to vector<16x16xf32>
    %45 = arith.subf %41, %44 : vector<16x16xf32>
    %46 = math.exp %45 : vector<16x16xf32>
    %cst_27 = arith.constant dense<0.000000e+00> : vector<16xf32>
    %47 = vector.multi_reduction <add>, %46, %cst_27 [1] : vector<16x16xf32> to vector<16xf32>
    %48 = vector.shape_cast %47 : vector<16xf32> to vector<16x1xf32>
    %49 = tpu.reciprocal %48 {approx = true} : vector<16x1xf32> -> vector<16x1xf32>
    %50 = vector.broadcast %49 : vector<16x1xf32> to vector<16x16xf32>
    %51 = arith.mulf %46, %50 : vector<16x16xf32>
    %52 = arith.truncf %51 : vector<16x16xf32> to vector<16x16xbf16>
    %cst_28 = arith.constant dense<0.000000e+00> : vector<16x64xf32>
    %53 = tpu.matmul %52, %40, %cst_28 {dimension_numbers = #tpu.dot_dimension_numbers<[1], [0], [0], [1], [0, 0, 1, 1], [], []>} : vector<16x16xbf16>, vector<16x64xbf16>, vector<16x64xf32> -> vector<16x64xf32>
    %54 = vector.extract_strided_slice %32 {offsets = [0, 64], sizes = [16, 64], strides = [1, 1]} : vector<16x256xf32> to vector<16x64xf32>
    %55 = arith.truncf %54 : vector<16x64xf32> to vector<16x64xbf16>
    %56 = vector.extract_strided_slice %33 {offsets = [0, 64], sizes = [16, 64], strides = [1, 1]} : vector<16x256xf32> to vector<16x64xf32>
    %57 = arith.truncf %56 : vector<16x64xf32> to vector<16x64xbf16>
    %58 = vector.extract_strided_slice %34 {offsets = [0, 64], sizes = [16, 64], strides = [1, 1]} : vector<16x256xf32> to vector<16x64xf32>
    %59 = arith.truncf %58 : vector<16x64xf32> to vector<16x64xbf16>
    %cst_29 = arith.constant dense<0.000000e+00> : vector<16x16xf32>
    %60 = tpu.matmul %55, %57, %cst_29 {dimension_numbers = #tpu.dot_dimension_numbers<[1], [1], [0], [0], [0, 0, 1, 0], [], []>} : vector<16x64xbf16>, vector<16x64xbf16>, vector<16x16xf32> -> vector<16x16xf32>
    %cst_30 = arith.constant dense<0xFF800000> : vector<16xf32>
    %61 = vector.multi_reduction <maximumf>, %60, %cst_30 [1] : vector<16x16xf32> to vector<16xf32>
    %62 = vector.shape_cast %61 : vector<16xf32> to vector<16x1xf32>
    %63 = vector.broadcast %62 : vector<16x1xf32> to vector<16x16xf32>
    %64 = arith.subf %60, %63 : vector<16x16xf32>
    %65 = math.exp %64 : vector<16x16xf32>
    %cst_31 = arith.constant dense<0.000000e+00> : vector<16xf32>
    %66 = vector.multi_reduction <add>, %65, %cst_31 [1] : vector<16x16xf32> to vector<16xf32>
    %67 = vector.shape_cast %66 : vector<16xf32> to vector<16x1xf32>
    %68 = tpu.reciprocal %67 {approx = true} : vector<16x1xf32> -> vector<16x1xf32>
    %69 = vector.broadcast %68 : vector<16x1xf32> to vector<16x16xf32>
    %70 = arith.mulf %65, %69 : vector<16x16xf32>
    %71 = arith.truncf %70 : vector<16x16xf32> to vector<16x16xbf16>
    %cst_32 = arith.constant dense<0.000000e+00> : vector<16x64xf32>
    %72 = tpu.matmul %71, %59, %cst_32 {dimension_numbers = #tpu.dot_dimension_numbers<[1], [0], [0], [1], [0, 0, 1, 1], [], []>} : vector<16x16xbf16>, vector<16x64xbf16>, vector<16x64xf32> -> vector<16x64xf32>
    %73 = vector.extract_strided_slice %32 {offsets = [0, 128], sizes = [16, 64], strides = [1, 1]} : vector<16x256xf32> to vector<16x64xf32>
    %74 = arith.truncf %73 : vector<16x64xf32> to vector<16x64xbf16>
    %75 = vector.extract_strided_slice %33 {offsets = [0, 128], sizes = [16, 64], strides = [1, 1]} : vector<16x256xf32> to vector<16x64xf32>
    %76 = arith.truncf %75 : vector<16x64xf32> to vector<16x64xbf16>
    %77 = vector.extract_strided_slice %34 {offsets = [0, 128], sizes = [16, 64], strides = [1, 1]} : vector<16x256xf32> to vector<16x64xf32>
    %78 = arith.truncf %77 : vector<16x64xf32> to vector<16x64xbf16>
    %cst_33 = arith.constant dense<0.000000e+00> : vector<16x16xf32>
    %79 = tpu.matmul %74, %76, %cst_33 {dimension_numbers = #tpu.dot_dimension_numbers<[1], [1], [0], [0], [0, 0, 1, 0], [], []>} : vector<16x64xbf16>, vector<16x64xbf16>, vector<16x16xf32> -> vector<16x16xf32>
    %cst_34 = arith.constant dense<0xFF800000> : vector<16xf32>
    %80 = vector.multi_reduction <maximumf>, %79, %cst_34 [1] : vector<16x16xf32> to vector<16xf32>
    %81 = vector.shape_cast %80 : vector<16xf32> to vector<16x1xf32>
    %82 = vector.broadcast %81 : vector<16x1xf32> to vector<16x16xf32>
    %83 = arith.subf %79, %82 : vector<16x16xf32>
    %84 = math.exp %83 : vector<16x16xf32>
    %cst_35 = arith.constant dense<0.000000e+00> : vector<16xf32>
    %85 = vector.multi_reduction <add>, %84, %cst_35 [1] : vector<16x16xf32> to vector<16xf32>
    %86 = vector.shape_cast %85 : vector<16xf32> to vector<16x1xf32>
    %87 = tpu.reciprocal %86 {approx = true} : vector<16x1xf32> -> vector<16x1xf32>
    %88 = vector.broadcast %87 : vector<16x1xf32> to vector<16x16xf32>
    %89 = arith.mulf %84, %88 : vector<16x16xf32>
    %90 = arith.truncf %89 : vector<16x16xf32> to vector<16x16xbf16>
    %cst_36 = arith.constant dense<0.000000e+00> : vector<16x64xf32>
    %91 = tpu.matmul %90, %78, %cst_36 {dimension_numbers = #tpu.dot_dimension_numbers<[1], [0], [0], [1], [0, 0, 1, 1], [], []>} : vector<16x16xbf16>, vector<16x64xbf16>, vector<16x64xf32> -> vector<16x64xf32>
    %92 = vector.extract_strided_slice %32 {offsets = [0, 192], sizes = [16, 64], strides = [1, 1]} : vector<16x256xf32> to vector<16x64xf32>
    %93 = arith.truncf %92 : vector<16x64xf32> to vector<16x64xbf16>
    %94 = vector.extract_strided_slice %33 {offsets = [0, 192], sizes = [16, 64], strides = [1, 1]} : vector<16x256xf32> to vector<16x64xf32>
    %95 = arith.truncf %94 : vector<16x64xf32> to vector<16x64xbf16>
    %96 = vector.extract_strided_slice %34 {offsets = [0, 192], sizes = [16, 64], strides = [1, 1]} : vector<16x256xf32> to vector<16x64xf32>
    %97 = arith.truncf %96 : vector<16x64xf32> to vector<16x64xbf16>
    %cst_37 = arith.constant dense<0.000000e+00> : vector<16x16xf32>
    %98 = tpu.matmul %93, %95, %cst_37 {dimension_numbers = #tpu.dot_dimension_numbers<[1], [1], [0], [0], [0, 0, 1, 0], [], []>} : vector<16x64xbf16>, vector<16x64xbf16>, vector<16x16xf32> -> vector<16x16xf32>
    %cst_38 = arith.constant dense<0xFF800000> : vector<16xf32>
    %99 = vector.multi_reduction <maximumf>, %98, %cst_38 [1] : vector<16x16xf32> to vector<16xf32>
    %100 = vector.shape_cast %99 : vector<16xf32> to vector<16x1xf32>
    %101 = vector.broadcast %100 : vector<16x1xf32> to vector<16x16xf32>
    %102 = arith.subf %98, %101 : vector<16x16xf32>
    %103 = math.exp %102 : vector<16x16xf32>
    %cst_39 = arith.constant dense<0.000000e+00> : vector<16xf32>
    %104 = vector.multi_reduction <add>, %103, %cst_39 [1] : vector<16x16xf32> to vector<16xf32>
    %105 = vector.shape_cast %104 : vector<16xf32> to vector<16x1xf32>
    %106 = tpu.reciprocal %105 {approx = true} : vector<16x1xf32> -> vector<16x1xf32>
    %107 = vector.broadcast %106 : vector<16x1xf32> to vector<16x16xf32>
    %108 = arith.mulf %103, %107 : vector<16x16xf32>
    %109 = arith.truncf %108 : vector<16x16xf32> to vector<16x16xbf16>
    %cst_40 = arith.constant dense<0.000000e+00> : vector<16x64xf32>
    %110 = tpu.matmul %109, %97, %cst_40 {dimension_numbers = #tpu.dot_dimension_numbers<[1], [0], [0], [1], [0, 0, 1, 1], [], []>} : vector<16x16xbf16>, vector<16x64xbf16>, vector<16x64xf32> -> vector<16x64xf32>
    %111 = tpu.concatenate %53, %72, %91, %110 in 1 : vector<16x64xf32>, vector<16x64xf32>, vector<16x64xf32>, vector<16x64xf32> -> vector<16x256xf32>
    %c0_41 = arith.constant 0 : index
    %c0_42 = arith.constant 0 : index
    %c0_43 = arith.constant 0 : index
    %112 = vector.load %arg10[%c0_41, %c0_42, %c0_43] : memref<3x256x256xbf16, #tpu.memory_space<vmem>>, vector<1x256x256xbf16>
    %113 = vector.shape_cast %112 : vector<1x256x256xbf16> to vector<256x256xbf16>
    %114 = arith.truncf %111 : vector<16x256xf32> to vector<16x256xbf16>
    %cst_44 = arith.constant dense<0.000000e+00> : vector<16x256xf32>
    %115 = tpu.matmul %114, %113, %cst_44 {dimension_numbers = #tpu.dot_dimension_numbers<[1], [0], [0], [1], [0, 0, 1, 1], [], []>} : vector<16x256xbf16>, vector<256x256xbf16>, vector<16x256xf32> -> vector<16x256xf32>
    %c0_45 = arith.constant 0 : index
    %c0_46 = arith.constant 0 : index
    %c0_47 = arith.constant 0 : index
    %116 = vector.load %arg11[%c0_45, %c0_46, %c0_47] : memref<3x1x256xf32, #tpu.memory_space<vmem>>, vector<1x1x256xf32>
    %117 = vector.shape_cast %116 : vector<1x1x256xf32> to vector<1x256xf32>
    %118 = vector.broadcast %117 : vector<1x256xf32> to vector<16x256xf32>
    %119 = arith.addf %115, %118 : vector<16x256xf32>
    %120 = arith.addf %23, %119 : vector<16x256xf32>
    %c0_48 = arith.constant 0 : index
    %c0_49 = arith.constant 0 : index
    %c0_50 = arith.constant 0 : index
    %121 = vector.load %arg12[%c0_48, %c0_49, %c0_50] : memref<3x1x256xf32, #tpu.memory_space<vmem>>, vector<1x1x256xf32>
    %122 = vector.shape_cast %121 : vector<1x1x256xf32> to vector<1x256xf32>
    %c0_51 = arith.constant 0 : index
    %c0_52 = arith.constant 0 : index
    %c0_53 = arith.constant 0 : index
    %123 = vector.load %arg13[%c0_51, %c0_52, %c0_53] : memref<3x1x256xf32, #tpu.memory_space<vmem>>, vector<1x1x256xf32>
    %124 = vector.shape_cast %123 : vector<1x1x256xf32> to vector<1x256xf32>
    %cst_54 = arith.constant dense<0.000000e+00> : vector<16xf32>
    %125 = vector.multi_reduction <add>, %120, %cst_54 [1] : vector<16x256xf32> to vector<16xf32>
    %126 = vector.shape_cast %125 : vector<16xf32> to vector<16x1xf32>
    %cst_55 = arith.constant 2.560000e+02 : f32
    %127 = vector.broadcast %cst_55 : f32 to vector<16x1xf32>
    %128 = arith.divf %126, %127 : vector<16x1xf32>
    %129 = vector.broadcast %128 : vector<16x1xf32> to vector<16x256xf32>
    %130 = arith.subf %120, %129 : vector<16x256xf32>
    %131 = arith.mulf %130, %130 : vector<16x256xf32>
    %cst_56 = arith.constant dense<0.000000e+00> : vector<16xf32>
    %132 = vector.multi_reduction <add>, %131, %cst_56 [1] : vector<16x256xf32> to vector<16xf32>
    %133 = vector.shape_cast %132 : vector<16xf32> to vector<16x1xf32>
    %cst_57 = arith.constant 2.560000e+02 : f32
    %134 = vector.broadcast %cst_57 : f32 to vector<16x1xf32>
    %135 = arith.divf %133, %134 : vector<16x1xf32>
    %cst_58 = arith.constant 9.99999974E-6 : f32
    %136 = vector.broadcast %cst_58 : f32 to vector<16x1xf32>
    %137 = arith.addf %135, %136 : vector<16x1xf32>
    %138 = math.rsqrt %137 : vector<16x1xf32>
    %139 = vector.broadcast %138 : vector<16x1xf32> to vector<16x256xf32>
    %140 = arith.mulf %130, %139 : vector<16x256xf32>
    %141 = vector.broadcast %122 : vector<1x256xf32> to vector<16x256xf32>
    %142 = arith.mulf %140, %141 : vector<16x256xf32>
    %143 = vector.broadcast %124 : vector<1x256xf32> to vector<16x256xf32>
    %144 = arith.addf %142, %143 : vector<16x256xf32>
    %c0_59 = arith.constant 0 : index
    %c0_60 = arith.constant 0 : index
    %c0_61 = arith.constant 0 : index
    %145 = vector.load %arg14[%c0_59, %c0_60, %c0_61] : memref<3x256x128xbf16, #tpu.memory_space<vmem>>, vector<1x256x128xbf16>
    %146 = vector.shape_cast %145 : vector<1x256x128xbf16> to vector<256x128xbf16>
    %147 = arith.truncf %144 : vector<16x256xf32> to vector<16x256xbf16>
    %cst_62 = arith.constant dense<0.000000e+00> : vector<16x128xf32>
    %148 = tpu.matmul %147, %146, %cst_62 {dimension_numbers = #tpu.dot_dimension_numbers<[1], [0], [0], [1], [0, 0, 1, 1], [], []>} : vector<16x256xbf16>, vector<256x128xbf16>, vector<16x128xf32> -> vector<16x128xf32>
    %c0_63 = arith.constant 0 : index
    %c0_64 = arith.constant 0 : index
    %c0_65 = arith.constant 0 : index
    %149 = vector.load %arg15[%c0_63, %c0_64, %c0_65] : memref<3x1x128xf32, #tpu.memory_space<vmem>>, vector<1x1x128xf32>
    %150 = vector.shape_cast %149 : vector<1x1x128xf32> to vector<1x128xf32>
    %151 = vector.broadcast %150 : vector<1x128xf32> to vector<16x128xf32>
    %152 = arith.addf %148, %151 : vector<16x128xf32>
    %cst_66 = arith.constant 0.000000e+00 : f32
    %153 = vector.broadcast %cst_66 : f32 to vector<16x128xf32>
    %154 = arith.maximumf %152, %153 : vector<16x128xf32>
    %c0_67 = arith.constant 0 : index
    %c0_68 = arith.constant 0 : index
    %c0_69 = arith.constant 0 : index
    %155 = vector.load %arg16[%c0_67, %c0_68, %c0_69] : memref<3x128x256xbf16, #tpu.memory_space<vmem>>, vector<1x128x256xbf16>
    %156 = vector.shape_cast %155 : vector<1x128x256xbf16> to vector<128x256xbf16>
    %157 = arith.truncf %154 : vector<16x128xf32> to vector<16x128xbf16>
    %cst_70 = arith.constant dense<0.000000e+00> : vector<16x256xf32>
    %158 = tpu.matmul %157, %156, %cst_70 {dimension_numbers = #tpu.dot_dimension_numbers<[1], [0], [0], [1], [0, 0, 1, 1], [], []>} : vector<16x128xbf16>, vector<128x256xbf16>, vector<16x256xf32> -> vector<16x256xf32>
    %c0_71 = arith.constant 0 : index
    %c0_72 = arith.constant 0 : index
    %c0_73 = arith.constant 0 : index
    %159 = vector.load %arg17[%c0_71, %c0_72, %c0_73] : memref<3x1x256xf32, #tpu.memory_space<vmem>>, vector<1x1x256xf32>
    %160 = vector.shape_cast %159 : vector<1x1x256xf32> to vector<1x256xf32>
    %161 = vector.broadcast %160 : vector<1x256xf32> to vector<16x256xf32>
    %162 = arith.addf %158, %161 : vector<16x256xf32>
    %163 = arith.addf %144, %162 : vector<16x256xf32>
    %c0_74 = arith.constant 0 : index
    %c0_75 = arith.constant 0 : index
    %c0_76 = arith.constant 0 : index
    %164 = vector.load %arg18[%c0_74, %c0_75, %c0_76] : memref<3x1x256xf32, #tpu.memory_space<vmem>>, vector<1x1x256xf32>
    %165 = vector.shape_cast %164 : vector<1x1x256xf32> to vector<1x256xf32>
    %c0_77 = arith.constant 0 : index
    %c0_78 = arith.constant 0 : index
    %c0_79 = arith.constant 0 : index
    %166 = vector.load %arg19[%c0_77, %c0_78, %c0_79] : memref<3x1x256xf32, #tpu.memory_space<vmem>>, vector<1x1x256xf32>
    %167 = vector.shape_cast %166 : vector<1x1x256xf32> to vector<1x256xf32>
    %cst_80 = arith.constant dense<0.000000e+00> : vector<16xf32>
    %168 = vector.multi_reduction <add>, %163, %cst_80 [1] : vector<16x256xf32> to vector<16xf32>
    %169 = vector.shape_cast %168 : vector<16xf32> to vector<16x1xf32>
    %cst_81 = arith.constant 2.560000e+02 : f32
    %170 = vector.broadcast %cst_81 : f32 to vector<16x1xf32>
    %171 = arith.divf %169, %170 : vector<16x1xf32>
    %172 = vector.broadcast %171 : vector<16x1xf32> to vector<16x256xf32>
    %173 = arith.subf %163, %172 : vector<16x256xf32>
    %174 = arith.mulf %173, %173 : vector<16x256xf32>
    %cst_82 = arith.constant dense<0.000000e+00> : vector<16xf32>
    %175 = vector.multi_reduction <add>, %174, %cst_82 [1] : vector<16x256xf32> to vector<16xf32>
    %176 = vector.shape_cast %175 : vector<16xf32> to vector<16x1xf32>
    %cst_83 = arith.constant 2.560000e+02 : f32
    %177 = vector.broadcast %cst_83 : f32 to vector<16x1xf32>
    %178 = arith.divf %176, %177 : vector<16x1xf32>
    %cst_84 = arith.constant 9.99999974E-6 : f32
    %179 = vector.broadcast %cst_84 : f32 to vector<16x1xf32>
    %180 = arith.addf %178, %179 : vector<16x1xf32>
    %181 = math.rsqrt %180 : vector<16x1xf32>
    %182 = vector.broadcast %181 : vector<16x1xf32> to vector<16x256xf32>
    %183 = arith.mulf %173, %182 : vector<16x256xf32>
    %184 = vector.broadcast %165 : vector<1x256xf32> to vector<16x256xf32>
    %185 = arith.mulf %183, %184 : vector<16x256xf32>
    %186 = vector.broadcast %167 : vector<1x256xf32> to vector<16x256xf32>
    %187 = arith.addf %185, %186 : vector<16x256xf32>
    %c1 = arith.constant 1 : index
    %c0_85 = arith.constant 0 : index
    %c0_86 = arith.constant 0 : index
    %188 = vector.load %arg8[%c1, %c0_85, %c0_86] : memref<3x256x768xbf16, #tpu.memory_space<vmem>>, vector<1x256x768xbf16>
    %189 = vector.shape_cast %188 : vector<1x256x768xbf16> to vector<256x768xbf16>
    %190 = arith.truncf %187 : vector<16x256xf32> to vector<16x256xbf16>
    %cst_87 = arith.constant dense<0.000000e+00> : vector<16x768xf32>
    %191 = tpu.matmul %190, %189, %cst_87 {dimension_numbers = #tpu.dot_dimension_numbers<[1], [0], [0], [1], [0, 0, 1, 1], [], []>} : vector<16x256xbf16>, vector<256x768xbf16>, vector<16x768xf32> -> vector<16x768xf32>
    %c1_88 = arith.constant 1 : index
    %c0_89 = arith.constant 0 : index
    %c0_90 = arith.constant 0 : index
    %192 = vector.load %arg9[%c1_88, %c0_89, %c0_90] : memref<3x1x768xf32, #tpu.memory_space<vmem>>, vector<1x1x768xf32>
    %193 = vector.shape_cast %192 : vector<1x1x768xf32> to vector<1x768xf32>
    %194 = vector.broadcast %193 : vector<1x768xf32> to vector<16x768xf32>
    %195 = arith.addf %191, %194 : vector<16x768xf32>
    %196 = vector.extract_strided_slice %195 {offsets = [0, 0], sizes = [16, 256], strides = [1, 1]} : vector<16x768xf32> to vector<16x256xf32>
    %197 = vector.extract_strided_slice %195 {offsets = [0, 256], sizes = [16, 256], strides = [1, 1]} : vector<16x768xf32> to vector<16x256xf32>
    %198 = vector.extract_strided_slice %195 {offsets = [0, 512], sizes = [16, 256], strides = [1, 1]} : vector<16x768xf32> to vector<16x256xf32>
    %199 = vector.extract_strided_slice %196 {offsets = [0, 0], sizes = [16, 64], strides = [1, 1]} : vector<16x256xf32> to vector<16x64xf32>
    %200 = arith.truncf %199 : vector<16x64xf32> to vector<16x64xbf16>
    %201 = vector.extract_strided_slice %197 {offsets = [0, 0], sizes = [16, 64], strides = [1, 1]} : vector<16x256xf32> to vector<16x64xf32>
    %202 = arith.truncf %201 : vector<16x64xf32> to vector<16x64xbf16>
    %203 = vector.extract_strided_slice %198 {offsets = [0, 0], sizes = [16, 64], strides = [1, 1]} : vector<16x256xf32> to vector<16x64xf32>
    %204 = arith.truncf %203 : vector<16x64xf32> to vector<16x64xbf16>
    %cst_91 = arith.constant dense<0.000000e+00> : vector<16x16xf32>
    %205 = tpu.matmul %200, %202, %cst_91 {dimension_numbers = #tpu.dot_dimension_numbers<[1], [1], [0], [0], [0, 0, 1, 0], [], []>} : vector<16x64xbf16>, vector<16x64xbf16>, vector<16x16xf32> -> vector<16x16xf32>
    %cst_92 = arith.constant dense<0xFF800000> : vector<16xf32>
    %206 = vector.multi_reduction <maximumf>, %205, %cst_92 [1] : vector<16x16xf32> to vector<16xf32>
    %207 = vector.shape_cast %206 : vector<16xf32> to vector<16x1xf32>
    %208 = vector.broadcast %207 : vector<16x1xf32> to vector<16x16xf32>
    %209 = arith.subf %205, %208 : vector<16x16xf32>
    %210 = math.exp %209 : vector<16x16xf32>
    %cst_93 = arith.constant dense<0.000000e+00> : vector<16xf32>
    %211 = vector.multi_reduction <add>, %210, %cst_93 [1] : vector<16x16xf32> to vector<16xf32>
    %212 = vector.shape_cast %211 : vector<16xf32> to vector<16x1xf32>
    %213 = tpu.reciprocal %212 {approx = true} : vector<16x1xf32> -> vector<16x1xf32>
    %214 = vector.broadcast %213 : vector<16x1xf32> to vector<16x16xf32>
    %215 = arith.mulf %210, %214 : vector<16x16xf32>
    %216 = arith.truncf %215 : vector<16x16xf32> to vector<16x16xbf16>
    %cst_94 = arith.constant dense<0.000000e+00> : vector<16x64xf32>
    %217 = tpu.matmul %216, %204, %cst_94 {dimension_numbers = #tpu.dot_dimension_numbers<[1], [0], [0], [1], [0, 0, 1, 1], [], []>} : vector<16x16xbf16>, vector<16x64xbf16>, vector<16x64xf32> -> vector<16x64xf32>
    %218 = vector.extract_strided_slice %196 {offsets = [0, 64], sizes = [16, 64], strides = [1, 1]} : vector<16x256xf32> to vector<16x64xf32>
    %219 = arith.truncf %218 : vector<16x64xf32> to vector<16x64xbf16>
    %220 = vector.extract_strided_slice %197 {offsets = [0, 64], sizes = [16, 64], strides = [1, 1]} : vector<16x256xf32> to vector<16x64xf32>
    %221 = arith.truncf %220 : vector<16x64xf32> to vector<16x64xbf16>
    %222 = vector.extract_strided_slice %198 {offsets = [0, 64], sizes = [16, 64], strides = [1, 1]} : vector<16x256xf32> to vector<16x64xf32>
    %223 = arith.truncf %222 : vector<16x64xf32> to vector<16x64xbf16>
    %cst_95 = arith.constant dense<0.000000e+00> : vector<16x16xf32>
    %224 = tpu.matmul %219, %221, %cst_95 {dimension_numbers = #tpu.dot_dimension_numbers<[1], [1], [0], [0], [0, 0, 1, 0], [], []>} : vector<16x64xbf16>, vector<16x64xbf16>, vector<16x16xf32> -> vector<16x16xf32>
    %cst_96 = arith.constant dense<0xFF800000> : vector<16xf32>
    %225 = vector.multi_reduction <maximumf>, %224, %cst_96 [1] : vector<16x16xf32> to vector<16xf32>
    %226 = vector.shape_cast %225 : vector<16xf32> to vector<16x1xf32>
    %227 = vector.broadcast %226 : vector<16x1xf32> to vector<16x16xf32>
    %228 = arith.subf %224, %227 : vector<16x16xf32>
    %229 = math.exp %228 : vector<16x16xf32>
    %cst_97 = arith.constant dense<0.000000e+00> : vector<16xf32>
    %230 = vector.multi_reduction <add>, %229, %cst_97 [1] : vector<16x16xf32> to vector<16xf32>
    %231 = vector.shape_cast %230 : vector<16xf32> to vector<16x1xf32>
    %232 = tpu.reciprocal %231 {approx = true} : vector<16x1xf32> -> vector<16x1xf32>
    %233 = vector.broadcast %232 : vector<16x1xf32> to vector<16x16xf32>
    %234 = arith.mulf %229, %233 : vector<16x16xf32>
    %235 = arith.truncf %234 : vector<16x16xf32> to vector<16x16xbf16>
    %cst_98 = arith.constant dense<0.000000e+00> : vector<16x64xf32>
    %236 = tpu.matmul %235, %223, %cst_98 {dimension_numbers = #tpu.dot_dimension_numbers<[1], [0], [0], [1], [0, 0, 1, 1], [], []>} : vector<16x16xbf16>, vector<16x64xbf16>, vector<16x64xf32> -> vector<16x64xf32>
    %237 = vector.extract_strided_slice %196 {offsets = [0, 128], sizes = [16, 64], strides = [1, 1]} : vector<16x256xf32> to vector<16x64xf32>
    %238 = arith.truncf %237 : vector<16x64xf32> to vector<16x64xbf16>
    %239 = vector.extract_strided_slice %197 {offsets = [0, 128], sizes = [16, 64], strides = [1, 1]} : vector<16x256xf32> to vector<16x64xf32>
    %240 = arith.truncf %239 : vector<16x64xf32> to vector<16x64xbf16>
    %241 = vector.extract_strided_slice %198 {offsets = [0, 128], sizes = [16, 64], strides = [1, 1]} : vector<16x256xf32> to vector<16x64xf32>
    %242 = arith.truncf %241 : vector<16x64xf32> to vector<16x64xbf16>
    %cst_99 = arith.constant dense<0.000000e+00> : vector<16x16xf32>
    %243 = tpu.matmul %238, %240, %cst_99 {dimension_numbers = #tpu.dot_dimension_numbers<[1], [1], [0], [0], [0, 0, 1, 0], [], []>} : vector<16x64xbf16>, vector<16x64xbf16>, vector<16x16xf32> -> vector<16x16xf32>
    %cst_100 = arith.constant dense<0xFF800000> : vector<16xf32>
    %244 = vector.multi_reduction <maximumf>, %243, %cst_100 [1] : vector<16x16xf32> to vector<16xf32>
    %245 = vector.shape_cast %244 : vector<16xf32> to vector<16x1xf32>
    %246 = vector.broadcast %245 : vector<16x1xf32> to vector<16x16xf32>
    %247 = arith.subf %243, %246 : vector<16x16xf32>
    %248 = math.exp %247 : vector<16x16xf32>
    %cst_101 = arith.constant dense<0.000000e+00> : vector<16xf32>
    %249 = vector.multi_reduction <add>, %248, %cst_101 [1] : vector<16x16xf32> to vector<16xf32>
    %250 = vector.shape_cast %249 : vector<16xf32> to vector<16x1xf32>
    %251 = tpu.reciprocal %250 {approx = true} : vector<16x1xf32> -> vector<16x1xf32>
    %252 = vector.broadcast %251 : vector<16x1xf32> to vector<16x16xf32>
    %253 = arith.mulf %248, %252 : vector<16x16xf32>
    %254 = arith.truncf %253 : vector<16x16xf32> to vector<16x16xbf16>
    %cst_102 = arith.constant dense<0.000000e+00> : vector<16x64xf32>
    %255 = tpu.matmul %254, %242, %cst_102 {dimension_numbers = #tpu.dot_dimension_numbers<[1], [0], [0], [1], [0, 0, 1, 1], [], []>} : vector<16x16xbf16>, vector<16x64xbf16>, vector<16x64xf32> -> vector<16x64xf32>
    %256 = vector.extract_strided_slice %196 {offsets = [0, 192], sizes = [16, 64], strides = [1, 1]} : vector<16x256xf32> to vector<16x64xf32>
    %257 = arith.truncf %256 : vector<16x64xf32> to vector<16x64xbf16>
    %258 = vector.extract_strided_slice %197 {offsets = [0, 192], sizes = [16, 64], strides = [1, 1]} : vector<16x256xf32> to vector<16x64xf32>
    %259 = arith.truncf %258 : vector<16x64xf32> to vector<16x64xbf16>
    %260 = vector.extract_strided_slice %198 {offsets = [0, 192], sizes = [16, 64], strides = [1, 1]} : vector<16x256xf32> to vector<16x64xf32>
    %261 = arith.truncf %260 : vector<16x64xf32> to vector<16x64xbf16>
    %cst_103 = arith.constant dense<0.000000e+00> : vector<16x16xf32>
    %262 = tpu.matmul %257, %259, %cst_103 {dimension_numbers = #tpu.dot_dimension_numbers<[1], [1], [0], [0], [0, 0, 1, 0], [], []>} : vector<16x64xbf16>, vector<16x64xbf16>, vector<16x16xf32> -> vector<16x16xf32>
    %cst_104 = arith.constant dense<0xFF800000> : vector<16xf32>
    %263 = vector.multi_reduction <maximumf>, %262, %cst_104 [1] : vector<16x16xf32> to vector<16xf32>
    %264 = vector.shape_cast %263 : vector<16xf32> to vector<16x1xf32>
    %265 = vector.broadcast %264 : vector<16x1xf32> to vector<16x16xf32>
    %266 = arith.subf %262, %265 : vector<16x16xf32>
    %267 = math.exp %266 : vector<16x16xf32>
    %cst_105 = arith.constant dense<0.000000e+00> : vector<16xf32>
    %268 = vector.multi_reduction <add>, %267, %cst_105 [1] : vector<16x16xf32> to vector<16xf32>
    %269 = vector.shape_cast %268 : vector<16xf32> to vector<16x1xf32>
    %270 = tpu.reciprocal %269 {approx = true} : vector<16x1xf32> -> vector<16x1xf32>
    %271 = vector.broadcast %270 : vector<16x1xf32> to vector<16x16xf32>
    %272 = arith.mulf %267, %271 : vector<16x16xf32>
    %273 = arith.truncf %272 : vector<16x16xf32> to vector<16x16xbf16>
    %cst_106 = arith.constant dense<0.000000e+00> : vector<16x64xf32>
    %274 = tpu.matmul %273, %261, %cst_106 {dimension_numbers = #tpu.dot_dimension_numbers<[1], [0], [0], [1], [0, 0, 1, 1], [], []>} : vector<16x16xbf16>, vector<16x64xbf16>, vector<16x64xf32> -> vector<16x64xf32>
    %275 = tpu.concatenate %217, %236, %255, %274 in 1 : vector<16x64xf32>, vector<16x64xf32>, vector<16x64xf32>, vector<16x64xf32> -> vector<16x256xf32>
    %c1_107 = arith.constant 1 : index
    %c0_108 = arith.constant 0 : index
    %c0_109 = arith.constant 0 : index
    %276 = vector.load %arg10[%c1_107, %c0_108, %c0_109] : memref<3x256x256xbf16, #tpu.memory_space<vmem>>, vector<1x256x256xbf16>
    %277 = vector.shape_cast %276 : vector<1x256x256xbf16> to vector<256x256xbf16>
    %278 = arith.truncf %275 : vector<16x256xf32> to vector<16x256xbf16>
    %cst_110 = arith.constant dense<0.000000e+00> : vector<16x256xf32>
    %279 = tpu.matmul %278, %277, %cst_110 {dimension_numbers = #tpu.dot_dimension_numbers<[1], [0], [0], [1], [0, 0, 1, 1], [], []>} : vector<16x256xbf16>, vector<256x256xbf16>, vector<16x256xf32> -> vector<16x256xf32>
    %c1_111 = arith.constant 1 : index
    %c0_112 = arith.constant 0 : index
    %c0_113 = arith.constant 0 : index
    %280 = vector.load %arg11[%c1_111, %c0_112, %c0_113] : memref<3x1x256xf32, #tpu.memory_space<vmem>>, vector<1x1x256xf32>
    %281 = vector.shape_cast %280 : vector<1x1x256xf32> to vector<1x256xf32>
    %282 = vector.broadcast %281 : vector<1x256xf32> to vector<16x256xf32>
    %283 = arith.addf %279, %282 : vector<16x256xf32>
    %284 = arith.addf %187, %283 : vector<16x256xf32>
    %c1_114 = arith.constant 1 : index
    %c0_115 = arith.constant 0 : index
    %c0_116 = arith.constant 0 : index
    %285 = vector.load %arg12[%c1_114, %c0_115, %c0_116] : memref<3x1x256xf32, #tpu.memory_space<vmem>>, vector<1x1x256xf32>
    %286 = vector.shape_cast %285 : vector<1x1x256xf32> to vector<1x256xf32>
    %c1_117 = arith.constant 1 : index
    %c0_118 = arith.constant 0 : index
    %c0_119 = arith.constant 0 : index
    %287 = vector.load %arg13[%c1_117, %c0_118, %c0_119] : memref<3x1x256xf32, #tpu.memory_space<vmem>>, vector<1x1x256xf32>
    %288 = vector.shape_cast %287 : vector<1x1x256xf32> to vector<1x256xf32>
    %cst_120 = arith.constant dense<0.000000e+00> : vector<16xf32>
    %289 = vector.multi_reduction <add>, %284, %cst_120 [1] : vector<16x256xf32> to vector<16xf32>
    %290 = vector.shape_cast %289 : vector<16xf32> to vector<16x1xf32>
    %cst_121 = arith.constant 2.560000e+02 : f32
    %291 = vector.broadcast %cst_121 : f32 to vector<16x1xf32>
    %292 = arith.divf %290, %291 : vector<16x1xf32>
    %293 = vector.broadcast %292 : vector<16x1xf32> to vector<16x256xf32>
    %294 = arith.subf %284, %293 : vector<16x256xf32>
    %295 = arith.mulf %294, %294 : vector<16x256xf32>
    %cst_122 = arith.constant dense<0.000000e+00> : vector<16xf32>
    %296 = vector.multi_reduction <add>, %295, %cst_122 [1] : vector<16x256xf32> to vector<16xf32>
    %297 = vector.shape_cast %296 : vector<16xf32> to vector<16x1xf32>
    %cst_123 = arith.constant 2.560000e+02 : f32
    %298 = vector.broadcast %cst_123 : f32 to vector<16x1xf32>
    %299 = arith.divf %297, %298 : vector<16x1xf32>
    %cst_124 = arith.constant 9.99999974E-6 : f32
    %300 = vector.broadcast %cst_124 : f32 to vector<16x1xf32>
    %301 = arith.addf %299, %300 : vector<16x1xf32>
    %302 = math.rsqrt %301 : vector<16x1xf32>
    %303 = vector.broadcast %302 : vector<16x1xf32> to vector<16x256xf32>
    %304 = arith.mulf %294, %303 : vector<16x256xf32>
    %305 = vector.broadcast %286 : vector<1x256xf32> to vector<16x256xf32>
    %306 = arith.mulf %304, %305 : vector<16x256xf32>
    %307 = vector.broadcast %288 : vector<1x256xf32> to vector<16x256xf32>
    %308 = arith.addf %306, %307 : vector<16x256xf32>
    %c1_125 = arith.constant 1 : index
    %c0_126 = arith.constant 0 : index
    %c0_127 = arith.constant 0 : index
    %309 = vector.load %arg14[%c1_125, %c0_126, %c0_127] : memref<3x256x128xbf16, #tpu.memory_space<vmem>>, vector<1x256x128xbf16>
    %310 = vector.shape_cast %309 : vector<1x256x128xbf16> to vector<256x128xbf16>
    %311 = arith.truncf %308 : vector<16x256xf32> to vector<16x256xbf16>
    %cst_128 = arith.constant dense<0.000000e+00> : vector<16x128xf32>
    %312 = tpu.matmul %311, %310, %cst_128 {dimension_numbers = #tpu.dot_dimension_numbers<[1], [0], [0], [1], [0, 0, 1, 1], [], []>} : vector<16x256xbf16>, vector<256x128xbf16>, vector<16x128xf32> -> vector<16x128xf32>
    %c1_129 = arith.constant 1 : index
    %c0_130 = arith.constant 0 : index
    %c0_131 = arith.constant 0 : index
    %313 = vector.load %arg15[%c1_129, %c0_130, %c0_131] : memref<3x1x128xf32, #tpu.memory_space<vmem>>, vector<1x1x128xf32>
    %314 = vector.shape_cast %313 : vector<1x1x128xf32> to vector<1x128xf32>
    %315 = vector.broadcast %314 : vector<1x128xf32> to vector<16x128xf32>
    %316 = arith.addf %312, %315 : vector<16x128xf32>
    %cst_132 = arith.constant 0.000000e+00 : f32
    %317 = vector.broadcast %cst_132 : f32 to vector<16x128xf32>
    %318 = arith.maximumf %316, %317 : vector<16x128xf32>
    %c1_133 = arith.constant 1 : index
    %c0_134 = arith.constant 0 : index
    %c0_135 = arith.constant 0 : index
    %319 = vector.load %arg16[%c1_133, %c0_134, %c0_135] : memref<3x128x256xbf16, #tpu.memory_space<vmem>>, vector<1x128x256xbf16>
    %320 = vector.shape_cast %319 : vector<1x128x256xbf16> to vector<128x256xbf16>
    %321 = arith.truncf %318 : vector<16x128xf32> to vector<16x128xbf16>
    %cst_136 = arith.constant dense<0.000000e+00> : vector<16x256xf32>
    %322 = tpu.matmul %321, %320, %cst_136 {dimension_numbers = #tpu.dot_dimension_numbers<[1], [0], [0], [1], [0, 0, 1, 1], [], []>} : vector<16x128xbf16>, vector<128x256xbf16>, vector<16x256xf32> -> vector<16x256xf32>
    %c1_137 = arith.constant 1 : index
    %c0_138 = arith.constant 0 : index
    %c0_139 = arith.constant 0 : index
    %323 = vector.load %arg17[%c1_137, %c0_138, %c0_139] : memref<3x1x256xf32, #tpu.memory_space<vmem>>, vector<1x1x256xf32>
    %324 = vector.shape_cast %323 : vector<1x1x256xf32> to vector<1x256xf32>
    %325 = vector.broadcast %324 : vector<1x256xf32> to vector<16x256xf32>
    %326 = arith.addf %322, %325 : vector<16x256xf32>
    %327 = arith.addf %308, %326 : vector<16x256xf32>
    %c1_140 = arith.constant 1 : index
    %c0_141 = arith.constant 0 : index
    %c0_142 = arith.constant 0 : index
    %328 = vector.load %arg18[%c1_140, %c0_141, %c0_142] : memref<3x1x256xf32, #tpu.memory_space<vmem>>, vector<1x1x256xf32>
    %329 = vector.shape_cast %328 : vector<1x1x256xf32> to vector<1x256xf32>
    %c1_143 = arith.constant 1 : index
    %c0_144 = arith.constant 0 : index
    %c0_145 = arith.constant 0 : index
    %330 = vector.load %arg19[%c1_143, %c0_144, %c0_145] : memref<3x1x256xf32, #tpu.memory_space<vmem>>, vector<1x1x256xf32>
    %331 = vector.shape_cast %330 : vector<1x1x256xf32> to vector<1x256xf32>
    %cst_146 = arith.constant dense<0.000000e+00> : vector<16xf32>
    %332 = vector.multi_reduction <add>, %327, %cst_146 [1] : vector<16x256xf32> to vector<16xf32>
    %333 = vector.shape_cast %332 : vector<16xf32> to vector<16x1xf32>
    %cst_147 = arith.constant 2.560000e+02 : f32
    %334 = vector.broadcast %cst_147 : f32 to vector<16x1xf32>
    %335 = arith.divf %333, %334 : vector<16x1xf32>
    %336 = vector.broadcast %335 : vector<16x1xf32> to vector<16x256xf32>
    %337 = arith.subf %327, %336 : vector<16x256xf32>
    %338 = arith.mulf %337, %337 : vector<16x256xf32>
    %cst_148 = arith.constant dense<0.000000e+00> : vector<16xf32>
    %339 = vector.multi_reduction <add>, %338, %cst_148 [1] : vector<16x256xf32> to vector<16xf32>
    %340 = vector.shape_cast %339 : vector<16xf32> to vector<16x1xf32>
    %cst_149 = arith.constant 2.560000e+02 : f32
    %341 = vector.broadcast %cst_149 : f32 to vector<16x1xf32>
    %342 = arith.divf %340, %341 : vector<16x1xf32>
    %cst_150 = arith.constant 9.99999974E-6 : f32
    %343 = vector.broadcast %cst_150 : f32 to vector<16x1xf32>
    %344 = arith.addf %342, %343 : vector<16x1xf32>
    %345 = math.rsqrt %344 : vector<16x1xf32>
    %346 = vector.broadcast %345 : vector<16x1xf32> to vector<16x256xf32>
    %347 = arith.mulf %337, %346 : vector<16x256xf32>
    %348 = vector.broadcast %329 : vector<1x256xf32> to vector<16x256xf32>
    %349 = arith.mulf %347, %348 : vector<16x256xf32>
    %350 = vector.broadcast %331 : vector<1x256xf32> to vector<16x256xf32>
    %351 = arith.addf %349, %350 : vector<16x256xf32>
    %c0_151 = arith.constant 0 : index
    %c0_152 = arith.constant 0 : index
    %c0_153 = arith.constant 0 : index
    %352 = vector.load %arg23[%c0_151, %c0_152, %c0_153] : memref<1x16x256xf32, #tpu.memory_space<vmem>>, vector<1x16x256xf32>
    %353 = vector.shape_cast %352 : vector<1x16x256xf32> to vector<16x256xf32>
    %354 = vector.shape_cast %351 : vector<16x256xf32> to vector<1x16x256xf32>
    tpu.vector_store %arg23[%c0_151, %c0_152, %c0_153], %354 {strides = array<i32>} : memref<1x16x256xf32, #tpu.memory_space<vmem>>, vector<1x16x256xf32>,
    %c2 = arith.constant 2 : index
    %c0_154 = arith.constant 0 : index
    %c0_155 = arith.constant 0 : index
    %355 = vector.load %arg8[%c2, %c0_154, %c0_155] : memref<3x256x768xbf16, #tpu.memory_space<vmem>>, vector<1x256x768xbf16>
    %356 = vector.shape_cast %355 : vector<1x256x768xbf16> to vector<256x768xbf16>
    %357 = arith.truncf %351 : vector<16x256xf32> to vector<16x256xbf16>
    %cst_156 = arith.constant dense<0.000000e+00> : vector<16x768xf32>
    %358 = tpu.matmul %357, %356, %cst_156 {dimension_numbers = #tpu.dot_dimension_numbers<[1], [0], [0], [1], [0, 0, 1, 1], [], []>} : vector<16x256xbf16>, vector<256x768xbf16>, vector<16x768xf32> -> vector<16x768xf32>
    %c2_157 = arith.constant 2 : index
    %c0_158 = arith.constant 0 : index
    %c0_159 = arith.constant 0 : index
    %359 = vector.load %arg9[%c2_157, %c0_158, %c0_159] : memref<3x1x768xf32, #tpu.memory_space<vmem>>, vector<1x1x768xf32>
    %360 = vector.shape_cast %359 : vector<1x1x768xf32> to vector<1x768xf32>
    %361 = vector.broadcast %360 : vector<1x768xf32> to vector<16x768xf32>
    %362 = arith.addf %358, %361 : vector<16x768xf32>
    %363 = vector.extract_strided_slice %362 {offsets = [0, 0], sizes = [16, 256], strides = [1, 1]} : vector<16x768xf32> to vector<16x256xf32>
    %364 = vector.extract_strided_slice %362 {offsets = [0, 256], sizes = [16, 256], strides = [1, 1]} : vector<16x768xf32> to vector<16x256xf32>
    %365 = vector.extract_strided_slice %362 {offsets = [0, 512], sizes = [16, 256], strides = [1, 1]} : vector<16x768xf32> to vector<16x256xf32>
    %366 = vector.extract_strided_slice %363 {offsets = [0, 0], sizes = [16, 64], strides = [1, 1]} : vector<16x256xf32> to vector<16x64xf32>
    %367 = arith.truncf %366 : vector<16x64xf32> to vector<16x64xbf16>
    %368 = vector.extract_strided_slice %364 {offsets = [0, 0], sizes = [16, 64], strides = [1, 1]} : vector<16x256xf32> to vector<16x64xf32>
    %369 = arith.truncf %368 : vector<16x64xf32> to vector<16x64xbf16>
    %370 = vector.extract_strided_slice %365 {offsets = [0, 0], sizes = [16, 64], strides = [1, 1]} : vector<16x256xf32> to vector<16x64xf32>
    %371 = arith.truncf %370 : vector<16x64xf32> to vector<16x64xbf16>
    %cst_160 = arith.constant dense<0.000000e+00> : vector<16x16xf32>
    %372 = tpu.matmul %367, %369, %cst_160 {dimension_numbers = #tpu.dot_dimension_numbers<[1], [1], [0], [0], [0, 0, 1, 0], [], []>} : vector<16x64xbf16>, vector<16x64xbf16>, vector<16x16xf32> -> vector<16x16xf32>
    %cst_161 = arith.constant dense<0xFF800000> : vector<16xf32>
    %373 = vector.multi_reduction <maximumf>, %372, %cst_161 [1] : vector<16x16xf32> to vector<16xf32>
    %374 = vector.shape_cast %373 : vector<16xf32> to vector<16x1xf32>
    %375 = vector.broadcast %374 : vector<16x1xf32> to vector<16x16xf32>
    %376 = arith.subf %372, %375 : vector<16x16xf32>
    %377 = math.exp %376 : vector<16x16xf32>
    %cst_162 = arith.constant dense<0.000000e+00> : vector<16xf32>
    %378 = vector.multi_reduction <add>, %377, %cst_162 [1] : vector<16x16xf32> to vector<16xf32>
    %379 = vector.shape_cast %378 : vector<16xf32> to vector<16x1xf32>
    %380 = tpu.reciprocal %379 {approx = true} : vector<16x1xf32> -> vector<16x1xf32>
    %381 = vector.broadcast %380 : vector<16x1xf32> to vector<16x16xf32>
    %382 = arith.mulf %377, %381 : vector<16x16xf32>
    %383 = arith.truncf %382 : vector<16x16xf32> to vector<16x16xbf16>
    %cst_163 = arith.constant dense<0.000000e+00> : vector<16x64xf32>
    %384 = tpu.matmul %383, %371, %cst_163 {dimension_numbers = #tpu.dot_dimension_numbers<[1], [0], [0], [1], [0, 0, 1, 1], [], []>} : vector<16x16xbf16>, vector<16x64xbf16>, vector<16x64xf32> -> vector<16x64xf32>
    %385 = vector.extract_strided_slice %363 {offsets = [0, 64], sizes = [16, 64], strides = [1, 1]} : vector<16x256xf32> to vector<16x64xf32>
    %386 = arith.truncf %385 : vector<16x64xf32> to vector<16x64xbf16>
    %387 = vector.extract_strided_slice %364 {offsets = [0, 64], sizes = [16, 64], strides = [1, 1]} : vector<16x256xf32> to vector<16x64xf32>
    %388 = arith.truncf %387 : vector<16x64xf32> to vector<16x64xbf16>
    %389 = vector.extract_strided_slice %365 {offsets = [0, 64], sizes = [16, 64], strides = [1, 1]} : vector<16x256xf32> to vector<16x64xf32>
    %390 = arith.truncf %389 : vector<16x64xf32> to vector<16x64xbf16>
    %cst_164 = arith.constant dense<0.000000e+00> : vector<16x16xf32>
    %391 = tpu.matmul %386, %388, %cst_164 {dimension_numbers = #tpu.dot_dimension_numbers<[1], [1], [0], [0], [0, 0, 1, 0], [], []>} : vector<16x64xbf16>, vector<16x64xbf16>, vector<16x16xf32> -> vector<16x16xf32>
    %cst_165 = arith.constant dense<0xFF800000> : vector<16xf32>
    %392 = vector.multi_reduction <maximumf>, %391, %cst_165 [1] : vector<16x16xf32> to vector<16xf32>
    %393 = vector.shape_cast %392 : vector<16xf32> to vector<16x1xf32>
    %394 = vector.broadcast %393 : vector<16x1xf32> to vector<16x16xf32>
    %395 = arith.subf %391, %394 : vector<16x16xf32>
    %396 = math.exp %395 : vector<16x16xf32>
    %cst_166 = arith.constant dense<0.000000e+00> : vector<16xf32>
    %397 = vector.multi_reduction <add>, %396, %cst_166 [1] : vector<16x16xf32> to vector<16xf32>
    %398 = vector.shape_cast %397 : vector<16xf32> to vector<16x1xf32>
    %399 = tpu.reciprocal %398 {approx = true} : vector<16x1xf32> -> vector<16x1xf32>
    %400 = vector.broadcast %399 : vector<16x1xf32> to vector<16x16xf32>
    %401 = arith.mulf %396, %400 : vector<16x16xf32>
    %402 = arith.truncf %401 : vector<16x16xf32> to vector<16x16xbf16>
    %cst_167 = arith.constant dense<0.000000e+00> : vector<16x64xf32>
    %403 = tpu.matmul %402, %390, %cst_167 {dimension_numbers = #tpu.dot_dimension_numbers<[1], [0], [0], [1], [0, 0, 1, 1], [], []>} : vector<16x16xbf16>, vector<16x64xbf16>, vector<16x64xf32> -> vector<16x64xf32>
    %404 = vector.extract_strided_slice %363 {offsets = [0, 128], sizes = [16, 64], strides = [1, 1]} : vector<16x256xf32> to vector<16x64xf32>
    %405 = arith.truncf %404 : vector<16x64xf32> to vector<16x64xbf16>
    %406 = vector.extract_strided_slice %364 {offsets = [0, 128], sizes = [16, 64], strides = [1, 1]} : vector<16x256xf32> to vector<16x64xf32>
    %407 = arith.truncf %406 : vector<16x64xf32> to vector<16x64xbf16>
    %408 = vector.extract_strided_slice %365 {offsets = [0, 128], sizes = [16, 64], strides = [1, 1]} : vector<16x256xf32> to vector<16x64xf32>
    %409 = arith.truncf %408 : vector<16x64xf32> to vector<16x64xbf16>
    %cst_168 = arith.constant dense<0.000000e+00> : vector<16x16xf32>
    %410 = tpu.matmul %405, %407, %cst_168 {dimension_numbers = #tpu.dot_dimension_numbers<[1], [1], [0], [0], [0, 0, 1, 0], [], []>} : vector<16x64xbf16>, vector<16x64xbf16>, vector<16x16xf32> -> vector<16x16xf32>
    %cst_169 = arith.constant dense<0xFF800000> : vector<16xf32>
    %411 = vector.multi_reduction <maximumf>, %410, %cst_169 [1] : vector<16x16xf32> to vector<16xf32>
    %412 = vector.shape_cast %411 : vector<16xf32> to vector<16x1xf32>
    %413 = vector.broadcast %412 : vector<16x1xf32> to vector<16x16xf32>
    %414 = arith.subf %410, %413 : vector<16x16xf32>
    %415 = math.exp %414 : vector<16x16xf32>
    %cst_170 = arith.constant dense<0.000000e+00> : vector<16xf32>
    %416 = vector.multi_reduction <add>, %415, %cst_170 [1] : vector<16x16xf32> to vector<16xf32>
    %417 = vector.shape_cast %416 : vector<16xf32> to vector<16x1xf32>
    %418 = tpu.reciprocal %417 {approx = true} : vector<16x1xf32> -> vector<16x1xf32>
    %419 = vector.broadcast %418 : vector<16x1xf32> to vector<16x16xf32>
    %420 = arith.mulf %415, %419 : vector<16x16xf32>
    %421 = arith.truncf %420 : vector<16x16xf32> to vector<16x16xbf16>
    %cst_171 = arith.constant dense<0.000000e+00> : vector<16x64xf32>
    %422 = tpu.matmul %421, %409, %cst_171 {dimension_numbers = #tpu.dot_dimension_numbers<[1], [0], [0], [1], [0, 0, 1, 1], [], []>} : vector<16x16xbf16>, vector<16x64xbf16>, vector<16x64xf32> -> vector<16x64xf32>
    %423 = vector.extract_strided_slice %363 {offsets = [0, 192], sizes = [16, 64], strides = [1, 1]} : vector<16x256xf32> to vector<16x64xf32>
    %424 = arith.truncf %423 : vector<16x64xf32> to vector<16x64xbf16>
    %425 = vector.extract_strided_slice %364 {offsets = [0, 192], sizes = [16, 64], strides = [1, 1]} : vector<16x256xf32> to vector<16x64xf32>
    %426 = arith.truncf %425 : vector<16x64xf32> to vector<16x64xbf16>
    %427 = vector.extract_strided_slice %365 {offsets = [0, 192], sizes = [16, 64], strides = [1, 1]} : vector<16x256xf32> to vector<16x64xf32>
    %428 = arith.truncf %427 : vector<16x64xf32> to vector<16x64xbf16>
    %cst_172 = arith.constant dense<0.000000e+00> : vector<16x16xf32>
    %429 = tpu.matmul %424, %426, %cst_172 {dimension_numbers = #tpu.dot_dimension_numbers<[1], [1], [0], [0], [0, 0, 1, 0], [], []>} : vector<16x64xbf16>, vector<16x64xbf16>, vector<16x16xf32> -> vector<16x16xf32>
    %cst_173 = arith.constant dense<0xFF800000> : vector<16xf32>
    %430 = vector.multi_reduction <maximumf>, %429, %cst_173 [1] : vector<16x16xf32> to vector<16xf32>
    %431 = vector.shape_cast %430 : vector<16xf32> to vector<16x1xf32>
    %432 = vector.broadcast %431 : vector<16x1xf32> to vector<16x16xf32>
    %433 = arith.subf %429, %432 : vector<16x16xf32>
    %434 = math.exp %433 : vector<16x16xf32>
    %cst_174 = arith.constant dense<0.000000e+00> : vector<16xf32>
    %435 = vector.multi_reduction <add>, %434, %cst_174 [1] : vector<16x16xf32> to vector<16xf32>
    %436 = vector.shape_cast %435 : vector<16xf32> to vector<16x1xf32>
    %437 = tpu.reciprocal %436 {approx = true} : vector<16x1xf32> -> vector<16x1xf32>
    %438 = vector.broadcast %437 : vector<16x1xf32> to vector<16x16xf32>
    %439 = arith.mulf %434, %438 : vector<16x16xf32>
    %440 = arith.truncf %439 : vector<16x16xf32> to vector<16x16xbf16>
    %cst_175 = arith.constant dense<0.000000e+00> : vector<16x64xf32>
    %441 = tpu.matmul %440, %428, %cst_175 {dimension_numbers = #tpu.dot_dimension_numbers<[1], [0], [0], [1], [0, 0, 1, 1], [], []>} : vector<16x16xbf16>, vector<16x64xbf16>, vector<16x64xf32> -> vector<16x64xf32>
    %442 = tpu.concatenate %384, %403, %422, %441 in 1 : vector<16x64xf32>, vector<16x64xf32>, vector<16x64xf32>, vector<16x64xf32> -> vector<16x256xf32>
    %c2_176 = arith.constant 2 : index
    %c0_177 = arith.constant 0 : index
    %c0_178 = arith.constant 0 : index
    %443 = vector.load %arg10[%c2_176, %c0_177, %c0_178] : memref<3x256x256xbf16, #tpu.memory_space<vmem>>, vector<1x256x256xbf16>
    %444 = vector.shape_cast %443 : vector<1x256x256xbf16> to vector<256x256xbf16>
    %445 = arith.truncf %442 : vector<16x256xf32> to vector<16x256xbf16>
    %cst_179 = arith.constant dense<0.000000e+00> : vector<16x256xf32>
    %446 = tpu.matmul %445, %444, %cst_179 {dimension_numbers = #tpu.dot_dimension_numbers<[1], [0], [0], [1], [0, 0, 1, 1], [], []>} : vector<16x256xbf16>, vector<256x256xbf16>, vector<16x256xf32> -> vector<16x256xf32>
    %c2_180 = arith.constant 2 : index
    %c0_181 = arith.constant 0 : index
    %c0_182 = arith.constant 0 : index
    %447 = vector.load %arg11[%c2_180, %c0_181, %c0_182] : memref<3x1x256xf32, #tpu.memory_space<vmem>>, vector<1x1x256xf32>
    %448 = vector.shape_cast %447 : vector<1x1x256xf32> to vector<1x256xf32>
    %449 = vector.broadcast %448 : vector<1x256xf32> to vector<16x256xf32>
    %450 = arith.addf %446, %449 : vector<16x256xf32>
    %451 = arith.addf %351, %450 : vector<16x256xf32>
    %c2_183 = arith.constant 2 : index
    %c0_184 = arith.constant 0 : index
    %c0_185 = arith.constant 0 : index
    %452 = vector.load %arg12[%c2_183, %c0_184, %c0_185] : memref<3x1x256xf32, #tpu.memory_space<vmem>>, vector<1x1x256xf32>
    %453 = vector.shape_cast %452 : vector<1x1x256xf32> to vector<1x256xf32>
    %c2_186 = arith.constant 2 : index
    %c0_187 = arith.constant 0 : index
    %c0_188 = arith.constant 0 : index
    %454 = vector.load %arg13[%c2_186, %c0_187, %c0_188] : memref<3x1x256xf32, #tpu.memory_space<vmem>>, vector<1x1x256xf32>
    %455 = vector.shape_cast %454 : vector<1x1x256xf32> to vector<1x256xf32>
    %cst_189 = arith.constant dense<0.000000e+00> : vector<16xf32>
    %456 = vector.multi_reduction <add>, %451, %cst_189 [1] : vector<16x256xf32> to vector<16xf32>
    %457 = vector.shape_cast %456 : vector<16xf32> to vector<16x1xf32>
    %cst_190 = arith.constant 2.560000e+02 : f32
    %458 = vector.broadcast %cst_190 : f32 to vector<16x1xf32>
    %459 = arith.divf %457, %458 : vector<16x1xf32>
    %460 = vector.broadcast %459 : vector<16x1xf32> to vector<16x256xf32>
    %461 = arith.subf %451, %460 : vector<16x256xf32>
    %462 = arith.mulf %461, %461 : vector<16x256xf32>
    %cst_191 = arith.constant dense<0.000000e+00> : vector<16xf32>
    %463 = vector.multi_reduction <add>, %462, %cst_191 [1] : vector<16x256xf32> to vector<16xf32>
    %464 = vector.shape_cast %463 : vector<16xf32> to vector<16x1xf32>
    %cst_192 = arith.constant 2.560000e+02 : f32
    %465 = vector.broadcast %cst_192 : f32 to vector<16x1xf32>
    %466 = arith.divf %464, %465 : vector<16x1xf32>
    %cst_193 = arith.constant 9.99999974E-6 : f32
    %467 = vector.broadcast %cst_193 : f32 to vector<16x1xf32>
    %468 = arith.addf %466, %467 : vector<16x1xf32>
    %469 = math.rsqrt %468 : vector<16x1xf32>
    %470 = vector.broadcast %469 : vector<16x1xf32> to vector<16x256xf32>
    %471 = arith.mulf %461, %470 : vector<16x256xf32>
    %472 = vector.broadcast %453 : vector<1x256xf32> to vector<16x256xf32>
    %473 = arith.mulf %471, %472 : vector<16x256xf32>
    %474 = vector.broadcast %455 : vector<1x256xf32> to vector<16x256xf32>
    %475 = arith.addf %473, %474 : vector<16x256xf32>
    %c2_194 = arith.constant 2 : index
    %c0_195 = arith.constant 0 : index
    %c0_196 = arith.constant 0 : index
    %476 = vector.load %arg14[%c2_194, %c0_195, %c0_196] : memref<3x256x128xbf16, #tpu.memory_space<vmem>>, vector<1x256x128xbf16>
    %477 = vector.shape_cast %476 : vector<1x256x128xbf16> to vector<256x128xbf16>
    %478 = arith.truncf %475 : vector<16x256xf32> to vector<16x256xbf16>
    %cst_197 = arith.constant dense<0.000000e+00> : vector<16x128xf32>
    %479 = tpu.matmul %478, %477, %cst_197 {dimension_numbers = #tpu.dot_dimension_numbers<[1], [0], [0], [1], [0, 0, 1, 1], [], []>} : vector<16x256xbf16>, vector<256x128xbf16>, vector<16x128xf32> -> vector<16x128xf32>
    %c2_198 = arith.constant 2 : index
    %c0_199 = arith.constant 0 : index
    %c0_200 = arith.constant 0 : index
    %480 = vector.load %arg15[%c2_198, %c0_199, %c0_200] : memref<3x1x128xf32, #tpu.memory_space<vmem>>, vector<1x1x128xf32>
    %481 = vector.shape_cast %480 : vector<1x1x128xf32> to vector<1x128xf32>
    %482 = vector.broadcast %481 : vector<1x128xf32> to vector<16x128xf32>
    %483 = arith.addf %479, %482 : vector<16x128xf32>
    %cst_201 = arith.constant 0.000000e+00 : f32
    %484 = vector.broadcast %cst_201 : f32 to vector<16x128xf32>
    %485 = arith.maximumf %483, %484 : vector<16x128xf32>
    %c2_202 = arith.constant 2 : index
    %c0_203 = arith.constant 0 : index
    %c0_204 = arith.constant 0 : index
    %486 = vector.load %arg16[%c2_202, %c0_203, %c0_204] : memref<3x128x256xbf16, #tpu.memory_space<vmem>>, vector<1x128x256xbf16>
    %487 = vector.shape_cast %486 : vector<1x128x256xbf16> to vector<128x256xbf16>
    %488 = arith.truncf %485 : vector<16x128xf32> to vector<16x128xbf16>
    %cst_205 = arith.constant dense<0.000000e+00> : vector<16x256xf32>
    %489 = tpu.matmul %488, %487, %cst_205 {dimension_numbers = #tpu.dot_dimension_numbers<[1], [0], [0], [1], [0, 0, 1, 1], [], []>} : vector<16x128xbf16>, vector<128x256xbf16>, vector<16x256xf32> -> vector<16x256xf32>
    %c2_206 = arith.constant 2 : index
    %c0_207 = arith.constant 0 : index
    %c0_208 = arith.constant 0 : index
    %490 = vector.load %arg17[%c2_206, %c0_207, %c0_208] : memref<3x1x256xf32, #tpu.memory_space<vmem>>, vector<1x1x256xf32>
    %491 = vector.shape_cast %490 : vector<1x1x256xf32> to vector<1x256xf32>
    %492 = vector.broadcast %491 : vector<1x256xf32> to vector<16x256xf32>
    %493 = arith.addf %489, %492 : vector<16x256xf32>
    %494 = arith.addf %475, %493 : vector<16x256xf32>
    %c2_209 = arith.constant 2 : index
    %c0_210 = arith.constant 0 : index
    %c0_211 = arith.constant 0 : index
    %495 = vector.load %arg18[%c2_209, %c0_210, %c0_211] : memref<3x1x256xf32, #tpu.memory_space<vmem>>, vector<1x1x256xf32>
    %496 = vector.shape_cast %495 : vector<1x1x256xf32> to vector<1x256xf32>
    %c2_212 = arith.constant 2 : index
    %c0_213 = arith.constant 0 : index
    %c0_214 = arith.constant 0 : index
    %497 = vector.load %arg19[%c2_212, %c0_213, %c0_214] : memref<3x1x256xf32, #tpu.memory_space<vmem>>, vector<1x1x256xf32>
    %498 = vector.shape_cast %497 : vector<1x1x256xf32> to vector<1x256xf32>
    %cst_215 = arith.constant dense<0.000000e+00> : vector<16xf32>
    %499 = vector.multi_reduction <add>, %494, %cst_215 [1] : vector<16x256xf32> to vector<16xf32>
    %500 = vector.shape_cast %499 : vector<16xf32> to vector<16x1xf32>
    %cst_216 = arith.constant 2.560000e+02 : f32
    %501 = vector.broadcast %cst_216 : f32 to vector<16x1xf32>
    %502 = arith.divf %500, %501 : vector<16x1xf32>
    %503 = vector.broadcast %502 : vector<16x1xf32> to vector<16x256xf32>
    %504 = arith.subf %494, %503 : vector<16x256xf32>
    %505 = arith.mulf %504, %504 : vector<16x256xf32>
    %cst_217 = arith.constant dense<0.000000e+00> : vector<16xf32>
    %506 = vector.multi_reduction <add>, %505, %cst_217 [1] : vector<16x256xf32> to vector<16xf32>
    %507 = vector.shape_cast %506 : vector<16xf32> to vector<16x1xf32>
    %cst_218 = arith.constant 2.560000e+02 : f32
    %508 = vector.broadcast %cst_218 : f32 to vector<16x1xf32>
    %509 = arith.divf %507, %508 : vector<16x1xf32>
    %cst_219 = arith.constant 9.99999974E-6 : f32
    %510 = vector.broadcast %cst_219 : f32 to vector<16x1xf32>
    %511 = arith.addf %509, %510 : vector<16x1xf32>
    %512 = math.rsqrt %511 : vector<16x1xf32>
    %513 = vector.broadcast %512 : vector<16x1xf32> to vector<16x256xf32>
    %514 = arith.mulf %504, %513 : vector<16x256xf32>
    %515 = vector.broadcast %496 : vector<1x256xf32> to vector<16x256xf32>
    %516 = arith.mulf %514, %515 : vector<16x256xf32>
    %517 = vector.broadcast %498 : vector<1x256xf32> to vector<16x256xf32>
    %518 = arith.addf %516, %517 : vector<16x256xf32>
    %c0_220 = arith.constant 0 : index
    %c0_221 = arith.constant 0 : index
    %c0_222 = arith.constant 0 : index
    %519 = vector.load %arg22[%c0_220, %c0_221, %c0_222] : memref<1x16x256xf32, #tpu.memory_space<vmem>>, vector<1x16x256xf32>
    %520 = vector.shape_cast %519 : vector<1x16x256xf32> to vector<16x256xf32>
    %521 = vector.shape_cast %518 : vector<16x256xf32> to vector<1x16x256xf32>
    tpu.vector_store %arg22[%c0_220, %c0_221, %c0_222], %521 {strides = array<i32>} : memref<1x16x256xf32, #tpu.memory_space<vmem>>, vector<1x16x256xf32>,
    %c0_223 = arith.constant 0 : index
    %c0_224 = arith.constant 0 : index
    %522 = vector.load %arg20[%c0_223, %c0_224] : memref<256x128xbf16, #tpu.memory_space<vmem>>, vector<256x128xbf16>
    %523 = arith.truncf %518 : vector<16x256xf32> to vector<16x256xbf16>
    %cst_225 = arith.constant dense<0.000000e+00> : vector<16x128xf32>
    %524 = tpu.matmul %523, %522, %cst_225 {dimension_numbers = #tpu.dot_dimension_numbers<[1], [0], [0], [1], [0, 0, 1, 1], [], []>} : vector<16x256xbf16>, vector<256x128xbf16>, vector<16x128xf32> -> vector<16x128xf32>
    %c0_226 = arith.constant 0 : index
    %c0_227 = arith.constant 0 : index
    %525 = vector.load %arg21[%c0_226, %c0_227] : memref<1x128xf32, #tpu.memory_space<vmem>>, vector<1x128xf32>
    %526 = vector.broadcast %525 : vector<1x128xf32> to vector<16x128xf32>
    %527 = arith.addf %524, %526 : vector<16x128xf32>
    %c0_228 = arith.constant 0 : index
    %c0_229 = arith.constant 0 : index
    %c0_230 = arith.constant 0 : index
    %528 = vector.load %arg24[%c0_228, %c0_229, %c0_230] : memref<1x16x128xf32, #tpu.memory_space<vmem>>, vector<1x16x128xf32>
    %529 = vector.shape_cast %528 : vector<1x16x128xf32> to vector<16x128xf32>
    %530 = vector.shape_cast %527 : vector<16x128xf32> to vector<1x16x128xf32>
    tpu.vector_store %arg24[%c0_228, %c0_229, %c0_230], %530 {strides = array<i32>} : memref<1x16x128xf32, #tpu.memory_space<vmem>>, vector<1x16x128xf32>,
    return
  }
  func.func @transform_0(%arg0: i32) -> (i32, i32, i32) {
    %c0_i32 = arith.constant 0 : i32
    %c0_i32_0 = arith.constant 0 : i32
    %c0_i32_1 = arith.constant 0 : i32
    return %arg0, %c0_i32, %c0_i32_0 : i32, i32, i32
  }
  func.func @transform_1(%arg0: i32) -> (i32, i32) {
    %c0_i32 = arith.constant 0 : i32
    %c0_i32_0 = arith.constant 0 : i32
    %c0_i32_1 = arith.constant 0 : i32
    return %c0_i32, %c0_i32_0 : i32, i32
  }
  func.func @transform_2(%arg0: i32) -> (i32, i32) {
    %c0_i32 = arith.constant 0 : i32
    %c0_i32_0 = arith.constant 0 : i32
    %c0_i32_1 = arith.constant 0 : i32
    return %c0_i32, %c0_i32_0 : i32, i32
  }
  func.func @transform_3(%arg0: i32) -> (i32, i32) {
    %c0_i32 = arith.constant 0 : i32
    %c0_i32_0 = arith.constant 0 : i32
    %c0_i32_1 = arith.constant 0 : i32
    return %c0_i32, %c0_i32_0 : i32, i32
  }
  func.func @transform_4(%arg0: i32) -> (i32, i32) {
    %c0_i32 = arith.constant 0 : i32
    %c0_i32_0 = arith.constant 0 : i32
    %c0_i32_1 = arith.constant 0 : i32
    return %c0_i32, %c0_i32_0 : i32, i32
  }
  func.func @transform_5(%arg0: i32) -> (i32, i32) {
    %c0_i32 = arith.constant 0 : i32
    %c0_i32_0 = arith.constant 0 : i32
    %c0_i32_1 = arith.constant 0 : i32
    return %c0_i32, %c0_i32_0 : i32, i32
  }
  func.func @transform_6(%arg0: i32) -> (i32, i32) {
    %c0_i32 = arith.constant 0 : i32
    %c0_i32_0 = arith.constant 0 : i32
    %c0_i32_1 = arith.constant 0 : i32
    return %c0_i32, %c0_i32_0 : i32, i32
  }
  func.func @transform_7(%arg0: i32) -> (i32, i32, i32) {
    %c0_i32 = arith.constant 0 : i32
    %c0_i32_0 = arith.constant 0 : i32
    %c0_i32_1 = arith.constant 0 : i32
    %c0_i32_2 = arith.constant 0 : i32
    return %c0_i32, %c0_i32_0, %c0_i32_1 : i32, i32, i32
  }
  func.func @transform_8(%arg0: i32) -> (i32, i32, i32) {
    %c0_i32 = arith.constant 0 : i32
    %c0_i32_0 = arith.constant 0 : i32
    %c0_i32_1 = arith.constant 0 : i32
    %c0_i32_2 = arith.constant 0 : i32
    return %c0_i32, %c0_i32_0, %c0_i32_1 : i32, i32, i32
  }
  func.func @transform_9(%arg0: i32) -> (i32, i32, i32) {
    %c0_i32 = arith.constant 0 : i32
    %c0_i32_0 = arith.constant 0 : i32
    %c0_i32_1 = arith.constant 0 : i32
    %c0_i32_2 = arith.constant 0 : i32
    return %c0_i32, %c0_i32_0, %c0_i32_1 : i32, i32, i32
  }
  func.func @transform_10(%arg0: i32) -> (i32, i32, i32) {
    %c0_i32 = arith.constant 0 : i32
    %c0_i32_0 = arith.constant 0 : i32
    %c0_i32_1 = arith.constant 0 : i32
    %c0_i32_2 = arith.constant 0 : i32
    return %c0_i32, %c0_i32_0, %c0_i32_1 : i32, i32, i32
  }
  func.func @transform_11(%arg0: i32) -> (i32, i32, i32) {
    %c0_i32 = arith.constant 0 : i32
    %c0_i32_0 = arith.constant 0 : i32
    %c0_i32_1 = arith.constant 0 : i32
    %c0_i32_2 = arith.constant 0 : i32
    return %c0_i32, %c0_i32_0, %c0_i32_1 : i32, i32, i32
  }
  func.func @transform_12(%arg0: i32) -> (i32, i32, i32) {
    %c0_i32 = arith.constant 0 : i32
    %c0_i32_0 = arith.constant 0 : i32
    %c0_i32_1 = arith.constant 0 : i32
    %c0_i32_2 = arith.constant 0 : i32
    return %c0_i32, %c0_i32_0, %c0_i32_1 : i32, i32, i32
  }
  func.func @transform_13(%arg0: i32) -> (i32, i32, i32) {
    %c0_i32 = arith.constant 0 : i32
    %c0_i32_0 = arith.constant 0 : i32
    %c0_i32_1 = arith.constant 0 : i32
    %c0_i32_2 = arith.constant 0 : i32
    return %c0_i32, %c0_i32_0, %c0_i32_1 : i32, i32, i32
  }
  func.func @transform_14(%arg0: i32) -> (i32, i32, i32) {
    %c0_i32 = arith.constant 0 : i32
    %c0_i32_0 = arith.constant 0 : i32
    %c0_i32_1 = arith.constant 0 : i32
    %c0_i32_2 = arith.constant 0 : i32
    return %c0_i32, %c0_i32_0, %c0_i32_1 : i32, i32, i32
  }
  func.func @transform_15(%arg0: i32) -> (i32, i32, i32) {
    %c0_i32 = arith.constant 0 : i32
    %c0_i32_0 = arith.constant 0 : i32
    %c0_i32_1 = arith.constant 0 : i32
    %c0_i32_2 = arith.constant 0 : i32
    return %c0_i32, %c0_i32_0, %c0_i32_1 : i32, i32, i32
  }
  func.func @transform_16(%arg0: i32) -> (i32, i32, i32) {
    %c0_i32 = arith.constant 0 : i32
    %c0_i32_0 = arith.constant 0 : i32
    %c0_i32_1 = arith.constant 0 : i32
    %c0_i32_2 = arith.constant 0 : i32
    return %c0_i32, %c0_i32_0, %c0_i32_1 : i32, i32, i32
  }
  func.func @transform_17(%arg0: i32) -> (i32, i32, i32) {
    %c0_i32 = arith.constant 0 : i32
    %c0_i32_0 = arith.constant 0 : i32
    %c0_i32_1 = arith.constant 0 : i32
    %c0_i32_2 = arith.constant 0 : i32
    return %c0_i32, %c0_i32_0, %c0_i32_1 : i32, i32, i32
  }
  func.func @transform_18(%arg0: i32) -> (i32, i32, i32) {
    %c0_i32 = arith.constant 0 : i32
    %c0_i32_0 = arith.constant 0 : i32
    %c0_i32_1 = arith.constant 0 : i32
    %c0_i32_2 = arith.constant 0 : i32
    return %c0_i32, %c0_i32_0, %c0_i32_1 : i32, i32, i32
  }
  func.func @transform_19(%arg0: i32) -> (i32, i32) {
    %c0_i32 = arith.constant 0 : i32
    %c0_i32_0 = arith.constant 0 : i32
    %c0_i32_1 = arith.constant 0 : i32
    return %c0_i32, %c0_i32_0 : i32, i32
  }
  func.func @transform_20(%arg0: i32) -> (i32, i32) {
    %c0_i32 = arith.constant 0 : i32
    %c0_i32_0 = arith.constant 0 : i32
    %c0_i32_1 = arith.constant 0 : i32
    return %c0_i32, %c0_i32_0 : i32, i32
  }
  func.func @transform_21(%arg0: i32) -> (i32, i32, i32) {
    %c0_i32 = arith.constant 0 : i32
    %c0_i32_0 = arith.constant 0 : i32
    %c0_i32_1 = arith.constant 0 : i32
    return %arg0, %c0_i32, %c0_i32_0 : i32, i32, i32
  }
  func.func @transform_22(%arg0: i32) -> (i32, i32, i32) {
    %c0_i32 = arith.constant 0 : i32
    %c0_i32_0 = arith.constant 0 : i32
    %c0_i32_1 = arith.constant 0 : i32
    return %arg0, %c0_i32, %c0_i32_0 : i32, i32, i32
  }
  func.func @transform_23(%arg0: i32) -> (i32, i32, i32) {
    %c0_i32 = arith.constant 0 : i32
    %c0_i32_0 = arith.constant 0 : i32
    %c0_i32_1 = arith.constant 0 : i32
    return %arg0, %c0_i32, %c0_i32_0 : i32, i32, i32
  }
}

</mosaic_0001>

<bundles_post_ra>
// kernel: a_call__.1
= control target key start
LH: loop header
LB: loop body
LE: loop exit
PB: predicated region body
PF: predicated region fallthrough
CT: control target
= control target key end

     0   :  { %s10862_s0 = inlined_call_operand.vmem [shape: f32[2,16,8], index: 0, kind: input, shape index: {}]   ;;  %s10863_s1 = inlined_call_operand.hbm [shape: bf16[8,64], index: 1, kind: input, shape index: {}]   ;;  %s10864_s2 = inlined_call_operand.vmem [shape: f32[1,64], index: 2, kind: input, shape index: {}]   ;;  %s10865_s3 = inlined_call_operand.hbm [shape: bf16[64,128], index: 3, kind: input, shape index: {}]   ;;  %s10866_s4 = inlined_call_operand.vmem [shape: f32[1,128], index: 4, kind: input, shape index: {}, may-alias: {4,20}]   ;;  %s10867_s5 = inlined_call_operand.hbm [shape: bf16[128,256], index: 5, kind: input, shape index: {}]   ;;  %s10868_s6 = inlined_call_operand.vmem [shape: f32[1,256], index: 6, kind: input, shape index: {}]   ;;  %s10869_s7 = inlined_call_operand.hbm [shape: bf16[3,256,768], index: 7, kind: input, shape index: {}]   ;;  %s10870_s8 = inlined_call_operand.vmem [shape: f32[3,1,768], index: 8, kind: input, shape index: {}]   ;;  %s10871_s9 = inlined_call_operand.hbm [shape: bf16[3,256,256], index: 9, kind: input, shape index: {}]   ;;  %s10872_s10 = inlined_call_operand.vmem [shape: f32[3,1,256], index: 10, kind: input, shape index: {}, may-alias: {10,12,16,18}]   ;;  %s10873_s11 = inlined_call_operand.vmem [shape: f32[3,1,256], index: 11, kind: input, shape index: {}, may-alias: {11,17}]   ;;  %s10874_s12 = inlined_call_operand.vmem [shape: f32[3,1,256], index: 12, kind: input, shape index: {}, may-alias: {10,12,16,18}]   ;;  %s10875_s13 = inlined_call_operand.hbm [shape: bf16[3,256,128], index: 13, kind: input, shape index: {}]   ;;  %s10876_s14 = inlined_call_operand.vmem [shape: f32[3,1,128], index: 14, kind: input, shape index: {}]   ;;  %s10877_s15 = inlined_call_operand.hbm [shape: bf16[3,128,256], index: 15, kind: input, shape index: {}]   ;;  %s10878_s16 = inlined_call_operand.vmem [shape: f32[3,1,256], index: 16, kind: input, shape index: {}, may-alias: {10,12,16,18}]   ;;  %s10879_s17 = inlined_call_operand.vmem [shape: f32[3,1,256], index: 17, kind: input, shape index: {}, may-alias: {11,17}]   ;;  %s10880_s18 = inlined_call_operand.vmem [shape: f32[3,1,256], index: 18, kind: input, shape index: {}, may-alias: {10,12,16,18}]   ;;  %s10881_s19 = inlined_call_operand.hbm [shape: bf16[256,128], index: 19, kind: input, shape index: {}]   ;;  %s10882_s20 = inlined_call_operand.vmem [shape: f32[1,128], index: 20, kind: input, shape index: {}, may-alias: {4,20}]   ;;  %s10883_s21 = inlined_call_operand.hbm [shape: f32[2,16,256], index: 21, kind: output, shape index: {0}]   ;;  %s10884_s22 = inlined_call_operand.vmem [shape: f32[2,16,256], index: 22, kind: output, shape index: {1}]   ;;  %s10885_s23 = inlined_call_operand.vmem [shape: f32[2,16,128], index: 23, kind: output, shape index: {2}]  }
   0x1   :  { %10899 = sst [smem:[#allocation31_spill]] %s10862_s0 }
   0x2   :  { %10900 = sst [smem:[#allocation32_spill]] %s10863_s1 }
   0x3   :  { %10901 = sst [smem:[#allocation33_spill]] %s10864_s2 }
   0x4   :  { %10902 = sst [smem:[#allocation34_spill]] %s10865_s3 }
   0x5   :  { %10903 = sst [smem:[#allocation35_spill]] %s10866_s4 }
   0x6   :  { %10904 = sst [smem:[#allocation36_spill]] %s10867_s5 }
   0x7   :  { %10905 = sst [smem:[#allocation37_spill]] %s10868_s6 }
   0x8   :  { %10906 = sst [smem:[#allocation38_spill]] %s10869_s7 }
   0x9   :  { %10907 = sst [smem:[#allocation39_spill]] %s10880_s18 }
   0xa   :  { %10908 = sst [smem:[#allocation40_spill]] %s10882_s20 }
   0xb   :  { %10909 = sst [smem:[#allocation41_spill]] %s10883_s21 }
   0xc   :  { %10910 = sst [smem:[#allocation42_spill]] %s10884_s22 }
   0xd   :  { %10911 = sst [smem:[#allocation43_spill]] %s10885_s23 }
   0xe   :  { %29 = vsyncpa [#allocation3], 0 }
   0xf   :  { %30 = vsyncpa [#allocation6], 0 }
  0x10   :  { %31 = vsyncpa [#allocation9], 0 }
  0x11   :  { %32 = vsyncpa [#allocation12], 0 }
  0x12   :  { %33 = vsyncpa [#allocation15], 0 }
  0x13   :  { %34 = vsyncpa [#allocation4], 0 }
  0x14   :  { %36 = vsyncpa [#allocation4 + $0x1], 0  ;;  %s10160_s4 = smov 0   ;;  %s10162_s30 = smov 0  }
  0x15   :  { %s10164_s24 = smov 0   ;;  %s10166_s25 = smov 0  }
  0x16 LB: > { %10912 = sst [smem:[#allocation23_spill]] %s10008_s4  ;;  %s10181_s5 = sadd.s32 4294967295, %s10020_s25   ;;  %s10020_s25 = sphi %s10166_s25, %s10943_s25   ;;  %s10016_s24 = sphi %s10164_s24, %s10946_s24   ;;  %s10012_s30 = sphi %s10162_s30, %s10945_s30   ;;  %s10008_s4 = sphi %s10160_s4, %s10944_s4  }
  0x17   : > { %10913 = sst [smem:[#allocation24_spill]] %s10012_s30  ;;  %s6748_s1 = sadd.s32 4294967294, %s10020_s25  }
  0x18   : > { %10914 = sst [smem:[#allocation25_spill]] %s10016_s24  ;;  %s10185_s26 = sadd.s32 1, %s10020_s25  }
  0x19   : > { %10915 = sst [smem:[#allocation26_spill]] %s10020_s25  ;;  %s495_s2 = sadd.s32 1, %s10016_s24 }
  0x1a   : > { %10916 = sst [smem:[#allocation27_spill]] %s10185_s26  ;;  %s492_s6 = ssub.s32 %s10020_s25, %s10185_s26 }
  0x1b   : > { %p505_p0 = scmp.ne.s32.totalorder %s10016_s24, %s10012_s30  ;;  %p493_p1 = scmp.eq.s32.totalorder %s492_s6, 0 }
  0x1c   : > { %p506_p2 = scmp.eq.s32.totalorder %s10181_s5, 1  ;;  %p511_p3 = scmp.ne.s32.totalorder %s10012_s30, %s10008_s4 }
  0x1d   : > { %p512_p4 = scmp.eq.s32.totalorder %s6748_s1, 1  ;;  %p6749_p7 = scmp.ge.s32.totalorder %s10020_s25, 1 }
  0x1e   : > { %s10196_s27 = scalar_select %p493_p1, %s10016_s24, %s495_s2  }
  0x1f   : > { %p10198_p5 = por %p506_p2, %p505_p0  ;;  %p10202_p6 = por %p512_p4, %p511_p3 }
  0x20   : > { %10917 = sst [smem:[#allocation28_spill]] %s10196_s27  ;;  %p571_p8 = scmp.lt.s32.totalorder %s10020_s25, 3 }
  0x21   : > { %s10918_s7 = scalar_select %p10198_p5, 1, 0 }
  0x22   : > { %s10920_s28 = scalar_select %p10202_p6, 1, 0 }
  0x23   : > { %10919 = sst [smem:[#allocation29_spill]] %s10918_s7  ;;  %p9469_p9 = scmp.eq.s32.totalorder %s10181_s5, 0 }
  0x24   : > { %10921 = sst [smem:[#allocation30_spill]] %s10920_s28  ;;  %p10209_p10 = pnand %p6749_p7, %p571_p8 }
  0x25   : > { %s10923_s1 = sld [smem:[#allocation34_spill]]  ;;  %s10022_s6 = smov [#allocation5]  }
  0x26   : > { %p9440_p11 = pneg %p10209_p10  ;;  %s599_s27 = sshll.u32 %s10022_s6, 4  ;;  %s600_s27 = int_to_ptr.vmem [resolvable:$true] %s599_s27 }
  0x27   : > { %s10925_s4 = sld [smem:[#allocation38_spill]]  ;;  %s10023_s3 = smov 64  }
  0x28   : > { %p10220_p12 = pnand %p9469_p9, %p9440_p11  ;;  %s10024_s0 = smov 4  }
  0x29   : > { %s10026_s23 = smov 384   ;;  %s10027_s20 = smov 24  }
  0x2a   : > { %s10028_s21 = smov [#allocation11]   ;;  %s10926_s18 = sld [smem:[#allocation32_spill]] }
  0x2b   : > { %s597_s2 = sshll.u32 %s10923_s1, 4  ;;  %s10025_s1 = smov [#allocation8]   ;;  %s598_s2 = int_to_ptr.hbm [resolvable:$true] %s597_s2 }
  0x2c   : > { %9446 = dma.hbm_to_vmem [thread:$0]  (!%p10220_p12), %s598_s2, 512, %s600_s27, [#allocation6], %s10023_s3, %s10023_s3, %s10024_s0  }
  0x2d   : > { %s631_s25 = sshll.u32 %s10925_s4, 4  ;;  %s633_s6 = sshll.u32 %s10025_s1, 4  ;;  %s632_s25 = int_to_ptr.hbm [resolvable:$true] %s631_s25  ;;  %s634_s6 = int_to_ptr.vmem [resolvable:$true] %s633_s6 }
  0x2e   : > { %9452 = dma.hbm_to_vmem [thread:$0]  (!%p10220_p12), %s632_s25, 36864, %s634_s6, [#allocation9], %s10026_s23, %s10026_s23, %s10027_s20  }
  0x2f   : > { %s671_s4 = sshll.u32 %s10875_s13, 4  ;;  %s673_s7 = sshll.u32 %s10028_s21, 4  ;;  %s672_s4 = int_to_ptr.hbm [resolvable:$true] %s671_s4  ;;  %s674_s7 = int_to_ptr.vmem [resolvable:$true] %s673_s7 }
  0x30   : > { %s583_s27 = sshll.u32 %s10926_s18, 4  ;;  %s10029_s20 = smov [#allocation2]   ;;  %s584_s27 = int_to_ptr.hbm [resolvable:$true] %s583_s27 }
  0x31   : > { %9458 = dma.hbm_to_vmem [thread:$0]  (!%p10220_p12), %s672_s4, 6144, %s674_s7, [#allocation12], %s10023_s3, %s10023_s3, %s10024_s0  }
  0x32   : > { %s585_s23 = sshll.u32 %s10029_s20, 4  ;;  %s10927_s1 = sld [smem:[#allocation36_spill]]  ;;  %s586_s23 = int_to_ptr.vmem [resolvable:$true] %s585_s23 }
  0x33   : > { %9443 = dma.hbm_to_vmem [thread:$0]  (!%p10220_p12), %s584_s27, 64, %s586_s23, [#allocation3]  }
  0x34   : > { %s10030_s21 = smov [#allocation7]   ;;  %s648_s26 = sshll.u32 %s10871_s9, 4  ;;  %s649_s26 = int_to_ptr.hbm [resolvable:$true] %s648_s26 }
  0x35   : > { %s616_s22 = sshll.u32 %s10030_s21, 4  ;;  %s10031_s7 = smov 128   ;;  %s617_s22 = int_to_ptr.vmem [resolvable:$true] %s616_s22 }
  0x36   : > { %s10032_s28 = smov 8   ;;  %s10033_s4 = smov [#allocation10]  }
  0x37   : > { %s650_s20 = sshll.u32 %s10033_s4, 4  ;;  %s688_s27 = sshll.u32 %s10877_s15, 4  ;;  %s651_s20 = int_to_ptr.vmem [resolvable:$true] %s650_s20  ;;  %s689_s27 = int_to_ptr.hbm [resolvable:$true] %s688_s27 }
  0x38   : > { %s614_s6 = sshll.u32 %s10927_s1, 4  ;;  %s711_s21 = sshll.u32 %s10881_s19, 4  ;;  %s615_s6 = int_to_ptr.hbm [resolvable:$true] %s614_s6  ;;  %s712_s21 = int_to_ptr.hbm [resolvable:$true] %s711_s21 }
  0x39   : > { %9449 = dma.hbm_to_vmem [thread:$0]  (!%p10220_p12), %s615_s6, 2048, %s617_s22, [#allocation6], %s10031_s7, %s10031_s7, %s10032_s28  }
  0x3a   : > { %9455 = dma.hbm_to_vmem [thread:$0]  (!%p10220_p12), %s649_s26, 12288, %s651_s20, [#allocation9], %s10031_s7, %s10031_s7, %s10032_s28  }
  0x3b   : > { %s10034_s18 = smov [#allocation13]   ;;  %s10035_s6 = smov [#allocation14]  }
  0x3c   : > { %s690_s30 = sshll.u32 %s10034_s18, 4  ;;  %s713_s22 = sshll.u32 %s10035_s6, 4  ;;  %s691_s30 = int_to_ptr.vmem [resolvable:$true] %s690_s30  ;;  %s714_s22 = int_to_ptr.vmem [resolvable:$true] %s713_s22 }
  0x3d   : > { %9461 = dma.hbm_to_vmem [thread:$0]  (!%p10220_p12), %s689_s27, 6144, %s691_s30, [#allocation12], %s10031_s7, %s10031_s7, %s10032_s28  }
  0x3e   : > { %9464 = dma.hbm_to_vmem [thread:$0]  (!%p10220_p12), %s712_s21, 2048, %s714_s22, [#allocation15], %s10023_s3, %s10023_s3, %s10024_s0  }
  0x3f   : > { %740 = sbr.rel (%p10209_p10) target bundleno = 6402 (0x1902), region = 104 }
  0x44   : > { %9983 = dma.done.wait (%p9469_p9), [#allocation3], 64  }
  0x45   : > { %9985 = vsyncadd (%p9469_p9), [#allocation3], 4294967232 }
  0x46   : > { %9987 = dma.done.wait (%p9469_p9), [#allocation6], 2560  }
  0x47   : > { %9989 = vsyncadd (%p9469_p9), [#allocation6], 4294964736 }
  0x48   : > { %9991 = dma.done.wait (%p9469_p9), [#allocation9], 49152  }
  0x49   : > { %9993 = vsyncadd (%p9469_p9), [#allocation9], 4294918144 }
  0x4a   : > { %9995 = dma.done.wait (%p9469_p9), [#allocation12], 12288  }
  0x4b   : > { %9997 = vsyncadd (%p9469_p9), [#allocation12], 4294955008 }
  0x4c   : > { %9999 = dma.done.wait (%p9469_p9), [#allocation15], 2048  }
  0x4d   : > { %10001 = vsyncadd (%p9469_p9), [#allocation15], 4294965248  ;;  %p850_p13 = scmp.lt.s32.totalorder %s10181_s5, 1  ;;  %vm878_vm0 = vcmask 1043456   ;;  %s10928_s26 = sld [smem:[#allocation31_spill]]  ;;  %vm874_vm1 = vcmask 64512  }
  0x4e   : > { %v868_v0 = vld [vmem:[#allocation2] sm:$0xf]  ;;  %v8891_v6 = vld [vmem:[#allocation5 + $0x10] sm:$0xff]  ;;  %v8890_v7 = vld [vmem:[#allocation5 + $0x8] sm:$0xff]  ;;  %s10929_s20 = sld [smem:[#allocation33_spill]]  ;;  %vm935_vm2 = vcmask 523264  }
  0x4f   : > { %s10294_s24 = scalar_select %p850_p13, %s10181_s5, 1  ;;  %v880_v3 = vsel %vm878_vm0, %v868_v0, 0  ;;  %v8892_v5 = vld [vmem:[#allocation5 + $0x18] sm:$0xff]  ;;  %v8889_v8 = vld [vmem:[#allocation5] sm:$0xff]  ;;  %v6851_v9 = vld [vmem:[#allocation7 + $0x70] sm:$0xf] }
  0x50   : > { %889 = vmatpush.bf16.msra.mxu0 %v880_v3  ;;  %943 = vmatpush.bf16.msra.mxu1 %v8892_v5  ;;  %v8908_v10 = vld [vmem:[#allocation7 + $0x74] sm:$0xf0]  ;;  %v8907_v11 = vld [vmem:[#allocation7 + $0x74] sm:$0xf]  ;;  %v6853_v13 = vld [vmem:[#allocation7 + $0x78] sm:$0xf0] }
  0x51   : > { %s10898_s29 = sshll.u32 %s10294_s24, 4  ;;  %v6852_v12 = vor.u32 %v8908_v10, %v6851_v9  ;;  %v6843_v14 = vld [vmem:[#allocation7 + $0x60] sm:$0xf]  ;;  %v8906_v15 = vld [vmem:[#allocation7 + $0x64] sm:$0xf0]  ;;  %v6856_v16 = vor.u32 %v8907_v11, %v6853_v13  ;;  %s10930_s27 = sld [smem:[#allocation35_spill]] }
  0x52   : > { %v8905_v17 = vld [vmem:[#allocation7 + $0x64] sm:$0xf]  ;;  %v6845_v18 = vld [vmem:[#allocation7 + $0x68] sm:$0xf0]  ;;  %v6844_v19 = vor.u32 %v8906_v15, %v6843_v14  ;;  %v6835_v21 = vld [vmem:[#allocation7 + $0x50] sm:$0xf] }
  0x53   : > { %s854_s7 = scalar_lea.vmem %s10928_s26, %s10898_s29  ;;  %1058 = vmatpush.bf16.msra.mxu2 %v6852_v12  ;;  %1072 = vmatpush.bf16.msra.mxu3 %v6856_v16  ;;  %v6848_v20 = vor.u32 %v8905_v17, %v6845_v18  ;;  %v8904_v22 = vld [vmem:[#allocation7 + $0x54] sm:$0xf0]  ;;  %v8903_v23 = vld [vmem:[#allocation7 + $0x54] sm:$0xf]  ;;  %v6837_v24 = vld [vmem:[#allocation7 + $0x58] sm:$0xf0] }
  0x54   : > { %v866_v1 = vld [vmem:[%s854_s7] sm:$0xff]  ;;  %v867_v2 = vld [vmem:[%s854_s7 + $0x8] sm:$0xff]  ;;  %944 = vmatpush.bf16.msra.mxu1 %v8891_v6  ;;  %v6836_v25 = vor.u32 %v8904_v22, %v6835_v21  ;;  %v6840_v26 = vor.u32 %v8903_v23, %v6837_v24  ;;  %v6829_v30 = vld [vmem:[#allocation7 + $0x48] sm:$0xf0]  ;;  %s10931_s21 = sld [smem:[#allocation37_spill]]  ;;  %s10036_s6 = smov 64  }
  0x55   : > { %v869_v4 = vpack.c.bf16 %v867_v2, %v866_v1  ;;  %v6827_v27 = vld [vmem:[#allocation7 + $0x40] sm:$0xf]  ;;  %v8902_v28 = vld [vmem:[#allocation7 + $0x44] sm:$0xf0]  ;;  %v8901_v29 = vld [vmem:[#allocation7 + $0x44] sm:$0xf] }
  0x56   : > { %v6828_v31 = vor.u32 %v8902_v28, %v6827_v27  ;;  %v6832_v32 = vor.u32 %v8901_v29, %v6829_v30  ;;  %v9566_v34 = vld [vmem:[%s10929_s20] ss:$0 sm:$0xff]  ;;  %v6819_v41 = vld [vmem:[#allocation7 + $0x30] sm:$0xf]  ;;  %v8900_v42 = vld [vmem:[#allocation7 + $0x34] sm:$0xf0] }
  0x57   : > { %6775 = vmatmul.msk.bf16.vlgmr.msra.gmra.mxu0 %vm874_vm1, %v869_v4  ;;  %1059 = vmatpush.bf16.msra.mxu2 %v6844_v19  ;;  %v8899_v43 = vld [vmem:[#allocation7 + $0x34] sm:$0xf]  ;;  %v6820_v44 = vor.u32 %v8900_v42, %v6819_v41  ;;  %v6821_v45 = vld [vmem:[#allocation7 + $0x38] sm:$0xf0]  ;;  %v6811_v47 = vld [vmem:[#allocation7 + $0x20] sm:$0xf] }
  0x58   : > { %945 = vmatpush.bf16.msra.mxu1 %v8890_v7  ;;  %1073 = vmatpush.bf16.msra.mxu3 %v6848_v20  ;;  %v6824_v46 = vor.u32 %v8899_v43, %v6821_v45  ;;  %v8898_v48 = vld [vmem:[#allocation7 + $0x24] sm:$0xf0]  ;;  %v8897_v49 = vld [vmem:[#allocation7 + $0x24] sm:$0xf]  ;;  %v6813_v51 = vld [vmem:[#allocation7 + $0x28] sm:$0xf0] }
  0x59   : > { %v6812_v50 = vor.u32 %v8898_v48, %v6811_v47  ;;  %v6816_v52 = vor.u32 %v8897_v49, %v6813_v51  ;;  %v6803_v53 = vld [vmem:[#allocation7 + $0x10] sm:$0xf]  ;;  %v8896_v54 = vld [vmem:[#allocation7 + $0x14] sm:$0xf0]  ;;  %v8895_v55 = vld [vmem:[#allocation7 + $0x14] sm:$0xf] }
  0x5a   : > { %v6804_v56 = vor.u32 %v8896_v54, %v6803_v53  ;;  %v6805_v57 = vld [vmem:[#allocation7 + $0x18] sm:$0xf0]  ;;  %v6795_v59 = vld [vmem:[#allocation7] sm:$0xf]  ;;  %v8894_v60 = vld [vmem:[#allocation7 + $0x4] sm:$0xf0] }
  0x5b   : > { %1060 = vmatpush.bf16.msra.mxu2 %v6836_v25  ;;  %v6808_v58 = vor.u32 %v8895_v55, %v6805_v57  ;;  %v8893_v61 = vld [vmem:[#allocation7 + $0x4] sm:$0xf]  ;;  %v6796_v62 = vor.u32 %v8894_v60, %v6795_v59  ;;  %v6797_v63 = vld [vmem:[#allocation7 + $0x8] sm:$0xf0]  ;;  %v7027_v1 = vld [vmem:[#allocation8 + $0x150] sm:$0xf] }
  0x5c   : > { %946 = vmatpush.bf16.msra.mxu1 %v8889_v8  ;;  %1074 = vmatpush.bf16.msra.mxu3 %v6840_v26  ;;  %v6800_v0 = vor.u32 %v8893_v61, %v6797_v63  ;;  %v8954_v2 = vld [vmem:[#allocation8 + $0x164] sm:$0xf0]  ;;  %v7219_v3 = vld [vmem:[#allocation8 + $0x2d0] sm:$0xf]  ;;  %v8951_v6 = vld [vmem:[#allocation8 + $0x154] sm:$0xf] }
  0x5d   : > { %v7028_v4 = vor.u32 %v8954_v2, %v7027_v1  ;;  %v9002_v5 = vld [vmem:[#allocation8 + $0x2e4] sm:$0xf0]  ;;  %v7029_v7 = vld [vmem:[#allocation8 + $0x168] sm:$0xf0]  ;;  %v8999_v10 = vld [vmem:[#allocation8 + $0x2d4] sm:$0xf] }
  0x5e   : > { %v7220_v8 = vor.u32 %v9002_v5, %v7219_v3  ;;  %v7032_v9 = vor.u32 %v8951_v6, %v7029_v7  ;;  %v7221_v11 = vld [vmem:[#allocation8 + $0x2e8] sm:$0xf0]  ;;  %v7003_v12 = vld [vmem:[#allocation8 + $0x120] sm:$0xf]  ;;  %v8948_v14 = vld [vmem:[#allocation8 + $0x134] sm:$0xf0] }
  0x5f   : > { %1061 = vmatpush.bf16.msra.mxu2 %v6828_v31  ;;  %1678 = vmatpush.bf16.msrb.mxu0 %v7028_v4  ;;  %v7224_v13 = vor.u32 %v8999_v10, %v7221_v11  ;;  %v7195_v15 = vld [vmem:[#allocation8 + $0x2a0] sm:$0xf]  ;;  %v8996_v16 = vld [vmem:[#allocation8 + $0x2b4] sm:$0xf0]  ;;  %v7004_v17 = vor.u32 %v8948_v14, %v7003_v12  ;;  %v8945_v19 = vld [vmem:[#allocation8 + $0x124] sm:$0xf] }
  0x60   : > { %1075 = vmatpush.bf16.msra.mxu3 %v6832_v32  ;;  %1692 = vmatpush.bf16.msrb.mxu1 %v7220_v8  ;;  %v7196_v18 = vor.u32 %v8996_v16, %v7195_v15  ;;  %v7005_v20 = vld [vmem:[#allocation8 + $0x138] sm:$0xf0]  ;;  %v8993_v21 = vld [vmem:[#allocation8 + $0x2a4] sm:$0xf]  ;;  %v6979_v24 = vld [vmem:[#allocation8 + $0xf0] sm:$0xf] }
  0x61   : > { %v7008_v22 = vor.u32 %v8945_v19, %v7005_v20  ;;  %v7197_v23 = vld [vmem:[#allocation8 + $0x2b8] sm:$0xf0]  ;;  %v8942_v25 = vld [vmem:[#allocation8 + $0x104] sm:$0xf0]  ;;  %v7171_v27 = vld [vmem:[#allocation8 + $0x270] sm:$0xf] }
  0x62   : > { %v7200_v26 = vor.u32 %v8993_v21, %v7197_v23  ;;  %v8990_v28 = vld [vmem:[#allocation8 + $0x284] sm:$0xf0]  ;;  %v8939_v29 = vld [vmem:[#allocation8 + $0xf4] sm:$0xf]  ;;  %v6980_v30 = vor.u32 %v8942_v25, %v6979_v24  ;;  %v6981_v31 = vld [vmem:[#allocation8 + $0x108] sm:$0xf0] }
  0x63   : > { %1062 = vmatpush.bf16.msra.mxu2 %v6820_v44  ;;  %1679 = vmatpush.bf16.msrb.mxu0 %v7004_v17  ;;  %v8987_v32 = vld [vmem:[#allocation8 + $0x274] sm:$0xf]  ;;  %v8933_v41 = vld [vmem:[#allocation8 + $0xc4] sm:$0xf]  ;;  %v6957_v42 = vld [vmem:[#allocation8 + $0xd8] sm:$0xf0] }
  0x64   : > { %1076 = vmatpush.bf16.msra.mxu3 %v6824_v46  ;;  %1693 = vmatpush.bf16.msrb.mxu1 %v7196_v18  ;;  %v8981_v43 = vld [vmem:[#allocation8 + $0x244] sm:$0xf]  ;;  %v7149_v44 = vld [vmem:[#allocation8 + $0x258] sm:$0xf0]  ;;  %v6960_v47 = vor.u32 %v8933_v41, %v6957_v42  ;;  %v6931_v48 = vld [vmem:[#allocation8 + $0x90] sm:$0xf] }
  0x65   : > { %v8930_v49 = vld [vmem:[#allocation8 + $0xa4] sm:$0xf0]  ;;  %v7152_v51 = vor.u32 %v8981_v43, %v7149_v44  ;;  %v8927_v53 = vld [vmem:[#allocation8 + $0x94] sm:$0xf]  ;;  %v6933_v54 = vld [vmem:[#allocation8 + $0xa8] sm:$0xf0] }
  0x66   : > { %v8975_v55 = vld [vmem:[#allocation8 + $0x214] sm:$0xf]  ;;  %v6932_v57 = vor.u32 %v8930_v49, %v6931_v48  ;;  %v6936_v59 = vor.u32 %v8927_v53, %v6933_v54  ;;  %v6907_v60 = vld [vmem:[#allocation8 + $0x60] sm:$0xf]  ;;  %v8924_v61 = vld [vmem:[#allocation8 + $0x74] sm:$0xf0] }
  0x67   : > { %1063 = vmatpush.bf16.msra.mxu2 %v6812_v50  ;;  %1680 = vmatpush.bf16.msrb.mxu0 %v6980_v30  ;;  %v7123_v50 = vld [vmem:[#allocation8 + $0x210] sm:$0xf]  ;;  %v8972_v1 = vld [vmem:[#allocation8 + $0x1f4] sm:$0xf0]  ;;  %v8921_v2 = vld [vmem:[#allocation8 + $0x64] sm:$0xf]  ;;  %v6908_v7 = vor.u32 %v8924_v61, %v6907_v60 }
  0x68   : > { %1077 = vmatpush.bf16.msra.mxu3 %v6816_v52  ;;  %v8978_v52 = vld [vmem:[#allocation8 + $0x224] sm:$0xf0]  ;;  %v6909_v3 = vld [vmem:[#allocation8 + $0x78] sm:$0xf0]  ;;  %v8969_v4 = vld [vmem:[#allocation8 + $0x1e4] sm:$0xf] }
  0x69   : > { %v7101_v5 = vld [vmem:[#allocation8 + $0x1f8] sm:$0xf0]  ;;  %v6883_v10 = vld [vmem:[#allocation8 + $0x30] sm:$0xf]  ;;  %v8918_v11 = vld [vmem:[#allocation8 + $0x44] sm:$0xf0] }
  0x6a   : > { %v9567_v6 = vld [vmem:[%s10930_s27] ss:$0 sm:$0xff]  ;;  %v7075_v12 = vld [vmem:[#allocation8 + $0x1b0] sm:$0xf]  ;;  %v8966_v14 = vld [vmem:[#allocation8 + $0x1c4] sm:$0xf0]  ;;  %v6884_v19 = vor.u32 %v8918_v11, %v6883_v10 }
  0x6b   : > { %1064 = vmatpush.bf16.msra.mxu2 %v6804_v56  ;;  %v7125_v56 = vld [vmem:[#allocation8 + $0x228] sm:$0xf0]  ;;  %v8915_v15 = vld [vmem:[#allocation8 + $0x34] sm:$0xf]  ;;  %v7076_v21 = vor.u32 %v8966_v14, %v7075_v12  ;;  %v6859_v23 = vld [vmem:[#allocation8] sm:$0xf] }
  0x6c   : > { %1078 = vmatpush.bf16.msra.mxu3 %v6808_v58  ;;  %v7124_v58 = vor.u32 %v8978_v52, %v7123_v50  ;;  %v6885_v16 = vld [vmem:[#allocation8 + $0x48] sm:$0xf0]  ;;  %v8963_v17 = vld [vmem:[#allocation8 + $0x1b4] sm:$0xf]  ;;  %v8912_v24 = vld [vmem:[#allocation8 + $0x14] sm:$0xf0] }
  0x6d   : > { %v7077_v18 = vld [vmem:[#allocation8 + $0x1c8] sm:$0xf0]  ;;  %v7051_v25 = vld [vmem:[#allocation8 + $0x180] sm:$0xf]  ;;  %v6861_v30 = vld [vmem:[#allocation8 + $0x18] sm:$0xf0] }
  0x6e   : > { %v8952_v41 = vld [vmem:[#allocation8 + $0x15c] sm:$0xf]  ;;  %v7037_v42 = vld [vmem:[#allocation8 + $0x170] sm:$0xf0]  ;;  %v7011_v52 = vld [vmem:[#allocation8 + $0x128] sm:$0xf] }
  0x6f   : > { %1065 = vmatpush.bf16.msra.mxu2 %v6796_v62  ;;  %v7099_v62 = vld [vmem:[#allocation8 + $0x1e0] sm:$0xf]  ;;  %v7203_v54 = vld [vmem:[#allocation8 + $0x2a8] sm:$0xf]  ;;  %v7205_v60 = vld [vmem:[#allocation8 + $0x2c0] sm:$0xf0] }
  0x70   : > { %1079 = vmatpush.bf16.msra.mxu3 %v6800_v0  ;;  %v7128_v0 = vor.u32 %v8975_v55, %v7125_v56  ;;  %v7100_v8 = vor.u32 %v8972_v1, %v7099_v62  ;;  %v8949_v53 = vld [vmem:[#allocation8 + $0x13c] sm:$0xf0]  ;;  %v8943_v1 = vld [vmem:[#allocation8 + $0x10c] sm:$0xf0]  ;;  %v6963_v12 = vld [vmem:[#allocation8 + $0xc8] sm:$0xf] }
  0x71   : > { %v8997_v56 = vld [vmem:[#allocation8 + $0x2bc] sm:$0xf0]  ;;  %v7012_v61 = vor.u32 %v8949_v53, %v7011_v52  ;;  %v7155_v14 = vld [vmem:[#allocation8 + $0x248] sm:$0xf]  ;;  %v8967_v53 = vld [vmem:[#allocation8 + $0x1cc] sm:$0xf0] }
  0x72   : > { %v7204_v62 = vor.u32 %v8997_v56, %v7203_v54  ;;  %v8916_v54 = vld [vmem:[#allocation8 + $0x3c] sm:$0xf]  ;;  %vm1869_vm3 = vcmask 130048   ;;  %s10932_s18 = sld [smem:[#allocation39_spill]]  ;;  %s8887_s22 = sshll.u32 %s10294_s24, 5 }
  0x73   : > { %1706 = vmatpush.bf16.msrb.mxu2 %v7032_v9  ;;  %v6912_v9 = vor.u32 %v8921_v2, %v6909_v3  ;;  %v7179_v2 = vld [vmem:[#allocation8 + $0x278] sm:$0xf]  ;;  %s10933_s26 = sld [smem:[#allocation42_spill]]  ;;  %s9405_s2 = sshll.u32 %s10181_s5, 5 }
  0x74   : > { %1720 = vmatpush.bf16.msrb.mxu3 %v7224_v13  ;;  %v7104_v13 = vor.u32 %v8969_v4, %v7101_v5  ;;  %v8991_v4 = vld [vmem:[#allocation8 + $0x28c] sm:$0xf0]  ;;  %v8940_v5 = vld [vmem:[#allocation8 + $0xfc] sm:$0xf]  ;;  %s10934_s3 = sld [smem:[#allocation24_spill]] }
  0x75   : > { %v7180_v10 = vor.u32 %v8991_v4, %v7179_v2  ;;  %v8910_v2 = vld [vmem:[#allocation8 + $0xc] sm:$0xf]  ;;  %s10936_s1 = sld [smem:[#allocation41_spill]] }
  0x77   : > { %1707 = vmatpush.bf16.msrb.mxu2 %v7008_v22  ;;  %v6888_v22 = vor.u32 %v8915_v15, %v6885_v16  ;;  %v8985_v16 = vld [vmem:[#allocation8 + $0x25c] sm:$0xf0] }
  0x78   : > { %1721 = vmatpush.bf16.msrb.mxu3 %v7200_v26 }
  0x79   : > { %s10666_s7 = scalar_lea.vmem %s10933_s26, %s8887_s22 }
  0x7b   : > { %s9958_s5 = scalar_lea.hbm %s10936_s1, 64 }
  0xd4   : > { %v891_v33 = vpop.f32.mrf.mxu0 }
  0xd5   : > { %v892_v35 = vadd.f32 %v9566_v34, %v891_v33  ;;  %v7173_v33 = vld [vmem:[#allocation8 + $0x288] sm:$0xf0] }
  0xd7   : > { %v896_v38 = vmax.f32 %v892_v35, 0.0  ;;  %v6984_v35 = vor.u32 %v8939_v29, %v6981_v31  ;;  %v8909_v29 = vld [vmem:[#allocation8 + $0x4] sm:$0xf] }
  0xd8   : > { %v6864_v44 = vor.u32 %v8909_v29, %v6861_v30  ;;  %v8979_v29 = vld [vmem:[#allocation8 + $0x22c] sm:$0xf0]  ;;  %v8928_v30 = vld [vmem:[#allocation8 + $0x9c] sm:$0xf] }
  0xd9   : > { %1708 = vmatpush.bf16.msrb.mxu2 %v6984_v35  ;;  %v6860_v35 = vor.u32 %v8912_v24, %v6859_v23 }
  0xdc   : > { %v893_v36 = vpop.f32.mrf.mxu0 }
  0xdd   : > { %v894_v37 = vadd.f32 %v9566_v34, %v893_v36  ;;  %v7172_v34 = vor.u32 %v8990_v28, %v7171_v27  ;;  %v6955_v36 = vld [vmem:[#allocation8 + $0xc0] sm:$0xf]  ;;  %1709 = vmatpush.bf16.msrb.mxu2 %v6960_v47  ;;  %v7080_v27 = vor.u32 %v8963_v17, %v7077_v18  ;;  %v8960_v28 = vld [vmem:[#allocation8 + $0x194] sm:$0xf0]  ;;  %v8934_v17 = vld [vmem:[#allocation8 + $0xcc] sm:$0xf] }
  0xde   : > { %v7052_v43 = vor.u32 %v8960_v28, %v7051_v25  ;;  %v6965_v18 = vld [vmem:[#allocation8 + $0xe0] sm:$0xf0]  ;;  %v6939_v25 = vld [vmem:[#allocation8 + $0x98] sm:$0xf] }
  0xdf   : > { %v897_v39 = vmax.f32 %v894_v37, 0.0  ;;  %v8936_v37 = vld [vmem:[#allocation8 + $0xd4] sm:$0xf0]  ;;  %1694 = vmatpush.bf16.msrb.mxu1 %v7172_v34  ;;  %v6968_v23 = vor.u32 %v8934_v17, %v6965_v18  ;;  %v7235_v18 = vld [vmem:[#allocation8 + $0x2e0] sm:$0xf] }
  0xe0   : > { %v6956_v45 = vor.u32 %v8936_v37, %v6955_v36  ;;  %v7035_v34 = vld [vmem:[#allocation8 + $0x158] sm:$0xf]  ;;  %v8955_v36 = vld [vmem:[#allocation8 + $0x16c] sm:$0xf0] }
  0xe1   : > { %v906_v40 = vpack.c.bf16 %v897_v39, %v896_v38  ;;  %v7147_v38 = vld [vmem:[#allocation8 + $0x240] sm:$0xf]  ;;  %v7176_v39 = vor.u32 %v8987_v32, %v7173_v33  ;;  %1710 = vmatpush.bf16.msrb.mxu2 %v6936_v59  ;;  %v8957_v32 = vld [vmem:[#allocation8 + $0x184] sm:$0xf]  ;;  %v7053_v33 = vld [vmem:[#allocation8 + $0x198] sm:$0xf0]  ;;  %v7036_v49 = vor.u32 %v8955_v36, %v7035_v34 }
  0xe2   : > { %1681 = vmatpush.bf16.msrb.mxu0 %v6956_v45  ;;  %v7227_v37 = vld [vmem:[#allocation8 + $0x2d8] sm:$0xf]  ;;  %v9000_v45 = vld [vmem:[#allocation8 + $0x2dc] sm:$0xf]  ;;  %v7056_v48 = vor.u32 %v8957_v32, %v7053_v33  ;;  %v8994_v59 = vld [vmem:[#allocation8 + $0x2ac] sm:$0xf] }
  0xe3   : > { %6792 = vmatmul.msk.bf16.vlgmr.msra.gmra.mxu1 %vm935_vm2, %v906_v40  ;;  %v8984_v40 = vld [vmem:[#allocation8 + $0x254] sm:$0xf0]  ;;  %1722 = vmatpush.bf16.msrb.mxu3 %v7176_v39  ;;  %v7208_v3 = vor.u32 %v8994_v59, %v7205_v60  ;;  %v6941_v32 = vld [vmem:[#allocation8 + $0xb0] sm:$0xf0]  ;;  %v8976_v33 = vld [vmem:[#allocation8 + $0x21c] sm:$0xf] }
  0xe4   : > { %v7148_v46 = vor.u32 %v8984_v40, %v7147_v38  ;;  %v9003_v38 = vld [vmem:[#allocation8 + $0x2ec] sm:$0xf0]  ;;  %v7133_v34 = vld [vmem:[#allocation8 + $0x230] sm:$0xf0] }
  0xe5   : > { %1711 = vmatpush.bf16.msrb.mxu2 %v6912_v9  ;;  %v7228_v50 = vor.u32 %v9003_v38, %v7227_v37  ;;  %v7136_v36 = vor.u32 %v8976_v33, %v7133_v34  ;;  %v6915_v37 = vld [vmem:[#allocation8 + $0x68] sm:$0xf]  ;;  %v8925_v38 = vld [vmem:[#allocation8 + $0x7c] sm:$0xf0]  ;;  %v7085_v59 = vld [vmem:[#allocation8 + $0x1d0] sm:$0xf0] }
  0xe6   : > { %1695 = vmatpush.bf16.msrb.mxu1 %v7148_v46  ;;  %1682 = vmatpush.bf16.msrb.mxu0 %v6932_v57  ;;  %v7229_v46 = vld [vmem:[#allocation8 + $0x2f0] sm:$0xf0]  ;;  %v8946_v57 = vld [vmem:[#allocation8 + $0x12c] sm:$0xf]  ;;  %v8950_v33 = vld [vmem:[#allocation8 + $0x144] sm:$0xf0] }
  0xe7   : > { %1723 = vmatpush.bf16.msrb.mxu3 %v7152_v51  ;;  %v7040_v51 = vor.u32 %v8952_v41, %v7037_v42  ;;  %v7232_v55 = vor.u32 %v9000_v45, %v7229_v46  ;;  %v8973_v41 = vld [vmem:[#allocation8 + $0x1fc] sm:$0xf0]  ;;  %v8922_v42 = vld [vmem:[#allocation8 + $0x6c] sm:$0xf] }
  0xe8   : > { %v8970_v46 = vld [vmem:[#allocation8 + $0x1ec] sm:$0xf] }
  0xe9   : > { %1712 = vmatpush.bf16.msrb.mxu2 %v6888_v22  ;;  %v7156_v22 = vor.u32 %v8985_v16, %v7155_v14  ;;  %v7043_v14 = vld [vmem:[#allocation8 + $0x160] sm:$0xf] }
  0xea   : > { %1696 = vmatpush.bf16.msrb.mxu1 %v7124_v58  ;;  %1683 = vmatpush.bf16.msrb.mxu0 %v6908_v7  ;;  %v7013_v58 = vld [vmem:[#allocation8 + $0x140] sm:$0xf0]  ;;  %v8988_v7 = vld [vmem:[#allocation8 + $0x27c] sm:$0xf] }
  0xeb   : > { %1724 = vmatpush.bf16.msrb.mxu3 %v7128_v0  ;;  %v6987_v0 = vld [vmem:[#allocation8 + $0xf8] sm:$0xf] }
  0xec   : > { %v6988_v9 = vor.u32 %v8943_v1, %v6987_v0  ;;  %v8961_v1 = vld [vmem:[#allocation8 + $0x19c] sm:$0xf0] }
  0xed   : > { %1713 = vmatpush.bf16.msrb.mxu2 %v6864_v44 }
  0xee   : > { %1697 = vmatpush.bf16.msrb.mxu1 %v7100_v8  ;;  %1684 = vmatpush.bf16.msrb.mxu0 %v6884_v19  ;;  %v7181_v8 = vld [vmem:[#allocation8 + $0x290] sm:$0xf0]  ;;  %v8982_v19 = vld [vmem:[#allocation8 + $0x24c] sm:$0xf] }
  0xef   : > { %1725 = vmatpush.bf16.msrb.mxu3 %v7104_v13  ;;  %v8937_v13 = vld [vmem:[#allocation8 + $0xdc] sm:$0xf0]  ;;  %v7184_v15 = vor.u32 %v8988_v7, %v7181_v8  ;;  %v7061_v7 = vld [vmem:[#allocation8 + $0x1a0] sm:$0xf0] }
  0xf2   : > { %1698 = vmatpush.bf16.msrb.mxu1 %v7076_v21  ;;  %1685 = vmatpush.bf16.msrb.mxu0 %v6860_v35  ;;  %v6964_v21 = vor.u32 %v8937_v13, %v6963_v12  ;;  %v6944_v35 = vor.u32 %v8928_v30, %v6941_v32  ;;  %v7019_v32 = vld [vmem:[#allocation8 + $0x130] sm:$0xf] }
  0xf3   : > { %1726 = vmatpush.bf16.msrb.mxu3 %v7080_v27  ;;  %v7131_v27 = vld [vmem:[#allocation8 + $0x218] sm:$0xf] }
  0xf6   : > { %1699 = vmatpush.bf16.msrb.mxu1 %v7052_v43  ;;  %1734 = vmatpush.bf16.msra.mxu0 %v7036_v49  ;;  %v6917_v43 = vld [vmem:[#allocation8 + $0x80] sm:$0xf0]  ;;  %v6891_v49 = vld [vmem:[#allocation8 + $0x38] sm:$0xf] }
  0xf7   : > { %1727 = vmatpush.bf16.msrb.mxu3 %v7056_v48  ;;  %v6920_v45 = vor.u32 %v8922_v42, %v6917_v43  ;;  %v7020_v42 = vor.u32 %v8950_v33, %v7019_v32 }
  0xfa   : > { %1748 = vmatpush.bf16.msra.mxu1 %v7228_v50  ;;  %1735 = vmatpush.bf16.msra.mxu0 %v7012_v61  ;;  %v8919_v50 = vld [vmem:[#allocation8 + $0x4c] sm:$0xf0]  ;;  %v6867_v61 = vld [vmem:[#allocation8 + $0x8] sm:$0xf] }
  0xfb   : > { %v6892_v52 = vor.u32 %v8919_v50, %v6891_v49  ;;  %v8992_v49 = vld [vmem:[#allocation8 + $0x294] sm:$0xf0]  ;;  %v8941_v50 = vld [vmem:[#allocation8 + $0x104] sm:$0xf] }
  0xfe   : > { %1749 = vmatpush.bf16.msra.mxu1 %v7204_v62  ;;  %1736 = vmatpush.bf16.msra.mxu0 %v6988_v9  ;;  %v8913_v62 = vld [vmem:[#allocation8 + $0x1c] sm:$0xf0] }
  0xff   : > { %v6868_v0 = vor.u32 %v8913_v62, %v6867_v61  ;;  %v8986_v61 = vld [vmem:[#allocation8 + $0x264] sm:$0xf0]  ;;  %v8935_v62 = vld [vmem:[#allocation8 + $0xd4] sm:$0xf] }
 0x102   : > { %1750 = vmatpush.bf16.msra.mxu1 %v7180_v10  ;;  %1737 = vmatpush.bf16.msra.mxu0 %v6964_v21 }
 0x106   : > { %1751 = vmatpush.bf16.msra.mxu1 %v7156_v22 }
 0x160   : > { %v948_v63 = vpop.f32.mrf.mxu1 }
 0x161   : > { %v949_v20 = vadd.f32 %v9567_v6, %v948_v63  ;;  %v7016_v63 = vor.u32 %v8946_v57, %v7013_v58  ;;  %v8964_v58 = vld [vmem:[#allocation8 + $0x1bc] sm:$0xf] }
 0x162   : > { %v7088_v60 = vor.u32 %v8964_v58, %v7085_v59 }
 0x163   : > { %v953_v39 = vmax.f32 %v949_v20, 0.0  ;;  %v7157_v20 = vld [vmem:[#allocation8 + $0x260] sm:$0xf0] }
 0x164   : > { %v7160_v24 = vor.u32 %v8982_v19, %v7157_v20  ;;  %v9004_v19 = vld [vmem:[#allocation8 + $0x2f4] sm:$0xf0]  ;;  %v8953_v20 = vld [vmem:[#allocation8 + $0x164] sm:$0xf] }
 0x168   : > { %v950_v26 = vpop.f32.mrf.mxu1 }
 0x169   : > { %v951_v31 = vadd.f32 %v9567_v6, %v950_v26  ;;  %v6989_v6 = vld [vmem:[#allocation8 + $0x110] sm:$0xf0]  ;;  %v8931_v26 = vld [vmem:[#allocation8 + $0xac] sm:$0xf0] }
 0x16a   : > { %v6992_v11 = vor.u32 %v8940_v5, %v6989_v6  ;;  %v6940_v28 = vor.u32 %v8931_v26, %v6939_v25  ;;  %v8958_v6 = vld [vmem:[#allocation8 + $0x18c] sm:$0xf]  ;;  %v7045_v25 = vld [vmem:[#allocation8 + $0x178] sm:$0xf0]  ;;  %v9001_v26 = vld [vmem:[#allocation8 + $0x2e4] sm:$0xf] }
 0x16b   : > { %v954_v40 = vmax.f32 %v951_v31, 0.0  ;;  %v7132_v31 = vor.u32 %v8979_v29, %v7131_v27  ;;  %v7064_v8 = vor.u32 %v8958_v6, %v7061_v7  ;;  %v7237_v27 = vld [vmem:[#allocation8 + $0x2f8] sm:$0xf0]  ;;  %v7048_v34 = vor.u32 %v8953_v20, %v7045_v25  ;;  %v7115_v20 = vld [vmem:[#allocation8 + $0x1f0] sm:$0xf] }
 0x16c   : > { %1738 = vmatpush.bf16.msra.mxu0 %v6940_v28  ;;  %v8974_v25 = vld [vmem:[#allocation8 + $0x204] sm:$0xf0] }
 0x16d   : > { %v971_v47 = vpack.c.bf16 %v954_v40, %v953_v39  ;;  %v7107_v39 = vld [vmem:[#allocation8 + $0x1e8] sm:$0xf]  ;;  %1752 = vmatpush.bf16.msra.mxu1 %v7132_v31  ;;  %v6916_v40 = vor.u32 %v8925_v38, %v6915_v37  ;;  %v7236_v31 = vor.u32 %v9004_v19, %v7235_v18  ;;  %v8947_v38 = vld [vmem:[#allocation8 + $0x134] sm:$0xf]  ;;  %v7116_v33 = vor.u32 %v8974_v25, %v7115_v20 }
 0x16e   : > { %v7108_v44 = vor.u32 %v8973_v41, %v7107_v39  ;;  %v8998_v37 = vld [vmem:[#allocation8 + $0x2c4] sm:$0xf0]  ;;  %v7021_v39 = vld [vmem:[#allocation8 + $0x148] sm:$0xf0] }
 0x16f   : > { %1066 = vmatmul.bf16.vlgmr.msra.gmra.mxu2 %v971_v47  ;;  %1080 = vmatmul.bf16.vlgmr.msra.gmra.mxu3 %v971_v47  ;;  %v7109_v47 = vld [vmem:[#allocation8 + $0x200] sm:$0xf0]  ;;  %v7213_v41 = vld [vmem:[#allocation8 + $0x2c8] sm:$0xf0] }
 0x170   : > { %1762 = vmatpush.bf16.msra.mxu2 %v7040_v51  ;;  %1776 = vmatpush.bf16.msra.mxu3 %v7232_v55  ;;  %v7112_v48 = vor.u32 %v8970_v46, %v7109_v47  ;;  %v7083_v51 = vld [vmem:[#allocation8 + $0x1b8] sm:$0xf]  ;;  %v6893_v55 = vld [vmem:[#allocation8 + $0x50] sm:$0xf0]  ;;  %v7024_v46 = vor.u32 %v8947_v38, %v7021_v39  ;;  %v7091_v38 = vld [vmem:[#allocation8 + $0x1c0] sm:$0xf] }
 0x171   : > { %1739 = vmatpush.bf16.msra.mxu0 %v6916_v40  ;;  %1753 = vmatpush.bf16.msra.mxu1 %v7108_v44  ;;  %v7084_v56 = vor.u32 %v8967_v53, %v7083_v51  ;;  %v6896_v57 = vor.u32 %v8916_v54, %v6893_v55  ;;  %v8995_v40 = vld [vmem:[#allocation8 + $0x2b4] sm:$0xf]  ;;  %v6995_v44 = vld [vmem:[#allocation8 + $0x100] sm:$0xf]  ;;  %v6997_v51 = vld [vmem:[#allocation8 + $0x118] sm:$0xf0] }
 0x172   : > { %v7216_v47 = vor.u32 %v8995_v40, %v7213_v41  ;;  %v7189_v53 = vld [vmem:[#allocation8 + $0x298] sm:$0xf0]  ;;  %v7000_v58 = vor.u32 %v8941_v50, %v6997_v51  ;;  %v8968_v39 = vld [vmem:[#allocation8 + $0x1d4] sm:$0xf0]  ;;  %v8917_v40 = vld [vmem:[#allocation8 + $0x44] sm:$0xf] }
 0x173   : > { %v6901_v41 = vld [vmem:[#allocation8 + $0x58] sm:$0xf0]  ;;  %v7067_v50 = vld [vmem:[#allocation8 + $0x190] sm:$0xf]  ;;  %v8962_v51 = vld [vmem:[#allocation8 + $0x1a4] sm:$0xf0] }
 0x174   : > { %1763 = vmatpush.bf16.msra.mxu2 %v7016_v63  ;;  %1777 = vmatpush.bf16.msra.mxu3 %v7208_v3  ;;  %v7059_v63 = vld [vmem:[#allocation8 + $0x188] sm:$0xf]  ;;  %v6869_v3 = vld [vmem:[#allocation8 + $0x20] sm:$0xf0] }
 0x175   : > { %1740 = vmatpush.bf16.msra.mxu0 %v6892_v52  ;;  %1754 = vmatpush.bf16.msra.mxu1 %v7084_v56  ;;  %v7060_v4 = vor.u32 %v8961_v1, %v7059_v63  ;;  %v6872_v5 = vor.u32 %v8910_v2, %v6869_v3  ;;  %v8989_v52 = vld [vmem:[#allocation8 + $0x284] sm:$0xf]  ;;  %v6971_v56 = vld [vmem:[#allocation8 + $0xd0] sm:$0xf]  ;;  %v6973_v63 = vld [vmem:[#allocation8 + $0xe8] sm:$0xf0] }
 0x176   : > { %v7192_v59 = vor.u32 %v8989_v52, %v7189_v53  ;;  %v7165_v1 = vld [vmem:[#allocation8 + $0x268] sm:$0xf0]  ;;  %v6976_v6 = vor.u32 %v8935_v62, %v6973_v63  ;;  %v8911_v52 = vld [vmem:[#allocation8 + $0x14] sm:$0xf] }
 0x177   : > { %v6877_v53 = vld [vmem:[#allocation8 + $0x28] sm:$0xf0] }
 0x178   : > { %1764 = vmatpush.bf16.msra.mxu2 %v6992_v11  ;;  %1778 = vmatpush.bf16.msra.mxu3 %v7184_v15  ;;  %v972_v11 = vld [vmem:[%s10931_s21] sm:$0x3]  ;;  %v8956_v15 = vld [vmem:[#allocation8 + $0x174] sm:$0xf0]  ;;  %s6547_s21 = scalar_lea.hbm %s10936_s1, %s9405_s2 }
 0x179   : > { %1741 = vmatpush.bf16.msra.mxu0 %v6868_v0  ;;  %1755 = vmatpush.bf16.msra.mxu1 %v7060_v4  ;;  %v974_v12 = vperm.slane %v972_v11, 0  ;;  %v975_v13 = vperm.slane %v972_v11, 1  ;;  %v7044_v30 = vor.u32 %v8956_v15, %v7043_v14  ;;  %v8983_v0 = vld [vmem:[#allocation8 + $0x254] sm:$0xf]  ;;  %v6947_v4 = vld [vmem:[#allocation8 + $0xa0] sm:$0xf] }
 0x17a   : > { %v7168_v7 = vor.u32 %v8983_v0, %v7165_v1  ;;  %v6949_v11 = vld [vmem:[#allocation8 + $0xb8] sm:$0xf0]  ;;  %s6550_s22 = sshll.u32 %s6547_s21, 4  ;;  %s6551_s22 = int_to_ptr.hbm [resolvable:$true] %s6550_s22 }
 0x17b   : > { %s9952_s26 = sshra.s32 %s6551_s22, 4  ;;  %s9953_s26 = int_to_ptr.hbm [resolvable:$true] %s9952_s26 }
 0x17c   : > { %1765 = vmatpush.bf16.msra.mxu2 %v6968_v23  ;;  %1779 = vmatpush.bf16.msra.mxu3 %v7160_v24  ;;  %s9954_s28 = scalar_lea.hbm %s9953_s26, 32  ;;  %p9959_p3 = scmp.lt.s32.totalorder %s9953_s26, %s10936_s1 }
 0x17d   : > { %p9955_p0 = scmp.ne.s32.totalorder %s9953_s26, %s9954_s28  ;;  %p9960_p4 = scmp.lt.s32.totalorder %s9958_s5, %s9954_s28 }
 0x17f   : > { %p9956_p1 = pnand %p9955_p0, %p10198_p5  ;;  %p9961_p7 = por %p9960_p4, %p9959_p3 }
 0x180   : > { %1766 = vmatpush.bf16.msra.mxu2 %v6944_v35  ;;  %1780 = vmatpush.bf16.msra.mxu3 %v7136_v36  ;;  %v7240_v35 = vor.u32 %v9001_v26, %v7237_v27  ;;  %v7211_v36 = vld [vmem:[#allocation8 + $0x2b0] sm:$0xf]  ;;  %v8923_v26 = vld [vmem:[#allocation8 + $0x74] sm:$0xf]  ;;  %v6925_v27 = vld [vmem:[#allocation8 + $0x88] sm:$0xf0] }
 0x181   : > { %v7212_v43 = vor.u32 %v8998_v37, %v7211_v36  ;;  %v6928_v36 = vor.u32 %v8923_v26, %v6925_v27  ;;  %p9957_p2 = pneg %p9956_p1 }
 0x183   : > { %p9962_p8 = pnand %p9961_p7, %p9957_p2 }
 0x184   : > { %1767 = vmatpush.bf16.msra.mxu2 %v6920_v45  ;;  %1781 = vmatpush.bf16.msra.mxu3 %v7112_v48  ;;  %v8944_v45 = vld [vmem:[#allocation8 + $0x114] sm:$0xf0]  ;;  %v7187_v48 = vld [vmem:[#allocation8 + $0x280] sm:$0xf] }
 0x185   : > { %v6996_v54 = vor.u32 %v8944_v45, %v6995_v44  ;;  %v7188_v55 = vor.u32 %v8992_v49, %v7187_v48  ;;  %v7092_v45 = vor.u32 %v8968_v39, %v7091_v38  ;;  %v6904_v48 = vor.u32 %v8917_v40, %v6901_v41 }
 0x188   : > { %1768 = vmatpush.bf16.msra.mxu2 %v6896_v57  ;;  %1782 = vmatpush.bf16.msra.mxu3 %v7088_v60  ;;  %v8938_v57 = vld [vmem:[#allocation8 + $0xe4] sm:$0xf0]  ;;  %v7163_v60 = vld [vmem:[#allocation8 + $0x250] sm:$0xf] }
 0x189   : > { %v6972_v2 = vor.u32 %v8938_v57, %v6971_v56  ;;  %v7164_v3 = vor.u32 %v8986_v61, %v7163_v60  ;;  %v7068_v57 = vor.u32 %v8962_v51, %v7067_v50 }
 0x18c   : > { %1769 = vmatpush.bf16.msra.mxu2 %v6872_v5  ;;  %1783 = vmatpush.bf16.msra.mxu3 %v7064_v8  ;;  %v8932_v5 = vld [vmem:[#allocation8 + $0xb4] sm:$0xf0]  ;;  %v7139_v8 = vld [vmem:[#allocation8 + $0x220] sm:$0xf] }
 0x18d   : > { %v6948_v14 = vor.u32 %v8932_v5, %v6947_v4 }
 0x1f2   : > { %v1067_v9 = vpop.f32.mrf.mxu2  ;;  %v1081_v10 = vpop.f32.mrf.mxu3 }
 0x1f3   : > { %v10312_v21 = vadd.f32 %v1067_v9, %v974_v12  ;;  %v10314_v22 = vadd.f32 %v1081_v10, %v975_v13  ;;  %v8980_v9 = vld [vmem:[#allocation8 + $0x234] sm:$0xf0]  ;;  %v8929_v10 = vld [vmem:[#allocation8 + $0xa4] sm:$0xf] }
 0x1f4   : > { %v7140_v15 = vor.u32 %v8980_v9, %v7139_v8  ;;  %v6952_v18 = vor.u32 %v8929_v10, %v6949_v11 }
 0x1fa   : > { %v1069_v16 = vpop.f32.mrf.mxu2  ;;  %v1083_v17 = vpop.f32.mrf.mxu3 }
 0x1fb   : > { %v10316_v23 = vadd.f32 %v1069_v16, %v974_v12  ;;  %v10318_v24 = vadd.f32 %v1083_v17, %v975_v13  ;;  %v8977_v12 = vld [vmem:[#allocation8 + $0x224] sm:$0xf]  ;;  %v7141_v13 = vld [vmem:[#allocation8 + $0x238] sm:$0xf0]  ;;  %v6923_v16 = vld [vmem:[#allocation8 + $0x70] sm:$0xf] }
 0x1fc   : > { %v8926_v17 = vld [vmem:[#allocation8 + $0x84] sm:$0xf0]  ;;  %v7144_v19 = vor.u32 %v8977_v12, %v7141_v13 }
 0x1fd   : > { %v10322_v28 = vpack.c.bf16 %v10316_v23, %v10312_v21  ;;  %v10326_v29 = vpack.c.bf16 %v10318_v24, %v10314_v22  ;;  %v6924_v32 = vor.u32 %v8926_v17, %v6923_v16 }
 0x1ff   : > { %1686 = vmatmul.bf16.vlgmr.msrb.gmra.mxu0 %v10322_v28  ;;  %1700 = vmatmul.bf16.vlgmr.msrb.gmra.mxu1 %v10326_v29 }
 0x200   : > { %1714 = vmatmul.bf16.vlgmr.msrb.gmra.mxu2 %v10322_v28  ;;  %1728 = vmatmul.bf16.vlgmr.msrb.gmra.mxu3 %v10326_v29 }
 0x201   : > { %1790 = vmatpush.bf16.msrb.mxu0 %v7044_v30  ;;  %1804 = vmatpush.bf16.msrb.mxu1 %v7236_v31  ;;  %v8971_v30 = vld [vmem:[#allocation8 + $0x1f4] sm:$0xf]  ;;  %v7117_v31 = vld [vmem:[#allocation8 + $0x208] sm:$0xf0] }
 0x202   : > { %1818 = vmatpush.bf16.msrb.mxu2 %v7048_v34  ;;  %1832 = vmatpush.bf16.msrb.mxu3 %v7240_v35  ;;  %v6899_v34 = vld [vmem:[#allocation8 + $0x40] sm:$0xf]  ;;  %v8920_v35 = vld [vmem:[#allocation8 + $0x54] sm:$0xf0]  ;;  %v7120_v37 = vor.u32 %v8971_v30, %v7117_v31 }
 0x203   : > { %v6900_v44 = vor.u32 %v8920_v35, %v6899_v34 }
 0x205   : > { %1791 = vmatpush.bf16.msrb.mxu0 %v7020_v42  ;;  %1805 = vmatpush.bf16.msrb.mxu1 %v7212_v43  ;;  %v8965_v42 = vld [vmem:[#allocation8 + $0x1c4] sm:$0xf]  ;;  %v7093_v43 = vld [vmem:[#allocation8 + $0x1d8] sm:$0xf0] }
 0x206   : > { %1819 = vmatpush.bf16.msrb.mxu2 %v7024_v46  ;;  %1833 = vmatpush.bf16.msrb.mxu3 %v7216_v47  ;;  %v6875_v46 = vld [vmem:[#allocation8 + $0x10] sm:$0xf]  ;;  %v8914_v47 = vld [vmem:[#allocation8 + $0x24] sm:$0xf0]  ;;  %v7096_v49 = vor.u32 %v8965_v42, %v7093_v43 }
 0x207   : > { %v6876_v56 = vor.u32 %v8914_v47, %v6875_v46 }
 0x209   : > { %1792 = vmatpush.bf16.msrb.mxu0 %v6996_v54  ;;  %1806 = vmatpush.bf16.msrb.mxu1 %v7188_v55  ;;  %v8959_v54 = vld [vmem:[#allocation8 + $0x194] sm:$0xf]  ;;  %v7069_v55 = vld [vmem:[#allocation8 + $0x1a8] sm:$0xf0] }
 0x20a   : > { %1820 = vmatpush.bf16.msrb.mxu2 %v7000_v58  ;;  %1834 = vmatpush.bf16.msrb.mxu3 %v7192_v59  ;;  %v6880_v58 = vor.u32 %v8911_v52, %v6877_v53  ;;  %v7072_v59 = vor.u32 %v8959_v54, %v7069_v55 }
 0x20d   : > { %1793 = vmatpush.bf16.msrb.mxu0 %v6972_v2  ;;  %1807 = vmatpush.bf16.msrb.mxu1 %v7164_v3 }
 0x20e   : > { %1821 = vmatpush.bf16.msrb.mxu2 %v6976_v6  ;;  %1835 = vmatpush.bf16.msrb.mxu3 %v7168_v7  ;;  %v1184_v6 = vld [vmem:[%s10870_s8] sm:$0x3f] }
 0x20f   : > { %1742 = vmatmul.bf16.vlgmr.msra.gmra.mxu0 %v10322_v28  ;;  %1756 = vmatmul.bf16.vlgmr.msra.gmra.mxu1 %v10326_v29  ;;  %v1188_v7 = vperm.slane %v1184_v6, 2  ;;  %v1189_v12 = vperm.slane %v1184_v6, 3  ;;  %v1186_v13 = vperm.slane %v1184_v6, 0  ;;  %v1190_v38 = vperm.slane %v1184_v6, 4 }
 0x210   : > { %1770 = vmatmul.bf16.vlgmr.msra.gmra.mxu2 %v10322_v28  ;;  %1784 = vmatmul.bf16.vlgmr.msra.gmra.mxu3 %v10326_v29 }
 0x211   : > { %1794 = vmatpush.bf16.msrb.mxu0 %v6948_v14  ;;  %1808 = vmatpush.bf16.msrb.mxu1 %v7140_v15 }
 0x212   : > { %1822 = vmatpush.bf16.msrb.mxu2 %v6952_v18  ;;  %1836 = vmatpush.bf16.msrb.mxu3 %v7144_v19 }
 0x215   : > { %1795 = vmatpush.bf16.msrb.mxu0 %v6924_v32  ;;  %1809 = vmatpush.bf16.msrb.mxu1 %v7116_v33  ;;  %v1187_v33 = vperm.slane %v1184_v6, 1 }
 0x216   : > { %1823 = vmatpush.bf16.msrb.mxu2 %v6928_v36  ;;  %1837 = vmatpush.bf16.msrb.mxu3 %v7120_v37 }
 0x219   : > { %1796 = vmatpush.bf16.msrb.mxu0 %v6900_v44  ;;  %1810 = vmatpush.bf16.msrb.mxu1 %v7092_v45 }
 0x21a   : > { %1824 = vmatpush.bf16.msrb.mxu2 %v6904_v48  ;;  %1838 = vmatpush.bf16.msrb.mxu3 %v7096_v49  ;;  %v1191_v49 = vperm.slane %v1184_v6, 5 }
 0x21d   : > { %1797 = vmatpush.bf16.msrb.mxu0 %v6876_v56  ;;  %1811 = vmatpush.bf16.msrb.mxu1 %v7068_v57 }
 0x21e   : > { %1825 = vmatpush.bf16.msrb.mxu2 %v6880_v58  ;;  %1839 = vmatpush.bf16.msrb.mxu3 %v7072_v59 }
 0x220   : > { %1798 = vmatmul.bf16.vlgmr.msrb.gmra.mxu0 %v10322_v28  ;;  %1812 = vmatmul.bf16.vlgmr.msrb.gmra.mxu1 %v10326_v29 }
 0x221   : > { %1826 = vmatmul.bf16.vlgmr.msrb.gmra.mxu2 %v10322_v28  ;;  %1840 = vmatmul.bf16.vlgmr.msrb.gmra.mxu3 %v10326_v29 }
 0x27c   : > { %v1687_v60 = vpop.f32.mrf.mxu0  ;;  %v1701_v61 = vpop.f32.mrf.mxu1 }
 0x27d   : > { %v1688_v19 = vadd.f32 %v1687_v60, %v1186_v13 }
 0x27f   : > { %v1702_v36 = vadd.f32 %v1701_v61, %v1688_v19 }
 0x283   : > { %v1715_v62 = vpop.f32.mrf.mxu2  ;;  %v1729_v63 = vpop.f32.mrf.mxu3 }
 0x284   : > { %v1689_v0 = vpop.f32.mrf.mxu0  ;;  %v1703_v1 = vpop.f32.mrf.mxu1  ;;  %v1716_v41 = vadd.f32 %v1715_v62, %v1187_v33 }
 0x285   : > { %v1690_v16 = vadd.f32 %v1689_v0, %v1186_v13 }
 0x286   : > { %v1730_v47 = vadd.f32 %v1729_v63, %v1716_v41 }
 0x287   : > { %v1704_v30 = vadd.f32 %v1703_v1, %v1690_v16 }
 0x289   : > { %v1846_v40 = vpack.c.bf16 %v1704_v30, %v1702_v36 }
 0x28b   : > { %v1717_v2 = vpop.f32.mrf.mxu2  ;;  %v1731_v3 = vpop.f32.mrf.mxu3 }
 0x28c   : > { %v1743_v4 = vpop.f32.mrf.mxu0  ;;  %v1757_v5 = vpop.f32.mrf.mxu1  ;;  %v1718_v37 = vadd.f32 %v1717_v2, %v1187_v33 }
 0x28d   : > { %v1744_v8 = vadd.f32 %v1743_v4, %v1188_v7 }
 0x28e   : > { %v1732_v42 = vadd.f32 %v1731_v3, %v1718_v37 }
 0x28f   : > { %v1758_v14 = vadd.f32 %v1757_v5, %v1744_v8 }
 0x290   : > { %v1980_v51 = vpack.c.bf16 %v1732_v42, %v1730_v47 }
 0x293   : > { %v1771_v9 = vpop.f32.mrf.mxu2  ;;  %v1785_v28 = vpop.f32.mrf.mxu3 }
 0x294   : > { %v1745_v10 = vpop.f32.mrf.mxu0  ;;  %v1759_v29 = vpop.f32.mrf.mxu1  ;;  %v1772_v18 = vadd.f32 %v1771_v9, %v1189_v12 }
 0x295   : > { %v1746_v11 = vadd.f32 %v1745_v10, %v1188_v7 }
 0x296   : > { %v1786_v34 = vadd.f32 %v1785_v28, %v1772_v18 }
 0x297   : > { %v1760_v15 = vadd.f32 %v1759_v29, %v1746_v11 }
 0x299   : > { %v1847_v17 = vpack.c.bf16 %v1760_v15, %v1758_v14 }
 0x29b   : > { %v1773_v20 = vpop.f32.mrf.mxu2  ;;  %v1787_v25 = vpop.f32.mrf.mxu3  ;;  %1914 = vrot.lane.b32.xlu0 %v1847_v17, %s10036_s6  ;;  %v1853_v26 = vsel %vm935_vm2, %v1847_v17, 0 }
 0x29c   : > { %v1774_v27 = vadd.f32 %v1773_v20, %v1189_v12  ;;  %1862 = vmatpush.bf16.xpose.msra.mxu0 %v1853_v26 }
 0x29d   : > { %v1799_v31 = vpop.f32.mrf.mxu0  ;;  %v1813_v32 = vpop.f32.mrf.mxu1 }
 0x29e   : > { %v1788_v35 = vadd.f32 %v1787_v25, %v1774_v27  ;;  %v1800_v43 = vadd.f32 %v1799_v31, %v1190_v38 }
 0x2a0   : > { %v1981_v39 = vpack.c.bf16 %v1788_v35, %v1786_v34  ;;  %v1814_v52 = vadd.f32 %v1813_v32, %v1800_v43 }
 0x2a2   : > { %2047 = vrot.lane.b32.xlu1 %v1981_v39, %s10036_s6  ;;  %v1987_v0 = vsel %vm935_vm2, %v1981_v39, 0 }
 0x2a3   : > { %1911 = vrot.lane.b32.xlu0 %v1846_v40, %s10036_s6  ;;  %7241 = vmatmul.msk.bf16.vlgmr.msra.gmra.mxu0 %vm935_vm2, %v1846_v40 }
 0x2a4   : > { %v1827_v44 = vpop.f32.mrf.mxu2  ;;  %v1841_v45 = vpop.f32.mrf.mxu3 }
 0x2a5   : > { %v1801_v46 = vpop.f32.mrf.mxu0  ;;  %v1815_v50 = vpop.f32.mrf.mxu1  ;;  %v1828_v55 = vadd.f32 %v1827_v44, %v1191_v49 }
 0x2a6   : > { %v1802_v48 = vadd.f32 %v1801_v46, %v1190_v38 }
 0x2a7   : > { %v1842_v59 = vadd.f32 %v1841_v45, %v1828_v55 }
 0x2a8   : > { %v1816_v53 = vadd.f32 %v1815_v50, %v1802_v48 }
 0x2aa   : > { %v1848_v54 = vpack.c.bf16 %v1816_v53, %v1814_v52  ;;  %2044 = vrot.lane.b32.xlu1 %v1980_v51, %s10036_s6 }
 0x2ac   : > { %v1829_v56 = vpop.f32.mrf.mxu2  ;;  %1903 = vmatpush.bf16.msra.mxu1 %v1848_v54  ;;  %v1843_v58 = vpop.f32.mrf.mxu3 }
 0x2ad   : > { %v1830_v57 = vadd.f32 %v1829_v56, %v1191_v49 }
 0x2af   : > { %v1844_v60 = vadd.f32 %v1843_v58, %v1830_v57 }
 0x2b1   : > { %v10349_v61 = vpack.c.bf16 %v1844_v60, %v1842_v59 }
 0x2b3   : > { %2036 = vmatpush.bf16.msra.mxu3 %v10349_v61 }
 0x30d   : > { %v1915_v62 = vpop.permute.xlu0 %1914 }
 0x30e   : > { %v1920_v63 = vsel %vm935_vm2, %v1915_v62, 0 }
 0x30f   : > { %1929 = vmatpush.bf16.xpose.msrb.mxu0 %v1920_v63 }
 0x314   : > { %v2048_v1 = vpop.permute.xlu1 %2047 }
 0x315   : > { %v1912_v2 = vpop.permute.xlu0 %1911  ;;  %v2053_v3 = vsel %vm935_vm2, %v2048_v1, 0 }
 0x316   : > { %7243 = vmatmul.msk.bf16.vlgmr.msrb.gmra.mxu0 %vm935_vm2, %v1912_v2 }
 0x317   : > { %1996 = vmatpush.bf16.xpose.msra.mxu0 %v1987_v0 }
 0x31c   : > { %v2045_v8 = vpop.permute.xlu1 %2044 }
 0x31f   : > { %2062 = vmatpush.bf16.xpose.msrb.mxu0 %v2053_v3 }
 0x320   : > { %v1864_v4 = vpop.f32.mrf.mxu0 }
 0x321   : > { %v1870_v5 = vsel %vm1869_vm3, %v1864_v4, -inf }
 0x322   : > { %1871 = vmax.xlane.f32.xlu2 %v1870_v5 }
 0x326   : > { %7245 = vmatmul.msk.bf16.vlgmr.msra.gmra.mxu0 %vm935_vm2, %v1980_v51 }
 0x328   : > { %v1866_v6 = vpop.f32.mrf.mxu0 }
 0x329   : > { %v1873_v7 = vsel %vm1869_vm3, %v1866_v6, -inf }
 0x32a   : > { %1874 = vmax.xlane.f32.xlu2 %v1873_v7 }
 0x336   : > { %7247 = vmatmul.msk.bf16.vlgmr.msrb.gmra.mxu0 %vm935_vm2, %v2045_v8 }
 0x393   : > { %v1931_v9 = vpop.f32.mrf.mxu0 }
 0x394   : > { %v1936_v28 = vsel %vm1869_vm3, %v1931_v9, -inf }
 0x395   : > { %v1872_v10 = vpop.xlane.xlu2 %1871  ;;  %1937 = vmax.xlane.f32.xlu0 %v1936_v28 }
 0x396   : > { %v1876_v29 = vsub.f32 %v1864_v4, %v1872_v10 }
 0x398   : > { %v1878_v11 = vmul.f32 1.442695, %v1876_v29 }
 0x39a   : > { %9572 = vpow2.f32 %v1878_v11 }
 0x39b   : > { %v1933_v12 = vpop.f32.mrf.mxu0 }
 0x39c   : > { %v1939_v13 = vsel %vm1869_vm3, %v1933_v12, -inf }
 0x39d   : > { %1940 = vmax.xlane.f32.xlu1 %v1939_v13  ;;  %v1875_v14 = vpop.xlane.xlu2 %1874 }
 0x39e   : > { %v1877_v16 = vsub.f32 %v1866_v6, %v1875_v14 }
 0x3a0   : > { %v9573_v15 = vpop.eup %9572  ;;  %v1880_v19 = vmul.f32 1.442695, %v1877_v16 }
 0x3a1   : > { %v1882_v17 = vsel %vm1869_vm3, %v9573_v15, 0.0 }
 0x3a2   : > { %1883 = vadd.xlane.f32.xlu2 %v1882_v17  ;;  %9574 = vpow2.f32 %v1880_v19 }
 0x3a3   : > { %v1998_v18 = vpop.f32.mrf.mxu0 }
 0x3a4   : > { %v2003_v20 = vsel %vm1869_vm3, %v1998_v18, -inf }
 0x3a8   : > { %v9575_v26 = vpop.eup %9574 }
 0x3a9   : > { %v1885_v27 = vsel %vm1869_vm3, %v9575_v26, 0.0 }
 0x3aa   : > { %2004 = vmax.xlane.f32.xlu2 %v2003_v20 }
 0x3ab   : > { %v2000_v25 = vpop.f32.mrf.mxu0 }
 0x3ac   : > { %v2006_v34 = vsel %vm1869_vm3, %v2000_v25, -inf }
 0x3b2   : > { %1886 = vadd.xlane.f32.xlu2 %v1885_v27 }
 0x3b3   : > { %v2064_v30 = vpop.f32.mrf.mxu0 }
 0x3b4   : > { %v2069_v31 = vsel %vm1869_vm3, %v2064_v30, -inf }
 0x3ba   : > { %2070 = vmax.xlane.f32.xlu2 %v2069_v31 }
 0x3bb   : > { %v2066_v32 = vpop.f32.mrf.mxu0 }
 0x3bc   : > { %v2072_v33 = vsel %vm1869_vm3, %v2066_v32, -inf }
 0x3c2   : > { %2073 = vmax.xlane.f32.xlu2 %v2072_v33 }
 0x3ca   : > { %2007 = vmax.xlane.f32.xlu2 %v2006_v34 }
 0x3e2   : > { %1960 = vrot.lane.b32.xlu2 %v1848_v54, %s10036_s6 }
 0x408   : > { %v1938_v35 = vpop.xlane.xlu0 %1937 }
 0x409   : > { %v1942_v36 = vsub.f32 %v1931_v9, %v1938_v35 }
 0x40b   : > { %v1944_v37 = vmul.f32 1.442695, %v1942_v36 }
 0x40d   : > { %9576 = vpow2.f32 %v1944_v37 }
 0x410   : > { %v1941_v38 = vpop.xlane.xlu1 %1940 }
 0x411   : > { %v1943_v39 = vsub.f32 %v1933_v12, %v1941_v38 }
 0x413   : > { %v9577_v40 = vpop.eup %9576  ;;  %v1946_v41 = vmul.f32 1.442695, %v1943_v39 }
 0x414   : > { %v1948_v42 = vsel %vm1869_vm3, %v9577_v40, 0.0 }
 0x415   : > { %9578 = vpow2.f32 %v1946_v41  ;;  %1949 = vadd.xlane.f32.xlu0 %v1948_v42  ;;  %v1884_v43 = vpop.xlane.xlu2 %1883  ;;  %v9020_v41 = vld [vmem:[#allocation10 + $0x74] sm:$0xf0]  ;;  %v9019_v42 = vld [vmem:[#allocation10 + $0x74] sm:$0xf] }
 0x416   : > { %9580 = vrcp.f32 %v1884_v43 }
 0x41b   : > { %v9579_v44 = vpop.eup %9578 }
 0x41c   : > { %v1951_v45 = vsel %vm1869_vm3, %v9579_v44, 0.0  ;;  %v9581_v48 = vpop.eup %9580 }
 0x41d   : > { %1952 = vadd.xlane.f32.xlu1 %v1951_v45  ;;  %v2005_v46 = vpop.xlane.xlu2 %2004  ;;  %v1890_v50 = vmul.f32 %v9581_v48, %v9573_v15  ;;  %v7299_v45 = vld [vmem:[#allocation10 + $0x60] sm:$0xf]  ;;  %v9017_v48 = vld [vmem:[#allocation10 + $0x64] sm:$0xf] }
 0x41e   : > { %v2009_v59 = vsub.f32 %v1998_v18, %v2005_v46  ;;  %v9018_v46 = vld [vmem:[#allocation10 + $0x64] sm:$0xf0] }
 0x420   : > { %v2011_v63 = vmul.f32 1.442695, %v2009_v59  ;;  %v7283_v59 = vld [vmem:[#allocation10 + $0x40] sm:$0xf] }
 0x425   : > { %v1887_v47 = vpop.xlane.xlu2 %1886 }
 0x426   : > { %9582 = vrcp.f32 %v1887_v47 }
 0x42c   : > { %v9583_v49 = vpop.eup %9582 }
 0x42d   : > { %v1891_v51 = vmul.f32 %v9583_v49, %v9575_v26  ;;  %v2071_v52 = vpop.xlane.xlu2 %2070  ;;  %v7301_v49 = vld [vmem:[#allocation10 + $0x68] sm:$0xf0] }
 0x42e   : > { %v2075_v53 = vsub.f32 %v2064_v30, %v2071_v52  ;;  %v7291_v52 = vld [vmem:[#allocation10 + $0x50] sm:$0xf] }
 0x42f   : > { %v1892_v54 = vpack.c.bf16 %v1891_v51, %v1890_v50  ;;  %v7300_v50 = vor.u32 %v9018_v46, %v7299_v45  ;;  %v7304_v51 = vor.u32 %v9017_v48, %v7301_v49  ;;  %v7355_v45 = vld [vmem:[#allocation10 + $0xd0] sm:$0xf]  ;;  %v9032_v46 = vld [vmem:[#allocation10 + $0xd4] sm:$0xf0]  ;;  %v7357_v48 = vld [vmem:[#allocation10 + $0xd8] sm:$0xf0] }
 0x430   : > { %v2077_v55 = vmul.f32 1.442695, %v2075_v53  ;;  %v9016_v53 = vld [vmem:[#allocation10 + $0x54] sm:$0xf0]  ;;  %v7356_v49 = vor.u32 %v9032_v46, %v7355_v45 }
 0x431   : > { %7242 = vmatmul.msk.bf16.vlgmr.msra.gmra.mxu1 %vm1869_vm3, %v1892_v54 }
 0x432   : > { %9584 = vpow2.f32 %v2077_v55  ;;  %v9015_v55 = vld [vmem:[#allocation10 + $0x54] sm:$0xf] }
 0x435   : > { %v2074_v56 = vpop.xlane.xlu2 %2073 }
 0x436   : > { %v2076_v57 = vsub.f32 %v2066_v32, %v2074_v56  ;;  %v7293_v56 = vld [vmem:[#allocation10 + $0x58] sm:$0xf0] }
 0x438   : > { %v9585_v58 = vpop.eup %9584  ;;  %v2079_v60 = vmul.f32 1.442695, %v2076_v57  ;;  %v7292_v57 = vor.u32 %v9016_v53, %v7291_v52  ;;  %v9030_v52 = vld [vmem:[#allocation10 + $0xc4] sm:$0xf0]  ;;  %v9029_v53 = vld [vmem:[#allocation10 + $0xc4] sm:$0xf] }
 0x439   : > { %v2081_v62 = vsel %vm1869_vm3, %v9585_v58, 0.0 }
 0x43a   : > { %9586 = vpow2.f32 %v2079_v60  ;;  %2082 = vadd.xlane.f32.xlu0 %v2081_v62  ;;  %v9014_v60 = vld [vmem:[#allocation10 + $0x44] sm:$0xf0]  ;;  %v9013_v62 = vld [vmem:[#allocation10 + $0x44] sm:$0xf] }
 0x43b   : > { %9588 = vpow2.f32 %v2011_v63  ;;  %v7285_v63 = vld [vmem:[#allocation10 + $0x48] sm:$0xf0] }
 0x43d   : > { %v2008_v0 = vpop.xlane.xlu2 %2007 }
 0x43e   : > { %v2010_v2 = vsub.f32 %v2000_v25, %v2008_v0  ;;  %v7284_v0 = vor.u32 %v9014_v60, %v7283_v59  ;;  %v9027_v59 = vld [vmem:[#allocation10 + $0xb4] sm:$0xf]  ;;  %v7341_v60 = vld [vmem:[#allocation10 + $0xb8] sm:$0xf0] }
 0x440   : > { %v9587_v1 = vpop.eup %9586  ;;  %v2013_v4 = vmul.f32 1.442695, %v2010_v2  ;;  %v7275_v2 = vld [vmem:[#allocation10 + $0x30] sm:$0xf] }
 0x441   : > { %v2084_v3 = vsel %vm1869_vm3, %v9587_v1, 0.0  ;;  %v9589_v6 = vpop.eup %9588 }
 0x442   : > { %2085 = vadd.xlane.f32.xlu1 %v2084_v3  ;;  %9590 = vpow2.f32 %v2013_v4  ;;  %v2015_v7 = vsel %vm1869_vm3, %v9589_v6, 0.0  ;;  %v9012_v3 = vld [vmem:[#allocation10 + $0x34] sm:$0xf0] }
 0x445   : > { %v1961_v5 = vpop.permute.xlu2 %1960 }
 0x446   : > { %1973 = vmatpush.bf16.msrb.mxu1 %v1961_v5  ;;  %v9011_v5 = vld [vmem:[#allocation10 + $0x34] sm:$0xf] }
 0x448   : > { %v9591_v8 = vpop.eup %9590 }
 0x449   : > { %v2018_v9 = vsel %vm1869_vm3, %v9591_v8, 0.0 }
 0x44a   : > { %2016 = vadd.xlane.f32.xlu1 %v2015_v7 }
 0x44e   : > { %2093 = vrot.lane.b32.xlu0 %v10349_v61, %s10036_s6 }
 0x452   : > { %2019 = vadd.xlane.f32.xlu1 %v2018_v9 }
 0x488   : > { %v1950_v28 = vpop.xlane.xlu0 %1949 }
 0x489   : > { %9592 = vrcp.f32 %v1950_v28  ;;  %v7267_v28 = vld [vmem:[#allocation10 + $0x20] sm:$0xf] }
 0x48f   : > { %v9593_v29 = vpop.eup %9592 }
 0x490   : > { %v1953_v10 = vpop.xlane.xlu1 %1952  ;;  %v1956_v12 = vmul.f32 %v9593_v29, %v9577_v40  ;;  %v7307_v40 = vld [vmem:[#allocation10 + $0x70] sm:$0xf]  ;;  %v9009_v29 = vld [vmem:[#allocation10 + $0x24] sm:$0xf] }
 0x491   : > { %9594 = vrcp.f32 %v1953_v10  ;;  %v7308_v43 = vor.u32 %v9020_v41, %v7307_v40  ;;  %v9010_v10 = vld [vmem:[#allocation10 + $0x24] sm:$0xf0]  ;;  %v9033_v41 = vld [vmem:[#allocation10 + $0xe4] sm:$0xf] }
 0x493   : > { %2333 = vmatpush.bf16.msra.mxu2 %v7308_v43 }
 0x497   : > { %v9595_v11 = vpop.eup %9594  ;;  %2334 = vmatpush.bf16.msra.mxu2 %v7300_v50 }
 0x498   : > { %v1957_v13 = vmul.f32 %v9595_v11, %v9579_v44  ;;  %v7309_v44 = vld [vmem:[#allocation10 + $0x78] sm:$0xf0]  ;;  %v7269_v11 = vld [vmem:[#allocation10 + $0x28] sm:$0xf0] }
 0x499   : > { %v7312_v47 = vor.u32 %v9019_v42, %v7309_v44  ;;  %v7365_v42 = vld [vmem:[#allocation10 + $0xe8] sm:$0xf0] }
 0x49a   : > { %v1958_v14 = vpack.c.bf16 %v1957_v13, %v1956_v12  ;;  %v7268_v12 = vor.u32 %v9010_v10, %v7267_v28  ;;  %v7272_v13 = vor.u32 %v9009_v29, %v7269_v11  ;;  %v7368_v44 = vor.u32 %v9033_v41, %v7365_v42 }
 0x49b   : > { %2361 = vmatpush.bf16.msra.mxu0 %v7312_v47  ;;  %2335 = vmatpush.bf16.msra.mxu2 %v7292_v57  ;;  %v9031_v47 = vld [vmem:[#allocation10 + $0xd4] sm:$0xf]  ;;  %v7339_v57 = vld [vmem:[#allocation10 + $0xb0] sm:$0xf] }
 0x49c   : > { %7244 = vmatmul.msk.bf16.vlgmr.msrb.gmra.mxu1 %vm1869_vm3, %v1958_v14  ;;  %v7259_v14 = vld [vmem:[#allocation10 + $0x10] sm:$0xf]  ;;  %v7360_v50 = vor.u32 %v9031_v47, %v7357_v48 }
 0x49f   : > { %2362 = vmatpush.bf16.msra.mxu0 %v7304_v51  ;;  %2336 = vmatpush.bf16.msra.mxu2 %v7284_v0  ;;  %v7347_v51 = vld [vmem:[#allocation10 + $0xc0] sm:$0xf] }
 0x4a0   : > { %v7331_v0 = vld [vmem:[#allocation10 + $0xa0] sm:$0xf] }
 0x4ad   : > { %v2083_v15 = vpop.xlane.xlu0 %2082 }
 0x4ae   : > { %v10381_v35 = vpop.f32.mrf.mxu1 }
 0x4b5   : > { %v2086_v16 = vpop.xlane.xlu1 %2085 }
 0x4b6   : > { %9596 = vrcp.f32 %v2086_v16  ;;  %v10383_v36 = vpop.f32.mrf.mxu1  ;;  %v9007_v16 = vld [vmem:[#allocation10 + $0x14] sm:$0xf] }
 0x4b7   : > { %9598 = vrcp.f32 %v2083_v15  ;;  %v9008_v15 = vld [vmem:[#allocation10 + $0x14] sm:$0xf0] }
 0x4bc   : > { %v9597_v17 = vpop.eup %9596 }
 0x4bd   : > { %v9599_v61 = vpop.eup %9598  ;;  %v2017_v18 = vpop.xlane.xlu1 %2016  ;;  %v2090_v19 = vmul.f32 %v9597_v17, %v9587_v1  ;;  %v7288_v1 = vor.u32 %v9013_v62, %v7285_v63  ;;  %v7261_v17 = vld [vmem:[#allocation10 + $0x18] sm:$0xf0]  ;;  %v7344_v63 = vor.u32 %v9027_v59, %v7341_v60  ;;  %v10037_v60 = vmov 256.0  }
 0x4be   : > { %v2089_v20 = vmul.f32 %v9599_v61, %v9585_v58  ;;  %9600 = vrcp.f32 %v2017_v18  ;;  %v7296_v58 = vor.u32 %v9015_v55, %v7293_v56  ;;  %v7260_v61 = vor.u32 %v9008_v15, %v7259_v14 }
 0x4bf   : > { %v7264_v18 = vor.u32 %v9007_v16, %v7261_v17  ;;  %v7348_v55 = vor.u32 %v9030_v52, %v7347_v51  ;;  %v7315_v16 = vld [vmem:[#allocation10 + $0x80] sm:$0xf]  ;;  %v9022_v17 = vld [vmem:[#allocation10 + $0x84] sm:$0xf0] }
 0x4c0   : > { %v2094_v25 = vpop.permute.xlu0 %2093  ;;  %v2091_v26 = vpack.c.bf16 %v2090_v19, %v2089_v20  ;;  %2363 = vmatpush.bf16.msra.mxu0 %v7296_v58  ;;  %v7251_v19 = vld [vmem:[#allocation10] sm:$0xf]  ;;  %v9006_v20 = vld [vmem:[#allocation10 + $0x4] sm:$0xf0]  ;;  %v9028_v58 = vld [vmem:[#allocation10 + $0xb4] sm:$0xf0] }
 0x4c1   : > { %2106 = vmatpush.bf16.msra.mxu1 %v2094_v25  ;;  %v9005_v25 = vld [vmem:[#allocation10 + $0x4] sm:$0xf]  ;;  %v7340_v62 = vor.u32 %v9028_v58, %v7339_v57 }
 0x4c4   : > { %7248 = vmatmul.msk.bf16.vlgmr.msra.gmra.mxu1 %vm1869_vm3, %v2091_v26  ;;  %v9601_v30 = vpop.eup %9600  ;;  %2364 = vmatpush.bf16.msra.mxu0 %v7288_v1  ;;  %v7252_v26 = vor.u32 %v9006_v20, %v7251_v19  ;;  %v9026_v1 = vld [vmem:[#allocation10 + $0xa4] sm:$0xf0]  ;;  %v7317_v19 = vld [vmem:[#allocation10 + $0x88] sm:$0xf0] }
 0x4c5   : > { %v2020_v27 = vpop.xlane.xlu1 %2019  ;;  %v2023_v32 = vmul.f32 %v9601_v30, %v9589_v6  ;;  %v7277_v6 = vld [vmem:[#allocation10 + $0x38] sm:$0xf0] }
 0x4c6   : > { %9602 = vrcp.f32 %v2020_v27  ;;  %v7280_v9 = vor.u32 %v9011_v5, %v7277_v6  ;;  %v7253_v27 = vld [vmem:[#allocation10 + $0x8] sm:$0xf0]  ;;  %v7323_v6 = vld [vmem:[#allocation10 + $0x90] sm:$0xf] }
 0x4c7   : > { %v7256_v30 = vor.u32 %v9005_v25, %v7253_v27  ;;  %9604 = vrcp.f32 %v10037_v60  ;;  %v7475_v60 = vld [vmem:[#allocation13 + $0x40] sm:$0xf] }
 0x4c8   : > { %2365 = vmatpush.bf16.msra.mxu0 %v7280_v9  ;;  %v7325_v9 = vld [vmem:[#allocation10 + $0x98] sm:$0xf0] }
 0x4cc   : > { %v9603_v31 = vpop.eup %9602  ;;  %2366 = vmatpush.bf16.msra.mxu0 %v7272_v13 }
 0x4cd   : > { %v2024_v33 = vmul.f32 %v9603_v31, %v9591_v8  ;;  %v7276_v8 = vor.u32 %v9012_v3, %v7275_v2  ;;  %v7371_v31 = vld [vmem:[#allocation10 + $0xf0] sm:$0xf]  ;;  %v9025_v2 = vld [vmem:[#allocation10 + $0xa4] sm:$0xf]  ;;  %v7333_v3 = vld [vmem:[#allocation10 + $0xa8] sm:$0xf0] }
 0x4ce   : > { %v7336_v5 = vor.u32 %v9025_v2, %v7333_v3 }
 0x4cf   : > { %v2025_v34 = vpack.c.bf16 %v2024_v33, %v2023_v32  ;;  %2337 = vmatpush.bf16.msra.mxu2 %v7276_v8  ;;  %v9036_v32 = vld [vmem:[#allocation10 + $0xf4] sm:$0xf0]  ;;  %v9035_v33 = vld [vmem:[#allocation10 + $0xf4] sm:$0xf] }
 0x4d0   : > { %2367 = vmatpush.bf16.msra.mxu0 %v7264_v18  ;;  %v9023_v8 = vld [vmem:[#allocation10 + $0x94] sm:$0xf]  ;;  %v7316_v18 = vor.u32 %v9022_v17, %v7315_v16  ;;  %v9042_v16 = vld [vmem:[#allocation11 + $0x28] sm:$0xff] }
 0x4d1   : > { %7246 = vmatmul.msk.bf16.vlgmr.msra.gmra.mxu3 %vm1869_vm3, %v2025_v34  ;;  %v7372_v34 = vor.u32 %v9036_v32, %v7371_v31  ;;  %v7328_v10 = vor.u32 %v9023_v8, %v7325_v9  ;;  %v9050_v17 = vld [vmem:[#allocation11 + $0x68] sm:$0xff] }
 0x4d3   : > { %2338 = vmatpush.bf16.msra.mxu2 %v7268_v12  ;;  %2347 = vmatpush.bf16.msrb.mxu3 %v7372_v34 }
 0x4d4   : > { %2368 = vmatpush.bf16.msra.mxu0 %v7256_v30 }
 0x4d7   : > { %2339 = vmatpush.bf16.msra.mxu2 %v7260_v61  ;;  %v9021_v61 = vld [vmem:[#allocation10 + $0x84] sm:$0xf] }
 0x4d8   : > { %v7320_v20 = vor.u32 %v9021_v61, %v7317_v19  ;;  %v9041_v61 = vld [vmem:[#allocation11 + $0x20] sm:$0xff]  ;;  %v9040_v19 = vld [vmem:[#allocation11 + $0x18] sm:$0xff] }
 0x4db   : > { %2340 = vmatpush.bf16.msra.mxu2 %v7252_v26 }
 0x519   : > { %v1975_v37 = vpop.f32.mrf.mxu1 }
 0x521   : > { %v1977_v38 = vpop.f32.mrf.mxu1 }
 0x522   : > { %v9536_v39 = vpack.i.bf16 %v1977_v38, %v1975_v37  ;;  %v7373_v37 = vld [vmem:[#allocation10 + $0xf8] sm:$0xf0]  ;;  %v7363_v38 = vld [vmem:[#allocation10 + $0xe0] sm:$0xf] }
 0x523   : > { %v7376_v40 = vor.u32 %v9035_v33, %v7373_v37  ;;  %v2167_v33 = vld [vmem:[%s10872_s10] sm:$0x3] }
 0x524   : > { %9537 = vrot.lane.b32.xlu2 %v9536_v39, %s10036_s6  ;;  %v9034_v39 = vld [vmem:[#allocation10 + $0xe4] sm:$0xf0]  ;;  %v2170_v37 = vperm.slane %v2167_v33, 1 }
 0x525   : > { %v7364_v43 = vor.u32 %v9034_v39, %v7363_v38  ;;  %2375 = vmatpush.bf16.msrb.mxu1 %v7376_v40  ;;  %v2169_v40 = vperm.slane %v2167_v33, 0 }
 0x527   : > { %2348 = vmatpush.bf16.msrb.mxu3 %v7364_v43 }
 0x529   : > { %2376 = vmatpush.bf16.msrb.mxu1 %v7368_v44 }
 0x52b   : > { %2349 = vmatpush.bf16.msrb.mxu3 %v7356_v49 }
 0x52d   : > { %2377 = vmatpush.bf16.msrb.mxu1 %v7360_v50 }
 0x52f   : > { %2350 = vmatpush.bf16.msrb.mxu3 %v7348_v55 }
 0x533   : > { %2351 = vmatpush.bf16.msrb.mxu3 %v7340_v62 }
 0x541   : > { %v2108_v54 = vpop.f32.mrf.mxu1 }
 0x549   : > { %v2110_v4 = vpop.f32.mrf.mxu1 }
 0x54a   : > { %v9541_v7 = vpack.i.bf16 %v2110_v4, %v2108_v54  ;;  %v7349_v54 = vld [vmem:[#allocation10 + $0xc8] sm:$0xf0]  ;;  %v7332_v4 = vor.u32 %v9026_v1, %v7331_v0 }
 0x54b   : > { %v7352_v56 = vor.u32 %v9029_v53, %v7349_v54 }
 0x54c   : > { %9542 = vrot.lane.b32.xlu1 %v9541_v7, %s10036_s6  ;;  %v9024_v7 = vld [vmem:[#allocation10 + $0x94] sm:$0xf0]  ;;  %2352 = vmatpush.bf16.msrb.mxu3 %v7332_v4 }
 0x54d   : > { %2378 = vmatpush.bf16.msrb.mxu1 %v7352_v56  ;;  %v7324_v28 = vor.u32 %v9024_v7, %v7323_v6 }
 0x550   : > { %2353 = vmatpush.bf16.msrb.mxu3 %v7324_v28 }
 0x551   : > { %2379 = vmatpush.bf16.msrb.mxu1 %v7344_v63 }
 0x554   : > { %2354 = vmatpush.bf16.msrb.mxu3 %v7316_v18  ;;  %v2038_v25 = vpop.f32.mrf.mxu3  ;;  %v9049_v18 = vld [vmem:[#allocation11 + $0x60] sm:$0xff] }
 0x555   : > { %2380 = vmatpush.bf16.msrb.mxu1 %v7336_v5 }
 0x559   : > { %2381 = vmatpush.bf16.msrb.mxu1 %v7328_v10 }
 0x55c   : > { %v2040_v31 = vpop.f32.mrf.mxu3 }
 0x55d   : > { %2382 = vmatpush.bf16.msrb.mxu1 %v7320_v20  ;;  %v9048_v20 = vld [vmem:[#allocation11 + $0x58] sm:$0xff] }
 0x57e   : > { %v9538_v29 = vpop.permute.xlu2 %9537 }
 0x57f   : > { %v9540_v11 = vunpack.i.h.bf16 %v9538_v29  ;;  %v9539_v12 = vunpack.i.l.bf16 %v9538_v29 }
 0x581   : > { %v2130_v13 = vsel %vm935_vm2, %v10383_v36, %v9540_v11  ;;  %v2129_v14 = vsel %vm935_vm2, %v10381_v35, %v9539_v12  ;;  %v9044_v12 = vld [vmem:[#allocation11 + $0x38] sm:$0xff] }
 0x582   : > { %v2165_v15 = vpack.c.bf16 %v2130_v13, %v2129_v14  ;;  %v9052_v13 = vld [vmem:[#allocation11 + $0x78] sm:$0xff]  ;;  %2604 = vmatpush.bf16.msrb.mxu2 %v9044_v12  ;;  %v9043_v14 = vld [vmem:[#allocation11 + $0x30] sm:$0xff] }
 0x583   : > { %2618 = vmatpush.bf16.msra.mxu3 %v9052_v13 }
 0x584   : > { %2341 = vmatmul.bf16.vlgmr.msra.gmra.mxu2 %v2165_v15  ;;  %2369 = vmatmul.bf16.vlgmr.msra.gmra.mxu0 %v2165_v15  ;;  %v9051_v15 = vld [vmem:[#allocation11 + $0x70] sm:$0xff] }
 0x586   : > { %2605 = vmatpush.bf16.msrb.mxu2 %v9043_v14  ;;  %v2394_v14 = vld [vmem:[%s10874_s12] sm:$0x3] }
 0x587   : > { %2619 = vmatpush.bf16.msra.mxu3 %v9051_v15 }
 0x58a   : > { %2606 = vmatpush.bf16.msrb.mxu2 %v9042_v16 }
 0x58b   : > { %2620 = vmatpush.bf16.msra.mxu3 %v9050_v17 }
 0x58e   : > { %2607 = vmatpush.bf16.msrb.mxu2 %v9041_v61 }
 0x58f   : > { %2621 = vmatpush.bf16.msra.mxu3 %v9049_v18  ;;  %v2462_v18 = vperm.slane %v2394_v14, 0 }
 0x592   : > { %2608 = vmatpush.bf16.msrb.mxu2 %v9040_v19  ;;  %v2463_v19 = vperm.slane %v2394_v14, 1 }
 0x593   : > { %2622 = vmatpush.bf16.msra.mxu3 %v9048_v20 }
 0x5be   : > { %v9543_v26 = vpop.permute.xlu1 %9542 }
 0x5bf   : > { %v9545_v27 = vunpack.i.h.bf16 %v9543_v26  ;;  %v9544_v30 = vunpack.i.l.bf16 %v9543_v26  ;;  %v9047_v26 = vld [vmem:[#allocation11 + $0x50] sm:$0xff] }
 0x5c0   : > { %2623 = vmatpush.bf16.msra.mxu3 %v9047_v26 }
 0x5c1   : > { %v2132_v36 = vsel %vm935_vm2, %v2040_v31, %v9545_v27  ;;  %v2131_v35 = vsel %vm935_vm2, %v2038_v25, %v9544_v30  ;;  %v9039_v25 = vld [vmem:[#allocation11 + $0x10] sm:$0xff]  ;;  %v9038_v27 = vld [vmem:[#allocation11 + $0x8] sm:$0xff] }
 0x5c2   : > { %v2166_v32 = vpack.c.bf16 %v2132_v36, %v2131_v35  ;;  %2609 = vmatpush.bf16.msrb.mxu2 %v9039_v25  ;;  %v9046_v30 = vld [vmem:[#allocation11 + $0x48] sm:$0xff]  ;;  %v9037_v35 = vld [vmem:[#allocation11] sm:$0xff] }
 0x5c4   : > { %2355 = vmatmul.bf16.vlgmr.msrb.gmra.mxu3 %v2166_v32  ;;  %2383 = vmatmul.bf16.vlgmr.msrb.gmra.mxu1 %v2166_v32  ;;  %v9045_v32 = vld [vmem:[#allocation11 + $0x40] sm:$0xff] }
 0x5c5   : > { %2624 = vmatpush.bf16.msra.mxu3 %v9046_v30 }
 0x5c6   : > { %2610 = vmatpush.bf16.msrb.mxu2 %v9038_v27 }
 0x5c9   : > { %2625 = vmatpush.bf16.msra.mxu3 %v9045_v32 }
 0x5ca   : > { %2611 = vmatpush.bf16.msrb.mxu2 %v9037_v35 }
 0x601   : > { %v2370_v34 = vpop.f32.mrf.mxu0 }
 0x602   : > { %v2371_v41 = vadd.f32 %v2370_v34, %v2170_v37  ;;  %v7499_v34 = vld [vmem:[#allocation13 + $0x70] sm:$0xf] }
 0x607   : > { %v2342_v38 = vpop.f32.mrf.mxu2 }
 0x608   : > { %v2343_v42 = vadd.f32 %v2342_v38, %v2169_v40  ;;  %v9067_v38 = vld [vmem:[#allocation13 + $0x74] sm:$0xf] }
 0x609   : > { %v2372_v46 = vpop.f32.mrf.mxu0 }
 0x60a   : > { %v2373_v51 = vadd.f32 %v2372_v46, %v2170_v37  ;;  %v9068_v37 = vld [vmem:[#allocation13 + $0x74] sm:$0xf0]  ;;  %v9065_v46 = vld [vmem:[#allocation13 + $0x64] sm:$0xf] }
 0x60f   : > { %v2344_v49 = vpop.f32.mrf.mxu2 }
 0x610   : > { %v2345_v53 = vadd.f32 %v2344_v49, %v2169_v40  ;;  %v7500_v40 = vor.u32 %v9068_v37, %v7499_v34  ;;  %v7467_v34 = vld [vmem:[#allocation13 + $0x30] sm:$0xf]  ;;  %v9059_v37 = vld [vmem:[#allocation13 + $0x34] sm:$0xf] }
 0x612   : > { %2737 = vmatpush.bf16.msrb.mxu0 %v7500_v40  ;;  %v7459_v40 = vld [vmem:[#allocation13 + $0x20] sm:$0xf] }
 0x641   : > { %v2384_v39 = vpop.f32.mrf.mxu1 }
 0x642   : > { %v2385_v43 = vadd.f32 %v2384_v39, %v2371_v41  ;;  %v7501_v41 = vld [vmem:[#allocation13 + $0x78] sm:$0xf0] }
 0x644   : > { %v2390_v47 = vadd.f32 %v2385_v43, %v10314_v22  ;;  %v9605_v22 = vpop.eup %9604  ;;  %v9066_v43 = vld [vmem:[#allocation13 + $0x64] sm:$0xf0] }
 0x645   : > { %v2402_v62 = vmul.f32 256.0, %v9605_v22  ;;  %vm2406_vm4 = vweird.f32 %v9605_v22 }
 0x647   : > { %v2356_v44 = vpop.f32.mrf.mxu3 }
 0x648   : > { %v2357_v45 = vadd.f32 %v2356_v44, %v2343_v42  ;;  %v7491_v42 = vld [vmem:[#allocation13 + $0x60] sm:$0xf] }
 0x649   : > { %v2386_v50 = vpop.f32.mrf.mxu1 }
 0x64a   : > { %v2389_v48 = vadd.f32 %v2357_v45, %v10312_v21  ;;  %v2387_v54 = vadd.f32 %v2386_v50, %v2373_v51  ;;  %v2403_v21 = vsub.f32 1.0, %v2402_v62  ;;  %v7504_v45 = vor.u32 %v9067_v38, %v7501_v41  ;;  %v7469_v38 = vld [vmem:[#allocation13 + $0x38] sm:$0xf0]  ;;  %v9058_v41 = vld [vmem:[#allocation13 + $0x24] sm:$0xf0] }
 0x64c   : > { %v2395_v52 = vadd.f32 %v2390_v47, %v2389_v48  ;;  %v2392_v58 = vadd.f32 %v2387_v54, %v10318_v24  ;;  %v2404_v63 = vmul.f32 %v9605_v22, %v2403_v21  ;;  %2751 = vmatpush.bf16.msra.mxu1 %v7504_v45  ;;  %v9061_v21 = vld [vmem:[#allocation13 + $0x44] sm:$0xf] }
 0x64e   : > { %2396 = vadd.xlane.f32.xlu0 %v2395_v52  ;;  %v2405_v0 = vadd.f32 %v9605_v22, %v2404_v63  ;;  %v7483_v52 = vld [vmem:[#allocation13 + $0x50] sm:$0xf]  ;;  %v7477_v63 = vld [vmem:[#allocation13 + $0x48] sm:$0xf0] }
 0x64f   : > { %v2358_v55 = vpop.f32.mrf.mxu3 }
 0x650   : > { %v2359_v56 = vadd.f32 %v2358_v55, %v2345_v53  ;;  %v10400_v1 = vsel %vm2406_vm4, %v9605_v22, %v2405_v0  ;;  %v9064_v53 = vld [vmem:[#allocation13 + $0x54] sm:$0xf0]  ;;  %v9063_v55 = vld [vmem:[#allocation13 + $0x54] sm:$0xf]  ;;  %v9062_v22 = vld [vmem:[#allocation13 + $0x44] sm:$0xf0] }
 0x652   : > { %v2391_v57 = vadd.f32 %v2359_v56, %v10316_v23  ;;  %v7485_v56 = vld [vmem:[#allocation13 + $0x58] sm:$0xf0] }
 0x654   : > { %v2398_v59 = vadd.f32 %v2392_v58, %v2391_v57 }
 0x656   : > { %2399 = vadd.xlane.f32.xlu2 %v2398_v59  ;;  %v7488_v59 = vor.u32 %v9063_v55, %v7485_v56  ;;  %v7445_v56 = vld [vmem:[#allocation13 + $0x8] sm:$0xf0] }
 0x6c1   : > { %v2397_v2 = vpop.xlane.xlu0 %2396 }
 0x6c2   : > { %v2408_v3 = vmul.f32 %v10400_v1, %v2397_v2  ;;  %v7476_v2 = vor.u32 %v9062_v22, %v7475_v60  ;;  %v9568_v60 = vld [vmem:[%s10876_s14] ss:$0 sm:$0xff] }
 0x6c4   : > { %v10403_v4 = vsub.f32 %v2389_v48, %v2408_v3  ;;  %v10405_v23 = vsub.f32 %v2390_v47, %v2408_v3  ;;  %v7493_v47 = vld [vmem:[#allocation13 + $0x68] sm:$0xf0]  ;;  %v7492_v48 = vor.u32 %v9066_v43, %v7491_v42  ;;  %v9057_v42 = vld [vmem:[#allocation13 + $0x24] sm:$0xf]  ;;  %v7460_v43 = vor.u32 %v9058_v41, %v7459_v40 }
 0x6c5   : > { %v7496_v51 = vor.u32 %v9065_v46, %v7493_v47  ;;  %v7451_v46 = vld [vmem:[#allocation13 + $0x10] sm:$0xf]  ;;  %v9056_v47 = vld [vmem:[#allocation13 + $0x14] sm:$0xf0] }
 0x6c6   : > { %v2414_v24 = vmul.f32 %v10403_v4, %v10403_v4  ;;  %v2415_v5 = vmul.f32 %v10405_v23, %v10405_v23  ;;  %2738 = vmatpush.bf16.msrb.mxu0 %v7492_v48  ;;  %v9055_v48 = vld [vmem:[#allocation13 + $0x14] sm:$0xf] }
 0x6c7   : > { %2752 = vmatpush.bf16.msra.mxu1 %v7496_v51 }
 0x6c8   : > { %v2418_v6 = vadd.f32 %v2415_v5, %v2414_v24  ;;  %v7480_v24 = vor.u32 %v9061_v21, %v7477_v63 }
 0x6c9   : > { %v2400_v7 = vpop.xlane.xlu2 %2399 }
 0x6ca   : > { %v2409_v8 = vmul.f32 %v10400_v1, %v2400_v7  ;;  %2419 = vadd.xlane.f32.xlu1 %v2418_v6 }
 0x6cb   : > { %2753 = vmatpush.bf16.msra.mxu1 %v7488_v59 }
 0x6cc   : > { %v10412_v9 = vsub.f32 %v2391_v57, %v2409_v8  ;;  %v10414_v28 = vsub.f32 %v2392_v58, %v2409_v8  ;;  %v7484_v58 = vor.u32 %v9064_v53, %v7483_v52  ;;  %v7443_v52 = vld [vmem:[#allocation13] sm:$0xf]  ;;  %v9054_v53 = vld [vmem:[#allocation13 + $0x4] sm:$0xf0] }
 0x6cd   : > { %v7444_v55 = vor.u32 %v9054_v53, %v7443_v52  ;;  %v9099_v52 = vld [vmem:[#allocation8 + $0x3f4] sm:$0xf] }
 0x6ce   : > { %v2416_v10 = vmul.f32 %v10412_v9, %v10412_v9  ;;  %v2417_v29 = vmul.f32 %v10414_v28, %v10414_v28  ;;  %2739 = vmatpush.bf16.msrb.mxu0 %v7484_v58 }
 0x6cf   : > { %2754 = vmatpush.bf16.msra.mxu1 %v7480_v24 }
 0x6d0   : > { %v2421_v11 = vadd.f32 %v2417_v29, %v2416_v10  ;;  %v2393_v29 = vld [vmem:[%s10873_s11] sm:$0x3] }
 0x6d1   : > { %v2453_v15 = vperm.slane %v2393_v29, 0  ;;  %v2454_v16 = vperm.slane %v2393_v29, 1 }
 0x6d2   : > { %2422 = vadd.xlane.f32.xlu0 %v2421_v11  ;;  %2740 = vmatpush.bf16.msrb.mxu0 %v7476_v2 }
 0x73d   : > { %v2420_v31 = vpop.xlane.xlu1 %2419 }
 0x73e   : > { %v2424_v36 = vmul.f32 %v2420_v31, %v10400_v1 }
 0x740   : > { %v2426_v33 = vadd.f32 1e-05, %v2424_v36 }
 0x742   : > { %9606 = vrsqrt.f32 %v2426_v33  ;;  %vm2434_vm6 = vweird.f32 %v2426_v33 }
 0x745   : > { %v2423_v39 = vpop.xlane.xlu0 %2422 }
 0x746   : > { %v2425_v44 = vmul.f32 %v2423_v39, %v10400_v1  ;;  %v7472_v39 = vor.u32 %v9059_v37, %v7469_v38  ;;  %v7870_v37 = vld [vmem:[#allocation8 + $0x5e8] sm:$0xf0]  ;;  %v7844_v38 = vld [vmem:[#allocation8 + $0x5a0] sm:$0xf] }
 0x748   : > { %v9607_v49 = vpop.eup %9606  ;;  %v2427_v50 = vadd.f32 1e-05, %v2425_v44  ;;  %2755 = vmatpush.bf16.msra.mxu1 %v7472_v39  ;;  %v7461_v44 = vld [vmem:[#allocation13 + $0x28] sm:$0xf0]  ;;  %v9156_v39 = vld [vmem:[#allocation8 + $0x5b4] sm:$0xf0] }
 0x749   : > { %v2429_v54 = vmul.f32 %v9607_v49, %v2426_v33  ;;  %vm2435_vm5 = vweird.f32 %v9607_v49  ;;  %v7464_v45 = vor.u32 %v9057_v42, %v7461_v44  ;;  %v7845_v41 = vor.u32 %v9156_v39, %v7844_v38  ;;  %v9105_v42 = vld [vmem:[#allocation8 + $0x424] sm:$0xf]  ;;  %v9084_v38 = vld [vmem:[#allocation8 + $0x374] sm:$0xf0]  ;;  %v7748_v39 = vld [vmem:[#allocation8 + $0x4e0] sm:$0xf] }
 0x74a   : > { %9608 = vrsqrt.f32 %v2427_v50  ;;  %vm2436_vm7 = vmor %vm2434_vm6, %vm2435_vm5  ;;  %vm2444_vm9 = vweird.f32 %v2427_v50  ;;  %v9153_v44 = vld [vmem:[#allocation8 + $0x5a4] sm:$0xf] }
 0x74b   : > { %v2430_v57 = vmul.f32 %v9607_v49, %v2429_v54  ;;  %v9053_v54 = vld [vmem:[#allocation13 + $0x4] sm:$0xf] }
 0x74c   : > { %2756 = vmatpush.bf16.msra.mxu1 %v7464_v45 }
 0x74d   : > { %v2431_v62 = vmul.f32 0.5, %v2430_v57  ;;  %v7448_v57 = vor.u32 %v9053_v54, %v7445_v56  ;;  %v7630_v54 = vld [vmem:[#allocation8 + $0x408] sm:$0xf0] }
 0x74e   : > { %v7822_v56 = vld [vmem:[#allocation8 + $0x588] sm:$0xf0] }
 0x74f   : > { %v2432_v0 = vsub.f32 1.5, %v2431_v62 }
 0x750   : > { %v9609_v3 = vpop.eup %9608 }
 0x751   : > { %v2433_v5 = vmul.f32 %v9607_v49, %v2432_v0  ;;  %v2439_v6 = vmul.f32 %v9609_v3, %v2427_v50  ;;  %vm2445_vm8 = vweird.f32 %v9609_v3  ;;  %v7453_v50 = vld [vmem:[#allocation13 + $0x18] sm:$0xf0] }
 0x752   : > { %vm2446_vm10 = vmor %vm2444_vm9, %vm2445_vm8  ;;  %v7456_v51 = vor.u32 %v9055_v48, %v7453_v50  ;;  %v9102_v48 = vld [vmem:[#allocation8 + $0x404] sm:$0xf0]  ;;  %v7820_v50 = vld [vmem:[#allocation8 + $0x570] sm:$0xf] }
 0x753   : > { %v2440_v7 = vmul.f32 %v9609_v3, %v2439_v6  ;;  %v2437_v8 = vsel %vm2436_vm7, %v9607_v49, %v2433_v5  ;;  %v7452_v49 = vor.u32 %v9056_v47, %v7451_v46  ;;  %v2651_v6 = vld [vmem:[%s10878_s16] sm:$0x3]  ;;  %v7628_v47 = vld [vmem:[#allocation8 + $0x3f0] sm:$0xf] }
 0x754   : > { %v2448_v12 = vmul.f32 %v2437_v8, %v10403_v4  ;;  %v2449_v13 = vmul.f32 %v2437_v8, %v10405_v23  ;;  %2757 = vmatpush.bf16.msra.mxu1 %v7456_v51  ;;  %v2654_v8 = vperm.slane %v2651_v6, 1  ;;  %v7846_v46 = vld [vmem:[#allocation8 + $0x5b8] sm:$0xf0]  ;;  %v9150_v51 = vld [vmem:[#allocation8 + $0x584] sm:$0xf0]  ;;  %v7629_v53 = vor.u32 %v9102_v48, %v7628_v47 }
 0x755   : > { %v2441_v10 = vmul.f32 0.5, %v2440_v7  ;;  %v2653_v7 = vperm.slane %v2651_v6, 0  ;;  %v7532_v47 = vld [vmem:[#allocation8 + $0x330] sm:$0xf]  ;;  %v9078_v48 = vld [vmem:[#allocation8 + $0x344] sm:$0xf0] }
 0x756   : > { %v2457_v26 = vmul.f32 %v2453_v15, %v2448_v12  ;;  %v2458_v4 = vmul.f32 %v2454_v16, %v2449_v13 }
 0x757   : > { %v2442_v11 = vsub.f32 1.5, %v2441_v10 }
 0x758   : > { %v2466_v30 = vadd.f32 %v2462_v18, %v2457_v26  ;;  %v2467_v36 = vadd.f32 %v2463_v19, %v2458_v4  ;;  %2758 = vmatpush.bf16.msra.mxu1 %v7448_v57  ;;  %v7676_v26 = vld [vmem:[#allocation8 + $0x450] sm:$0xf]  ;;  %v9114_v4 = vld [vmem:[#allocation8 + $0x464] sm:$0xf0]  ;;  %v7821_v57 = vor.u32 %v9150_v51, %v7820_v50  ;;  %v7533_v50 = vor.u32 %v9078_v48, %v7532_v47 }
 0x759   : > { %v2443_v17 = vmul.f32 %v9609_v3, %v2442_v11  ;;  %v9126_v51 = vld [vmem:[#allocation8 + $0x4c4] sm:$0xf0] }
 0x75a   : > { %v7612_v48 = vld [vmem:[#allocation8 + $0x3c8] sm:$0xf] }
 0x75b   : > { %v2447_v61 = vsel %vm2446_vm10, %v9609_v3, %v2443_v17 }
 0x75c   : > { %v2450_v20 = vmul.f32 %v2447_v61, %v10412_v9  ;;  %v2451_v25 = vmul.f32 %v2447_v61, %v10414_v28  ;;  %v9060_v9 = vld [vmem:[#allocation13 + $0x34] sm:$0xf0] }
 0x75d   : > { %v7468_v28 = vor.u32 %v9060_v9, %v7467_v34  ;;  %v9159_v9 = vld [vmem:[#allocation8 + $0x5d4] sm:$0xf] }
 0x75e   : > { %v2459_v27 = vmul.f32 %v2453_v15, %v2450_v20  ;;  %v2460_v23 = vmul.f32 %v2454_v16, %v2451_v25 }
 0x75f   : > { %2741 = vmatpush.bf16.msrb.mxu0 %v7468_v28  ;;  %v7873_v28 = vor.u32 %v9159_v9, %v7870_v37 }
 0x760   : > { %v10432_v31 = vadd.f32 %v2462_v18, %v2459_v27  ;;  %v10434_v35 = vadd.f32 %v2463_v19, %v2460_v23  ;;  %v7868_v27 = vld [vmem:[#allocation8 + $0x5d0] sm:$0xf]  ;;  %v7677_v23 = vor.u32 %v9114_v4, %v7676_v26 }
 0x761   : > { %3475 = vmatpush.bf16.msrb.mxu1 %v7873_v28 }
 0x762   : > { %v2502_v32 = vpack.c.bf16 %v10432_v31, %v2466_v30  ;;  %v2503_v33 = vpack.c.bf16 %v10434_v35, %v2467_v36  ;;  %3433 = vmatpush.bf16.msra.mxu2 %v7677_v23 }
 0x763   : > { %2742 = vmatpush.bf16.msrb.mxu0 %v7460_v43  ;;  %v7654_v43 = vld [vmem:[#allocation8 + $0x438] sm:$0xf0] }
 0x764   : > { %2612 = vmatmul.bf16.vlgmr.msrb.gmra.mxu2 %v2502_v32  ;;  %2626 = vmatmul.bf16.vlgmr.msra.gmra.mxu3 %v2503_v33  ;;  %v7678_v32 = vld [vmem:[#allocation8 + $0x468] sm:$0xf0]  ;;  %v7657_v45 = vor.u32 %v9105_v42, %v7654_v43  ;;  %v9081_v42 = vld [vmem:[#allocation8 + $0x364] sm:$0xf]  ;;  %v7558_v43 = vld [vmem:[#allocation8 + $0x378] sm:$0xf0] }
 0x767   : > { %2743 = vmatpush.bf16.msrb.mxu0 %v7452_v49  ;;  %v7849_v49 = vor.u32 %v9153_v44, %v7846_v46  ;;  %v7561_v44 = vor.u32 %v9081_v42, %v7558_v43  ;;  %v9151_v42 = vld [vmem:[#allocation8 + $0x58c] sm:$0xf0]  ;;  %v9100_v43 = vld [vmem:[#allocation8 + $0x3fc] sm:$0xf] }
 0x769   : > { %3476 = vmatpush.bf16.msrb.mxu1 %v7849_v49  ;;  %v7724_v49 = vld [vmem:[#allocation8 + $0x4b0] sm:$0xf] }
 0x76b   : > { %2744 = vmatpush.bf16.msrb.mxu0 %v7444_v55  ;;  %v9147_v55 = vld [vmem:[#allocation8 + $0x574] sm:$0xf] }
 0x7e7   : > { %v2613_v58 = vpop.f32.mrf.mxu2  ;;  %v2627_v59 = vpop.f32.mrf.mxu3 }
 0x7e8   : > { %v2614_v22 = vadd.f32 %v9568_v60, %v2613_v58  ;;  %v7633_v58 = vor.u32 %v9099_v52, %v7630_v54  ;;  %v9075_v52 = vld [vmem:[#allocation8 + $0x334] sm:$0xf]  ;;  %v7725_v54 = vor.u32 %v9126_v51, %v7724_v49  ;;  %v9097_v49 = vld [vmem:[#allocation8 + $0x3dc] sm:$0xf0] }
 0x7e9   : > { %v7613_v51 = vor.u32 %v9097_v49, %v7612_v48 }
 0x7ea   : > { %v2628_v21 = vadd.f32 %v2627_v59, %v2614_v22  ;;  %v7604_v59 = vld [vmem:[#allocation8 + $0x3c0] sm:$0xf] }
 0x7eb   : > { %v7796_v22 = vld [vmem:[#allocation8 + $0x540] sm:$0xf] }
 0x7ec   : > { %v2632_v3 = vmax.f32 %v2628_v21, 0.0  ;;  %v9144_v21 = vld [vmem:[#allocation8 + $0x554] sm:$0xf0] }
 0x7ef   : > { %v2615_v62 = vpop.f32.mrf.mxu2  ;;  %v2629_v0 = vpop.f32.mrf.mxu3 }
 0x7f0   : > { %v2616_v63 = vadd.f32 %v9568_v60, %v2615_v62  ;;  %v9096_v60 = vld [vmem:[#allocation8 + $0x3d4] sm:$0xf0]  ;;  %v7825_v62 = vor.u32 %v9147_v55, %v7822_v56  ;;  %v9123_v56 = vld [vmem:[#allocation8 + $0x4b4] sm:$0xf] }
 0x7f2   : > { %v2630_v2 = vadd.f32 %v2629_v0, %v2616_v63  ;;  %v9093_v63 = vld [vmem:[#allocation8 + $0x3c4] sm:$0xf]  ;;  %v7606_v0 = vld [vmem:[#allocation8 + $0x3d8] sm:$0xf0]  ;;  %3477 = vmatpush.bf16.msrb.mxu1 %v7825_v62 }
 0x7f3   : > { %v7609_v6 = vor.u32 %v9093_v63, %v7606_v0  ;;  %v9069_v63 = vld [vmem:[#allocation8 + $0x304] sm:$0xf]  ;;  %v7510_v0 = vld [vmem:[#allocation8 + $0x318] sm:$0xf0] }
 0x7f4   : > { %v2633_v24 = vmax.f32 %v2630_v2, 0.0  ;;  %v9141_v2 = vld [vmem:[#allocation8 + $0x544] sm:$0xf] }
 0x7f6   : > { %v2650_v5 = vpack.c.bf16 %v2633_v24, %v2632_v3  ;;  %v7798_v3 = vld [vmem:[#allocation8 + $0x558] sm:$0xf0]  ;;  %v7605_v24 = vor.u32 %v9096_v60, %v7604_v59  ;;  %v7508_v59 = vld [vmem:[#allocation8 + $0x300] sm:$0xf]  ;;  %v9072_v60 = vld [vmem:[#allocation8 + $0x314] sm:$0xf0] }
 0x7f7   : > { %v7509_v62 = vor.u32 %v9072_v60, %v7508_v59  ;;  %v7588_v60 = vld [vmem:[#allocation8 + $0x398] sm:$0xf] }
 0x7f8   : > { %2745 = vmatmul.bf16.vlgmr.msrb.gmra.mxu0 %v2650_v5  ;;  %2759 = vmatmul.bf16.vlgmr.msra.gmra.mxu1 %v2650_v5  ;;  %v7797_v5 = vor.u32 %v9144_v21, %v7796_v22  ;;  %v7700_v22 = vld [vmem:[#allocation8 + $0x480] sm:$0xf]  ;;  %v9120_v21 = vld [vmem:[#allocation8 + $0x494] sm:$0xf0] }
 0x875   : > { %v2746_v10 = vpop.f32.mrf.mxu0  ;;  %v2760_v29 = vpop.f32.mrf.mxu1 }
 0x876   : > { %v2747_v11 = vadd.f32 %v2746_v10, %v2653_v7  ;;  %v2761_v12 = vadd.f32 %v2760_v29, %v2654_v8  ;;  %v7772_v10 = vld [vmem:[#allocation8 + $0x510] sm:$0xf]  ;;  %v7801_v29 = vor.u32 %v9141_v2, %v7798_v3  ;;  %v7701_v2 = vor.u32 %v9120_v21, %v7700_v22 }
 0x877   : > { %v7513_v3 = vor.u32 %v9069_v63, %v7510_v0  ;;  %v9091_v22 = vld [vmem:[#allocation8 + $0x3ac] sm:$0xf0]  ;;  %v9088_v0 = vld [vmem:[#allocation8 + $0x39c] sm:$0xf] }
 0x878   : > { %v10444_v13 = vadd.f32 %v2747_v11, %v2466_v30  ;;  %v10446_v14 = vadd.f32 %v2761_v12, %v2467_v36  ;;  %v9162_v30 = vld [vmem:[#allocation8 + $0x5e4] sm:$0xf0]  ;;  %v9111_v36 = vld [vmem:[#allocation8 + $0x454] sm:$0xf]  ;;  %3478 = vmatpush.bf16.msrb.mxu1 %v7801_v29  ;;  %v9163_v29 = vld [vmem:[#allocation8 + $0x5ec] sm:$0xf0]  ;;  %v7589_v21 = vor.u32 %v9091_v22, %v7588_v60 }
 0x879   : > { %v7869_v33 = vor.u32 %v9162_v30, %v7868_v27  ;;  %v7681_v34 = vor.u32 %v9111_v36, %v7678_v32  ;;  %v9138_v11 = vld [vmem:[#allocation8 + $0x524] sm:$0xf0]  ;;  %v9087_v12 = vld [vmem:[#allocation8 + $0x394] sm:$0xf]  ;;  %v9139_v63 = vld [vmem:[#allocation8 + $0x52c] sm:$0xf0] }
 0x87a   : > { %v2771_v15 = vadd.f32 %v10446_v14, %v10444_v13  ;;  %v7773_v26 = vor.u32 %v9138_v11, %v7772_v10  ;;  %v7876_v10 = vld [vmem:[#allocation8 + $0x5d8] sm:$0xf] }
 0x87b   : > { %3447 = vmatpush.bf16.msrb.mxu3 %v7869_v33  ;;  %3461 = vmatpush.bf16.msra.mxu0 %v7681_v34 }
 0x87c   : > { %2772 = vadd.xlane.f32.xlu2 %v2771_v15  ;;  %v7582_v15 = vld [vmem:[#allocation8 + $0x3a8] sm:$0xf0] }
 0x87d   : > { %v2748_v16 = vpop.f32.mrf.mxu0  ;;  %v2762_v17 = vpop.f32.mrf.mxu1  ;;  %v7585_v4 = vor.u32 %v9087_v12, %v7582_v15  ;;  %v7877_v12 = vor.u32 %v9163_v29, %v7876_v10  ;;  %v9112_v15 = vld [vmem:[#allocation8 + $0x45c] sm:$0xf]  ;;  %v9085_v10 = vld [vmem:[#allocation8 + $0x37c] sm:$0xf0]  ;;  %v7756_v29 = vld [vmem:[#allocation8 + $0x4e8] sm:$0xf] }
 0x87e   : > { %v2749_v61 = vadd.f32 %v2748_v16, %v2653_v7  ;;  %v2763_v18 = vadd.f32 %v2762_v17, %v2654_v8  ;;  %v7580_v7 = vld [vmem:[#allocation8 + $0x390] sm:$0xf]  ;;  %v9090_v8 = vld [vmem:[#allocation8 + $0x3a4] sm:$0xf0]  ;;  %v9135_v16 = vld [vmem:[#allocation8 + $0x514] sm:$0xf] }
 0x87f   : > { %3448 = vmatpush.bf16.msrb.mxu3 %v7845_v41  ;;  %3462 = vmatpush.bf16.msra.mxu0 %v7657_v45  ;;  %v7774_v17 = vld [vmem:[#allocation8 + $0x528] sm:$0xf0]  ;;  %v9132_v41 = vld [vmem:[#allocation8 + $0x4f4] sm:$0xf0]  ;;  %v9129_v45 = vld [vmem:[#allocation8 + $0x4e4] sm:$0xf] }
 0x880   : > { %v10451_v19 = vadd.f32 %v2749_v61, %v10432_v31  ;;  %v10454_v20 = vadd.f32 %v2763_v18, %v10434_v35  ;;  %v7652_v31 = vld [vmem:[#allocation8 + $0x420] sm:$0xf]  ;;  %v9108_v35 = vld [vmem:[#allocation8 + $0x434] sm:$0xf0]  ;;  %v7581_v18 = vor.u32 %v9090_v8, %v7580_v7  ;;  %v7777_v27 = vor.u32 %v9135_v16, %v7774_v17  ;;  %v9115_v8 = vld [vmem:[#allocation8 + $0x46c] sm:$0xf0] }
 0x881   : > { %v7653_v40 = vor.u32 %v9108_v35, %v7652_v31  ;;  %v7556_v35 = vld [vmem:[#allocation8 + $0x360] sm:$0xf]  ;;  %v7686_v16 = vld [vmem:[#allocation8 + $0x470] sm:$0xf0]  ;;  %v9160_v17 = vld [vmem:[#allocation8 + $0x5dc] sm:$0xf] }
 0x882   : > { %v2774_v25 = vadd.f32 %v10454_v20, %v10451_v19  ;;  %3479 = vmatpush.bf16.msrb.mxu1 %v7777_v27 }
 0x883   : > { %3434 = vmatpush.bf16.msra.mxu2 %v7653_v40  ;;  %3449 = vmatpush.bf16.msrb.mxu3 %v7821_v57  ;;  %v7557_v40 = vor.u32 %v9084_v38, %v7556_v35  ;;  %v7726_v57 = vld [vmem:[#allocation8 + $0x4c8] sm:$0xf0]  ;;  %v7636_v38 = vld [vmem:[#allocation8 + $0x3f8] sm:$0xf] }
 0x884   : > { %2775 = vadd.xlane.f32.xlu0 %v2774_v25  ;;  %3463 = vmatpush.bf16.msra.mxu0 %v7633_v58  ;;  %v7729_v58 = vor.u32 %v9123_v56, %v7726_v57  ;;  %v9142_v57 = vld [vmem:[#allocation8 + $0x54c] sm:$0xf] }
 0x887   : > { %3435 = vmatpush.bf16.msra.mxu2 %v7629_v53  ;;  %3450 = vmatpush.bf16.msrb.mxu3 %v7797_v5  ;;  %v7534_v53 = vld [vmem:[#allocation8 + $0x348] sm:$0xf0]  ;;  %v7702_v5 = vld [vmem:[#allocation8 + $0x498] sm:$0xf0] }
 0x888   : > { %3464 = vmatpush.bf16.msra.mxu0 %v7609_v6  ;;  %v7537_v55 = vor.u32 %v9075_v52, %v7534_v53  ;;  %v7684_v6 = vld [vmem:[#allocation8 + $0x458] sm:$0xf]  ;;  %v9145_v52 = vld [vmem:[#allocation8 + $0x55c] sm:$0xf0]  ;;  %v9094_v53 = vld [vmem:[#allocation8 + $0x3cc] sm:$0xf] }
 0x889   : > { %v7685_v11 = vor.u32 %v9115_v8, %v7684_v6  ;;  %v7782_v6 = vld [vmem:[#allocation8 + $0x530] sm:$0xf0]  ;;  %v7564_v8 = vld [vmem:[#allocation8 + $0x368] sm:$0xf] }
 0x88b   : > { %3436 = vmatpush.bf16.msra.mxu2 %v7605_v24  ;;  %3451 = vmatpush.bf16.msrb.mxu3 %v7773_v26  ;;  %v9117_v24 = vld [vmem:[#allocation8 + $0x484] sm:$0xf]  ;;  %v9109_v26 = vld [vmem:[#allocation8 + $0x43c] sm:$0xf0] }
 0x88c   : > { %3465 = vmatpush.bf16.msra.mxu0 %v7585_v4  ;;  %v7705_v7 = vor.u32 %v9117_v24, %v7702_v5  ;;  %v9136_v5 = vld [vmem:[#allocation8 + $0x51c] sm:$0xf] }
 0x88f   : > { %3437 = vmatpush.bf16.msra.mxu2 %v7581_v18  ;;  %v7878_v18 = vld [vmem:[#allocation8 + $0x5f0] sm:$0xf0] }
 0x890   : > { %3466 = vmatpush.bf16.msra.mxu0 %v7561_v44  ;;  %v7881_v4 = vor.u32 %v9160_v17, %v7878_v18 }
 0x893   : > { %3438 = vmatpush.bf16.msra.mxu2 %v7557_v40  ;;  %v7828_v40 = vld [vmem:[#allocation8 + $0x578] sm:$0xf] }
 0x894   : > { %3467 = vmatpush.bf16.msra.mxu0 %v7537_v55  ;;  %v7829_v44 = vor.u32 %v9151_v42, %v7828_v40  ;;  %v7516_v42 = vld [vmem:[#allocation8 + $0x308] sm:$0xf] }
 0x897   : > { %3439 = vmatpush.bf16.msra.mxu2 %v7533_v50  ;;  %v7804_v50 = vld [vmem:[#allocation8 + $0x548] sm:$0xf] }
 0x898   : > { %3468 = vmatpush.bf16.msra.mxu0 %v7513_v3  ;;  %v7805_v55 = vor.u32 %v9145_v52, %v7804_v50  ;;  %v9118_v50 = vld [vmem:[#allocation8 + $0x48c] sm:$0xf] }
 0x89b   : > { %3440 = vmatpush.bf16.msra.mxu2 %v7509_v62  ;;  %v7780_v62 = vld [vmem:[#allocation8 + $0x518] sm:$0xf] }
 0x89c   : > { %v7781_v3 = vor.u32 %v9139_v63, %v7780_v62  ;;  %v2769_v63 = vld [vmem:[%s10879_s17] sm:$0x3] }
 0x89f   : > { %3489 = vmatpush.bf16.msrb.mxu2 %v7685_v11  ;;  %v7565_v11 = vor.u32 %v9085_v10, %v7564_v8 }
 0x8ef   : > { %v2773_v61 = vpop.xlane.xlu2 %2772 }
 0x8f0   : > { %v2777_v25 = vmul.f32 %v2773_v61, %v10400_v1  ;;  %v7689_v61 = vor.u32 %v9112_v15, %v7686_v16  ;;  %v9082_v15 = vld [vmem:[#allocation8 + $0x36c] sm:$0xf]  ;;  %v7566_v16 = vld [vmem:[#allocation8 + $0x380] sm:$0xf0] }
 0x8f1   : > { %v7569_v18 = vor.u32 %v9082_v15, %v7566_v16 }
 0x8f2   : > { %v10460_v23 = vsub.f32 %v10444_v13, %v2777_v25  ;;  %v10463_v30 = vsub.f32 %v10446_v14, %v2777_v25  ;;  %v7660_v25 = vld [vmem:[#allocation8 + $0x428] sm:$0xf]  ;;  %3517 = vmatpush.bf16.msrb.mxu0 %v7689_v61 }
 0x8f3   : > { %v7661_v27 = vor.u32 %v9109_v26, %v7660_v25  ;;  %v9130_v25 = vld [vmem:[#allocation8 + $0x4ec] sm:$0xf]  ;;  %v7758_v26 = vld [vmem:[#allocation8 + $0x500] sm:$0xf0] }
 0x8f4   : > { %v2783_v36 = vmul.f32 %v10460_v23, %v10460_v23  ;;  %v2784_v32 = vmul.f32 %v10463_v30, %v10463_v30 }
 0x8f5   : > { %3490 = vmatpush.bf16.msrb.mxu2 %v7661_v27  ;;  %v7761_v27 = vor.u32 %v9130_v25, %v7758_v26  ;;  %v7692_v26 = vld [vmem:[#allocation8 + $0x460] sm:$0xf] }
 0x8f6   : > { %v2787_v33 = vadd.f32 %v2784_v32, %v2783_v36  ;;  %v7852_v36 = vld [vmem:[#allocation8 + $0x5a8] sm:$0xf]  ;;  %v9157_v32 = vld [vmem:[#allocation8 + $0x5bc] sm:$0xf0] }
 0x8f7   : > { %v2776_v34 = vpop.xlane.xlu0 %2775 }
 0x8f8   : > { %v2778_v9 = vmul.f32 %v2776_v34, %v10400_v1  ;;  %2788 = vadd.xlane.f32.xlu2 %v2787_v33  ;;  %v9106_v33 = vld [vmem:[#allocation8 + $0x42c] sm:$0xf]  ;;  %v7853_v34 = vor.u32 %v9157_v32, %v7852_v36  ;;  %v7540_v36 = vld [vmem:[#allocation8 + $0x338] sm:$0xf]  ;;  %v9079_v32 = vld [vmem:[#allocation8 + $0x34c] sm:$0xf0] }
 0x8fa   : > { %v10471_v13 = vsub.f32 %v10451_v19, %v2778_v9  ;;  %v10474_v14 = vsub.f32 %v10454_v20, %v2778_v9  ;;  %v7749_v19 = vor.u32 %v9132_v41, %v7748_v39  ;;  %v7750_v20 = vld [vmem:[#allocation8 + $0x4f8] sm:$0xf0]  ;;  %v7662_v9 = vld [vmem:[#allocation8 + $0x440] sm:$0xf0]  ;;  %v9103_v39 = vld [vmem:[#allocation8 + $0x40c] sm:$0xf0] }
 0x8fb   : > { %v7753_v46 = vor.u32 %v9129_v45, %v7750_v20  ;;  %v7637_v41 = vor.u32 %v9103_v39, %v7636_v38  ;;  %v9148_v20 = vld [vmem:[#allocation8 + $0x57c] sm:$0xf]  ;;  %v7734_v39 = vld [vmem:[#allocation8 + $0x4d0] sm:$0xf0] }
 0x8fc   : > { %v2785_v37 = vmul.f32 %v10471_v13, %v10471_v13  ;;  %v2786_v31 = vmul.f32 %v10474_v14, %v10474_v14  ;;  %3452 = vmatpush.bf16.msrb.mxu3 %v7749_v19  ;;  %v7638_v19 = vld [vmem:[#allocation8 + $0x410] sm:$0xf0]  ;;  %v9124_v38 = vld [vmem:[#allocation8 + $0x4bc] sm:$0xf] }
 0x8fd   : > { %3480 = vmatpush.bf16.msrb.mxu1 %v7753_v46  ;;  %v7641_v45 = vor.u32 %v9100_v43, %v7638_v19  ;;  %v7830_v46 = vld [vmem:[#allocation8 + $0x590] sm:$0xf0]  ;;  %3491 = vmatpush.bf16.msrb.mxu2 %v7637_v41  ;;  %v7737_v41 = vor.u32 %v9124_v38, %v7734_v39  ;;  %v9073_v43 = vld [vmem:[#allocation8 + $0x31c] sm:$0xf0]  ;;  %v7708_v19 = vld [vmem:[#allocation8 + $0x488] sm:$0xf] }
 0x8fe   : > { %v2790_v28 = vadd.f32 %v2786_v31, %v2785_v37  ;;  %v9154_v37 = vld [vmem:[#allocation8 + $0x5ac] sm:$0xf]  ;;  %v7854_v31 = vld [vmem:[#allocation8 + $0x5c0] sm:$0xf0]  ;;  %v7833_v47 = vor.u32 %v9148_v20, %v7830_v46  ;;  %v7668_v38 = vld [vmem:[#allocation8 + $0x430] sm:$0xf] }
 0x8ff   : > { %v7857_v35 = vor.u32 %v9154_v37, %v7854_v31  ;;  %v9127_v37 = vld [vmem:[#allocation8 + $0x4cc] sm:$0xf0]  ;;  %v9076_v31 = vld [vmem:[#allocation8 + $0x33c] sm:$0xf]  ;;  %v9070_v20 = vld [vmem:[#allocation8 + $0x30c] sm:$0xf] }
 0x900   : > { %2791 = vadd.xlane.f32.xlu0 %v2790_v28  ;;  %3453 = vmatpush.bf16.msrb.mxu3 %v7725_v54  ;;  %v7665_v28 = vor.u32 %v9106_v33, %v7662_v9  ;;  %v7614_v54 = vld [vmem:[#allocation8 + $0x3e0] sm:$0xf0]  ;;  %v7732_v33 = vld [vmem:[#allocation8 + $0x4b8] sm:$0xf]  ;;  %v7541_v9 = vor.u32 %v9079_v32, %v7540_v36  ;;  %v9110_v39 = vld [vmem:[#allocation8 + $0x444] sm:$0xf0] }
 0x901   : > { %3481 = vmatpush.bf16.msrb.mxu1 %v7729_v58  ;;  %v7617_v56 = vor.u32 %v9094_v53, %v7614_v54  ;;  %v7806_v58 = vld [vmem:[#allocation8 + $0x560] sm:$0xf0]  ;;  %3492 = vmatpush.bf16.msrb.mxu2 %v7613_v51 }
 0x902   : > { %3518 = vmatpush.bf16.msrb.mxu0 %v7665_v28  ;;  %v7809_v59 = vor.u32 %v9142_v57, %v7806_v58  ;;  %v7733_v28 = vor.u32 %v9127_v37, %v7732_v33  ;;  %v7518_v46 = vld [vmem:[#allocation8 + $0x320] sm:$0xf0] }
 0x903   : > { %v7521_v49 = vor.u32 %v9070_v20, %v7518_v46  ;;  %v7710_v51 = vld [vmem:[#allocation8 + $0x4a0] sm:$0xf0]  ;;  %v7862_v20 = vld [vmem:[#allocation8 + $0x5c8] sm:$0xf0]  ;;  %v7669_v46 = vor.u32 %v9110_v39, %v7668_v38 }
 0x904   : > { %3454 = vmatpush.bf16.msrb.mxu3 %v7701_v2  ;;  %v7590_v2 = vld [vmem:[#allocation8 + $0x3b0] sm:$0xf0]  ;;  %v7713_v53 = vor.u32 %v9118_v50, %v7710_v51  ;;  %v9113_v36 = vld [vmem:[#allocation8 + $0x464] sm:$0xf]  ;;  %v7766_v38 = vld [vmem:[#allocation8 + $0x508] sm:$0xf0] }
 0x905   : > { %3482 = vmatpush.bf16.msrb.mxu1 %v7705_v7  ;;  %v7593_v24 = vor.u32 %v9088_v0, %v7590_v2  ;;  %v7785_v7 = vor.u32 %v9136_v5, %v7782_v6  ;;  %3493 = vmatpush.bf16.msrb.mxu2 %v7589_v21  ;;  %v2822_v5 = vperm.slane %v2769_v63, 0  ;;  %v2823_v6 = vperm.slane %v2769_v63, 1  ;;  %v9161_v37 = vld [vmem:[#allocation8 + $0x5e4] sm:$0xf]  ;;  %v7812_v63 = vld [vmem:[#allocation8 + $0x550] sm:$0xf] }
 0x906   : > { %3519 = vmatpush.bf16.msrb.mxu0 %v7641_v45  ;;  %v9121_v45 = vld [vmem:[#allocation8 + $0x49c] sm:$0xf0] }
 0x907   : > { %v7709_v48 = vor.u32 %v9121_v45, %v7708_v19  ;;  %v9107_v19 = vld [vmem:[#allocation8 + $0x434] sm:$0xf] }
 0x908   : > { %3503 = vmatpush.bf16.msra.mxu3 %v7877_v12  ;;  %v9133_v12 = vld [vmem:[#allocation8 + $0x4fc] sm:$0xf0]  ;;  %v9155_v45 = vld [vmem:[#allocation8 + $0x5b4] sm:$0xf] }
 0x909   : > { %3531 = vmatpush.bf16.msra.mxu1 %v7881_v4  ;;  %v7757_v61 = vor.u32 %v9133_v12, %v7756_v29  ;;  %3494 = vmatpush.bf16.msrb.mxu2 %v7565_v11  ;;  %v7865_v51 = vor.u32 %v9155_v45, %v7862_v20  ;;  %v9128_v45 = vld [vmem:[#allocation8 + $0x4d4] sm:$0xf0]  ;;  %v9077_v20 = vld [vmem:[#allocation8 + $0x344] sm:$0xf] }
 0x90a   : > { %3520 = vmatpush.bf16.msrb.mxu0 %v7617_v56 }
 0x90c   : > { %3504 = vmatpush.bf16.msra.mxu3 %v7853_v34 }
 0x90d   : > { %3532 = vmatpush.bf16.msra.mxu1 %v7857_v35  ;;  %v7542_v35 = vld [vmem:[#allocation8 + $0x350] sm:$0xf0]  ;;  %3495 = vmatpush.bf16.msrb.mxu2 %v7541_v9  ;;  %v7694_v9 = vld [vmem:[#allocation8 + $0x478] sm:$0xf0] }
 0x90e   : > { %3521 = vmatpush.bf16.msrb.mxu0 %v7593_v24  ;;  %v7545_v40 = vor.u32 %v9076_v31, %v7542_v35  ;;  %v2770_v24 = vld [vmem:[%s10932_s18] sm:$0x3] }
 0x90f   : > { %v2831_v29 = vperm.slane %v2770_v24, 0  ;;  %v2832_v11 = vperm.slane %v2770_v24, 1  ;;  %v9143_v24 = vld [vmem:[#allocation8 + $0x554] sm:$0xf] }
 0x910   : > { %3505 = vmatpush.bf16.msra.mxu3 %v7829_v44  ;;  %v7517_v44 = vor.u32 %v9073_v43, %v7516_v42  ;;  %v7860_v42 = vld [vmem:[#allocation8 + $0x5b0] sm:$0xf]  ;;  %v9158_v43 = vld [vmem:[#allocation8 + $0x5c4] sm:$0xf0] }
 0x911   : > { %3533 = vmatpush.bf16.msra.mxu1 %v7833_v47 }
 0x912   : > { %3522 = vmatpush.bf16.msrb.mxu0 %v7569_v18  ;;  %3496 = vmatpush.bf16.msrb.mxu2 %v7517_v44  ;;  %v7670_v44 = vld [vmem:[#allocation8 + $0x448] sm:$0xf0] }
 0x913   : > { %v7673_v50 = vor.u32 %v9107_v19, %v7670_v44  ;;  %v7740_v44 = vld [vmem:[#allocation8 + $0x4c0] sm:$0xf] }
 0x914   : > { %3506 = vmatpush.bf16.msra.mxu3 %v7805_v55 }
 0x915   : > { %3534 = vmatpush.bf16.msra.mxu1 %v7809_v59 }
 0x916   : > { %3523 = vmatpush.bf16.msrb.mxu0 %v7545_v40  ;;  %v7697_v40 = vor.u32 %v9113_v36, %v7694_v9  ;;  %v7764_v9 = vld [vmem:[#allocation8 + $0x4f0] sm:$0xf] }
 0x918   : > { %3507 = vmatpush.bf16.msra.mxu3 %v7781_v3 }
 0x919   : > { %3535 = vmatpush.bf16.msra.mxu1 %v7785_v7 }
 0x91a   : > { %3524 = vmatpush.bf16.msrb.mxu0 %v7521_v49  ;;  %v9104_v49 = vld [vmem:[#allocation8 + $0x414] sm:$0xf0] }
 0x91c   : > { %3508 = vmatpush.bf16.msra.mxu3 %v7757_v61 }
 0x91d   : > { %3536 = vmatpush.bf16.msra.mxu1 %v7761_v27  ;;  %v7884_v27 = vld [vmem:[#allocation8 + $0x5e0] sm:$0xf] }
 0x920   : > { %3509 = vmatpush.bf16.msra.mxu3 %v7733_v28 }
 0x921   : > { %3537 = vmatpush.bf16.msra.mxu1 %v7737_v41 }
 0x924   : > { %3510 = vmatpush.bf16.msra.mxu3 %v7709_v48  ;;  %v7644_v48 = vld [vmem:[#allocation8 + $0x400] sm:$0xf] }
 0x925   : > { %3538 = vmatpush.bf16.msra.mxu1 %v7713_v53  ;;  %v9152_v53 = vld [vmem:[#allocation8 + $0x594] sm:$0xf0] }
 0x96b   : > { %v2789_v17 = vpop.xlane.xlu2 %2788 }
 0x96c   : > { %v2793_v4 = vmul.f32 %v2789_v17, %v10400_v1 }
 0x96e   : > { %v2795_v34 = vadd.f32 1e-05, %v2793_v4  ;;  %v9116_v4 = vld [vmem:[#allocation8 + $0x474] sm:$0xf0] }
 0x96f   : > { %v7693_v28 = vor.u32 %v9116_v4, %v7692_v26  ;;  %v7572_v4 = vld [vmem:[#allocation8 + $0x370] sm:$0xf] }
 0x970   : > { %9610 = vrsqrt.f32 %v2795_v34  ;;  %vm2803_vm12 = vweird.f32 %v2795_v34 }
 0x973   : > { %v2792_v47 = vpop.xlane.xlu0 %2791 }
 0x974   : > { %v2794_v52 = vmul.f32 %v2792_v47, %v10400_v1  ;;  %v7861_v47 = vor.u32 %v9158_v43, %v7860_v42  ;;  %v9080_v42 = vld [vmem:[#allocation8 + $0x354] sm:$0xf0] }
 0x976   : > { %v9611_v54 = vpop.eup %9610  ;;  %v2796_v55 = vadd.f32 1e-05, %v2794_v52  ;;  %v7836_v52 = vld [vmem:[#allocation8 + $0x580] sm:$0xf] }
 0x977   : > { %v2798_v56 = vmul.f32 %v9611_v54, %v2795_v34  ;;  %vm2804_vm11 = vweird.f32 %v9611_v54 }
 0x978   : > { %9612 = vrsqrt.f32 %v2796_v55  ;;  %vm2805_vm13 = vmor %vm2803_vm12, %vm2804_vm11  ;;  %vm2813_vm15 = vweird.f32 %v2796_v55 }
 0x979   : > { %v2799_v57 = vmul.f32 %v9611_v54, %v2798_v56  ;;  %v9149_v56 = vld [vmem:[#allocation8 + $0x584] sm:$0xf] }
 0x97b   : > { %v2800_v58 = vmul.f32 0.5, %v2799_v57  ;;  %v7838_v57 = vld [vmem:[#allocation8 + $0x598] sm:$0xf0] }
 0x97d   : > { %v2801_v59 = vsub.f32 1.5, %v2800_v58  ;;  %v7645_v58 = vor.u32 %v9104_v49, %v7644_v48  ;;  %v7742_v48 = vld [vmem:[#allocation8 + $0x4d8] sm:$0xf0] }
 0x97e   : > { %v9613_v60 = vpop.eup %9612 }
 0x97f   : > { %v2802_v22 = vmul.f32 %v9611_v54, %v2801_v59  ;;  %v2808_v62 = vmul.f32 %v9613_v60, %v2796_v55  ;;  %vm2814_vm14 = vweird.f32 %v9613_v60  ;;  %v7646_v55 = vld [vmem:[#allocation8 + $0x418] sm:$0xf0]  ;;  %v7837_v59 = vor.u32 %v9152_v53, %v7836_v52  ;;  %v9074_v52 = vld [vmem:[#allocation8 + $0x324] sm:$0xf0] }
 0x980   : > { %vm2815_vm0 = vmor %vm2813_vm15, %vm2814_vm14 }
 0x981   : > { %v2809_v21 = vmul.f32 %v9613_v60, %v2808_v62  ;;  %v2806_v0 = vsel %vm2805_vm13, %v9611_v54, %v2802_v22  ;;  %v9101_v54 = vld [vmem:[#allocation8 + $0x404] sm:$0xf]  ;;  %v9098_v22 = vld [vmem:[#allocation8 + $0x3e4] sm:$0xf0] }
 0x982   : > { %v2817_v7 = vmul.f32 %v2806_v0, %v10460_v23  ;;  %v2818_v8 = vmul.f32 %v2806_v0, %v10463_v30  ;;  %v9164_v23 = vld [vmem:[#allocation8 + $0x5f4] sm:$0xf0]  ;;  %v7649_v62 = vor.u32 %v9101_v54, %v7646_v55  ;;  %v9146_v0 = vld [vmem:[#allocation8 + $0x564] sm:$0xf0]  ;;  %v7716_v55 = vld [vmem:[#allocation8 + $0x490] sm:$0xf] }
 0x983   : > { %v2810_v2 = vmul.f32 0.5, %v2809_v21  ;;  %v7885_v35 = vor.u32 %v9164_v23, %v7884_v27  ;;  %v7841_v21 = vor.u32 %v9149_v56, %v7838_v57  ;;  %v9086_v27 = vld [vmem:[#allocation8 + $0x384] sm:$0xf0]  ;;  %v9071_v57 = vld [vmem:[#allocation8 + $0x314] sm:$0xf] }
 0x984   : > { %v2826_v15 = vmul.f32 %v2822_v5, %v2817_v7  ;;  %v2827_v16 = vmul.f32 %v2823_v6, %v2818_v8  ;;  %v7813_v7 = vor.u32 %v9146_v0, %v7812_v63  ;;  %v7596_v8 = vld [vmem:[#allocation8 + $0x3a0] sm:$0xf]  ;;  %v7573_v39 = vor.u32 %v9086_v27, %v7572_v4  ;;  %v9122_v56 = vld [vmem:[#allocation8 + $0x4a4] sm:$0xf0] }
 0x985   : > { %v2811_v3 = vsub.f32 1.5, %v2810_v2  ;;  %v9095_v2 = vld [vmem:[#allocation8 + $0x3d4] sm:$0xf] }
 0x986   : > { %v10492_v30 = vadd.f32 %v2831_v29, %v2826_v15  ;;  %v10494_v32 = vadd.f32 %v2832_v11, %v2827_v16  ;;  %v9140_v15 = vld [vmem:[#allocation8 + $0x534] sm:$0xf0]  ;;  %v9089_v16 = vld [vmem:[#allocation8 + $0x3a4] sm:$0xf] }
 0x987   : > { %v2812_v10 = vmul.f32 %v9613_v60, %v2811_v3  ;;  %v7622_v3 = vld [vmem:[#allocation8 + $0x3e8] sm:$0xf0] }
 0x989   : > { %v2816_v12 = vsel %vm2815_vm0, %v9613_v60, %v2812_v10  ;;  %v7620_v60 = vld [vmem:[#allocation8 + $0x3d0] sm:$0xf]  ;;  %v9092_v10 = vld [vmem:[#allocation8 + $0x3b4] sm:$0xf0] }
 0x98a   : > { %v2819_v17 = vmul.f32 %v2816_v12, %v10471_v13  ;;  %v2820_v61 = vmul.f32 %v2816_v12, %v10474_v14  ;;  %v7886_v13 = vld [vmem:[#allocation8 + $0x5f8] sm:$0xf0]  ;;  %v7788_v12 = vld [vmem:[#allocation8 + $0x520] sm:$0xf] }
 0x98b   : > { %v7889_v41 = vor.u32 %v9161_v37, %v7886_v13  ;;  %v7789_v26 = vor.u32 %v9140_v15, %v7788_v12  ;;  %v9134_v37 = vld [vmem:[#allocation8 + $0x504] sm:$0xf0]  ;;  %v9083_v13 = vld [vmem:[#allocation8 + $0x374] sm:$0xf] }
 0x98c   : > { %v2828_v18 = vmul.f32 %v2822_v5, %v2819_v17  ;;  %v2829_v25 = vmul.f32 %v2823_v6, %v2820_v61  ;;  %v7814_v5 = vld [vmem:[#allocation8 + $0x568] sm:$0xf0]  ;;  %v7621_v6 = vor.u32 %v9098_v22, %v7620_v60  ;;  %v7598_v17 = vld [vmem:[#allocation8 + $0x3b8] sm:$0xf0]  ;;  %v9137_v61 = vld [vmem:[#allocation8 + $0x524] sm:$0xf] }
 0x98d   : > { %v7601_v23 = vor.u32 %v9089_v16, %v7598_v17  ;;  %v7718_v60 = vld [vmem:[#allocation8 + $0x4a8] sm:$0xf0] }
 0x98e   : > { %v10496_v33 = vadd.f32 %v2831_v29, %v2828_v18  ;;  %v10498_v34 = vadd.f32 %v2832_v11, %v2829_v25  ;;  %v7625_v29 = vor.u32 %v9095_v2, %v7622_v3  ;;  %v7817_v11 = vor.u32 %v9143_v24, %v7814_v5  ;;  %v7790_v18 = vld [vmem:[#allocation8 + $0x538] sm:$0xf0]  ;;  %v7505_v5 = vld [vmem:[%s10870_s8 + $0x6] sm:$0x3f] }
 0x98f   : > { %v7597_v25 = vor.u32 %v9092_v10, %v7596_v8  ;;  %v7793_v36 = vor.u32 %v9137_v61, %v7790_v18  ;;  %v2944_v61 = vperm.slane %v7505_v5, 3  ;;  %v2943_v4 = vperm.slane %v7505_v5, 2 }
 0x990   : > { %v10502_v14 = vpack.c.bf16 %v10496_v33, %v10492_v30  ;;  %v10506_v31 = vpack.c.bf16 %v10498_v34, %v10494_v32 }
 0x992   : > { %3441 = vmatmul.bf16.vlgmr.msra.gmra.mxu2 %v10502_v14  ;;  %3455 = vmatmul.bf16.vlgmr.msrb.gmra.mxu3 %v10506_v31 }
 0x993   : > { %3469 = vmatmul.bf16.vlgmr.msra.gmra.mxu0 %v10502_v14  ;;  %3483 = vmatmul.bf16.vlgmr.msrb.gmra.mxu1 %v10506_v31 }
 0x994   : > { %3545 = vmatpush.bf16.msra.mxu2 %v7693_v28  ;;  %3559 = vmatpush.bf16.msrb.mxu3 %v7885_v35  ;;  %v7574_v28 = vld [vmem:[#allocation8 + $0x388] sm:$0xf0]  ;;  %v9131_v35 = vld [vmem:[#allocation8 + $0x4f4] sm:$0xf] }
 0x995   : > { %3573 = vmatpush.bf16.msra.mxu0 %v7697_v40  ;;  %3587 = vmatpush.bf16.msrb.mxu1 %v7889_v41  ;;  %v7765_v40 = vor.u32 %v9134_v37, %v7764_v9  ;;  %v7548_v41 = vld [vmem:[#allocation8 + $0x340] sm:$0xf]  ;;  %v7577_v43 = vor.u32 %v9083_v13, %v7574_v28  ;;  %v7769_v19 = vor.u32 %v9131_v35, %v7766_v38 }
 0x996   : > { %v7549_v49 = vor.u32 %v9080_v42, %v7548_v41 }
 0x998   : > { %3546 = vmatpush.bf16.msra.mxu2 %v7669_v46  ;;  %3560 = vmatpush.bf16.msrb.mxu3 %v7861_v47  ;;  %v7550_v46 = vld [vmem:[#allocation8 + $0x358] sm:$0xf0]  ;;  %v9125_v47 = vld [vmem:[#allocation8 + $0x4c4] sm:$0xf] }
 0x999   : > { %3574 = vmatpush.bf16.msra.mxu0 %v7673_v50  ;;  %3588 = vmatpush.bf16.msrb.mxu1 %v7865_v51  ;;  %v7741_v50 = vor.u32 %v9128_v45, %v7740_v44  ;;  %v7524_v51 = vld [vmem:[#allocation8 + $0x310] sm:$0xf]  ;;  %v7553_v53 = vor.u32 %v9077_v20, %v7550_v46  ;;  %v7745_v54 = vor.u32 %v9125_v47, %v7742_v48 }
 0x99a   : > { %v7525_v22 = vor.u32 %v9074_v52, %v7524_v51  ;;  %v2945_v52 = vperm.slane %v7505_v5, 4 }
 0x99c   : > { %3547 = vmatpush.bf16.msra.mxu2 %v7645_v58  ;;  %3561 = vmatpush.bf16.msrb.mxu3 %v7837_v59  ;;  %v7526_v58 = vld [vmem:[#allocation8 + $0x328] sm:$0xf0]  ;;  %v9119_v59 = vld [vmem:[#allocation8 + $0x494] sm:$0xf] }
 0x99d   : > { %3575 = vmatpush.bf16.msra.mxu0 %v7649_v62  ;;  %3589 = vmatpush.bf16.msrb.mxu1 %v7841_v21  ;;  %v7717_v62 = vor.u32 %v9122_v56, %v7716_v55  ;;  %v7529_v21 = vor.u32 %v9071_v57, %v7526_v58  ;;  %v7721_v63 = vor.u32 %v9119_v59, %v7718_v60  ;;  %v2946_v55 = vperm.slane %v7505_v5, 5 }
 0x9a0   : > { %3548 = vmatpush.bf16.msra.mxu2 %v7621_v6  ;;  %3562 = vmatpush.bf16.msrb.mxu3 %v7813_v7  ;;  %v2941_v6 = vperm.slane %v7505_v5, 0 }
 0x9a1   : > { %3576 = vmatpush.bf16.msra.mxu0 %v7625_v29  ;;  %3590 = vmatpush.bf16.msrb.mxu1 %v7817_v11 }
 0x9a2   : > { %3497 = vmatmul.bf16.vlgmr.msrb.gmra.mxu2 %v10502_v14  ;;  %3511 = vmatmul.bf16.vlgmr.msra.gmra.mxu3 %v10506_v31 }
 0x9a3   : > { %3525 = vmatmul.bf16.vlgmr.msrb.gmra.mxu0 %v10502_v14  ;;  %3539 = vmatmul.bf16.vlgmr.msra.gmra.mxu1 %v10506_v31 }
 0x9a4   : > { %3549 = vmatpush.bf16.msra.mxu2 %v7597_v25  ;;  %3563 = vmatpush.bf16.msrb.mxu3 %v7789_v26 }
 0x9a5   : > { %3577 = vmatpush.bf16.msra.mxu0 %v7601_v23  ;;  %3591 = vmatpush.bf16.msrb.mxu1 %v7793_v36 }
 0x9a8   : > { %3550 = vmatpush.bf16.msra.mxu2 %v7573_v39  ;;  %3564 = vmatpush.bf16.msrb.mxu3 %v7765_v40  ;;  %v2942_v40 = vperm.slane %v7505_v5, 1 }
 0x9a9   : > { %3578 = vmatpush.bf16.msra.mxu0 %v7577_v43  ;;  %3592 = vmatpush.bf16.msrb.mxu1 %v7769_v19 }
 0x9ac   : > { %3551 = vmatpush.bf16.msra.mxu2 %v7549_v49  ;;  %3565 = vmatpush.bf16.msrb.mxu3 %v7741_v50 }
 0x9ad   : > { %3579 = vmatpush.bf16.msra.mxu0 %v7553_v53  ;;  %3593 = vmatpush.bf16.msrb.mxu1 %v7745_v54 }
 0x9b0   : > { %3552 = vmatpush.bf16.msra.mxu2 %v7525_v22  ;;  %3566 = vmatpush.bf16.msrb.mxu3 %v7717_v62 }
 0x9b1   : > { %3580 = vmatpush.bf16.msra.mxu0 %v7529_v21  ;;  %3594 = vmatpush.bf16.msrb.mxu1 %v7721_v63 }
 0x9b3   : > { %3553 = vmatmul.bf16.vlgmr.msra.gmra.mxu2 %v10502_v14  ;;  %3567 = vmatmul.bf16.vlgmr.msrb.gmra.mxu3 %v10506_v31 }
 0x9b4   : > { %3581 = vmatmul.bf16.vlgmr.msra.gmra.mxu0 %v10502_v14  ;;  %3595 = vmatmul.bf16.vlgmr.msrb.gmra.mxu1 %v10506_v31 }
 0xa10   : > { %v3470_v0 = vpop.f32.mrf.mxu0  ;;  %v3484_v2 = vpop.f32.mrf.mxu1 }
 0xa11   : > { %v3471_v45 = vadd.f32 %v3470_v0, %v2942_v40 }
 0xa13   : > { %v3485_v51 = vadd.f32 %v3484_v2, %v3471_v45 }
 0xa15   : > { %v3442_v3 = vpop.f32.mrf.mxu2  ;;  %v3456_v24 = vpop.f32.mrf.mxu3 }
 0xa16   : > { %v3443_v10 = vadd.f32 %v3442_v3, %v2941_v6 }
 0xa18   : > { %v3472_v7 = vpop.f32.mrf.mxu0  ;;  %v3486_v8 = vpop.f32.mrf.mxu1  ;;  %v3457_v15 = vadd.f32 %v3456_v24, %v3443_v10 }
 0xa19   : > { %v3473_v19 = vadd.f32 %v3472_v7, %v2942_v40 }
 0xa1b   : > { %v3487_v48 = vadd.f32 %v3486_v8, %v3473_v19 }
 0xa1d   : > { %v3444_v29 = vpop.f32.mrf.mxu2  ;;  %v3458_v11 = vpop.f32.mrf.mxu3  ;;  %v3734_v54 = vpack.c.bf16 %v3487_v48, %v3485_v51 }
 0xa1e   : > { %v3445_v12 = vadd.f32 %v3444_v29, %v2941_v6 }
 0xa20   : > { %v3459_v16 = vadd.f32 %v3458_v11, %v3445_v12  ;;  %v3526_v14 = vpop.f32.mrf.mxu0  ;;  %v3540_v17 = vpop.f32.mrf.mxu1 }
 0xa21   : > { %v3527_v26 = vadd.f32 %v3526_v14, %v2944_v61 }
 0xa22   : > { %v3601_v31 = vpack.c.bf16 %v3459_v16, %v3457_v15 }
 0xa23   : > { %v3541_v9 = vadd.f32 %v3540_v17, %v3527_v26 }
 0xa24   : > { %3665 = vrot.lane.b32.xlu1 %v3601_v31, %s10036_s6 }
 0xa25   : > { %v3498_v18 = vpop.f32.mrf.mxu2  ;;  %v3512_v25 = vpop.f32.mrf.mxu3 }
 0xa26   : > { %v3499_v13 = vadd.f32 %v3498_v18, %v2943_v4 }
 0xa28   : > { %v3528_v27 = vpop.f32.mrf.mxu0  ;;  %v3542_v36 = vpop.f32.mrf.mxu1  ;;  %v3513_v41 = vadd.f32 %v3512_v25, %v3499_v13 }
 0xa29   : > { %v3529_v23 = vadd.f32 %v3528_v27, %v2944_v61 }
 0xa2b   : > { %v3543_v37 = vadd.f32 %v3542_v36, %v3529_v23 }
 0xa2d   : > { %v3735_v28 = vpack.c.bf16 %v3543_v37, %v3541_v9  ;;  %v3500_v35 = vpop.f32.mrf.mxu2  ;;  %v3514_v38 = vpop.f32.mrf.mxu3 }
 0xa2e   : > { %v3501_v39 = vadd.f32 %v3500_v35, %v2943_v4 }
 0xa2f   : > { %3801 = vrot.lane.b32.xlu0 %v3735_v28, %s10036_s6  ;;  %v3741_v47 = vsel %vm935_vm2, %v3735_v28, 0 }
 0xa30   : > { %v3515_v42 = vadd.f32 %v3514_v38, %v3501_v39 }
 0xa31   : > { %v3582_v43 = vpop.f32.mrf.mxu0  ;;  %v3596_v46 = vpop.f32.mrf.mxu1 }
 0xa32   : > { %v3602_v44 = vpack.c.bf16 %v3515_v42, %v3513_v41  ;;  %v3583_v58 = vadd.f32 %v3582_v43, %v2946_v55 }
 0xa34   : > { %3668 = vrot.lane.b32.xlu2 %v3602_v44, %s10036_s6  ;;  %v3608_v20 = vsel %vm935_vm2, %v3602_v44, 0  ;;  %v3597_v3 = vadd.f32 %v3596_v46, %v3583_v58 }
 0xa35   : > { %3617 = vmatpush.bf16.xpose.msrb.mxu2 %v3608_v20 }
 0xa36   : > { %v3554_v49 = vpop.f32.mrf.mxu2  ;;  %v3568_v50 = vpop.f32.mrf.mxu3 }
 0xa37   : > { %v3555_v57 = vadd.f32 %v3554_v49, %v2945_v52 }
 0xa39   : > { %v3584_v53 = vpop.f32.mrf.mxu0  ;;  %v3598_v60 = vpop.f32.mrf.mxu1  ;;  %v3569_v63 = vadd.f32 %v3568_v50, %v3555_v57 }
 0xa3a   : > { %v3585_v56 = vadd.f32 %v3584_v53, %v2946_v55 }
 0xa3c   : > { %3798 = vrot.lane.b32.xlu2 %v3734_v54, %s10036_s6  ;;  %7890 = vmatmul.msk.bf16.vlgmr.msrb.gmra.mxu2 %vm935_vm2, %v3601_v31  ;;  %v3599_v62 = vadd.f32 %v3598_v60, %v3585_v56 }
 0xa3d   : > { %3750 = vmatpush.bf16.xpose.msra.mxu2 %v3741_v47 }
 0xa3e   : > { %v3556_v59 = vpop.f32.mrf.mxu2  ;;  %v3570_v21 = vpop.f32.mrf.mxu3  ;;  %v10530_v24 = vpack.c.bf16 %v3599_v62, %v3597_v3 }
 0xa3f   : > { %v3557_v22 = vadd.f32 %v3556_v59, %v2945_v52 }
 0xa41   : > { %v3571_v0 = vadd.f32 %v3570_v21, %v3557_v22 }
 0xa43   : > { %v3603_v2 = vpack.c.bf16 %v3571_v0, %v3569_v63 }
 0xa45   : > { %3657 = vmatpush.bf16.msra.mxu3 %v3603_v2 }
 0xa49   : > { %3790 = vmatpush.bf16.msrb.mxu3 %v10530_v24 }
 0xa4c   : > { %7894 = vmatmul.msk.bf16.vlgmr.msra.gmra.mxu2 %vm935_vm2, %v3734_v54 }
 0xa8e   : > { %v3669_v5 = vpop.permute.xlu2 %3668 }
 0xa8f   : > { %v3674_v6 = vsel %vm935_vm2, %v3669_v5, 0 }
 0xa90   : > { %3683 = vmatpush.bf16.xpose.msrb.mxu0 %v3674_v6 }
 0xa96   : > { %v3666_v7 = vpop.permute.xlu1 %3665  ;;  %v3799_v29 = vpop.permute.xlu2 %3798 }
 0xa97   : > { %7892 = vmatmul.msk.bf16.vlgmr.msrb.gmra.mxu0 %vm935_vm2, %v3666_v7 }
 0xaa1   : > { %v3802_v8 = vpop.permute.xlu0 %3801 }
 0xaa2   : > { %v3807_v10 = vsel %vm935_vm2, %v3802_v8, 0 }
 0xaa3   : > { %3816 = vmatpush.bf16.xpose.msra.mxu0 %v3807_v10 }
 0xaaa   : > { %7896 = vmatmul.msk.bf16.vlgmr.msra.gmra.mxu0 %vm935_vm2, %v3799_v29 }
 0xabf   : > { %v3619_v11 = vpop.f32.mrf.mxu2 }
 0xac0   : > { %v3624_v61 = vsel %vm1869_vm3, %v3619_v11, -inf }
 0xac7   : > { %v3621_v16 = vpop.f32.mrf.mxu2 }
 0xac8   : > { %v3627_v36 = vsel %vm1869_vm3, %v3621_v16, -inf }
 0xacf   : > { %v3752_v31 = vpop.f32.mrf.mxu2 }
 0xad0   : > { %v3757_v9 = vsel %vm1869_vm3, %v3752_v31, -inf }
 0xad7   : > { %v3754_v26 = vpop.f32.mrf.mxu2 }
 0xad8   : > { %v3760_v4 = vsel %vm1869_vm3, %v3754_v26, -inf }
 0xb14   : > { %v3685_v12 = vpop.f32.mrf.mxu0 }
 0xb15   : > { %v3690_v15 = vsel %vm1869_vm3, %v3685_v12, -inf }
 0xb16   : > { %3691 = vmax.xlane.f32.xlu0 %v3690_v15 }
 0xb1c   : > { %v3687_v14 = vpop.f32.mrf.mxu0 }
 0xb1d   : > { %v3693_v17 = vsel %vm1869_vm3, %v3687_v14, -inf }
 0xb1e   : > { %3694 = vmax.xlane.f32.xlu1 %v3693_v17 }
 0xb26   : > { %3625 = vmax.xlane.f32.xlu1 %v3624_v61 }
 0xb27   : > { %v3818_v18 = vpop.f32.mrf.mxu0 }
 0xb28   : > { %v3823_v25 = vsel %vm1869_vm3, %v3818_v18, -inf }
 0xb29   : > { %3824 = vmax.xlane.f32.xlu2 %v3823_v25 }
 0xb2e   : > { %3761 = vmax.xlane.f32.xlu1 %v3760_v4 }
 0xb2f   : > { %v3820_v27 = vpop.f32.mrf.mxu0 }
 0xb30   : > { %v3826_v23 = vsel %vm1869_vm3, %v3820_v27, -inf }
 0xb31   : > { %3827 = vmax.xlane.f32.xlu0 %v3826_v23  ;;  %3628 = vmax.xlane.f32.xlu2 %v3627_v36 }
 0xb39   : > { %3758 = vmax.xlane.f32.xlu0 %v3757_v9 }
 0xb47   : > { %3714 = vrot.lane.b32.xlu1 %v3603_v2, %s10036_s6 }
 0xb89   : > { %v3692_v37 = vpop.xlane.xlu0 %3691 }
 0xb8a   : > { %v3696_v13 = vsub.f32 %v3685_v12, %v3692_v37 }
 0xb8c   : > { %v3698_v28 = vmul.f32 1.442695, %v3696_v13 }
 0xb8e   : > { %9614 = vpow2.f32 %v3698_v28 }
 0xb91   : > { %v3695_v35 = vpop.xlane.xlu1 %3694 }
 0xb92   : > { %v3697_v38 = vsub.f32 %v3687_v14, %v3695_v35 }
 0xb94   : > { %v9615_v39 = vpop.eup %9614  ;;  %v3700_v40 = vmul.f32 1.442695, %v3697_v38 }
 0xb95   : > { %v3702_v41 = vsel %vm1869_vm3, %v9615_v39, 0.0 }
 0xb96   : > { %9616 = vpow2.f32 %v3700_v40  ;;  %3703 = vadd.xlane.f32.xlu2 %v3702_v41 }
 0xb99   : > { %v3626_v20 = vpop.xlane.xlu1 %3625 }
 0xb9a   : > { %v3630_v49 = vsub.f32 %v3619_v11, %v3626_v20 }
 0xb9c   : > { %v9617_v42 = vpop.eup %9616  ;;  %v3825_v43 = vpop.xlane.xlu2 %3824  ;;  %v3632_v52 = vmul.f32 1.442695, %v3630_v49  ;;  %v7957_v49 = vld [vmem:[#allocation10 + $0x170] sm:$0xf] }
 0xb9d   : > { %v3829_v19 = vsub.f32 %v3818_v18, %v3825_v43  ;;  %v3705_v44 = vsel %vm1869_vm3, %v9617_v42, 0.0 }
 0xb9e   : > { %3706 = vadd.xlane.f32.xlu0 %v3705_v44 }
 0xb9f   : > { %v3831_v45 = vmul.f32 1.442695, %v3829_v19 }
 0xba1   : > { %9618 = vpow2.f32 %v3831_v45  ;;  %v3762_v60 = vpop.xlane.xlu1 %3761 }
 0xba2   : > { %v3764_v63 = vsub.f32 %v3754_v26, %v3762_v60 }
 0xba4   : > { %v3828_v46 = vpop.xlane.xlu0 %3827  ;;  %v3629_v53 = vpop.xlane.xlu2 %3628  ;;  %v3767_v5 = vmul.f32 1.442695, %v3764_v63  ;;  %v7943_v63 = vld [vmem:[#allocation10 + $0x158] sm:$0xf0] }
 0xba5   : > { %v3830_v47 = vsub.f32 %v3820_v27, %v3828_v46  ;;  %v3631_v57 = vsub.f32 %v3621_v16, %v3629_v53  ;;  %v7959_v53 = vld [vmem:[#allocation10 + $0x178] sm:$0xf0] }
 0xba7   : > { %v9619_v48 = vpop.eup %9618  ;;  %v3833_v50 = vmul.f32 1.442695, %v3830_v47  ;;  %v3634_v22 = vmul.f32 1.442695, %v3631_v57  ;;  %v9177_v57 = vld [vmem:[#allocation10 + $0x164] sm:$0xf] }
 0xba8   : > { %v3835_v51 = vsel %vm1869_vm3, %v9619_v48, 0.0 }
 0xba9   : > { %9620 = vpow2.f32 %v3833_v50  ;;  %3836 = vadd.xlane.f32.xlu2 %v3835_v51  ;;  %v9180_v50 = vld [vmem:[#allocation10 + $0x174] sm:$0xf0]  ;;  %v9179_v51 = vld [vmem:[#allocation10 + $0x174] sm:$0xf] }
 0xbaa   : > { %9622 = vpow2.f32 %v3632_v52  ;;  %v7958_v52 = vor.u32 %v9180_v50, %v7957_v49  ;;  %v8005_v50 = vld [vmem:[#allocation10 + $0x1d0] sm:$0xf] }
 0xbac   : > { %v3759_v54 = vpop.xlane.xlu0 %3758  ;;  %4089 = vmatpush.bf16.msrb.mxu2 %v7958_v52  ;;  %v9191_v52 = vld [vmem:[#allocation10 + $0x1d4] sm:$0xf] }
 0xbad   : > { %v3763_v55 = vsub.f32 %v3752_v31, %v3759_v54  ;;  %v7949_v54 = vld [vmem:[#allocation10 + $0x160] sm:$0xf] }
 0xbaf   : > { %v9621_v56 = vpop.eup %9620  ;;  %v3765_v58 = vmul.f32 1.442695, %v3763_v55  ;;  %v9178_v55 = vld [vmem:[#allocation10 + $0x164] sm:$0xf0] }
 0xbb0   : > { %v3838_v59 = vsel %vm1869_vm3, %v9621_v56, 0.0  ;;  %v9623_v62 = vpop.eup %9622 }
 0xbb1   : > { %9624 = vpow2.f32 %v3765_v58  ;;  %3839 = vadd.xlane.f32.xlu0 %v3838_v59  ;;  %v3636_v0 = vsel %vm1869_vm3, %v9623_v62, 0.0  ;;  %v7951_v58 = vld [vmem:[#allocation10 + $0x168] sm:$0xf0]  ;;  %v7950_v59 = vor.u32 %v9178_v55, %v7949_v54 }
 0xbb2   : > { %9626 = vpow2.f32 %v3634_v22  ;;  %v7954_v60 = vor.u32 %v9177_v57, %v7951_v58  ;;  %v7941_v22 = vld [vmem:[#allocation10 + $0x150] sm:$0xf]  ;;  %v9190_v57 = vld [vmem:[#allocation10 + $0x1c4] sm:$0xf0]  ;;  %v9189_v58 = vld [vmem:[#allocation10 + $0x1c4] sm:$0xf] }
 0xbb3   : > { %9628 = vpow2.f32 %v3767_v5  ;;  %4090 = vmatpush.bf16.msrb.mxu2 %v7950_v59  ;;  %v9174_v5 = vld [vmem:[#allocation10 + $0x144] sm:$0xf0]  ;;  %v7999_v59 = vld [vmem:[#allocation10 + $0x1c8] sm:$0xf0] }
 0xbb7   : > { %v9625_v21 = vpop.eup %9624 }
 0xbb8   : > { %v3769_v3 = vsel %vm1869_vm3, %v9625_v21, 0.0  ;;  %v9627_v6 = vpop.eup %9626 }
 0xbb9   : > { %3637 = vadd.xlane.f32.xlu0 %v3636_v0  ;;  %3770 = vadd.xlane.f32.xlu1 %v3769_v3  ;;  %v3715_v2 = vpop.permute.xlu1 %3714  ;;  %v3639_v7 = vsel %vm1869_vm3, %v9627_v6, 0.0  ;;  %v9629_v8 = vpop.eup %9628 }
 0xbba   : > { %3727 = vmatpush.bf16.msra.mxu1 %v3715_v2  ;;  %v3772_v10 = vsel %vm1869_vm3, %v9629_v8, 0.0  ;;  %v7933_v2 = vld [vmem:[#allocation10 + $0x140] sm:$0xf] }
 0xbc1   : > { %3847 = vrot.lane.b32.xlu2 %v10530_v24, %s10036_s6  ;;  %3640 = vadd.xlane.f32.xlu0 %v3639_v7  ;;  %v7935_v7 = vld [vmem:[#allocation10 + $0x148] sm:$0xf0] }
 0xbc9   : > { %3773 = vadd.xlane.f32.xlu0 %v3772_v10 }
 0xc09   : > { %v3704_v29 = vpop.xlane.xlu2 %3703 }
 0xc0a   : > { %9630 = vrcp.f32 %v3704_v29  ;;  %v7925_v29 = vld [vmem:[#allocation10 + $0x130] sm:$0xf] }
 0xc10   : > { %v9631_v12 = vpop.eup %9630 }
 0xc11   : > { %v3707_v11 = vpop.xlane.xlu0 %3706  ;;  %v3710_v16 = vmul.f32 %v9631_v12, %v9615_v39  ;;  %v9171_v12 = vld [vmem:[#allocation10 + $0x134] sm:$0xf] }
 0xc12   : > { %9632 = vrcp.f32 %v3707_v11  ;;  %v9172_v11 = vld [vmem:[#allocation10 + $0x134] sm:$0xf0] }
 0xc18   : > { %v9633_v15 = vpop.eup %9632 }
 0xc19   : > { %v3711_v14 = vmul.f32 %v9633_v15, %v9617_v42  ;;  %v7927_v15 = vld [vmem:[#allocation10 + $0x138] sm:$0xf0] }
 0xc1b   : > { %v3712_v17 = vpack.c.bf16 %v3711_v14, %v3710_v16  ;;  %v7926_v16 = vor.u32 %v9172_v11, %v7925_v29  ;;  %v7930_v14 = vor.u32 %v9171_v12, %v7927_v15  ;;  %v7973_v12 = vld [vmem:[#allocation10 + $0x190] sm:$0xf]  ;;  %v9184_v15 = vld [vmem:[#allocation10 + $0x194] sm:$0xf0] }
 0xc1c   : > { %v3837_v31 = vpop.xlane.xlu2 %3836 }
 0xc1d   : > { %7893 = vmatmul.msk.bf16.vlgmr.msra.gmra.mxu1 %vm1869_vm3, %v3712_v17  ;;  %9634 = vrcp.f32 %v3837_v31  ;;  %v7917_v17 = vld [vmem:[#allocation10 + $0x120] sm:$0xf]  ;;  %v9170_v31 = vld [vmem:[#allocation10 + $0x124] sm:$0xf0] }
 0xc23   : > { %v9635_v18 = vpop.eup %9634 }
 0xc24   : > { %v3840_v61 = vpop.xlane.xlu0 %3839  ;;  %v3848_v24 = vpop.permute.xlu2 %3847  ;;  %v3843_v26 = vmul.f32 %v9635_v18, %v9619_v48  ;;  %v7918_v18 = vor.u32 %v9170_v31, %v7917_v17  ;;  %v7974_v17 = vor.u32 %v9184_v15, %v7973_v12 }
 0xc25   : > { %9636 = vrcp.f32 %v3840_v61  ;;  %3860 = vmatpush.bf16.msrb.mxu1 %v3848_v24  ;;  %v9169_v61 = vld [vmem:[#allocation10 + $0x124] sm:$0xf]  ;;  %v7919_v24 = vld [vmem:[#allocation10 + $0x128] sm:$0xf0] }
 0xc2b   : > { %v9637_v25 = vpop.eup %9636 }
 0xc2c   : > { %v3844_v4 = vmul.f32 %v9637_v25, %v9621_v56  ;;  %v3638_v27 = vpop.xlane.xlu0 %3637  ;;  %v3771_v39 = vpop.xlane.xlu1 %3770  ;;  %v7962_v56 = vor.u32 %v9179_v51, %v7959_v53  ;;  %v7922_v25 = vor.u32 %v9169_v61, %v7919_v24  ;;  %v9192_v51 = vld [vmem:[#allocation10 + $0x1d4] sm:$0xf0]  ;;  %v8007_v53 = vld [vmem:[#allocation10 + $0x1d8] sm:$0xf0] }
 0xc2d   : > { %9638 = vrcp.f32 %v3638_v27  ;;  %v9167_v27 = vld [vmem:[#allocation10 + $0x114] sm:$0xf]  ;;  %v8006_v54 = vor.u32 %v9192_v51, %v8005_v50  ;;  %v8010_v55 = vor.u32 %v9191_v52, %v8007_v53 }
 0xc2e   : > { %v3845_v23 = vpack.c.bf16 %v3844_v4, %v3843_v26  ;;  %4117 = vmatpush.bf16.msrb.mxu0 %v7962_v56  ;;  %v7909_v26 = vld [vmem:[#allocation10 + $0x110] sm:$0xf]  ;;  %v9168_v4 = vld [vmem:[#allocation10 + $0x114] sm:$0xf0]  ;;  %v7997_v56 = vld [vmem:[#allocation10 + $0x1c0] sm:$0xf] }
 0xc30   : > { %7897 = vmatmul.msk.bf16.vlgmr.msrb.gmra.mxu1 %vm1869_vm3, %v3845_v23  ;;  %v7911_v23 = vld [vmem:[#allocation10 + $0x118] sm:$0xf0] }
 0xc32   : > { %4118 = vmatpush.bf16.msrb.mxu0 %v7954_v60  ;;  %v7998_v60 = vor.u32 %v9190_v57, %v7997_v56 }
 0xc33   : > { %v9639_v9 = vpop.eup %9638 }
 0xc34   : > { %v3641_v36 = vpop.xlane.xlu0 %3640  ;;  %v3644_v13 = vmul.f32 %v9639_v9, %v9623_v62  ;;  %v9176_v62 = vld [vmem:[#allocation10 + $0x154] sm:$0xf0]  ;;  %v7914_v9 = vor.u32 %v9167_v27, %v7911_v23  ;;  %v7965_v23 = vld [vmem:[#allocation10 + $0x180] sm:$0xf] }
 0xc35   : > { %9640 = vrcp.f32 %v3641_v36  ;;  %v7942_v0 = vor.u32 %v9176_v62, %v7941_v22  ;;  %v7910_v36 = vor.u32 %v9168_v4, %v7909_v26  ;;  %v8002_v22 = vor.u32 %v9189_v58, %v7999_v59  ;;  %v7989_v62 = vld [vmem:[#allocation10 + $0x1b0] sm:$0xf] }
 0xc37   : > { %4091 = vmatpush.bf16.msrb.mxu2 %v7942_v0  ;;  %v7991_v0 = vld [vmem:[#allocation10 + $0x1b8] sm:$0xf0] }
 0xc3b   : > { %v9641_v37 = vpop.eup %9640 }
 0xc3c   : > { %v3645_v28 = vmul.f32 %v9641_v37, %v9627_v6  ;;  %v3774_v38 = vpop.xlane.xlu0 %3773  ;;  %v9173_v6 = vld [vmem:[#allocation10 + $0x144] sm:$0xf]  ;;  %v7901_v37 = vld [vmem:[#allocation10 + $0x100] sm:$0xf] }
 0xc3d   : > { %9642 = vrcp.f32 %v3774_v38  ;;  %v7938_v10 = vor.u32 %v9173_v6, %v7935_v7  ;;  %v7903_v38 = vld [vmem:[#allocation10 + $0x108] sm:$0xf0]  ;;  %v9186_v6 = vld [vmem:[#allocation10 + $0x1a4] sm:$0xf0]  ;;  %v9185_v7 = vld [vmem:[#allocation10 + $0x1a4] sm:$0xf] }
 0xc3e   : > { %v3646_v35 = vpack.c.bf16 %v3645_v28, %v3644_v13  ;;  %9644 = vrcp.f32 %v3771_v39  ;;  %v9166_v13 = vld [vmem:[#allocation10 + $0x104] sm:$0xf0]  ;;  %v9165_v28 = vld [vmem:[#allocation10 + $0x104] sm:$0xf] }
 0xc3f   : > { %v7906_v39 = vor.u32 %v9165_v28, %v7903_v38 }
 0xc40   : > { %7891 = vmatmul.msk.bf16.vlgmr.msra.gmra.mxu3 %vm1869_vm3, %v3646_v35  ;;  %v7902_v35 = vor.u32 %v9166_v13, %v7901_v37  ;;  %v7967_v13 = vld [vmem:[#allocation10 + $0x188] sm:$0xf0] }
 0xc43   : > { %v9643_v40 = vpop.eup %9642 }
 0xc44   : > { %v9645_v41 = vpop.eup %9644  ;;  %v3778_v42 = vmul.f32 %v9643_v40, %v9629_v8  ;;  %v7934_v8 = vor.u32 %v9174_v5, %v7933_v2  ;;  %v8021_v40 = vld [vmem:[#allocation10 + $0x1f0] sm:$0xf]  ;;  %v7981_v5 = vld [vmem:[#allocation10 + $0x1a0] sm:$0xf] }
 0xc45   : > { %v3777_v43 = vmul.f32 %v9645_v41, %v9625_v21  ;;  %v9175_v21 = vld [vmem:[#allocation10 + $0x154] sm:$0xf]  ;;  %v9196_v41 = vld [vmem:[#allocation10 + $0x1f4] sm:$0xf0]  ;;  %v7982_v29 = vor.u32 %v9186_v6, %v7981_v5 }
 0xc46   : > { %v7946_v3 = vor.u32 %v9175_v21, %v7943_v63  ;;  %4092 = vmatpush.bf16.msrb.mxu2 %v7934_v8  ;;  %v9188_v21 = vld [vmem:[#allocation10 + $0x1b4] sm:$0xf0]  ;;  %v9187_v63 = vld [vmem:[#allocation10 + $0x1b4] sm:$0xf]  ;;  %v7983_v8 = vld [vmem:[#allocation10 + $0x1a8] sm:$0xf0] }
 0xc47   : > { %v3779_v19 = vpack.c.bf16 %v3778_v42, %v3777_v43  ;;  %v9195_v42 = vld [vmem:[#allocation10 + $0x1f4] sm:$0xf]  ;;  %v8022_v43 = vor.u32 %v9196_v41, %v8021_v40  ;;  %v7994_v2 = vor.u32 %v9187_v63, %v7991_v0  ;;  %v7986_v11 = vor.u32 %v9185_v7, %v7983_v8 }
 0xc48   : > { %4119 = vmatpush.bf16.msrb.mxu0 %v7946_v3  ;;  %v7990_v3 = vor.u32 %v9188_v21, %v7989_v62 }
 0xc49   : > { %4103 = vmatpush.bf16.msra.mxu3 %v8022_v43 }
 0xc4a   : > { %4093 = vmatpush.bf16.msrb.mxu2 %v7926_v16  ;;  %v9183_v16 = vld [vmem:[#allocation10 + $0x194] sm:$0xf] }
 0xc4c   : > { %4120 = vmatpush.bf16.msrb.mxu0 %v7938_v10 }
 0xc4e   : > { %4094 = vmatpush.bf16.msrb.mxu2 %v7918_v18 }
 0xc50   : > { %7895 = vmatmul.msk.bf16.vlgmr.msrb.gmra.mxu3 %vm1869_vm3, %v3779_v19  ;;  %4121 = vmatpush.bf16.msrb.mxu0 %v7930_v14  ;;  %v8023_v19 = vld [vmem:[#allocation10 + $0x1f8] sm:$0xf0] }
 0xc51   : > { %v7975_v14 = vld [vmem:[#allocation10 + $0x198] sm:$0xf0] }
 0xc52   : > { %4095 = vmatpush.bf16.msrb.mxu2 %v7910_v36  ;;  %v7978_v31 = vor.u32 %v9183_v16, %v7975_v14  ;;  %v9182_v36 = vld [vmem:[#allocation10 + $0x184] sm:$0xf0]  ;;  %v9204_v14 = vld [vmem:[#allocation11 + $0xb8] sm:$0xff] }
 0xc53   : > { %v7966_v37 = vor.u32 %v9182_v36, %v7965_v23  ;;  %v9199_v23 = vld [vmem:[#allocation11 + $0x90] sm:$0xff] }
 0xc54   : > { %4122 = vmatpush.bf16.msrb.mxu0 %v7922_v25  ;;  %v9207_v36 = vld [vmem:[#allocation11 + $0xd0] sm:$0xff] }
 0xc56   : > { %4096 = vmatpush.bf16.msrb.mxu2 %v7902_v35 }
 0xc58   : > { %4123 = vmatpush.bf16.msrb.mxu0 %v7914_v9  ;;  %v9181_v9 = vld [vmem:[#allocation10 + $0x184] sm:$0xf] }
 0xc59   : > { %v7970_v28 = vor.u32 %v9181_v9, %v7967_v13  ;;  %v9198_v9 = vld [vmem:[#allocation11 + $0x88] sm:$0xff] }
 0xc5a   : > { %4357 = vmatpush.bf16.msra.mxu2 %v9204_v14  ;;  %v8028_v14 = vld [vmem:[%s10874_s12 + $0x2] sm:$0x3] }
 0xc5c   : > { %4124 = vmatpush.bf16.msrb.mxu0 %v7906_v39 }
 0xc9a   : > { %v3729_v44 = vpop.f32.mrf.mxu1 }
 0xca2   : > { %v3731_v45 = vpop.f32.mrf.mxu1 }
 0xca3   : > { %v9546_v20 = vpack.i.bf16 %v3731_v45, %v3729_v44  ;;  %v8013_v44 = vld [vmem:[#allocation10 + $0x1e0] sm:$0xf]  ;;  %v9194_v45 = vld [vmem:[#allocation10 + $0x1e4] sm:$0xf0] }
 0xca5   : > { %9547 = vrot.lane.b32.xlu2 %v9546_v20, %s10036_s6  ;;  %v8026_v20 = vor.u32 %v9195_v42, %v8023_v19 }
 0xca7   : > { %4131 = vmatpush.bf16.msra.mxu1 %v8026_v20 }
 0xcad   : > { %v3862_v46 = vpop.f32.mrf.mxu1 }
 0xcb5   : > { %v3864_v47 = vpop.f32.mrf.mxu1 }
 0xcb6   : > { %v9551_v48 = vpack.i.bf16 %v3864_v47, %v3862_v46  ;;  %v9193_v46 = vld [vmem:[#allocation10 + $0x1e4] sm:$0xf]  ;;  %v8015_v47 = vld [vmem:[#allocation10 + $0x1e8] sm:$0xf0] }
 0xcb7   : > { %v8018_v49 = vor.u32 %v9193_v46, %v8015_v47 }
 0xcb8   : > { %9552 = vrot.lane.b32.xlu0 %v9551_v48, %s10036_s6  ;;  %v8014_v48 = vor.u32 %v9194_v45, %v8013_v44  ;;  %v7898_v44 = vld [vmem:[%s10872_s10 + $0x2] sm:$0x3] }
 0xcb9   : > { %4132 = vmatpush.bf16.msra.mxu1 %v8018_v49  ;;  %v3926_v20 = vperm.slane %v7898_v44, 1 }
 0xcba   : > { %4104 = vmatpush.bf16.msra.mxu3 %v8014_v48  ;;  %v3925_v48 = vperm.slane %v7898_v44, 0  ;;  %v8155_v44 = vld [vmem:[#allocation13 + $0xf8] sm:$0xf0] }
 0xcbd   : > { %4133 = vmatpush.bf16.msra.mxu1 %v8010_v55 }
 0xcbe   : > { %4105 = vmatpush.bf16.msra.mxu3 %v8006_v54 }
 0xcc1   : > { %4134 = vmatpush.bf16.msra.mxu1 %v8002_v22 }
 0xcc2   : > { %4106 = vmatpush.bf16.msra.mxu3 %v7998_v60 }
 0xcc3   : > { %v3659_v10 = vpop.f32.mrf.mxu3 }
 0xcc5   : > { %4135 = vmatpush.bf16.msra.mxu1 %v7994_v2 }
 0xcc6   : > { %4107 = vmatpush.bf16.msra.mxu3 %v7990_v3 }
 0xcc9   : > { %4136 = vmatpush.bf16.msra.mxu1 %v7986_v11 }
 0xcca   : > { %4108 = vmatpush.bf16.msra.mxu3 %v7982_v29 }
 0xccb   : > { %v3661_v25 = vpop.f32.mrf.mxu3 }
 0xccd   : > { %4137 = vmatpush.bf16.msra.mxu1 %v7978_v31  ;;  %v9203_v31 = vld [vmem:[#allocation11 + $0xb0] sm:$0xff] }
 0xcce   : > { %4109 = vmatpush.bf16.msra.mxu3 %v7974_v17  ;;  %v9212_v17 = vld [vmem:[#allocation11 + $0xf8] sm:$0xff]  ;;  %4358 = vmatpush.bf16.msra.mxu2 %v9203_v31 }
 0xcd1   : > { %4138 = vmatpush.bf16.msra.mxu1 %v7970_v28 }
 0xcd2   : > { %4110 = vmatpush.bf16.msra.mxu3 %v7966_v37  ;;  %v9206_v37 = vld [vmem:[#allocation11 + $0xc8] sm:$0xff] }
 0xcd3   : > { %v3792_v35 = vpop.f32.mrf.mxu3 }
 0xcd6   : > { %4371 = vmatpush.bf16.msrb.mxu3 %v9212_v17 }
 0xcdb   : > { %v3794_v41 = vpop.f32.mrf.mxu3 }
 0xcff   : > { %v9548_v61 = vpop.permute.xlu2 %9547 }
 0xd00   : > { %v9550_v24 = vunpack.i.h.bf16 %v9548_v61  ;;  %v9549_v18 = vunpack.i.l.bf16 %v9548_v61  ;;  %v9211_v61 = vld [vmem:[#allocation11 + $0xf0] sm:$0xff] }
 0xd01   : > { %4372 = vmatpush.bf16.msrb.mxu3 %v9211_v61 }
 0xd02   : > { %v3884_v26 = vsel %vm935_vm2, %v3661_v25, %v9550_v24  ;;  %v3883_v4 = vsel %vm935_vm2, %v3659_v10, %v9549_v18  ;;  %v9202_v24 = vld [vmem:[#allocation11 + $0xa8] sm:$0xff]  ;;  %v9201_v25 = vld [vmem:[#allocation11 + $0xa0] sm:$0xff] }
 0xd03   : > { %v3920_v27 = vpack.c.bf16 %v3884_v26, %v3883_v4  ;;  %v9210_v18 = vld [vmem:[#allocation11 + $0xe8] sm:$0xff]  ;;  %4359 = vmatpush.bf16.msra.mxu2 %v9202_v24  ;;  %v9209_v26 = vld [vmem:[#allocation11 + $0xe0] sm:$0xff]  ;;  %v9200_v4 = vld [vmem:[#allocation11 + $0x98] sm:$0xff] }
 0xd05   : > { %4097 = vmatmul.bf16.vlgmr.msrb.gmra.mxu2 %v3920_v27  ;;  %4125 = vmatmul.bf16.vlgmr.msrb.gmra.mxu0 %v3920_v27  ;;  %v9208_v27 = vld [vmem:[#allocation11 + $0xd8] sm:$0xff] }
 0xd06   : > { %4373 = vmatpush.bf16.msrb.mxu3 %v9210_v18 }
 0xd07   : > { %4360 = vmatpush.bf16.msra.mxu2 %v9201_v25  ;;  %v4213_v25 = vperm.slane %v8028_v14, 0 }
 0xd0a   : > { %4374 = vmatpush.bf16.msrb.mxu3 %v9209_v26  ;;  %v4214_v26 = vperm.slane %v8028_v14, 1 }
 0xd0b   : > { %4361 = vmatpush.bf16.msra.mxu2 %v9200_v4 }
 0xd0e   : > { %4375 = vmatpush.bf16.msrb.mxu3 %v9208_v27 }
 0xd0f   : > { %4362 = vmatpush.bf16.msra.mxu2 %v9199_v23 }
 0xd12   : > { %4376 = vmatpush.bf16.msrb.mxu3 %v9207_v36 }
 0xd13   : > { %4363 = vmatpush.bf16.msra.mxu2 %v9198_v9 }
 0xd16   : > { %4377 = vmatpush.bf16.msrb.mxu3 %v9206_v37 }
 0xd2a   : > { %v9553_v38 = vpop.permute.xlu0 %9552 }
 0xd2b   : > { %v9555_v39 = vunpack.i.h.bf16 %v9553_v38  ;;  %v9554_v40 = vunpack.i.l.bf16 %v9553_v38  ;;  %v9197_v38 = vld [vmem:[#allocation11 + $0x80] sm:$0xff] }
 0xd2c   : > { %4364 = vmatpush.bf16.msra.mxu2 %v9197_v38 }
 0xd2d   : > { %v3886_v42 = vsel %vm935_vm2, %v3794_v41, %v9555_v39  ;;  %v3885_v43 = vsel %vm935_vm2, %v3792_v35, %v9554_v40  ;;  %v9205_v39 = vld [vmem:[#allocation11 + $0xc0] sm:$0xff]  ;;  %v8153_v40 = vld [vmem:[#allocation13 + $0xf0] sm:$0xf]  ;;  %v9228_v41 = vld [vmem:[#allocation13 + $0xf4] sm:$0xf0] }
 0xd2e   : > { %v3921_v19 = vpack.c.bf16 %v3886_v42, %v3885_v43  ;;  %4378 = vmatpush.bf16.msrb.mxu3 %v9205_v39  ;;  %v9227_v42 = vld [vmem:[#allocation13 + $0xf4] sm:$0xf] }
 0xd30   : > { %4111 = vmatmul.bf16.vlgmr.msra.gmra.mxu3 %v3921_v19  ;;  %4139 = vmatmul.bf16.vlgmr.msra.gmra.mxu1 %v3921_v19  ;;  %v8154_v19 = vor.u32 %v9228_v41, %v8153_v40  ;;  %v8121_v40 = vld [vmem:[#allocation13 + $0xb0] sm:$0xf]  ;;  %v9220_v41 = vld [vmem:[#allocation13 + $0xb4] sm:$0xf0] }
 0xd32   : > { %4492 = vmatpush.bf16.msra.mxu0 %v8154_v19  ;;  %v8113_v19 = vld [vmem:[#allocation13 + $0xa0] sm:$0xf] }
 0xd82   : > { %v4126_v45 = vpop.f32.mrf.mxu0 }
 0xd83   : > { %v4127_v49 = vadd.f32 %v4126_v45, %v3926_v20  ;;  %v8145_v45 = vld [vmem:[#allocation13 + $0xe0] sm:$0xf] }
 0xd88   : > { %v4098_v46 = vpop.f32.mrf.mxu2 }
 0xd89   : > { %v4099_v50 = vadd.f32 %v4098_v46, %v3925_v48 }
 0xd8a   : > { %v4128_v54 = vpop.f32.mrf.mxu0 }
 0xd8b   : > { %v4129_v59 = vadd.f32 %v4128_v54, %v3926_v20  ;;  %v9226_v20 = vld [vmem:[#allocation13 + $0xe4] sm:$0xf0]  ;;  %v8137_v54 = vld [vmem:[#allocation13 + $0xd0] sm:$0xf] }
 0xd90   : > { %v4100_v57 = vpop.f32.mrf.mxu2 }
 0xd91   : > { %v4101_v22 = vadd.f32 %v4100_v57, %v3925_v48  ;;  %v9225_v48 = vld [vmem:[#allocation13 + $0xe4] sm:$0xf]  ;;  %v9223_v57 = vld [vmem:[#allocation13 + $0xd4] sm:$0xf] }
 0xdad   : > { %v4140_v47 = vpop.f32.mrf.mxu1 }
 0xdae   : > { %v4141_v51 = vadd.f32 %v4140_v47, %v4127_v49  ;;  %v8158_v47 = vor.u32 %v9227_v42, %v8155_v44  ;;  %v8147_v49 = vld [vmem:[#allocation13 + $0xe8] sm:$0xf0]  ;;  %v9219_v42 = vld [vmem:[#allocation13 + $0xb4] sm:$0xf]  ;;  %v9218_v44 = vld [vmem:[#allocation13 + $0xa4] sm:$0xf0] }
 0xdb0   : > { %v4146_v55 = vadd.f32 %v4141_v51, %v10494_v32  ;;  %4506 = vmatpush.bf16.msrb.mxu1 %v8158_v47 }
 0xdb3   : > { %v4112_v52 = vpop.f32.mrf.mxu3 }
 0xdb4   : > { %v4113_v53 = vadd.f32 %v4112_v52, %v4099_v50  ;;  %v8146_v50 = vor.u32 %v9226_v20, %v8145_v45  ;;  %v9217_v45 = vld [vmem:[#allocation13 + $0xa4] sm:$0xf]  ;;  %v8114_v20 = vor.u32 %v9218_v44, %v8113_v19 }
 0xdb5   : > { %v4142_v58 = vpop.f32.mrf.mxu1 }
 0xdb6   : > { %v4145_v56 = vadd.f32 %v4113_v53, %v10492_v30  ;;  %v4143_v62 = vadd.f32 %v4142_v58, %v4129_v59  ;;  %v8150_v53 = vor.u32 %v9225_v48, %v8147_v49  ;;  %v8139_v58 = vld [vmem:[#allocation13 + $0xd8] sm:$0xf0]  ;;  %4493 = vmatpush.bf16.msra.mxu0 %v8146_v50  ;;  %v8105_v48 = vld [vmem:[#allocation13 + $0x90] sm:$0xf]  ;;  %v9216_v49 = vld [vmem:[#allocation13 + $0x94] sm:$0xf0] }
 0xdb7   : > { %v9215_v50 = vld [vmem:[#allocation13 + $0x94] sm:$0xf] }
 0xdb8   : > { %v4153_v60 = vadd.f32 %v4146_v55, %v4145_v56  ;;  %v4148_v0 = vadd.f32 %v4143_v62, %v10498_v34  ;;  %4507 = vmatpush.bf16.msrb.mxu1 %v8150_v53  ;;  %v8129_v62 = vld [vmem:[#allocation13 + $0xc0] sm:$0xf] }
 0xdba   : > { %4154 = vadd.xlane.f32.xlu2 %v4153_v60 }
 0xdbb   : > { %v4114_v21 = vpop.f32.mrf.mxu3 }
 0xdbc   : > { %v4115_v63 = vadd.f32 %v4114_v21, %v4101_v22  ;;  %v8142_v22 = vor.u32 %v9223_v57, %v8139_v58  ;;  %v9222_v21 = vld [vmem:[#allocation13 + $0xc4] sm:$0xf0]  ;;  %v8099_v58 = vld [vmem:[#allocation13 + $0x88] sm:$0xf0] }
 0xdbe   : > { %v4147_v3 = vadd.f32 %v4115_v63, %v10496_v33  ;;  %4508 = vmatpush.bf16.msrb.mxu1 %v8142_v22 }
 0xdc0   : > { %v4156_v2 = vadd.f32 %v4148_v0, %v4147_v3 }
 0xdc2   : > { %4157 = vadd.xlane.f32.xlu0 %v4156_v2 }
 0xe2d   : > { %v4155_v5 = vpop.xlane.xlu2 %4154 }
 0xe2e   : > { %v4159_v32 = vmul.f32 %v4155_v5, %v10400_v1  ;;  %v8130_v5 = vor.u32 %v9222_v21, %v8129_v62  ;;  %v9569_v62 = vld [vmem:[%s10876_s14 + $0x1] ss:$0 sm:$0xff] }
 0xe30   : > { %v10575_v6 = vsub.f32 %v4145_v56, %v4159_v32  ;;  %v10577_v30 = vsub.f32 %v4146_v55, %v4159_v32  ;;  %v9224_v55 = vld [vmem:[#allocation13 + $0xd4] sm:$0xf0] }
 0xe31   : > { %v8138_v60 = vor.u32 %v9224_v55, %v8137_v54  ;;  %v8097_v54 = vld [vmem:[#allocation13 + $0x80] sm:$0xf]  ;;  %v9214_v55 = vld [vmem:[#allocation13 + $0x84] sm:$0xf0] }
 0xe32   : > { %v4165_v7 = vmul.f32 %v10575_v6, %v10575_v6  ;;  %v4166_v8 = vmul.f32 %v10577_v30, %v10577_v30  ;;  %v8098_v57 = vor.u32 %v9214_v55, %v8097_v54  ;;  %v9259_v54 = vld [vmem:[#allocation8 + $0x6f4] sm:$0xf] }
 0xe33   : > { %4494 = vmatpush.bf16.msra.mxu0 %v8138_v60 }
 0xe34   : > { %v4169_v10 = vadd.f32 %v4166_v8, %v4165_v7 }
 0xe35   : > { %v4158_v29 = vpop.xlane.xlu0 %4157 }
 0xe36   : > { %v4160_v34 = vmul.f32 %v4158_v29, %v10400_v1  ;;  %4170 = vadd.xlane.f32.xlu1 %v4169_v10 }
 0xe37   : > { %4495 = vmatpush.bf16.msra.mxu0 %v8130_v5 }
 0xe38   : > { %v10584_v33 = vsub.f32 %v4147_v3, %v4160_v34  ;;  %v10586_v11 = vsub.f32 %v4148_v0, %v4160_v34  ;;  %v9221_v0 = vld [vmem:[#allocation13 + $0xc4] sm:$0xf]  ;;  %v8131_v3 = vld [vmem:[#allocation13 + $0xc8] sm:$0xf0]  ;;  %v8027_v34 = vld [vmem:[%s10873_s11 + $0x2] sm:$0x3] }
 0xe39   : > { %v8134_v7 = vor.u32 %v9221_v0, %v8131_v3  ;;  %v4204_v17 = vperm.slane %v8027_v34, 0  ;;  %v4205_v31 = vperm.slane %v8027_v34, 1 }
 0xe3a   : > { %v4167_v12 = vmul.f32 %v10584_v33, %v10584_v33  ;;  %v4168_v15 = vmul.f32 %v10586_v11, %v10586_v11 }
 0xe3b   : > { %4509 = vmatpush.bf16.msrb.mxu1 %v8134_v7 }
 0xe3c   : > { %v4172_v16 = vadd.f32 %v4168_v15, %v4167_v12 }
 0xe3e   : > { %4173 = vadd.xlane.f32.xlu1 %v4172_v16 }
 0xea9   : > { %v4171_v13 = vpop.xlane.xlu1 %4170 }
 0xeaa   : > { %v4175_v28 = vmul.f32 %v4171_v13, %v10400_v1 }
 0xeac   : > { %v4177_v35 = vadd.f32 1e-05, %v4175_v28 }
 0xeae   : > { %9646 = vrsqrt.f32 %v4177_v35  ;;  %vm4185_vm4 = vweird.f32 %v4177_v35 }
 0xeb1   : > { %v4174_v43 = vpop.xlane.xlu1 %4173 }
 0xeb2   : > { %v4176_v46 = vmul.f32 %v4174_v43, %v10400_v1  ;;  %v8123_v43 = vld [vmem:[#allocation13 + $0xb8] sm:$0xf0] }
 0xeb4   : > { %v9647_v51 = vpop.eup %9646  ;;  %v4178_v52 = vadd.f32 1e-05, %v4176_v46  ;;  %v8115_v46 = vld [vmem:[#allocation13 + $0xa8] sm:$0xf0] }
 0xeb5   : > { %v4180_v56 = vmul.f32 %v9647_v51, %v4177_v35  ;;  %vm4186_vm1 = vweird.f32 %v9647_v51  ;;  %v8118_v47 = vor.u32 %v9217_v45, %v8115_v46  ;;  %v9265_v45 = vld [vmem:[#allocation8 + $0x724] sm:$0xf] }
 0xeb6   : > { %9648 = vrsqrt.f32 %v4178_v52  ;;  %vm4187_vm5 = vmor %vm4185_vm4, %vm4186_vm1  ;;  %vm4195_vm7 = vweird.f32 %v4178_v52  ;;  %v9313_v46 = vld [vmem:[#allocation8 + $0x8a4] sm:$0xf] }
 0xeb7   : > { %v4181_v59 = vmul.f32 %v9647_v51, %v4180_v56  ;;  %v9213_v56 = vld [vmem:[#allocation13 + $0x84] sm:$0xf] }
 0xeb9   : > { %v4182_v63 = vmul.f32 0.5, %v4181_v59  ;;  %v8102_v59 = vor.u32 %v9213_v56, %v8099_v58  ;;  %v8286_v56 = vld [vmem:[#allocation8 + $0x708] sm:$0xf0] }
 0xeba   : > { %v8478_v58 = vld [vmem:[#allocation8 + $0x888] sm:$0xf0] }
 0xebb   : > { %v4183_v2 = vsub.f32 1.5, %v4182_v63 }
 0xebc   : > { %v9649_v32 = vpop.eup %9648 }
 0xebd   : > { %v4184_v8 = vmul.f32 %v9647_v51, %v4183_v2  ;;  %v4190_v10 = vmul.f32 %v9649_v32, %v4178_v52  ;;  %vm4196_vm6 = vweird.f32 %v9649_v32  ;;  %v8107_v52 = vld [vmem:[#allocation13 + $0x98] sm:$0xf0] }
 0xebe   : > { %vm4197_vm8 = vmor %vm4195_vm7, %vm4196_vm6  ;;  %v8110_v53 = vor.u32 %v9215_v50, %v8107_v52  ;;  %v9262_v50 = vld [vmem:[#allocation8 + $0x704] sm:$0xf0]  ;;  %v8476_v52 = vld [vmem:[#allocation8 + $0x870] sm:$0xf] }
 0xebf   : > { %v4191_v29 = vmul.f32 %v9649_v32, %v4190_v10  ;;  %v4188_v12 = vsel %vm4187_vm5, %v9647_v51, %v4184_v8  ;;  %v8106_v51 = vor.u32 %v9216_v49, %v8105_v48  ;;  %v8094_v10 = vld [vmem:[%s10878_s16 + $0x2] sm:$0x3]  ;;  %v8284_v49 = vld [vmem:[#allocation8 + $0x6f0] sm:$0xf] }
 0xec0   : > { %v4199_v61 = vmul.f32 %v4188_v12, %v10575_v6  ;;  %v4200_v24 = vmul.f32 %v4188_v12, %v10577_v30  ;;  %v4409_v34 = vperm.slane %v8094_v10, 1  ;;  %v8502_v48 = vld [vmem:[#allocation8 + $0x8b8] sm:$0xf0]  ;;  %v8285_v55 = vor.u32 %v9262_v50, %v8284_v49  ;;  %v8188_v49 = vld [vmem:[#allocation8 + $0x630] sm:$0xf] }
 0xec1   : > { %v4192_v15 = vmul.f32 0.5, %v4191_v29  ;;  %v4408_v29 = vperm.slane %v8094_v10, 0  ;;  %v9238_v50 = vld [vmem:[#allocation8 + $0x644] sm:$0xf0] }
 0xec2   : > { %v4208_v27 = vmul.f32 %v4204_v17, %v4199_v61  ;;  %v4209_v23 = vmul.f32 %v4205_v31, %v4200_v24 }
 0xec3   : > { %v4193_v16 = vsub.f32 1.5, %v4192_v15 }
 0xec4   : > { %v4217_v28 = vadd.f32 %v4213_v25, %v4208_v27  ;;  %v4218_v35 = vadd.f32 %v4214_v26, %v4209_v23 }
 0xec5   : > { %v4194_v18 = vmul.f32 %v9649_v32, %v4193_v16 }
 0xec7   : > { %v4198_v4 = vsel %vm4197_vm8, %v9649_v32, %v4194_v18 }
 0xec8   : > { %v4201_v36 = vmul.f32 %v4198_v4, %v10584_v33  ;;  %v4202_v9 = vmul.f32 %v4198_v4, %v10586_v11  ;;  %v8122_v33 = vor.u32 %v9220_v41, %v8121_v40  ;;  %v8126_v11 = vor.u32 %v9219_v42, %v8123_v43  ;;  %v9319_v41 = vld [vmem:[#allocation8 + $0x8d4] sm:$0xf]  ;;  %v8526_v42 = vld [vmem:[#allocation8 + $0x8e8] sm:$0xf0]  ;;  %v8500_v43 = vld [vmem:[#allocation8 + $0x8a0] sm:$0xf] }
 0xeca   : > { %v4210_v37 = vmul.f32 %v4204_v17, %v4201_v36  ;;  %v4211_v13 = vmul.f32 %v4205_v31, %v4202_v9  ;;  %4496 = vmatpush.bf16.msra.mxu0 %v8122_v33  ;;  %4510 = vmatpush.bf16.msrb.mxu1 %v8126_v11  ;;  %v8332_v36 = vld [vmem:[#allocation8 + $0x750] sm:$0xf]  ;;  %v9274_v9 = vld [vmem:[#allocation8 + $0x764] sm:$0xf0]  ;;  %v8529_v33 = vor.u32 %v9319_v41, %v8526_v42  ;;  %v9316_v11 = vld [vmem:[#allocation8 + $0x8b4] sm:$0xf0] }
 0xecb   : > { %v8501_v44 = vor.u32 %v9316_v11, %v8500_v43  ;;  %v9244_v43 = vld [vmem:[#allocation8 + $0x674] sm:$0xf0]  ;;  %v8404_v11 = vld [vmem:[#allocation8 + $0x7e0] sm:$0xf] }
 0xecc   : > { %v10604_v38 = vadd.f32 %v4213_v25, %v4210_v37  ;;  %v10606_v6 = vadd.f32 %v4214_v26, %v4211_v13  ;;  %v8524_v37 = vld [vmem:[#allocation8 + $0x8d0] sm:$0xf]  ;;  %v8333_v13 = vor.u32 %v9274_v9, %v8332_v36 }
 0xece   : > { %v4254_v30 = vpack.c.bf16 %v10604_v38, %v4217_v28  ;;  %v4255_v39 = vpack.c.bf16 %v10606_v6, %v4218_v35  ;;  %4497 = vmatpush.bf16.msra.mxu0 %v8114_v20  ;;  %4511 = vmatpush.bf16.msrb.mxu1 %v8118_v47  ;;  %v8310_v20 = vld [vmem:[#allocation8 + $0x738] sm:$0xf0] }
 0xecf   : > { %5194 = vmatpush.bf16.msrb.mxu2 %v8333_v13  ;;  %v8313_v47 = vor.u32 %v9265_v45, %v8310_v20  ;;  %v9241_v45 = vld [vmem:[#allocation8 + $0x664] sm:$0xf]  ;;  %v8214_v20 = vld [vmem:[#allocation8 + $0x678] sm:$0xf0] }
 0xed0   : > { %4365 = vmatmul.bf16.vlgmr.msra.gmra.mxu2 %v4254_v30  ;;  %4379 = vmatmul.bf16.vlgmr.msrb.gmra.mxu3 %v4255_v39  ;;  %v8334_v30 = vld [vmem:[#allocation8 + $0x768] sm:$0xf0] }
 0xed2   : > { %4498 = vmatpush.bf16.msra.mxu0 %v8106_v51  ;;  %4512 = vmatpush.bf16.msrb.mxu1 %v8110_v53  ;;  %v8505_v51 = vor.u32 %v9313_v46, %v8502_v48  ;;  %v9310_v53 = vld [vmem:[#allocation8 + $0x884] sm:$0xf0]  ;;  %v8217_v46 = vor.u32 %v9241_v45, %v8214_v20  ;;  %v9311_v45 = vld [vmem:[#allocation8 + $0x88c] sm:$0xf0]  ;;  %v9260_v20 = vld [vmem:[#allocation8 + $0x6fc] sm:$0xf] }
 0xed6   : > { %4499 = vmatpush.bf16.msra.mxu0 %v8098_v57  ;;  %4513 = vmatpush.bf16.msrb.mxu1 %v8102_v59  ;;  %v9307_v57 = vld [vmem:[#allocation8 + $0x874] sm:$0xf]  ;;  %v8477_v59 = vor.u32 %v9310_v53, %v8476_v52  ;;  %v8189_v52 = vor.u32 %v9238_v50, %v8188_v49  ;;  %v9286_v53 = vld [vmem:[#allocation8 + $0x7c4] sm:$0xf0] }
 0xed7   : > { %v8268_v50 = vld [vmem:[#allocation8 + $0x6c8] sm:$0xf] }
 0xeda   : > { %5236 = vmatpush.bf16.msra.mxu1 %v8529_v33 }
 0xede   : > { %5237 = vmatpush.bf16.msra.mxu1 %v8505_v51  ;;  %v8380_v51 = vld [vmem:[#allocation8 + $0x7b0] sm:$0xf] }
 0xf53   : > { %v4366_v60 = vpop.f32.mrf.mxu2  ;;  %v4380_v22 = vpop.f32.mrf.mxu3 }
 0xf54   : > { %v4367_v21 = vadd.f32 %v9569_v62, %v4366_v60  ;;  %v8289_v60 = vor.u32 %v9259_v54, %v8286_v56  ;;  %v9235_v54 = vld [vmem:[#allocation8 + $0x634] sm:$0xf]  ;;  %v8381_v56 = vor.u32 %v9286_v53, %v8380_v51  ;;  %v9257_v51 = vld [vmem:[#allocation8 + $0x6dc] sm:$0xf0] }
 0xf55   : > { %v8269_v53 = vor.u32 %v9257_v51, %v8268_v50  ;;  %v9278_v51 = vld [vmem:[#allocation8 + $0x78c] sm:$0xf] }
 0xf56   : > { %v4381_v0 = vadd.f32 %v4380_v22, %v4367_v21  ;;  %v8260_v22 = vld [vmem:[#allocation8 + $0x6c0] sm:$0xf] }
 0xf57   : > { %v8452_v21 = vld [vmem:[#allocation8 + $0x840] sm:$0xf] }
 0xf58   : > { %v4385_v32 = vmax.f32 %v4381_v0, 0.0  ;;  %v9304_v0 = vld [vmem:[#allocation8 + $0x854] sm:$0xf0] }
 0xf5b   : > { %v4368_v63 = vpop.f32.mrf.mxu2  ;;  %v4382_v2 = vpop.f32.mrf.mxu3 }
 0xf5c   : > { %v4369_v3 = vadd.f32 %v9569_v62, %v4368_v63  ;;  %v9256_v62 = vld [vmem:[#allocation8 + $0x6d4] sm:$0xf0]  ;;  %v8481_v63 = vor.u32 %v9307_v57, %v8478_v58  ;;  %v9283_v58 = vld [vmem:[#allocation8 + $0x7b4] sm:$0xf] }
 0xf5e   : > { %v4383_v5 = vadd.f32 %v4382_v2, %v4369_v3  ;;  %v9253_v3 = vld [vmem:[#allocation8 + $0x6c4] sm:$0xf]  ;;  %v8262_v2 = vld [vmem:[#allocation8 + $0x6d8] sm:$0xf0]  ;;  %5238 = vmatpush.bf16.msra.mxu1 %v8481_v63 }
 0xf5f   : > { %v8265_v10 = vor.u32 %v9253_v3, %v8262_v2  ;;  %v9229_v3 = vld [vmem:[#allocation8 + $0x604] sm:$0xf]  ;;  %v8166_v2 = vld [vmem:[#allocation8 + $0x618] sm:$0xf0] }
 0xf60   : > { %v4386_v7 = vmax.f32 %v4383_v5, 0.0  ;;  %v9301_v5 = vld [vmem:[#allocation8 + $0x844] sm:$0xf] }
 0xf62   : > { %v4404_v8 = vpack.c.bf16 %v4386_v7, %v4385_v32  ;;  %v8454_v32 = vld [vmem:[#allocation8 + $0x858] sm:$0xf0]  ;;  %v8261_v7 = vor.u32 %v9256_v62, %v8260_v22  ;;  %v8164_v22 = vld [vmem:[#allocation8 + $0x600] sm:$0xf]  ;;  %v9232_v62 = vld [vmem:[#allocation8 + $0x614] sm:$0xf0] }
 0xf63   : > { %v8165_v63 = vor.u32 %v9232_v62, %v8164_v22  ;;  %v8244_v62 = vld [vmem:[#allocation8 + $0x698] sm:$0xf] }
 0xf64   : > { %4500 = vmatmul.bf16.vlgmr.msra.gmra.mxu0 %v4404_v8  ;;  %4514 = vmatmul.bf16.vlgmr.msrb.gmra.mxu1 %v4404_v8  ;;  %v8453_v8 = vor.u32 %v9304_v0, %v8452_v21  ;;  %v8356_v21 = vld [vmem:[#allocation8 + $0x780] sm:$0xf]  ;;  %v9280_v0 = vld [vmem:[#allocation8 + $0x794] sm:$0xf0] }
 0xfe1   : > { %v4501_v12 = vpop.f32.mrf.mxu0  ;;  %v4515_v15 = vpop.f32.mrf.mxu1 }
 0xfe2   : > { %v4502_v16 = vadd.f32 %v4501_v12, %v4408_v29  ;;  %v4516_v14 = vadd.f32 %v4515_v15, %v4409_v34  ;;  %v8428_v12 = vld [vmem:[#allocation8 + $0x810] sm:$0xf]  ;;  %v8457_v15 = vor.u32 %v9301_v5, %v8454_v32  ;;  %v8357_v5 = vor.u32 %v9280_v0, %v8356_v21 }
 0xfe3   : > { %v8169_v32 = vor.u32 %v9229_v3, %v8166_v2  ;;  %v9251_v21 = vld [vmem:[#allocation8 + $0x6ac] sm:$0xf0]  ;;  %v9248_v2 = vld [vmem:[#allocation8 + $0x69c] sm:$0xf] }
 0xfe4   : > { %v10616_v17 = vadd.f32 %v4502_v16, %v4217_v28  ;;  %v10618_v31 = vadd.f32 %v4516_v14, %v4218_v35  ;;  %v9322_v28 = vld [vmem:[#allocation8 + $0x8e4] sm:$0xf0]  ;;  %v9271_v35 = vld [vmem:[#allocation8 + $0x754] sm:$0xf]  ;;  %5239 = vmatpush.bf16.msra.mxu1 %v8457_v15  ;;  %v9323_v15 = vld [vmem:[#allocation8 + $0x8ec] sm:$0xf0]  ;;  %v8245_v0 = vor.u32 %v9251_v21, %v8244_v62 }
 0xfe5   : > { %v8525_v39 = vor.u32 %v9322_v28, %v8524_v37  ;;  %v8337_v40 = vor.u32 %v9271_v35, %v8334_v30  ;;  %v9298_v16 = vld [vmem:[#allocation8 + $0x824] sm:$0xf0]  ;;  %v9247_v14 = vld [vmem:[#allocation8 + $0x694] sm:$0xf]  ;;  %v9299_v3 = vld [vmem:[#allocation8 + $0x82c] sm:$0xf0] }
 0xfe6   : > { %v4528_v61 = vadd.f32 %v10618_v31, %v10616_v17  ;;  %v8429_v36 = vor.u32 %v9298_v16, %v8428_v12  ;;  %v8532_v12 = vld [vmem:[#allocation8 + $0x8d8] sm:$0xf] }
 0xfe7   : > { %5208 = vmatpush.bf16.msra.mxu3 %v8525_v39  ;;  %5222 = vmatpush.bf16.msrb.mxu0 %v8337_v40 }
 0xfe8   : > { %4529 = vadd.xlane.f32.xlu1 %v4528_v61  ;;  %v8238_v61 = vld [vmem:[#allocation8 + $0x6a8] sm:$0xf0] }
 0xfe9   : > { %v4503_v24 = vpop.f32.mrf.mxu0  ;;  %v4517_v18 = vpop.f32.mrf.mxu1  ;;  %v8241_v9 = vor.u32 %v9247_v14, %v8238_v61  ;;  %v8533_v14 = vor.u32 %v9323_v15, %v8532_v12  ;;  %v9272_v61 = vld [vmem:[#allocation8 + $0x75c] sm:$0xf]  ;;  %v9245_v12 = vld [vmem:[#allocation8 + $0x67c] sm:$0xf0]  ;;  %v8412_v15 = vld [vmem:[#allocation8 + $0x7e8] sm:$0xf] }
 0xfea   : > { %v4504_v25 = vadd.f32 %v4503_v24, %v4408_v29  ;;  %v4518_v26 = vadd.f32 %v4517_v18, %v4409_v34  ;;  %v8236_v29 = vld [vmem:[#allocation8 + $0x690] sm:$0xf]  ;;  %v9250_v34 = vld [vmem:[#allocation8 + $0x6a4] sm:$0xf0]  ;;  %v9295_v24 = vld [vmem:[#allocation8 + $0x814] sm:$0xf] }
 0xfeb   : > { %5209 = vmatpush.bf16.msra.mxu3 %v8501_v44  ;;  %5223 = vmatpush.bf16.msrb.mxu0 %v8313_v47  ;;  %v8430_v18 = vld [vmem:[#allocation8 + $0x828] sm:$0xf0]  ;;  %v9292_v44 = vld [vmem:[#allocation8 + $0x7f4] sm:$0xf0]  ;;  %v9289_v47 = vld [vmem:[#allocation8 + $0x7e4] sm:$0xf] }
 0xfec   : > { %v10623_v4 = vadd.f32 %v4504_v25, %v10604_v38  ;;  %v10626_v27 = vadd.f32 %v4518_v26, %v10606_v6  ;;  %v8308_v38 = vld [vmem:[#allocation8 + $0x720] sm:$0xf]  ;;  %v9268_v6 = vld [vmem:[#allocation8 + $0x734] sm:$0xf0]  ;;  %v8237_v26 = vor.u32 %v9250_v34, %v8236_v29  ;;  %v8433_v37 = vor.u32 %v9295_v24, %v8430_v18  ;;  %v9275_v34 = vld [vmem:[#allocation8 + $0x76c] sm:$0xf0] }
 0xfed   : > { %v8309_v19 = vor.u32 %v9268_v6, %v8308_v38  ;;  %v8212_v6 = vld [vmem:[#allocation8 + $0x660] sm:$0xf]  ;;  %v8342_v24 = vld [vmem:[#allocation8 + $0x770] sm:$0xf0]  ;;  %v9320_v18 = vld [vmem:[#allocation8 + $0x8dc] sm:$0xf] }
 0xfee   : > { %v4531_v23 = vadd.f32 %v10626_v27, %v10623_v4  ;;  %5240 = vmatpush.bf16.msra.mxu1 %v8433_v37 }
 0xfef   : > { %5195 = vmatpush.bf16.msrb.mxu2 %v8309_v19  ;;  %5210 = vmatpush.bf16.msra.mxu3 %v8477_v59  ;;  %v8213_v19 = vor.u32 %v9244_v43, %v8212_v6  ;;  %v8382_v59 = vld [vmem:[#allocation8 + $0x7c8] sm:$0xf0]  ;;  %v8292_v43 = vld [vmem:[#allocation8 + $0x6f8] sm:$0xf] }
 0xff0   : > { %4532 = vadd.xlane.f32.xlu2 %v4531_v23  ;;  %5224 = vmatpush.bf16.msrb.mxu0 %v8289_v60  ;;  %v8385_v60 = vor.u32 %v9283_v58, %v8382_v59  ;;  %v9302_v59 = vld [vmem:[#allocation8 + $0x84c] sm:$0xf] }
 0xff3   : > { %5196 = vmatpush.bf16.msrb.mxu2 %v8285_v55  ;;  %5211 = vmatpush.bf16.msra.mxu3 %v8453_v8  ;;  %v8190_v55 = vld [vmem:[#allocation8 + $0x648] sm:$0xf0]  ;;  %v8358_v8 = vld [vmem:[#allocation8 + $0x798] sm:$0xf0] }
 0xff4   : > { %5225 = vmatpush.bf16.msrb.mxu0 %v8265_v10  ;;  %v8193_v57 = vor.u32 %v9235_v54, %v8190_v55  ;;  %v8340_v10 = vld [vmem:[#allocation8 + $0x758] sm:$0xf]  ;;  %v9305_v54 = vld [vmem:[#allocation8 + $0x85c] sm:$0xf0]  ;;  %v9254_v55 = vld [vmem:[#allocation8 + $0x6cc] sm:$0xf] }
 0xff5   : > { %v8341_v16 = vor.u32 %v9275_v34, %v8340_v10  ;;  %v8438_v10 = vld [vmem:[#allocation8 + $0x830] sm:$0xf0]  ;;  %v8220_v34 = vld [vmem:[#allocation8 + $0x668] sm:$0xf] }
 0xff7   : > { %5197 = vmatpush.bf16.msrb.mxu2 %v8261_v7  ;;  %5212 = vmatpush.bf16.msra.mxu3 %v8429_v36  ;;  %v9277_v7 = vld [vmem:[#allocation8 + $0x784] sm:$0xf]  ;;  %v9269_v36 = vld [vmem:[#allocation8 + $0x73c] sm:$0xf0] }
 0xff8   : > { %5226 = vmatpush.bf16.msrb.mxu0 %v8241_v9  ;;  %v8361_v29 = vor.u32 %v9277_v7, %v8358_v8  ;;  %v9296_v8 = vld [vmem:[#allocation8 + $0x81c] sm:$0xf] }
 0xffb   : > { %5198 = vmatpush.bf16.msrb.mxu2 %v8237_v26  ;;  %v8534_v26 = vld [vmem:[#allocation8 + $0x8f0] sm:$0xf0] }
 0xffc   : > { %5227 = vmatpush.bf16.msrb.mxu0 %v8217_v46  ;;  %v8537_v9 = vor.u32 %v9320_v18, %v8534_v26  ;;  %v9290_v26 = vld [vmem:[#allocation8 + $0x7ec] sm:$0xf] }
 0xfff   : > { %5199 = vmatpush.bf16.msrb.mxu2 %v8213_v19  ;;  %v8484_v19 = vld [vmem:[#allocation8 + $0x878] sm:$0xf] }
0x1000   : > { %5228 = vmatpush.bf16.msrb.mxu0 %v8193_v57  ;;  %v8485_v46 = vor.u32 %v9311_v45, %v8484_v19  ;;  %v8390_v19 = vld [vmem:[#allocation8 + $0x7d0] sm:$0xf0]  ;;  %v8172_v45 = vld [vmem:[#allocation8 + $0x608] sm:$0xf] }
0x1003   : > { %5200 = vmatpush.bf16.msrb.mxu2 %v8189_v52  ;;  %v8460_v52 = vld [vmem:[#allocation8 + $0x848] sm:$0xf] }
0x1004   : > { %5229 = vmatpush.bf16.msrb.mxu0 %v8169_v32  ;;  %v8461_v57 = vor.u32 %v9305_v54, %v8460_v52  ;;  %v8366_v52 = vld [vmem:[#allocation8 + $0x7a0] sm:$0xf0] }
0x1005   : > { %v8369_v54 = vor.u32 %v9278_v51, %v8366_v52  ;;  %v9264_v51 = vld [vmem:[#allocation8 + $0x714] sm:$0xf0] }
0x1007   : > { %5201 = vmatpush.bf16.msrb.mxu2 %v8165_v63  ;;  %v8436_v63 = vld [vmem:[#allocation8 + $0x818] sm:$0xf] }
0x1008   : > { %v8437_v32 = vor.u32 %v9299_v3, %v8436_v63  ;;  %v8160_v63 = vld [vmem:[%s10932_s18 + $0x2] sm:$0x3] }
0x100b   : > { %5250 = vmatpush.bf16.msra.mxu2 %v8341_v16  ;;  %v8221_v16 = vor.u32 %v9245_v12, %v8220_v34 }
0x105b   : > { %v4530_v25 = vpop.xlane.xlu1 %4529 }
0x105c   : > { %v4534_v23 = vmul.f32 %v4530_v25, %v10400_v1  ;;  %v8345_v25 = vor.u32 %v9272_v61, %v8342_v24  ;;  %v9242_v61 = vld [vmem:[#allocation8 + $0x66c] sm:$0xf]  ;;  %v8222_v24 = vld [vmem:[#allocation8 + $0x680] sm:$0xf0] }
0x105e   : > { %v10632_v13 = vsub.f32 %v10616_v17, %v4534_v23  ;;  %v10635_v28 = vsub.f32 %v10618_v31, %v4534_v23  ;;  %v8316_v23 = vld [vmem:[#allocation8 + $0x728] sm:$0xf]  ;;  %5278 = vmatpush.bf16.msra.mxu0 %v8345_v25  ;;  %v8225_v25 = vor.u32 %v9242_v61, %v8222_v24 }
0x105f   : > { %v8317_v37 = vor.u32 %v9269_v36, %v8316_v23  ;;  %v8414_v23 = vld [vmem:[#allocation8 + $0x800] sm:$0xf0] }
0x1060   : > { %v4540_v35 = vmul.f32 %v10632_v13, %v10632_v13  ;;  %v4541_v30 = vmul.f32 %v10635_v28, %v10635_v28 }
0x1061   : > { %5251 = vmatpush.bf16.msra.mxu2 %v8317_v37 }
0x1062   : > { %v4544_v39 = vadd.f32 %v4541_v30, %v4540_v35  ;;  %v8508_v35 = vld [vmem:[#allocation8 + $0x8a8] sm:$0xf]  ;;  %v9317_v30 = vld [vmem:[#allocation8 + $0x8bc] sm:$0xf0] }
0x1063   : > { %v4533_v40 = vpop.xlane.xlu2 %4532 }
0x1064   : > { %v4535_v41 = vmul.f32 %v4533_v40, %v10400_v1  ;;  %4545 = vadd.xlane.f32.xlu1 %v4544_v39  ;;  %v9266_v39 = vld [vmem:[#allocation8 + $0x72c] sm:$0xf]  ;;  %v8509_v40 = vor.u32 %v9317_v30, %v8508_v35  ;;  %v8196_v35 = vld [vmem:[#allocation8 + $0x638] sm:$0xf]  ;;  %v9239_v30 = vld [vmem:[#allocation8 + $0x64c] sm:$0xf0] }
0x1066   : > { %v10643_v17 = vsub.f32 %v10623_v4, %v4535_v41  ;;  %v10646_v31 = vsub.f32 %v10626_v27, %v4535_v41  ;;  %v8405_v4 = vor.u32 %v9292_v44, %v8404_v11  ;;  %v8406_v27 = vld [vmem:[#allocation8 + $0x7f8] sm:$0xf0]  ;;  %v8318_v41 = vld [vmem:[#allocation8 + $0x740] sm:$0xf0]  ;;  %v9263_v11 = vld [vmem:[#allocation8 + $0x70c] sm:$0xf0] }
0x1067   : > { %v8409_v48 = vor.u32 %v9289_v47, %v8406_v27  ;;  %v8293_v44 = vor.u32 %v9263_v11, %v8292_v43  ;;  %v9308_v27 = vld [vmem:[#allocation8 + $0x87c] sm:$0xf] }
0x1068   : > { %v4542_v42 = vmul.f32 %v10643_v17, %v10643_v17  ;;  %v4543_v38 = vmul.f32 %v10646_v31, %v10646_v31  ;;  %5213 = vmatpush.bf16.msra.mxu3 %v8405_v4  ;;  %v8294_v4 = vld [vmem:[#allocation8 + $0x710] sm:$0xf0]  ;;  %v9284_v11 = vld [vmem:[#allocation8 + $0x7bc] sm:$0xf] }
0x1069   : > { %5241 = vmatpush.bf16.msra.mxu1 %v8409_v48  ;;  %v8297_v47 = vor.u32 %v9260_v20, %v8294_v4  ;;  %v8486_v48 = vld [vmem:[#allocation8 + $0x890] sm:$0xf0]  ;;  %5252 = vmatpush.bf16.msra.mxu2 %v8293_v44  ;;  %v8393_v44 = vor.u32 %v9284_v11, %v8390_v19  ;;  %v9233_v20 = vld [vmem:[#allocation8 + $0x61c] sm:$0xf0]  ;;  %v8364_v4 = vld [vmem:[#allocation8 + $0x788] sm:$0xf] }
0x106a   : > { %v4547_v33 = vadd.f32 %v4543_v38, %v4542_v42  ;;  %v9314_v42 = vld [vmem:[#allocation8 + $0x8ac] sm:$0xf]  ;;  %v8510_v38 = vld [vmem:[#allocation8 + $0x8c0] sm:$0xf0]  ;;  %v8489_v49 = vor.u32 %v9308_v27, %v8486_v48  ;;  %v9270_v11 = vld [vmem:[#allocation8 + $0x744] sm:$0xf0] }
0x106b   : > { %v8513_v6 = vor.u32 %v9314_v42, %v8510_v38  ;;  %v9236_v42 = vld [vmem:[#allocation8 + $0x63c] sm:$0xf]  ;;  %v8198_v38 = vld [vmem:[#allocation8 + $0x650] sm:$0xf0]  ;;  %v9230_v27 = vld [vmem:[#allocation8 + $0x60c] sm:$0xf] }
0x106c   : > { %4548 = vadd.xlane.f32.xlu2 %v4547_v33  ;;  %5214 = vmatpush.bf16.msra.mxu3 %v8381_v56  ;;  %v8321_v33 = vor.u32 %v9266_v39, %v8318_v41  ;;  %v8270_v56 = vld [vmem:[#allocation8 + $0x6e0] sm:$0xf0]  ;;  %v8388_v39 = vld [vmem:[#allocation8 + $0x7b8] sm:$0xf]  ;;  %v9287_v41 = vld [vmem:[#allocation8 + $0x7cc] sm:$0xf0]  ;;  %v8201_v43 = vor.u32 %v9236_v42, %v8198_v38 }
0x106d   : > { %5242 = vmatpush.bf16.msra.mxu1 %v8385_v60  ;;  %v8273_v58 = vor.u32 %v9254_v55, %v8270_v56  ;;  %v8462_v60 = vld [vmem:[#allocation8 + $0x860] sm:$0xf0]  ;;  %5253 = vmatpush.bf16.msra.mxu2 %v8269_v53  ;;  %v8542_v38 = vld [vmem:[#allocation8 + $0x8f8] sm:$0xf0]  ;;  %v8516_v19 = vld [vmem:[#allocation8 + $0x8b0] sm:$0xf] }
0x106e   : > { %5279 = vmatpush.bf16.msra.mxu0 %v8321_v33  ;;  %v8465_v22 = vor.u32 %v9302_v59, %v8462_v60  ;;  %v8174_v48 = vld [vmem:[#allocation8 + $0x620] sm:$0xf0] }
0x106f   : > { %v8177_v50 = vor.u32 %v9230_v27, %v8174_v48  ;;  %v9321_v42 = vld [vmem:[#allocation8 + $0x8e4] sm:$0xf]  ;;  %v8518_v27 = vld [vmem:[#allocation8 + $0x8c8] sm:$0xf0] }
0x1070   : > { %5215 = vmatpush.bf16.msra.mxu3 %v8357_v5  ;;  %v8246_v5 = vld [vmem:[#allocation8 + $0x6b0] sm:$0xf0] }
0x1071   : > { %5243 = vmatpush.bf16.msra.mxu1 %v8361_v29  ;;  %v8249_v7 = vor.u32 %v9248_v2, %v8246_v5  ;;  %v8441_v29 = vor.u32 %v9296_v8, %v8438_v10  ;;  %5254 = vmatpush.bf16.msra.mxu2 %v8245_v0  ;;  %v4588_v8 = vperm.slane %v8160_v63, 0  ;;  %v4589_v10 = vperm.slane %v8160_v63, 1 }
0x1072   : > { %5280 = vmatpush.bf16.msra.mxu0 %v8297_v47  ;;  %v9281_v47 = vld [vmem:[#allocation8 + $0x79c] sm:$0xf0] }
0x1074   : > { %5264 = vmatpush.bf16.msrb.mxu3 %v8533_v14  ;;  %v9293_v14 = vld [vmem:[#allocation8 + $0x7fc] sm:$0xf0] }
0x1075   : > { %5292 = vmatpush.bf16.msrb.mxu1 %v8537_v9  ;;  %v8413_v18 = vor.u32 %v9293_v14, %v8412_v15  ;;  %v8417_v9 = vor.u32 %v9290_v26, %v8414_v23  ;;  %5255 = vmatpush.bf16.msra.mxu2 %v8221_v16 }
0x1076   : > { %5281 = vmatpush.bf16.msra.mxu0 %v8273_v58 }
0x1078   : > { %5265 = vmatpush.bf16.msrb.mxu3 %v8509_v40  ;;  %v8197_v40 = vor.u32 %v9239_v30, %v8196_v35  ;;  %v9324_v35 = vld [vmem:[#allocation8 + $0x8f4] sm:$0xf0]  ;;  %v9273_v30 = vld [vmem:[#allocation8 + $0x764] sm:$0xf] }
0x1079   : > { %5293 = vmatpush.bf16.msrb.mxu1 %v8513_v6  ;;  %v8389_v6 = vor.u32 %v9287_v41, %v8388_v39  ;;  %v8350_v41 = vld [vmem:[#allocation8 + $0x778] sm:$0xf0] }
0x107a   : > { %5282 = vmatpush.bf16.msra.mxu0 %v8249_v7  ;;  %5256 = vmatpush.bf16.msra.mxu2 %v8197_v40 }
0x107c   : > { %5266 = vmatpush.bf16.msrb.mxu3 %v8485_v46  ;;  %v8173_v46 = vor.u32 %v9233_v20, %v8172_v45  ;;  %v8545_v45 = vor.u32 %v9321_v42, %v8542_v38  ;;  %v9318_v20 = vld [vmem:[#allocation8 + $0x8c4] sm:$0xf0]  ;;  %v8422_v42 = vld [vmem:[#allocation8 + $0x808] sm:$0xf0] }
0x107d   : > { %5294 = vmatpush.bf16.msrb.mxu1 %v8489_v49  ;;  %v8365_v49 = vor.u32 %v9281_v47, %v8364_v4  ;;  %v9267_v4 = vld [vmem:[#allocation8 + $0x734] sm:$0xf] }
0x107e   : > { %5283 = vmatpush.bf16.msra.mxu0 %v8225_v25  ;;  %5257 = vmatpush.bf16.msra.mxu2 %v8173_v46  ;;  %v8326_v46 = vld [vmem:[#allocation8 + $0x748] sm:$0xf0]  ;;  %v9315_v47 = vld [vmem:[#allocation8 + $0x8b4] sm:$0xf] }
0x107f   : > { %v8329_v52 = vor.u32 %v9267_v4, %v8326_v46  ;;  %v8206_v4 = vld [vmem:[#allocation8 + $0x658] sm:$0xf0]  ;;  %v9285_v46 = vld [vmem:[#allocation8 + $0x7c4] sm:$0xf] }
0x1080   : > { %5267 = vmatpush.bf16.msrb.mxu3 %v8461_v57 }
0x1081   : > { %5295 = vmatpush.bf16.msrb.mxu1 %v8465_v22  ;;  %v8159_v22 = vld [vmem:[%s10879_s17 + $0x2] sm:$0x3] }
0x1082   : > { %5284 = vmatpush.bf16.msra.mxu0 %v8201_v43  ;;  %v4579_v2 = vperm.slane %v8159_v22, 0  ;;  %v4580_v5 = vperm.slane %v8159_v22, 1 }
0x1084   : > { %5268 = vmatpush.bf16.msrb.mxu3 %v8437_v32 }
0x1085   : > { %5296 = vmatpush.bf16.msrb.mxu1 %v8441_v29 }
0x1086   : > { %5285 = vmatpush.bf16.msra.mxu0 %v8177_v50  ;;  %v8300_v50 = vld [vmem:[#allocation8 + $0x700] sm:$0xf] }
0x1088   : > { %5269 = vmatpush.bf16.msrb.mxu3 %v8413_v18 }
0x1089   : > { %5297 = vmatpush.bf16.msrb.mxu1 %v8417_v9  ;;  %v9276_v9 = vld [vmem:[#allocation8 + $0x774] sm:$0xf0] }
0x108c   : > { %5270 = vmatpush.bf16.msrb.mxu3 %v8389_v6 }
0x108d   : > { %5298 = vmatpush.bf16.msrb.mxu1 %v8393_v44  ;;  %v8353_v44 = vor.u32 %v9273_v30, %v8350_v41  ;;  %v9294_v30 = vld [vmem:[#allocation8 + $0x804] sm:$0xf0]  ;;  %v9291_v41 = vld [vmem:[#allocation8 + $0x7f4] sm:$0xf] }
0x1090   : > { %5271 = vmatpush.bf16.msrb.mxu3 %v8365_v49  ;;  %v8517_v49 = vor.u32 %v9318_v20, %v8516_v19  ;;  %v8425_v19 = vor.u32 %v9291_v41, %v8422_v42  ;;  %v9237_v20 = vld [vmem:[#allocation8 + $0x644] sm:$0xf] }
0x1091   : > { %5299 = vmatpush.bf16.msrb.mxu1 %v8369_v54  ;;  %v8492_v54 = vld [vmem:[#allocation8 + $0x880] sm:$0xf] }
0x10d7   : > { %v4546_v36 = vpop.xlane.xlu1 %4545 }
0x10d8   : > { %v4550_v37 = vmul.f32 %v4546_v36, %v10400_v1  ;;  %v8348_v36 = vld [vmem:[#allocation8 + $0x760] sm:$0xf] }
0x10da   : > { %v4552_v33 = vadd.f32 1e-05, %v4550_v37  ;;  %v8540_v37 = vld [vmem:[#allocation8 + $0x8e0] sm:$0xf] }
0x10db   : > { %v8541_v43 = vor.u32 %v9324_v35, %v8540_v37  ;;  %v8420_v35 = vld [vmem:[#allocation8 + $0x7f0] sm:$0xf] }
0x10dc   : > { %9650 = vrsqrt.f32 %v4552_v33  ;;  %vm4560_vm10 = vweird.f32 %v4552_v33 }
0x10df   : > { %v4549_v53 = vpop.xlane.xlu2 %4548 }
0x10e0   : > { %v4551_v55 = vmul.f32 %v4549_v53, %v10400_v1  ;;  %v8521_v53 = vor.u32 %v9315_v47, %v8518_v27  ;;  %v8398_v47 = vld [vmem:[#allocation8 + $0x7d8] sm:$0xf0] }
0x10e2   : > { %v9651_v56 = vpop.eup %9650  ;;  %v4553_v57 = vadd.f32 1e-05, %v4551_v55  ;;  %v9312_v55 = vld [vmem:[#allocation8 + $0x894] sm:$0xf0] }
0x10e3   : > { %v4555_v58 = vmul.f32 %v9651_v56, %v4552_v33  ;;  %vm4561_vm9 = vweird.f32 %v9651_v56  ;;  %v8324_v33 = vld [vmem:[#allocation8 + $0x730] sm:$0xf]  ;;  %v8493_v22 = vor.u32 %v9312_v55, %v8492_v54  ;;  %v9282_v54 = vld [vmem:[#allocation8 + $0x7a4] sm:$0xf0]  ;;  %v9231_v55 = vld [vmem:[#allocation8 + $0x614] sm:$0xf] }
0x10e4   : > { %9652 = vrsqrt.f32 %v4553_v57  ;;  %vm4562_vm11 = vmor %vm4560_vm10, %vm4561_vm9  ;;  %vm4570_vm13 = vweird.f32 %v4553_v57  ;;  %v8325_v48 = vor.u32 %v9270_v11, %v8324_v33  ;;  %v8421_v33 = vor.u32 %v9294_v30, %v8420_v35 }
0x10e5   : > { %v4556_v59 = vmul.f32 %v9651_v56, %v4555_v58  ;;  %v9309_v58 = vld [vmem:[#allocation8 + $0x884] sm:$0xf] }
0x10e7   : > { %v4557_v60 = vmul.f32 0.5, %v4556_v59  ;;  %v8494_v59 = vld [vmem:[#allocation8 + $0x898] sm:$0xf0] }
0x10e9   : > { %v4558_v62 = vsub.f32 1.5, %v4557_v60  ;;  %v8301_v60 = vor.u32 %v9264_v51, %v8300_v50  ;;  %v9234_v50 = vld [vmem:[#allocation8 + $0x624] sm:$0xf0]  ;;  %v8209_v51 = vor.u32 %v9237_v20, %v8206_v4 }
0x10ea   : > { %v9653_v21 = vpop.eup %9652 }
0x10eb   : > { %v4559_v0 = vmul.f32 %v9651_v56, %v4558_v62  ;;  %v4565_v3 = vmul.f32 %v9653_v21, %v4553_v57  ;;  %vm4571_vm12 = vweird.f32 %v9653_v21  ;;  %v8302_v57 = vld [vmem:[#allocation8 + $0x718] sm:$0xf0]  ;;  %v8276_v62 = vld [vmem:[#allocation8 + $0x6d0] sm:$0xf] }
0x10ec   : > { %vm4572_vm14 = vmor %vm4570_vm13, %vm4571_vm12 }
0x10ed   : > { %v4563_v32 = vsel %vm4562_vm11, %v9651_v56, %v4559_v0  ;;  %v4566_v7 = vmul.f32 %v9653_v21, %v4565_v3  ;;  %v9261_v56 = vld [vmem:[#allocation8 + $0x704] sm:$0xf]  ;;  %v8497_v0 = vor.u32 %v9309_v58, %v8494_v59  ;;  %v8468_v3 = vld [vmem:[#allocation8 + $0x850] sm:$0xf]  ;;  %v8374_v58 = vld [vmem:[#allocation8 + $0x7a8] sm:$0xf0] }
0x10ee   : > { %v4574_v29 = vmul.f32 %v4563_v32, %v10632_v13  ;;  %v4575_v34 = vmul.f32 %v4563_v32, %v10635_v28  ;;  %v8305_v63 = vor.u32 %v9261_v56, %v8302_v57  ;;  %v8278_v32 = vld [vmem:[#allocation8 + $0x6e8] sm:$0xf0]  ;;  %v9279_v57 = vld [vmem:[#allocation8 + $0x794] sm:$0xf] }
0x10ef   : > { %v4567_v12 = vmul.f32 0.5, %v4566_v7  ;;  %v9303_v7 = vld [vmem:[#allocation8 + $0x854] sm:$0xf]  ;;  %v8182_v56 = vld [vmem:[#allocation8 + $0x628] sm:$0xf0] }
0x10f0   : > { %v4583_v15 = vmul.f32 %v4579_v2, %v4574_v29  ;;  %v4584_v16 = vmul.f32 %v4580_v5, %v4575_v34  ;;  %v8252_v34 = vld [vmem:[#allocation8 + $0x6a0] sm:$0xf] }
0x10f1   : > { %v4568_v14 = vsub.f32 1.5, %v4567_v12  ;;  %v9252_v12 = vld [vmem:[#allocation8 + $0x6b4] sm:$0xf0] }
0x10f2   : > { %v4592_v61 = vadd.f32 %v4588_v8, %v4583_v15  ;;  %v4593_v24 = vadd.f32 %v4589_v10, %v4584_v16 }
0x10f3   : > { %v4569_v18 = vmul.f32 %v9653_v21, %v4568_v14  ;;  %v8444_v14 = vld [vmem:[#allocation8 + $0x820] sm:$0xf] }
0x10f4   : > { %4596 = vst [vmem:[%s10666_s7] sm:$0xff] %v4592_v61 }
0x10f5   : > { %4597 = vst [vmem:[%s10666_s7 + $0x8] sm:$0xff] %v4593_v24  ;;  %v4573_v13 = vsel %vm4572_vm14, %v9653_v21, %v4569_v18  ;;  %v9258_v21 = vld [vmem:[#allocation8 + $0x6e4] sm:$0xf0]  ;;  %v8254_v18 = vld [vmem:[#allocation8 + $0x6b8] sm:$0xf0] }
0x10f6   : > { %v4576_v28 = vmul.f32 %v4573_v13, %v10643_v17  ;;  %v4577_v25 = vmul.f32 %v4573_v13, %v10646_v31  ;;  %v8349_v31 = vor.u32 %v9276_v9, %v8348_v36  ;;  %v9297_v13 = vld [vmem:[#allocation8 + $0x824] sm:$0xf]  ;;  %v9246_v36 = vld [vmem:[#allocation8 + $0x684] sm:$0xf0] }
0x10f8   : > { %v4585_v26 = vmul.f32 %v4579_v2, %v4576_v28  ;;  %v4586_v23 = vmul.f32 %v4580_v5, %v4577_v25  ;;  %v9306_v2 = vld [vmem:[#allocation8 + $0x864] sm:$0xf0]  ;;  %v9255_v5 = vld [vmem:[#allocation8 + $0x6d4] sm:$0xf]  ;;  %v8446_v28 = vld [vmem:[#allocation8 + $0x838] sm:$0xf0]  ;;  %v8253_v25 = vor.u32 %v9252_v12, %v8252_v34 }
0x10f9   : > { %v8469_v29 = vor.u32 %v9306_v2, %v8468_v3  ;;  %v8281_v15 = vor.u32 %v9255_v5, %v8278_v32  ;;  %v8449_v37 = vor.u32 %v9297_v13, %v8446_v28  ;;  %v8161_v2 = vld [vmem:[%s10870_s8 + $0xc] sm:$0x3f] }
0x10fa   : > { %v4594_v39 = vadd.f32 %v4588_v8, %v4585_v26  ;;  %v4595_v40 = vadd.f32 %v4589_v10, %v4586_v23  ;;  %v8470_v8 = vld [vmem:[#allocation8 + $0x868] sm:$0xf0]  ;;  %v8277_v10 = vor.u32 %v9258_v21, %v8276_v62  ;;  %v8228_v23 = vld [vmem:[#allocation8 + $0x670] sm:$0xf]  ;;  %v8377_v62 = vor.u32 %v9279_v57, %v8374_v58 }
0x10fb   : > { %v8473_v16 = vor.u32 %v9303_v7, %v8470_v8  ;;  %v8229_v38 = vor.u32 %v9246_v36, %v8228_v23  ;;  %v4702_v5 = vperm.slane %v8161_v2, 0  ;;  %v4704_v13 = vperm.slane %v8161_v2, 2 }
0x10fc   : > { %4598 = vst [vmem:[%s10666_s7 + $0x10] sm:$0xff] %v4594_v39  ;;  %v10673_v6 = vpack.c.bf16 %v4594_v39, %v4592_v61  ;;  %v10675_v17 = vpack.c.bf16 %v4595_v40, %v4593_v24  ;;  %v9300_v61 = vld [vmem:[#allocation8 + $0x834] sm:$0xf0]  ;;  %v9249_v24 = vld [vmem:[#allocation8 + $0x6a4] sm:$0xf]  ;;  %v4703_v23 = vperm.slane %v8161_v2, 1 }
0x10fd   : > { %4599 = vst [vmem:[%s10666_s7 + $0x18] sm:$0xff] %v4595_v40  ;;  %v8445_v26 = vor.u32 %v9300_v61, %v8444_v14  ;;  %v8257_v9 = vor.u32 %v9249_v24, %v8254_v18  ;;  %v9243_v39 = vld [vmem:[#allocation8 + $0x674] sm:$0xf]  ;;  %v8230_v40 = vld [vmem:[#allocation8 + $0x688] sm:$0xf0]  ;;  %v4705_v14 = vperm.slane %v8161_v2, 3 }
0x10fe   : > { %5202 = vmatmul.bf16.vlgmr.msrb.gmra.mxu2 %v10673_v6  ;;  %5216 = vmatmul.bf16.vlgmr.msra.gmra.mxu3 %v10675_v17  ;;  %v8233_v11 = vor.u32 %v9243_v39, %v8230_v40 }
0x10ff   : > { %5230 = vmatmul.bf16.vlgmr.msrb.gmra.mxu0 %v10673_v6  ;;  %5244 = vmatmul.bf16.vlgmr.msra.gmra.mxu1 %v10675_v17 }
0x1100   : > { %5306 = vmatpush.bf16.msrb.mxu2 %v8349_v31  ;;  %5320 = vmatpush.bf16.msra.mxu3 %v8541_v43  ;;  %v8204_v31 = vld [vmem:[#allocation8 + $0x640] sm:$0xf]  ;;  %v9240_v43 = vld [vmem:[#allocation8 + $0x654] sm:$0xf0] }
0x1101   : > { %5334 = vmatpush.bf16.msrb.mxu0 %v8353_v44  ;;  %5348 = vmatpush.bf16.msra.mxu1 %v8545_v45  ;;  %v8396_v44 = vld [vmem:[#allocation8 + $0x7c0] sm:$0xf]  ;;  %v9288_v45 = vld [vmem:[#allocation8 + $0x7d4] sm:$0xf0]  ;;  %v8205_v27 = vor.u32 %v9240_v43, %v8204_v31 }
0x1104   : > { %5307 = vmatpush.bf16.msrb.mxu2 %v8325_v48  ;;  %5321 = vmatpush.bf16.msra.mxu3 %v8517_v49  ;;  %v8397_v48 = vor.u32 %v9288_v45, %v8396_v44  ;;  %v8180_v49 = vld [vmem:[#allocation8 + $0x610] sm:$0xf] }
0x1105   : > { %5335 = vmatpush.bf16.msrb.mxu0 %v8329_v52  ;;  %5349 = vmatpush.bf16.msra.mxu1 %v8521_v53  ;;  %v8401_v52 = vor.u32 %v9285_v46, %v8398_v47  ;;  %v8372_v53 = vld [vmem:[#allocation8 + $0x790] sm:$0xf]  ;;  %v8181_v59 = vor.u32 %v9234_v50, %v8180_v49  ;;  %v4707_v49 = vperm.slane %v8161_v2, 5 }
0x1108   : > { %5308 = vmatpush.bf16.msrb.mxu2 %v8301_v60  ;;  %5322 = vmatpush.bf16.msra.mxu3 %v8493_v22  ;;  %v8373_v60 = vor.u32 %v9282_v54, %v8372_v53  ;;  %v8185_v22 = vor.u32 %v9231_v55, %v8182_v56 }
0x1109   : > { %5336 = vmatpush.bf16.msrb.mxu0 %v8305_v63  ;;  %5350 = vmatpush.bf16.msra.mxu1 %v8497_v0 }
0x110c   : > { %5309 = vmatpush.bf16.msrb.mxu2 %v8277_v10  ;;  %5323 = vmatpush.bf16.msra.mxu3 %v8469_v29 }
0x110d   : > { %5337 = vmatpush.bf16.msrb.mxu0 %v8281_v15  ;;  %5351 = vmatpush.bf16.msra.mxu1 %v8473_v16 }
0x110e   : > { %5258 = vmatmul.bf16.vlgmr.msra.gmra.mxu2 %v10673_v6  ;;  %5272 = vmatmul.bf16.vlgmr.msrb.gmra.mxu3 %v10675_v17 }
0x110f   : > { %5286 = vmatmul.bf16.vlgmr.msra.gmra.mxu0 %v10673_v6  ;;  %5300 = vmatmul.bf16.vlgmr.msrb.gmra.mxu1 %v10675_v17 }
0x1110   : > { %5310 = vmatpush.bf16.msrb.mxu2 %v8253_v25  ;;  %5324 = vmatpush.bf16.msra.mxu3 %v8445_v26 }
0x1111   : > { %5338 = vmatpush.bf16.msrb.mxu0 %v8257_v9  ;;  %5352 = vmatpush.bf16.msra.mxu1 %v8449_v37 }
0x1114   : > { %5311 = vmatpush.bf16.msrb.mxu2 %v8229_v38  ;;  %5325 = vmatpush.bf16.msra.mxu3 %v8421_v33 }
0x1115   : > { %5339 = vmatpush.bf16.msrb.mxu0 %v8233_v11  ;;  %5353 = vmatpush.bf16.msra.mxu1 %v8425_v19 }
0x1118   : > { %5312 = vmatpush.bf16.msrb.mxu2 %v8205_v27  ;;  %5326 = vmatpush.bf16.msra.mxu3 %v8397_v48  ;;  %v4706_v27 = vperm.slane %v8161_v2, 4 }
0x1119   : > { %5340 = vmatpush.bf16.msrb.mxu0 %v8209_v51  ;;  %5354 = vmatpush.bf16.msra.mxu1 %v8401_v52 }
0x111c   : > { %5313 = vmatpush.bf16.msrb.mxu2 %v8181_v59  ;;  %5327 = vmatpush.bf16.msra.mxu3 %v8373_v60 }
0x111d   : > { %5341 = vmatpush.bf16.msrb.mxu0 %v8185_v22  ;;  %5355 = vmatpush.bf16.msra.mxu1 %v8377_v62 }
0x111f   : > { %5314 = vmatmul.bf16.vlgmr.msrb.gmra.mxu2 %v10673_v6  ;;  %5328 = vmatmul.bf16.vlgmr.msra.gmra.mxu3 %v10675_v17 }
0x1120   : > { %5342 = vmatmul.bf16.vlgmr.msrb.gmra.mxu0 %v10673_v6  ;;  %5356 = vmatmul.bf16.vlgmr.msra.gmra.mxu1 %v10675_v17 }
0x117c   : > { %v5231_v21 = vpop.f32.mrf.mxu0  ;;  %v5245_v63 = vpop.f32.mrf.mxu1 }
0x117d   : > { %v5232_v42 = vadd.f32 %v5231_v21, %v4703_v23 }
0x117f   : > { %v5246_v19 = vadd.f32 %v5245_v63, %v5232_v42 }
0x1181   : > { %v5203_v0 = vpop.f32.mrf.mxu2  ;;  %v5217_v3 = vpop.f32.mrf.mxu3 }
0x1182   : > { %v5204_v8 = vadd.f32 %v5203_v0, %v4702_v5 }
0x1184   : > { %v5233_v32 = vpop.f32.mrf.mxu0  ;;  %v5247_v7 = vpop.f32.mrf.mxu1  ;;  %v5218_v12 = vadd.f32 %v5217_v3, %v5204_v8 }
0x1185   : > { %v5234_v35 = vadd.f32 %v5233_v32, %v4703_v23 }
0x1187   : > { %v5248_v31 = vadd.f32 %v5247_v7, %v5234_v35 }
0x1189   : > { %v5205_v10 = vpop.f32.mrf.mxu2  ;;  %v5219_v29 = vpop.f32.mrf.mxu3  ;;  %v5495_v45 = vpack.c.bf16 %v5248_v31, %v5246_v19 }
0x118a   : > { %v5206_v34 = vadd.f32 %v5205_v10, %v4702_v5 }
0x118c   : > { %v5220_v15 = vadd.f32 %v5219_v29, %v5206_v34  ;;  %v5287_v6 = vpop.f32.mrf.mxu0  ;;  %v5301_v16 = vpop.f32.mrf.mxu1 }
0x118d   : > { %v5288_v18 = vadd.f32 %v5287_v6, %v4705_v14 }
0x118e   : > { %v5362_v17 = vpack.c.bf16 %v5220_v15, %v5218_v12 }
0x118f   : > { %v5302_v36 = vadd.f32 %v5301_v16, %v5288_v18 }
0x1190   : > { %5426 = vrot.lane.b32.xlu2 %v5362_v17, %s10036_s6 }
0x1191   : > { %v5259_v61 = vpop.f32.mrf.mxu2  ;;  %v5273_v24 = vpop.f32.mrf.mxu3 }
0x1192   : > { %v5260_v37 = vadd.f32 %v5259_v61, %v4704_v13 }
0x1194   : > { %v5289_v28 = vpop.f32.mrf.mxu0  ;;  %v5303_v26 = vpop.f32.mrf.mxu1  ;;  %v5274_v38 = vadd.f32 %v5273_v24, %v5260_v37 }
0x1195   : > { %v5290_v25 = vadd.f32 %v5289_v28, %v4705_v14 }
0x1197   : > { %v5304_v9 = vadd.f32 %v5303_v26, %v5290_v25 }
0x1199   : > { %v5496_v30 = vpack.c.bf16 %v5304_v9, %v5302_v36  ;;  %v5261_v39 = vpop.f32.mrf.mxu2  ;;  %v5275_v40 = vpop.f32.mrf.mxu3 }
0x119a   : > { %v5262_v41 = vadd.f32 %v5261_v39, %v4704_v13 }
0x119b   : > { %5562 = vrot.lane.b32.xlu0 %v5496_v30, %s10036_s6  ;;  %v5502_v4 = vsel %vm935_vm2, %v5496_v30, 0 }
0x119c   : > { %v5276_v33 = vadd.f32 %v5275_v40, %v5262_v41 }
0x119d   : > { %v5343_v43 = vpop.f32.mrf.mxu0  ;;  %v5357_v20 = vpop.f32.mrf.mxu1 }
0x119e   : > { %v5363_v11 = vpack.c.bf16 %v5276_v33, %v5274_v38  ;;  %v5344_v52 = vadd.f32 %v5343_v43, %v4707_v49 }
0x11a0   : > { %5429 = vrot.lane.b32.xlu1 %v5363_v11, %s10036_s6  ;;  %v5369_v44 = vsel %vm935_vm2, %v5363_v11, 0  ;;  %v5358_v60 = vadd.f32 %v5357_v20, %v5344_v52 }
0x11a1   : > { %5378 = vmatpush.bf16.xpose.msra.mxu2 %v5369_v44 }
0x11a2   : > { %v5315_v46 = vpop.f32.mrf.mxu2  ;;  %v5329_v47 = vpop.f32.mrf.mxu3 }
0x11a3   : > { %5559 = vrot.lane.b32.xlu0 %v5495_v45, %s10036_s6  ;;  %v5316_v51 = vadd.f32 %v5315_v46, %v4706_v27 }
0x11a5   : > { %v5345_v48 = vpop.f32.mrf.mxu0  ;;  %v5359_v54 = vpop.f32.mrf.mxu1  ;;  %v5330_v58 = vadd.f32 %v5329_v47, %v5316_v51 }
0x11a6   : > { %v5346_v50 = vadd.f32 %v5345_v48, %v4707_v49 }
0x11a8   : > { %8546 = vmatmul.msk.bf16.vlgmr.msra.gmra.mxu2 %vm935_vm2, %v5362_v17  ;;  %v5360_v56 = vadd.f32 %v5359_v54, %v5346_v50 }
0x11a9   : > { %5511 = vmatpush.bf16.xpose.msrb.mxu2 %v5502_v4 }
0x11aa   : > { %v5317_v53 = vpop.f32.mrf.mxu2  ;;  %v5331_v57 = vpop.f32.mrf.mxu3  ;;  %v10700_v62 = vpack.c.bf16 %v5360_v56, %v5358_v60 }
0x11ab   : > { %v5318_v55 = vadd.f32 %v5317_v53, %v4706_v27 }
0x11ad   : > { %v5332_v59 = vadd.f32 %v5331_v57, %v5318_v55 }
0x11af   : > { %v5364_v22 = vpack.c.bf16 %v5332_v59, %v5330_v58 }
0x11b1   : > { %5418 = vmatpush.bf16.msrb.mxu3 %v5364_v22 }
0x11b5   : > { %5551 = vmatpush.bf16.msra.mxu3 %v10700_v62 }
0x11b8   : > { %8550 = vmatmul.msk.bf16.vlgmr.msrb.gmra.mxu2 %vm935_vm2, %v5495_v45 }
0x11ea   : > { %v5427_v2 = vpop.permute.xlu2 %5426 }
0x120d   : > { %v5563_v21 = vpop.permute.xlu0 %5562 }
0x120e   : > { %v5568_v3 = vsel %vm935_vm2, %v5563_v21, 0 }
0x1212   : > { %v5430_v63 = vpop.permute.xlu1 %5429 }
0x1213   : > { %v5435_v0 = vsel %vm935_vm2, %v5430_v63, 0 }
0x1214   : > { %5444 = vmatpush.bf16.xpose.msra.mxu0 %v5435_v0 }
0x1215   : > { %v5560_v5 = vpop.permute.xlu0 %5559 }
0x121b   : > { %8548 = vmatmul.msk.bf16.vlgmr.msra.gmra.mxu0 %vm935_vm2, %v5427_v2 }
0x121c   : > { %5577 = vmatpush.bf16.xpose.msrb.mxu0 %v5568_v3 }
0x122b   : > { %8552 = vmatmul.msk.bf16.vlgmr.msrb.gmra.mxu0 %vm935_vm2, %v5560_v5  ;;  %v5380_v32 = vpop.f32.mrf.mxu2 }
0x122c   : > { %v5385_v16 = vsel %vm1869_vm3, %v5380_v32, -inf }
0x1233   : > { %v5382_v10 = vpop.f32.mrf.mxu2 }
0x1234   : > { %v5388_v18 = vsel %vm1869_vm3, %v5382_v10, -inf }
0x123b   : > { %v5513_v12 = vpop.f32.mrf.mxu2 }
0x123c   : > { %v5518_v13 = vsel %vm1869_vm3, %v5513_v12, -inf }
0x1243   : > { %v5515_v17 = vpop.f32.mrf.mxu2 }
0x1244   : > { %v5521_v24 = vsel %vm1869_vm3, %v5515_v17, -inf }
0x1298   : > { %v5446_v7 = vpop.f32.mrf.mxu0 }
0x1299   : > { %v5451_v8 = vsel %vm1869_vm3, %v5446_v7, -inf }
0x129a   : > { %5452 = vmax.xlane.f32.xlu2 %v5451_v8 }
0x12a0   : > { %v5448_v29 = vpop.f32.mrf.mxu0 }
0x12a1   : > { %v5454_v34 = vsel %vm1869_vm3, %v5448_v29, -inf }
0x12a2   : > { %5455 = vmax.xlane.f32.xlu1 %v5454_v34 }
0x12a8   : > { %v5579_v15 = vpop.f32.mrf.mxu0 }
0x12a9   : > { %v5584_v6 = vsel %vm1869_vm3, %v5579_v15, -inf }
0x12aa   : > { %5585 = vmax.xlane.f32.xlu0 %v5584_v6  ;;  %5386 = vmax.xlane.f32.xlu1 %v5385_v16 }
0x12b0   : > { %v5581_v14 = vpop.f32.mrf.mxu0 }
0x12b1   : > { %v5587_v61 = vsel %vm1869_vm3, %v5581_v14, -inf }
0x12b2   : > { %5588 = vmax.xlane.f32.xlu2 %v5587_v61  ;;  %5522 = vmax.xlane.f32.xlu1 %v5521_v24 }
0x12b3   : > { %5389 = vmax.xlane.f32.xlu0 %v5388_v18 }
0x12ba   : > { %5519 = vmax.xlane.f32.xlu2 %v5518_v13 }
0x12cb   : > { %5475 = vrot.lane.b32.xlu1 %v5364_v22, %s10036_s6 }
0x130d   : > { %v5453_v28 = vpop.xlane.xlu2 %5452 }
0x130e   : > { %v5457_v25 = vsub.f32 %v5446_v7, %v5453_v28 }
0x1310   : > { %v5459_v26 = vmul.f32 1.442695, %v5457_v25 }
0x1312   : > { %9654 = vpow2.f32 %v5459_v26 }
0x1315   : > { %v5456_v23 = vpop.xlane.xlu1 %5455 }
0x1316   : > { %v5458_v36 = vsub.f32 %v5448_v29, %v5456_v23 }
0x1318   : > { %v9655_v9 = vpop.eup %9654  ;;  %v5461_v37 = vmul.f32 1.442695, %v5458_v36 }
0x1319   : > { %v5463_v35 = vsel %vm1869_vm3, %v9655_v9, 0.0 }
0x131a   : > { %9656 = vpow2.f32 %v5461_v37  ;;  %5464 = vadd.xlane.f32.xlu0 %v5463_v35 }
0x131d   : > { %v5586_v30 = vpop.xlane.xlu0 %5585  ;;  %v5387_v38 = vpop.xlane.xlu1 %5386 }
0x131e   : > { %v5590_v39 = vsub.f32 %v5579_v15, %v5586_v30  ;;  %v5391_v11 = vsub.f32 %v5380_v32, %v5387_v38  ;;  %v8677_v38 = vld [vmem:[#allocation10 + $0x2f0] sm:$0xf] }
0x1320   : > { %v9657_v40 = vpop.eup %9656  ;;  %v5592_v41 = vmul.f32 1.442695, %v5590_v39  ;;  %v5393_v45 = vmul.f32 1.442695, %v5391_v11  ;;  %v8679_v11 = vld [vmem:[#allocation10 + $0x2f8] sm:$0xf0] }
0x1321   : > { %v5466_v42 = vsel %vm1869_vm3, %v9657_v40, 0.0 }
0x1322   : > { %9658 = vpow2.f32 %v5592_v41  ;;  %5467 = vadd.xlane.f32.xlu2 %v5466_v42 }
0x1325   : > { %v5589_v33 = vpop.xlane.xlu2 %5588  ;;  %v5523_v51 = vpop.xlane.xlu1 %5522 }
0x1326   : > { %v5591_v31 = vsub.f32 %v5581_v14, %v5589_v33  ;;  %v5390_v20 = vpop.xlane.xlu0 %5389  ;;  %v5525_v54 = vsub.f32 %v5515_v17, %v5523_v51  ;;  %v9356_v33 = vld [vmem:[#allocation10 + $0x2f4] sm:$0xf0] }
0x1327   : > { %v5392_v27 = vsub.f32 %v5382_v10, %v5390_v20  ;;  %v9353_v20 = vld [vmem:[#allocation10 + $0x2e4] sm:$0xf] }
0x1328   : > { %v9659_v43 = vpop.eup %9658  ;;  %v5594_v19 = vmul.f32 1.442695, %v5591_v31  ;;  %v5528_v57 = vmul.f32 1.442695, %v5525_v54  ;;  %v9355_v31 = vld [vmem:[#allocation10 + $0x2f4] sm:$0xf] }
0x1329   : > { %v5596_v44 = vsel %vm1869_vm3, %v9659_v43, 0.0  ;;  %v5395_v50 = vmul.f32 1.442695, %v5392_v27  ;;  %v9340_v27 = vld [vmem:[#allocation10 + $0x274] sm:$0xf0] }
0x132a   : > { %9660 = vpow2.f32 %v5594_v19  ;;  %5597 = vadd.xlane.f32.xlu0 %v5596_v44  ;;  %v8669_v19 = vld [vmem:[#allocation10 + $0x2e0] sm:$0xf]  ;;  %v9354_v44 = vld [vmem:[#allocation10 + $0x2e4] sm:$0xf0]  ;;  %v9352_v54 = vld [vmem:[#allocation10 + $0x2d4] sm:$0xf0] }
0x132b   : > { %9662 = vpow2.f32 %v5393_v45  ;;  %v8682_v45 = vor.u32 %v9355_v31, %v8679_v11  ;;  %v9329_v11 = vld [vmem:[#allocation10 + $0x224] sm:$0xf] }
0x132d   : > { %v5520_v4 = vpop.xlane.xlu2 %5519 }
0x132e   : > { %v5524_v46 = vsub.f32 %v5513_v12, %v5520_v4  ;;  %v8671_v4 = vld [vmem:[#allocation10 + $0x2e8] sm:$0xf0] }
0x1330   : > { %v9661_v47 = vpop.eup %9660  ;;  %v5526_v48 = vmul.f32 1.442695, %v5524_v46  ;;  %v8613_v46 = vld [vmem:[#allocation10 + $0x270] sm:$0xf] }
0x1331   : > { %v5599_v49 = vsel %vm1869_vm3, %v9661_v47, 0.0  ;;  %v9663_v52 = vpop.eup %9662  ;;  %v8614_v51 = vor.u32 %v9340_v27, %v8613_v46  ;;  %v8631_v46 = vld [vmem:[#allocation10 + $0x298] sm:$0xf0] }
0x1332   : > { %9664 = vpow2.f32 %v5526_v48  ;;  %5600 = vadd.xlane.f32.xlu2 %v5599_v49  ;;  %v5397_v55 = vsel %vm1869_vm3, %v9663_v52, 0.0  ;;  %v9339_v48 = vld [vmem:[#allocation10 + $0x274] sm:$0xf]  ;;  %v8615_v49 = vld [vmem:[#allocation10 + $0x278] sm:$0xf0] }
0x1333   : > { %9666 = vpow2.f32 %v5395_v50  ;;  %v8674_v50 = vor.u32 %v9353_v20, %v8671_v4  ;;  %5850 = vmatpush.bf16.msra.mxu2 %v8614_v51  ;;  %v9344_v20 = vld [vmem:[#allocation10 + $0x294] sm:$0xf0]  ;;  %v9343_v4 = vld [vmem:[#allocation10 + $0x294] sm:$0xf]  ;;  %v9342_v51 = vld [vmem:[#allocation10 + $0x284] sm:$0xf0] }
0x1334   : > { %9668 = vpow2.f32 %v5528_v57  ;;  %v8605_v57 = vld [vmem:[#allocation10 + $0x260] sm:$0xf] }
0x1338   : > { %v9665_v53 = vpop.eup %9664 }
0x1339   : > { %v5530_v56 = vsel %vm1869_vm3, %v9665_v53, 0.0  ;;  %v9667_v59 = vpop.eup %9666 }
0x133a   : > { %5398 = vadd.xlane.f32.xlu2 %v5397_v55  ;;  %5531 = vadd.xlane.f32.xlu1 %v5530_v56  ;;  %v5400_v60 = vsel %vm1869_vm3, %v9667_v59, 0.0  ;;  %v9669_v22 = vpop.eup %9668  ;;  %v9351_v55 = vld [vmem:[#allocation10 + $0x2d4] sm:$0xf]  ;;  %v8663_v56 = vld [vmem:[#allocation10 + $0x2d8] sm:$0xf0] }
0x133b   : > { %v5533_v21 = vsel %vm1869_vm3, %v9669_v22, 0.0 }
0x133d   : > { %v5476_v58 = vpop.permute.xlu1 %5475 }
0x133e   : > { %5488 = vmatpush.bf16.msrb.mxu1 %v5476_v58  ;;  %5608 = vrot.lane.b32.xlu0 %v10700_v62, %s10036_s6  ;;  %v9338_v58 = vld [vmem:[#allocation10 + $0x264] sm:$0xf0] }
0x1342   : > { %5401 = vadd.xlane.f32.xlu2 %v5400_v60  ;;  %v9337_v60 = vld [vmem:[#allocation10 + $0x264] sm:$0xf] }
0x134a   : > { %5534 = vadd.xlane.f32.xlu2 %v5533_v21 }
0x138d   : > { %v5465_v63 = vpop.xlane.xlu0 %5464 }
0x138e   : > { %9670 = vrcp.f32 %v5465_v63 }
0x1394   : > { %v9671_v3 = vpop.eup %9670 }
0x1395   : > { %v5468_v0 = vpop.xlane.xlu2 %5467  ;;  %v5471_v5 = vmul.f32 %v9671_v3, %v9655_v9  ;;  %v9350_v3 = vld [vmem:[#allocation10 + $0x2c4] sm:$0xf0] }
0x1396   : > { %9672 = vrcp.f32 %v5468_v0  ;;  %v8653_v0 = vld [vmem:[#allocation10 + $0x2c0] sm:$0xf] }
0x139c   : > { %v9673_v2 = vpop.eup %9672 }
0x139d   : > { %v5472_v32 = vmul.f32 %v9673_v2, %v9657_v40  ;;  %v5598_v62 = vpop.xlane.xlu0 %5597  ;;  %v8666_v2 = vor.u32 %v9351_v55, %v8663_v56  ;;  %v8565_v55 = vld [vmem:[#allocation10 + $0x210] sm:$0xf]  ;;  %v9328_v56 = vld [vmem:[#allocation10 + $0x214] sm:$0xf0] }
0x139f   : > { %v5473_v7 = vpack.c.bf16 %v5472_v32, %v5471_v5  ;;  %v8597_v5 = vld [vmem:[#allocation10 + $0x250] sm:$0xf]  ;;  %v9336_v32 = vld [vmem:[#allocation10 + $0x254] sm:$0xf0] }
0x13a1   : > { %8549 = vmatmul.msk.bf16.vlgmr.msrb.gmra.mxu1 %vm1869_vm3, %v5473_v7  ;;  %v9335_v7 = vld [vmem:[#allocation10 + $0x254] sm:$0xf] }
0x13a5   : > { %v5601_v8 = vpop.xlane.xlu2 %5600 }
0x13a6   : > { %9674 = vrcp.f32 %v5601_v8  ;;  %v8655_v8 = vld [vmem:[#allocation10 + $0x2c8] sm:$0xf0] }
0x13a7   : > { %9676 = vrcp.f32 %v5598_v62  ;;  %v9349_v62 = vld [vmem:[#allocation10 + $0x2c4] sm:$0xf] }
0x13ac   : > { %v9675_v10 = vpop.eup %9674 }
0x13ad   : > { %v9677_v29 = vpop.eup %9676  ;;  %v5399_v34 = vpop.xlane.xlu2 %5398  ;;  %v5605_v12 = vmul.f32 %v9675_v10, %v9661_v47  ;;  %v8670_v47 = vor.u32 %v9354_v44, %v8669_v19  ;;  %v8599_v10 = vld [vmem:[#allocation10 + $0x258] sm:$0xf0]  ;;  %v8575_v19 = vld [vmem:[#allocation10 + $0x228] sm:$0xf0] }
0x13ae   : > { %v5604_v15 = vmul.f32 %v9677_v29, %v9659_v43  ;;  %9678 = vrcp.f32 %v5399_v34  ;;  %v5532_v25 = vpop.xlane.xlu1 %5531  ;;  %v8678_v43 = vor.u32 %v9356_v33, %v8677_v38  ;;  %v8598_v29 = vor.u32 %v9336_v32, %v8597_v5  ;;  %v8573_v33 = vld [vmem:[#allocation10 + $0x220] sm:$0xf]  ;;  %v8559_v5 = vld [vmem:[#allocation10 + $0x208] sm:$0xf0] }
0x13af   : > { %v8602_v34 = vor.u32 %v9335_v7, %v8599_v10  ;;  %v8578_v27 = vor.u32 %v9329_v11, %v8575_v19 }
0x13b0   : > { %v5609_v6 = vpop.permute.xlu0 %5608  ;;  %v5606_v16 = vpack.c.bf16 %v5605_v12, %v5604_v15  ;;  %v8589_v12 = vld [vmem:[#allocation10 + $0x240] sm:$0xf]  ;;  %v8654_v15 = vor.u32 %v9350_v3, %v8653_v0  ;;  %v9326_v0 = vld [vmem:[#allocation10 + $0x204] sm:$0xf0]  ;;  %v9325_v3 = vld [vmem:[#allocation10 + $0x204] sm:$0xf] }
0x13b1   : > { %5621 = vmatpush.bf16.msra.mxu1 %v5609_v6  ;;  %v9334_v6 = vld [vmem:[#allocation10 + $0x244] sm:$0xf0]  ;;  %v8562_v32 = vor.u32 %v9325_v3, %v8559_v5  ;;  %v9372_v3 = vld [vmem:[#allocation11 + $0x178] sm:$0xff]  ;;  %v9371_v5 = vld [vmem:[#allocation11 + $0x170] sm:$0xff] }
0x13b4   : > { %8553 = vmatmul.msk.bf16.vlgmr.msra.gmra.mxu1 %vm1869_vm3, %v5606_v16  ;;  %v9679_v14 = vpop.eup %9678  ;;  %v9333_v16 = vld [vmem:[#allocation10 + $0x244] sm:$0xf] }
0x13b5   : > { %v5402_v17 = vpop.xlane.xlu2 %5401  ;;  %v5405_v24 = vmul.f32 %v9679_v14, %v9663_v52  ;;  %5892 = vmatpush.bf16.msrb.mxu1 %v8682_v45  ;;  %v8618_v52 = vor.u32 %v9339_v48, %v8615_v49  ;;  %v8658_v14 = vor.u32 %v9349_v62, %v8655_v8  ;;  %v8629_v45 = vld [vmem:[#allocation10 + $0x290] sm:$0xf]  ;;  %v8634_v49 = vor.u32 %v9343_v4, %v8631_v46 }
0x13b6   : > { %9680 = vrcp.f32 %v5402_v17  ;;  %v8591_v17 = vld [vmem:[#allocation10 + $0x248] sm:$0xf0]  ;;  %v8630_v48 = vor.u32 %v9344_v20, %v8629_v45 }
0x13b7   : > { %5878 = vmatpush.bf16.msra.mxu0 %v8618_v52  ;;  %v9341_v52 = vld [vmem:[#allocation10 + $0x284] sm:$0xf]  ;;  %v9696_v46 = vld [vmem:[%s10666_s7 + $0x10] sm:$0xff] }
0x13b9   : > { %5893 = vmatpush.bf16.msrb.mxu1 %v8674_v50  ;;  %v8621_v50 = vld [vmem:[#allocation10 + $0x280] sm:$0xf] }
0x13bc   : > { %v9681_v61 = vpop.eup %9680 }
0x13bd   : > { %v5406_v18 = vmul.f32 %v9681_v61, %v9667_v59  ;;  %v5535_v28 = vpop.xlane.xlu2 %5534  ;;  %v8606_v59 = vor.u32 %v9338_v58, %v8605_v57  ;;  %5894 = vmatpush.bf16.msrb.mxu1 %v8666_v2  ;;  %v8645_v61 = vld [vmem:[#allocation10 + $0x2b0] sm:$0xf] }
0x13be   : > { %9682 = vrcp.f32 %v5535_v28  ;;  %v8590_v28 = vor.u32 %v9334_v6, %v8589_v12 }
0x13bf   : > { %v5407_v13 = vpack.c.bf16 %v5406_v18, %v5405_v24  ;;  %9684 = vrcp.f32 %v5532_v25  ;;  %5851 = vmatpush.bf16.msra.mxu2 %v8606_v59  ;;  %v9348_v24 = vld [vmem:[#allocation10 + $0x2b4] sm:$0xf0]  ;;  %v9347_v18 = vld [vmem:[#allocation10 + $0x2b4] sm:$0xf]  ;;  %v8594_v25 = vor.u32 %v9333_v16, %v8591_v17  ;;  %v8566_v59 = vor.u32 %v9328_v56, %v8565_v55 }
0x13c1   : > { %8547 = vmatmul.msk.bf16.vlgmr.msrb.gmra.mxu3 %vm1869_vm3, %v5407_v13  ;;  %v8647_v13 = vld [vmem:[#allocation10 + $0x2b8] sm:$0xf0]  ;;  %5895 = vmatpush.bf16.msrb.mxu1 %v8658_v14 }
0x13c2   : > { %5864 = vmatpush.bf16.msrb.mxu3 %v8678_v43  ;;  %v9330_v43 = vld [vmem:[#allocation10 + $0x224] sm:$0xf0] }
0x13c3   : > { %5852 = vmatpush.bf16.msra.mxu2 %v8598_v29 }
0x13c4   : > { %v9683_v26 = vpop.eup %9682 }
0x13c5   : > { %v9685_v23 = vpop.eup %9684  ;;  %v5539_v36 = vmul.f32 %v9683_v26, %v9669_v22  ;;  %v8607_v22 = vld [vmem:[#allocation10 + $0x268] sm:$0xf0]  ;;  %v8581_v26 = vld [vmem:[#allocation10 + $0x230] sm:$0xf] }
0x13c6   : > { %v5538_v9 = vmul.f32 %v9685_v23, %v9665_v53  ;;  %v8661_v53 = vld [vmem:[#allocation10 + $0x2d0] sm:$0xf]  ;;  %5865 = vmatpush.bf16.msrb.mxu3 %v8670_v47  ;;  %v8610_v63 = vor.u32 %v9337_v60, %v8607_v22  ;;  %v8646_v23 = vor.u32 %v9348_v24, %v8645_v61  ;;  %v8574_v47 = vor.u32 %v9330_v43, %v8573_v33  ;;  %v9327_v60 = vld [vmem:[#allocation10 + $0x214] sm:$0xf]  ;;  %v8567_v22 = vld [vmem:[#allocation10 + $0x218] sm:$0xf0] }
0x13c7   : > { %v8662_v21 = vor.u32 %v9352_v54, %v8661_v53  ;;  %5853 = vmatpush.bf16.msra.mxu2 %v8590_v28  ;;  %v8622_v53 = vor.u32 %v9342_v51, %v8621_v50  ;;  %v8623_v54 = vld [vmem:[#allocation10 + $0x288] sm:$0xf0]  ;;  %v9695_v33 = vld [vmem:[%s10666_s7 + $0x8] sm:$0xff] }
0x13c8   : > { %v5540_v37 = vpack.c.bf16 %v5539_v36, %v5538_v9  ;;  %5879 = vmatpush.bf16.msra.mxu0 %v8610_v63  ;;  %v9332_v36 = vld [vmem:[#allocation10 + $0x234] sm:$0xf0]  ;;  %v9331_v9 = vld [vmem:[#allocation10 + $0x234] sm:$0xf]  ;;  %v8626_v58 = vor.u32 %v9341_v52, %v8623_v54  ;;  %v8557_v63 = vld [vmem:[#allocation10 + $0x200] sm:$0xf] }
0x13c9   : > { %v8558_v2 = vor.u32 %v9326_v0, %v8557_v63  ;;  %v9364_v0 = vld [vmem:[#allocation11 + $0x138] sm:$0xff] }
0x13ca   : > { %5866 = vmatpush.bf16.msrb.mxu3 %v8662_v21  ;;  %v8570_v21 = vor.u32 %v9327_v60, %v8567_v22 }
0x13cc   : > { %5880 = vmatpush.bf16.msra.mxu0 %v8602_v34 }
0x13ce   : > { %5867 = vmatpush.bf16.msrb.mxu3 %v8654_v15 }
0x13d0   : > { %5881 = vmatpush.bf16.msra.mxu0 %v8594_v25 }
0x13d1   : > { %8551 = vmatmul.msk.bf16.vlgmr.msra.gmra.mxu3 %vm1869_vm3, %v5540_v37  ;;  %v8583_v37 = vld [vmem:[#allocation10 + $0x238] sm:$0xf0] }
0x13d2   : > { %v8586_v38 = vor.u32 %v9331_v9, %v8583_v37  ;;  %5868 = vmatpush.bf16.msrb.mxu3 %v8646_v23 }
0x13d4   : > { %5882 = vmatpush.bf16.msra.mxu0 %v8586_v38 }
0x13d8   : > { %5883 = vmatpush.bf16.msra.mxu0 %v8578_v27  ;;  %v9697_v27 = vld [vmem:[%s10666_s7 + $0x18] sm:$0xff] }
0x13dc   : > { %5884 = vmatpush.bf16.msra.mxu0 %v8570_v21 }
0x13e0   : > { %5885 = vmatpush.bf16.msra.mxu0 %v8562_v32  ;;  %v9362_v32 = vld [vmem:[#allocation11 + $0x128] sm:$0xff] }
0x141e   : > { %v5490_v35 = vpop.f32.mrf.mxu1 }
0x1426   : > { %v5492_v30 = vpop.f32.mrf.mxu1 }
0x1427   : > { %v9556_v39 = vpack.i.bf16 %v5492_v30, %v5490_v35  ;;  %v8650_v35 = vor.u32 %v9347_v18, %v8647_v13  ;;  %v8637_v30 = vld [vmem:[#allocation10 + $0x2a0] sm:$0xf] }
0x1428   : > { %v8554_v13 = vld [vmem:[%s10872_s10 + $0x4] sm:$0x3] }
0x1429   : > { %9557 = vrot.lane.b32.xlu0 %v9556_v39, %s10036_s6  ;;  %v9346_v39 = vld [vmem:[#allocation10 + $0x2a4] sm:$0xf0]  ;;  %5896 = vmatpush.bf16.msrb.mxu1 %v8650_v35  ;;  %v5687_v28 = vperm.slane %v8554_v13, 1  ;;  %v5686_v23 = vperm.slane %v8554_v13, 0  ;;  %v9388_v13 = vld [vmem:[#allocation13 + $0x174] sm:$0xf0] }
0x142a   : > { %v8638_v31 = vor.u32 %v9346_v39, %v8637_v30 }
0x142c   : > { %5869 = vmatpush.bf16.msrb.mxu3 %v8638_v31 }
0x1430   : > { %5870 = vmatpush.bf16.msrb.mxu3 %v8630_v48 }
0x1431   : > { %v5623_v40 = vpop.f32.mrf.mxu1 }
0x1434   : > { %5871 = vmatpush.bf16.msrb.mxu3 %v8622_v53 }
0x1438   : > { %6132 = vmatpush.bf16.msra.mxu3 %v9372_v3 }
0x1439   : > { %v5625_v41 = vpop.f32.mrf.mxu1 }
0x143a   : > { %v9561_v42 = vpack.i.bf16 %v5625_v41, %v5623_v40  ;;  %v9345_v40 = vld [vmem:[#allocation10 + $0x2a4] sm:$0xf]  ;;  %v8639_v41 = vld [vmem:[#allocation10 + $0x2a8] sm:$0xf0] }
0x143b   : > { %v8642_v44 = vor.u32 %v9345_v40, %v8639_v41 }
0x143c   : > { %9562 = vrot.lane.b32.xlu2 %v9561_v42, %s10036_s6  ;;  %v8582_v42 = vor.u32 %v9332_v36, %v8581_v26  ;;  %6133 = vmatpush.bf16.msra.mxu3 %v9371_v5 }
0x143d   : > { %5897 = vmatpush.bf16.msrb.mxu1 %v8642_v44 }
0x143e   : > { %5854 = vmatpush.bf16.msra.mxu2 %v8582_v42  ;;  %v9694_v42 = vld [vmem:[%s10666_s7] sm:$0xff]  ;;  %s833_s7 = sand.u32 1, %s10934_s3  }
0x143f   : > { %s6768_s6 = sshll.u32 %s833_s7, 5  ;;  %s6526_s0 = scalar_lea.sflag [#allocation4], %s833_s7 }
0x1440   : > { %s835_s20 = scalar_lea.vmem [#allocation16], %s6768_s6 }
0x1441   : > { %5898 = vmatpush.bf16.msrb.mxu1 %v8634_v49  ;;  %s6548_s30 = sshll.u32 %s835_s20, 4  ;;  %s6549_s30 = int_to_ptr.vmem [resolvable:$true] %s6548_s30 }
0x1442   : > { %5855 = vmatpush.bf16.msra.mxu2 %v8574_v47 }
0x1444   : > { %v5420_v57 = vpop.f32.mrf.mxu3 }
0x1445   : > { %5899 = vmatpush.bf16.msrb.mxu1 %v8626_v58 }
0x1446   : > { %5856 = vmatpush.bf16.msra.mxu2 %v8566_v59 }
0x144a   : > { %5857 = vmatpush.bf16.msra.mxu2 %v8558_v2  ;;  %v9363_v2 = vld [vmem:[#allocation11 + $0x130] sm:$0xff] }
0x144c   : > { %v5422_v7 = vpop.f32.mrf.mxu3 }
0x144e   : > { %6118 = vmatpush.bf16.msrb.mxu2 %v9364_v0  ;;  %v8684_v0 = vld [vmem:[%s10874_s12 + $0x4] sm:$0x3] }
0x1452   : > { %6119 = vmatpush.bf16.msrb.mxu2 %v9363_v2 }
0x1454   : > { %v5553_v62 = vpop.f32.mrf.mxu3 }
0x1456   : > { %6120 = vmatpush.bf16.msrb.mxu2 %v9362_v32 }
0x145c   : > { %v5555_v34 = vpop.f32.mrf.mxu3 }
0x1496   : > { %v9563_v8 = vpop.permute.xlu2 %9562 }
0x1497   : > { %v9565_v10 = vunpack.i.h.bf16 %v9563_v8  ;;  %v9564_v29 = vunpack.i.l.bf16 %v9563_v8  ;;  %v9369_v8 = vld [vmem:[#allocation11 + $0x160] sm:$0xff] }
0x1499   : > { %v5647_v12 = vsel %vm935_vm2, %v5555_v34, %v9565_v10  ;;  %v5646_v15 = vsel %vm935_vm2, %v5553_v62, %v9564_v29  ;;  %v9361_v62 = vld [vmem:[#allocation11 + $0x120] sm:$0xff]  ;;  %v9360_v10 = vld [vmem:[#allocation11 + $0x118] sm:$0xff]  ;;  %v9359_v34 = vld [vmem:[#allocation11 + $0x110] sm:$0xff] }
0x149a   : > { %v5682_v6 = vpack.c.bf16 %v5647_v12, %v5646_v15  ;;  %6121 = vmatpush.bf16.msrb.mxu2 %v9361_v62  ;;  %v9368_v29 = vld [vmem:[#allocation11 + $0x158] sm:$0xff]  ;;  %v9367_v12 = vld [vmem:[#allocation11 + $0x150] sm:$0xff]  ;;  %v5974_v62 = vperm.slane %v8684_v0, 0 }
0x149b   : > { %v9558_v16 = vpop.permute.xlu0 %9557 }
0x149c   : > { %v9560_v17 = vunpack.i.h.bf16 %v9558_v16  ;;  %v9559_v14 = vunpack.i.l.bf16 %v9558_v16  ;;  %5872 = vmatmul.bf16.vlgmr.msrb.gmra.mxu3 %v5682_v6  ;;  %5900 = vmatmul.bf16.vlgmr.msrb.gmra.mxu1 %v5682_v6  ;;  %v9358_v6 = vld [vmem:[#allocation11 + $0x108] sm:$0xff] }
0x149d   : > { %v9366_v16 = vld [vmem:[#allocation11 + $0x148] sm:$0xff] }
0x149e   : > { %v5645_v61 = vsel %vm935_vm2, %v5422_v7, %v9560_v17  ;;  %v5644_v24 = vsel %vm935_vm2, %v5420_v57, %v9559_v14  ;;  %v9370_v7 = vld [vmem:[#allocation11 + $0x168] sm:$0xff]  ;;  %6122 = vmatpush.bf16.msrb.mxu2 %v9360_v10 }
0x149f   : > { %v5681_v18 = vpack.c.bf16 %v5645_v61, %v5644_v24  ;;  %6134 = vmatpush.bf16.msra.mxu3 %v9370_v7  ;;  %v9357_v61 = vld [vmem:[#allocation11 + $0x100] sm:$0xff] }
0x14a0   : > { %v9365_v24 = vld [vmem:[#allocation11 + $0x140] sm:$0xff] }
0x14a1   : > { %5858 = vmatmul.bf16.vlgmr.msra.gmra.mxu2 %v5681_v18  ;;  %5886 = vmatmul.bf16.vlgmr.msra.gmra.mxu0 %v5681_v18  ;;  %v8809_v18 = vld [vmem:[#allocation13 + $0x170] sm:$0xf] }
0x14a2   : > { %6123 = vmatpush.bf16.msrb.mxu2 %v9359_v34 }
0x14a3   : > { %6135 = vmatpush.bf16.msra.mxu3 %v9369_v8  ;;  %v5975_v8 = vperm.slane %v8684_v0, 1 }
0x14a6   : > { %6124 = vmatpush.bf16.msrb.mxu2 %v9358_v6 }
0x14a7   : > { %6136 = vmatpush.bf16.msra.mxu3 %v9368_v29 }
0x14aa   : > { %6125 = vmatpush.bf16.msrb.mxu2 %v9357_v61 }
0x14ab   : > { %6137 = vmatpush.bf16.msra.mxu3 %v9367_v12 }
0x14af   : > { %6138 = vmatpush.bf16.msra.mxu3 %v9366_v16 }
0x14b3   : > { %6139 = vmatpush.bf16.msra.mxu3 %v9365_v24 }
0x1519   : > { %v5901_v36 = vpop.f32.mrf.mxu1 }
0x151e   : > { %v5887_v25 = vpop.f32.mrf.mxu0 }
0x151f   : > { %v5888_v26 = vadd.f32 %v5887_v25, %v5687_v28  ;;  %v5873_v9 = vpop.f32.mrf.mxu3 }
0x1521   : > { %v5902_v35 = vadd.f32 %v5901_v36, %v5888_v26  ;;  %v5903_v11 = vpop.f32.mrf.mxu1  ;;  %v8810_v26 = vor.u32 %v9388_v13, %v8809_v18  ;;  %v8801_v36 = vld [vmem:[#allocation13 + $0x160] sm:$0xf]  ;;  %v8777_v18 = vld [vmem:[#allocation13 + $0x130] sm:$0xf]  ;;  %v9380_v13 = vld [vmem:[#allocation13 + $0x134] sm:$0xf0] }
0x1523   : > { %v5907_v31 = vadd.f32 %v9695_v33, %v5902_v35  ;;  %6253 = vmatpush.bf16.msrb.mxu0 %v8810_v26  ;;  %v8793_v33 = vld [vmem:[#allocation13 + $0x150] sm:$0xf]  ;;  %v8769_v26 = vld [vmem:[#allocation13 + $0x120] sm:$0xf] }
0x1524   : > { %v5859_v37 = vpop.f32.mrf.mxu2 }
0x1525   : > { %v5860_v30 = vadd.f32 %v5859_v37, %v5686_v23 }
0x1526   : > { %v5889_v39 = vpop.f32.mrf.mxu0 }
0x1527   : > { %v5874_v40 = vadd.f32 %v5873_v9, %v5860_v30  ;;  %v5890_v41 = vadd.f32 %v5889_v39, %v5687_v28  ;;  %v5875_v20 = vpop.f32.mrf.mxu3  ;;  %v9387_v28 = vld [vmem:[#allocation13 + $0x174] sm:$0xf]  ;;  %v9386_v9 = vld [vmem:[#allocation13 + $0x164] sm:$0xf0]  ;;  %v9385_v30 = vld [vmem:[#allocation13 + $0x164] sm:$0xf] }
0x1528   : > { %v8803_v39 = vld [vmem:[#allocation13 + $0x168] sm:$0xf0] }
0x1529   : > { %v5906_v38 = vadd.f32 %v9694_v42, %v5874_v40  ;;  %v5904_v44 = vadd.f32 %v5903_v11, %v5890_v41  ;;  %v8802_v40 = vor.u32 %v9386_v9, %v8801_v36  ;;  %v9383_v11 = vld [vmem:[#allocation13 + $0x154] sm:$0xf]  ;;  %v9377_v36 = vld [vmem:[#allocation13 + $0x124] sm:$0xf] }
0x152b   : > { %v5914_v43 = vadd.f32 %v5907_v31, %v5906_v38  ;;  %v5909_v48 = vadd.f32 %v9697_v27, %v5904_v44  ;;  %6254 = vmatpush.bf16.msrb.mxu0 %v8802_v40  ;;  %v9381_v27 = vld [vmem:[#allocation13 + $0x144] sm:$0xf]  ;;  %v9375_v40 = vld [vmem:[#allocation13 + $0x114] sm:$0xf] }
0x152c   : > { %v5861_v19 = vpop.f32.mrf.mxu2 }
0x152d   : > { %v5862_v45 = vadd.f32 %v5861_v19, %v5686_v23  ;;  %5915 = vadd.xlane.f32.xlu0 %v5914_v43  ;;  %v8811_v23 = vld [vmem:[#allocation13 + $0x178] sm:$0xf0] }
0x152e   : > { %v8814_v35 = vor.u32 %v9387_v28, %v8811_v23  ;;  %v8795_v19 = vld [vmem:[#allocation13 + $0x158] sm:$0xf0]  ;;  %v9379_v28 = vld [vmem:[#allocation13 + $0x134] sm:$0xf]  ;;  %v9378_v23 = vld [vmem:[#allocation13 + $0x124] sm:$0xf0] }
0x152f   : > { %v5876_v4 = vadd.f32 %v5875_v20, %v5862_v45  ;;  %v8798_v20 = vor.u32 %v9383_v11, %v8795_v19  ;;  %v8770_v9 = vor.u32 %v9378_v23, %v8769_v26  ;;  %v8755_v19 = vld [vmem:[#allocation13 + $0x108] sm:$0xf0]  ;;  %v9395_v26 = vld [vmem:[#allocation14 + $0x30] sm:$0xff] }
0x1530   : > { %6267 = vmatpush.bf16.msra.mxu1 %v8814_v35  ;;  %v9403_v23 = vld [vmem:[#allocation14 + $0x70] sm:$0xff] }
0x1531   : > { %v5908_v47 = vadd.f32 %v9696_v46, %v5876_v4  ;;  %v8785_v4 = vld [vmem:[#allocation13 + $0x140] sm:$0xf]  ;;  %v9382_v46 = vld [vmem:[#allocation13 + $0x144] sm:$0xf0] }
0x1533   : > { %v5917_v49 = vadd.f32 %v5909_v48, %v5908_v47 }
0x1535   : > { %5918 = vadd.xlane.f32.xlu2 %v5917_v49 }
0x15a0   : > { %v5916_v50 = vpop.xlane.xlu0 %5915 }
0x15a1   : > { %v5920_v51 = vmul.f32 %v5916_v50, %v10400_v1  ;;  %v8786_v50 = vor.u32 %v9382_v46, %v8785_v4  ;;  %v9570_v4 = vld [vmem:[%s10876_s14 + $0x2] ss:$0 sm:$0xff] }
0x15a3   : > { %v10745_v52 = vsub.f32 %v5906_v38, %v5920_v51  ;;  %v10747_v53 = vsub.f32 %v5907_v31, %v5920_v51  ;;  %v8806_v38 = vor.u32 %v9385_v30, %v8803_v39  ;;  %v9384_v31 = vld [vmem:[#allocation13 + $0x154] sm:$0xf0]  ;;  %v8761_v30 = vld [vmem:[#allocation13 + $0x110] sm:$0xf] }
0x15a4   : > { %v8794_v45 = vor.u32 %v9384_v31, %v8793_v33  ;;  %v9376_v39 = vld [vmem:[#allocation13 + $0x114] sm:$0xf0]  ;;  %v8753_v33 = vld [vmem:[#allocation13 + $0x100] sm:$0xf]  ;;  %v9374_v31 = vld [vmem:[#allocation13 + $0x104] sm:$0xf0] }
0x15a5   : > { %v5926_v54 = vmul.f32 %v10745_v52, %v10745_v52  ;;  %v5927_v55 = vmul.f32 %v10747_v53, %v10747_v53  ;;  %6268 = vmatpush.bf16.msra.mxu1 %v8806_v38  ;;  %v8754_v11 = vor.u32 %v9374_v31, %v8753_v33  ;;  %v9398_v33 = vld [vmem:[#allocation14 + $0x48] sm:$0xff] }
0x15a6   : > { %6255 = vmatpush.bf16.msrb.mxu0 %v8794_v45 }
0x15a7   : > { %v5930_v56 = vadd.f32 %v5927_v55, %v5926_v54 }
0x15a8   : > { %v5919_v57 = vpop.xlane.xlu2 %5918 }
0x15a9   : > { %v5921_v58 = vmul.f32 %v5919_v57, %v10400_v1  ;;  %5931 = vadd.xlane.f32.xlu1 %v5930_v56  ;;  %6269 = vmatpush.bf16.msra.mxu1 %v8798_v20 }
0x15aa   : > { %6256 = vmatpush.bf16.msrb.mxu0 %v8786_v50 }
0x15ab   : > { %v10754_v59 = vsub.f32 %v5908_v47, %v5921_v58  ;;  %v10756_v60 = vsub.f32 %v5909_v48, %v5921_v58  ;;  %v8787_v48 = vld [vmem:[#allocation13 + $0x148] sm:$0xf0]  ;;  %v8683_v58 = vld [vmem:[%s10873_s11 + $0x4] sm:$0x3] }
0x15ac   : > { %v8790_v54 = vor.u32 %v9381_v27, %v8787_v48  ;;  %v5965_v3 = vperm.slane %v8683_v58, 0  ;;  %v5966_v2 = vperm.slane %v8683_v58, 1 }
0x15ad   : > { %v5928_v22 = vmul.f32 %v10754_v59, %v10754_v59  ;;  %v5929_v21 = vmul.f32 %v10756_v60, %v10756_v60 }
0x15ae   : > { %6270 = vmatpush.bf16.msra.mxu1 %v8790_v54 }
0x15af   : > { %v5933_v63 = vadd.f32 %v5929_v21, %v5928_v22 }
0x15b1   : > { %5934 = vadd.xlane.f32.xlu1 %v5933_v63 }
0x161c   : > { %v5932_v15 = vpop.xlane.xlu1 %5931 }
0x161d   : > { %v5936_v17 = vmul.f32 %v5932_v15, %v10400_v1 }
0x161f   : > { %v5938_v14 = vadd.f32 1e-05, %v5936_v17 }
0x1621   : > { %9686 = vrsqrt.f32 %v5938_v14  ;;  %vm5946_vm3 = vweird.f32 %v5938_v14 }
0x1624   : > { %v5935_v25 = vpop.xlane.xlu1 %5934 }
0x1625   : > { %v5937_v37 = vmul.f32 %v5935_v25, %v10400_v1  ;;  %v8779_v25 = vld [vmem:[#allocation13 + $0x138] sm:$0xf0] }
0x1627   : > { %v9687_v41 = vpop.eup %9686  ;;  %v5939_v42 = vadd.f32 1e-05, %v5937_v37  ;;  %v8771_v37 = vld [vmem:[#allocation13 + $0x128] sm:$0xf0] }
0x1628   : > { %v5941_v43 = vmul.f32 %v9687_v41, %v5938_v14  ;;  %vm5947_vm2 = vweird.f32 %v9687_v41  ;;  %v8774_v35 = vor.u32 %v9377_v36, %v8771_v37  ;;  %v9394_v36 = vld [vmem:[#allocation14 + $0x28] sm:$0xff]  ;;  %v9393_v37 = vld [vmem:[#allocation14 + $0x20] sm:$0xff] }
0x1629   : > { %9688 = vrsqrt.f32 %v5939_v42  ;;  %vm5948_vm15 = vmor %vm5946_vm3, %vm5947_vm2  ;;  %vm5956_vm1 = vweird.f32 %v5939_v42 }
0x162a   : > { %v5942_v44 = vmul.f32 %v9687_v41, %v5941_v43  ;;  %v9373_v43 = vld [vmem:[#allocation13 + $0x104] sm:$0xf] }
0x162c   : > { %v5943_v47 = vmul.f32 0.5, %v5942_v44  ;;  %v8758_v44 = vor.u32 %v9373_v43, %v8755_v19  ;;  %v9397_v19 = vld [vmem:[#allocation14 + $0x40] sm:$0xff] }
0x162e   : > { %v5944_v49 = vsub.f32 1.5, %v5943_v47 }
0x162f   : > { %v9689_v51 = vpop.eup %9688 }
0x1630   : > { %v5945_v55 = vmul.f32 %v9687_v41, %v5944_v49  ;;  %v5951_v56 = vmul.f32 %v9689_v51, %v5939_v42  ;;  %vm5957_vm0 = vweird.f32 %v9689_v51  ;;  %v8763_v42 = vld [vmem:[#allocation13 + $0x118] sm:$0xf0] }
0x1631   : > { %vm5958_vm4 = vmor %vm5956_vm1, %vm5957_vm0  ;;  %v8766_v38 = vor.u32 %v9375_v40, %v8763_v42  ;;  %v9391_v40 = vld [vmem:[#allocation14 + $0x10] sm:$0xff] }
0x1632   : > { %v5952_v57 = vmul.f32 %v9689_v51, %v5951_v56  ;;  %v5949_v22 = vsel %vm5948_vm15, %v9687_v41, %v5945_v55  ;;  %v8762_v41 = vor.u32 %v9376_v39, %v8761_v30  ;;  %v8750_v56 = vld [vmem:[%s10878_s16 + $0x4] sm:$0x3]  ;;  %v9392_v30 = vld [vmem:[#allocation14 + $0x18] sm:$0xff] }
0x1633   : > { %v5960_v5 = vmul.f32 %v5949_v22, %v10745_v52  ;;  %v5961_v32 = vmul.f32 %v5949_v22, %v10747_v53  ;;  %v6170_v58 = vperm.slane %v8750_v56, 1  ;;  %v9400_v39 = vld [vmem:[#allocation14 + $0x58] sm:$0xff] }
0x1634   : > { %v5953_v21 = vmul.f32 0.5, %v5952_v57  ;;  %v6169_v57 = vperm.slane %v8750_v56, 0 }
0x1635   : > { %v5969_v29 = vmul.f32 %v5965_v3, %v5960_v5  ;;  %v5970_v34 = vmul.f32 %v5966_v2, %v5961_v32 }
0x1636   : > { %v5954_v63 = vsub.f32 1.5, %v5953_v21 }
0x1637   : > { %v5978_v17 = vadd.f32 %v5974_v62, %v5969_v29  ;;  %v5979_v14 = vadd.f32 %v5975_v8, %v5970_v34 }
0x1638   : > { %v5955_v7 = vmul.f32 %v9689_v51, %v5954_v63 }
0x163a   : > { %v5959_v10 = vsel %vm5958_vm4, %v9689_v51, %v5955_v7 }
0x163b   : > { %v5962_v12 = vmul.f32 %v5959_v10, %v10754_v59  ;;  %v5963_v15 = vmul.f32 %v5959_v10, %v10756_v60  ;;  %v8778_v59 = vor.u32 %v9380_v13, %v8777_v18  ;;  %v8782_v60 = vor.u32 %v9379_v28, %v8779_v25  ;;  %v9396_v25 = vld [vmem:[#allocation14 + $0x38] sm:$0xff] }
0x163c   : > { %6495 = vmatpush.bf16.msra.mxu2 %v9396_v25 }
0x163d   : > { %v5971_v6 = vmul.f32 %v5965_v3, %v5962_v12  ;;  %v5972_v16 = vmul.f32 %v5966_v2, %v5963_v15  ;;  %6257 = vmatpush.bf16.msrb.mxu0 %v8778_v59  ;;  %6271 = vmatpush.bf16.msra.mxu1 %v8782_v60  ;;  %v9404_v60 = vld [vmem:[#allocation14 + $0x78] sm:$0xff] }
0x163e   : > { %6509 = vmatpush.bf16.msrb.mxu3 %v9404_v60 }
0x163f   : > { %v10774_v61 = vadd.f32 %v5974_v62, %v5971_v6  ;;  %v10776_v52 = vadd.f32 %v5975_v8, %v5972_v16 }
0x1640   : > { %6496 = vmatpush.bf16.msra.mxu2 %v9395_v26 }
0x1641   : > { %v6015_v53 = vpack.c.bf16 %v10774_v61, %v5978_v17  ;;  %v6016_v24 = vpack.c.bf16 %v10776_v52, %v5979_v14  ;;  %6258 = vmatpush.bf16.msrb.mxu0 %v8770_v9  ;;  %6272 = vmatpush.bf16.msra.mxu1 %v8774_v35  ;;  %v9402_v9 = vld [vmem:[#allocation14 + $0x68] sm:$0xff]  ;;  %v9401_v35 = vld [vmem:[#allocation14 + $0x60] sm:$0xff] }
0x1642   : > { %6510 = vmatpush.bf16.msrb.mxu3 %v9403_v23 }
0x1643   : > { %6126 = vmatmul.bf16.vlgmr.msrb.gmra.mxu2 %v6015_v53  ;;  %6140 = vmatmul.bf16.vlgmr.msra.gmra.mxu3 %v6016_v24 }
0x1644   : > { %6497 = vmatpush.bf16.msra.mxu2 %v9394_v36 }
0x1645   : > { %6259 = vmatpush.bf16.msrb.mxu0 %v8762_v41  ;;  %6273 = vmatpush.bf16.msra.mxu1 %v8766_v38  ;;  %v9399_v41 = vld [vmem:[#allocation14 + $0x50] sm:$0xff]  ;;  %v9390_v38 = vld [vmem:[#allocation14 + $0x8] sm:$0xff] }
0x1646   : > { %6511 = vmatpush.bf16.msrb.mxu3 %v9402_v9 }
0x1648   : > { %6498 = vmatpush.bf16.msra.mxu2 %v9393_v37 }
0x1649   : > { %6260 = vmatpush.bf16.msrb.mxu0 %v8754_v11  ;;  %6274 = vmatpush.bf16.msra.mxu1 %v8758_v44  ;;  %v9389_v11 = vld [vmem:[#allocation14] sm:$0xff] }
0x164a   : > { %6512 = vmatpush.bf16.msrb.mxu3 %v9401_v35 }
0x164c   : > { %6499 = vmatpush.bf16.msra.mxu2 %v9392_v30 }
0x164e   : > { %6513 = vmatpush.bf16.msrb.mxu3 %v9400_v39 }
0x1650   : > { %6500 = vmatpush.bf16.msra.mxu2 %v9391_v40 }
0x1652   : > { %6514 = vmatpush.bf16.msrb.mxu3 %v9399_v41 }
0x1654   : > { %6501 = vmatpush.bf16.msra.mxu2 %v9390_v38 }
0x1656   : > { %6515 = vmatpush.bf16.msrb.mxu3 %v9398_v33 }
0x1658   : > { %6502 = vmatpush.bf16.msra.mxu2 %v9389_v11 }
0x165a   : > { %6516 = vmatpush.bf16.msrb.mxu3 %v9397_v19 }
0x16c6   : > { %v6127_v45 = vpop.f32.mrf.mxu2  ;;  %v6141_v20 = vpop.f32.mrf.mxu3 }
0x16c7   : > { %v6128_v46 = vadd.f32 %v9570_v4, %v6127_v45 }
0x16c9   : > { %v6142_v27 = vadd.f32 %v6141_v20, %v6128_v46 }
0x16cb   : > { %v6146_v51 = vmax.f32 %v6142_v27, 0.0 }
0x16ce   : > { %v6129_v47 = vpop.f32.mrf.mxu2  ;;  %v6143_v49 = vpop.f32.mrf.mxu3 }
0x16cf   : > { %v6130_v48 = vadd.f32 %v9570_v4, %v6129_v47 }
0x16d1   : > { %v6144_v50 = vadd.f32 %v6143_v49, %v6130_v48  ;;  %v8815_v48 = vld [vmem:[%s10879_s17 + $0x4] sm:$0x3] }
0x16d2   : > { %v6341_v56 = vperm.slane %v8815_v48, 1 }
0x16d3   : > { %v6147_v54 = vmax.f32 %v6144_v50, 0.0 }
0x16d5   : > { %v6165_v55 = vpack.c.bf16 %v6147_v54, %v6146_v51  ;;  %v8816_v51 = vld [vmem:[%s10932_s18 + $0x4] sm:$0x3] }
0x16d7   : > { %6261 = vmatmul.bf16.vlgmr.msrb.gmra.mxu0 %v6165_v55  ;;  %6275 = vmatmul.bf16.vlgmr.msra.gmra.mxu1 %v6165_v55  ;;  %v6340_v55 = vperm.slane %v8815_v48, 0 }
0x1754   : > { %v6262_v22 = vpop.f32.mrf.mxu0  ;;  %v6276_v21 = vpop.f32.mrf.mxu1 }
0x1755   : > { %v6263_v63 = vadd.f32 %v6262_v22, %v6169_v57  ;;  %v6277_v0 = vadd.f32 %v6276_v21, %v6170_v58  ;;  %v6349_v22 = vperm.slane %v8816_v51, 0  ;;  %v6350_v21 = vperm.slane %v8816_v51, 1 }
0x1757   : > { %v6281_v3 = vadd.f32 %v6263_v63, %v5978_v17  ;;  %v6282_v2 = vadd.f32 %v6277_v0, %v5979_v14 }
0x1759   : > { %v6289_v5 = vadd.f32 %v6282_v2, %v6281_v3 }
0x175b   : > { %6290 = vadd.xlane.f32.xlu0 %v6289_v5 }
0x175c   : > { %v6264_v32 = vpop.f32.mrf.mxu0  ;;  %v6278_v7 = vpop.f32.mrf.mxu1 }
0x175d   : > { %v6265_v62 = vadd.f32 %v6264_v32, %v6169_v57  ;;  %v6279_v8 = vadd.f32 %v6278_v7, %v6170_v58 }
0x175f   : > { %v6283_v10 = vadd.f32 %v6265_v62, %v10774_v61  ;;  %v6284_v29 = vadd.f32 %v6279_v8, %v10776_v52 }
0x1761   : > { %v6292_v34 = vadd.f32 %v6284_v29, %v6283_v10 }
0x1763   : > { %6293 = vadd.xlane.f32.xlu1 %v6292_v34 }
0x17ce   : > { %v6291_v12 = vpop.xlane.xlu0 %6290 }
0x17cf   : > { %v6295_v15 = vmul.f32 %v6291_v12, %v10400_v1 }
0x17d1   : > { %v10789_v6 = vsub.f32 %v6281_v3, %v6295_v15  ;;  %v10791_v16 = vsub.f32 %v6282_v2, %v6295_v15 }
0x17d3   : > { %v6301_v17 = vmul.f32 %v10789_v6, %v10789_v6  ;;  %v6302_v14 = vmul.f32 %v10791_v16, %v10791_v16 }
0x17d5   : > { %v6305_v53 = vadd.f32 %v6302_v14, %v6301_v17 }
0x17d6   : > { %v6294_v24 = vpop.xlane.xlu1 %6293 }
0x17d7   : > { %v6296_v61 = vmul.f32 %v6294_v24, %v10400_v1  ;;  %6306 = vadd.xlane.f32.xlu0 %v6305_v53 }
0x17d9   : > { %v10798_v52 = vsub.f32 %v6283_v10, %v6296_v61  ;;  %v10800_v18 = vsub.f32 %v6284_v29, %v6296_v61 }
0x17db   : > { %v6303_v13 = vmul.f32 %v10798_v52, %v10798_v52  ;;  %v6304_v28 = vmul.f32 %v10800_v18, %v10800_v18 }
0x17dd   : > { %v6308_v59 = vadd.f32 %v6304_v28, %v6303_v13 }
0x17df   : > { %6309 = vadd.xlane.f32.xlu1 %v6308_v59 }
0x184a   : > { %v6307_v42 = vpop.xlane.xlu0 %6306 }
0x184b   : > { %v6311_v31 = vmul.f32 %v6307_v42, %v10400_v1 }
0x184d   : > { %v6313_v43 = vadd.f32 1e-05, %v6311_v31 }
0x184f   : > { %9690 = vrsqrt.f32 %v6313_v43  ;;  %vm6321_vm6 = vweird.f32 %v6313_v43 }
0x1852   : > { %v6310_v44 = vpop.xlane.xlu1 %6309 }
0x1853   : > { %v6312_v45 = vmul.f32 %v6310_v44, %v10400_v1 }
0x1855   : > { %v9691_v20 = vpop.eup %9690  ;;  %v6314_v4 = vadd.f32 1e-05, %v6312_v45 }
0x1856   : > { %v6316_v46 = vmul.f32 %v9691_v20, %v6313_v43  ;;  %vm6322_vm5 = vweird.f32 %v9691_v20 }
0x1857   : > { %9692 = vrsqrt.f32 %v6314_v4  ;;  %vm6323_vm7 = vmor %vm6321_vm6, %vm6322_vm5  ;;  %vm6331_vm9 = vweird.f32 %v6314_v4 }
0x1858   : > { %v6317_v47 = vmul.f32 %v9691_v20, %v6316_v46 }
0x185a   : > { %v6318_v27 = vmul.f32 0.5, %v6317_v47 }
0x185c   : > { %v6319_v49 = vsub.f32 1.5, %v6318_v27 }
0x185d   : > { %v9693_v50 = vpop.eup %9692 }
0x185e   : > { %v6320_v1 = vmul.f32 %v9691_v20, %v6319_v49  ;;  %v6326_v54 = vmul.f32 %v9693_v50, %v6314_v4  ;;  %vm6332_vm8 = vweird.f32 %v9693_v50 }
0x185f   : > { %vm6333_vm10 = vmor %vm6331_vm9, %vm6332_vm8 }
0x1860   : > { %v6324_v57 = vsel %vm6323_vm7, %v9691_v20, %v6320_v1  ;;  %v6327_v58 = vmul.f32 %v9693_v50, %v6326_v54 }
0x1861   : > { %v6335_v63 = vmul.f32 %v6324_v57, %v10789_v6  ;;  %v6336_v0 = vmul.f32 %v6324_v57, %v10791_v16 }
0x1862   : > { %v6328_v3 = vmul.f32 0.5, %v6327_v58 }
0x1863   : > { %v6344_v2 = vmul.f32 %v6340_v55, %v6335_v63  ;;  %v6345_v5 = vmul.f32 %v6341_v56, %v6336_v0 }
0x1864   : > { %v6329_v32 = vsub.f32 1.5, %v6328_v3 }
0x1865   : > { %v6353_v7 = vadd.f32 %v6349_v22, %v6344_v2  ;;  %v6354_v62 = vadd.f32 %v6350_v21, %v6345_v5 }
0x1866   : > { %v6330_v8 = vmul.f32 %v9693_v50, %v6329_v32 }
0x1867   : > { %6357 = vst [vmem:[%s835_s20] sm:$0xff] %v6353_v7 }
0x1868   : > { %6358 = vst [vmem:[%s835_s20 + $0x8] sm:$0xff] %v6354_v62  ;;  %v6334_v10 = vsel %vm6333_vm10, %v9693_v50, %v6330_v8 }
0x1869   : > { %v6337_v29 = vmul.f32 %v6334_v10, %v10798_v52  ;;  %v6338_v34 = vmul.f32 %v6334_v10, %v10800_v18 }
0x186b   : > { %v6346_v12 = vmul.f32 %v6340_v55, %v6337_v29  ;;  %v6347_v15 = vmul.f32 %v6341_v56, %v6338_v34 }
0x186d   : > { %v6355_v6 = vadd.f32 %v6349_v22, %v6346_v12  ;;  %v6356_v16 = vadd.f32 %v6350_v21, %v6347_v15 }
0x186f   : > { %6359 = vst [vmem:[%s835_s20 + $0x10] sm:$0xff] %v6355_v6  ;;  %v6393_v17 = vpack.c.bf16 %v6355_v6, %v6353_v7  ;;  %v6394_v14 = vpack.c.bf16 %v6356_v16, %v6354_v62 }
0x1870   : > { %6360 = vst [vmem:[%s835_s20 + $0x18] sm:$0xff] %v6356_v16 }
0x1871   : > { %6503 = vmatmul.bf16.vlgmr.msra.gmra.mxu2 %v6393_v17  ;;  %6517 = vmatmul.bf16.vlgmr.msrb.gmra.mxu3 %v6394_v14 }
0x1872   : > { %9965 = shalt.err (!%p9962_p8)
}
0x1873   : > { %s10038_s3 = smov 256   ;;  %s10039_s7 = smov 16  }
0x1874   : > { %9438 = dma.vmem_to_hbm [thread:$0]  (%p10198_p5), %s6549_s30, 512, %s6551_s22, %s6526_s0, %s10038_s3, %s10038_s3, %s10039_s7  }
0x1875   : > { %s10937_s23 = sld [smem:[#allocation40_spill]]  ;;  %s10938_s21 = sshll.u32 %s10294_s24, 4 }
0x1876   : > { %s10939_s28 = sld [smem:[#allocation43_spill]] }
0x187b   : > { %v9571_v53 = vld [vmem:[%s10937_s23] ss:$0 sm:$0xff] }
0x187c   : > { %s864_s4 = scalar_lea.vmem %s10939_s28, %s10938_s21 }
0x18f4   : > { %v6504_v24 = vpop.f32.mrf.mxu2  ;;  %v6518_v61 = vpop.f32.mrf.mxu3 }
0x18f5   : > { %v6505_v52 = vadd.f32 %v9571_v53, %v6504_v24 }
0x18f7   : > { %v6519_v18 = vadd.f32 %v6518_v61, %v6505_v52 }
0x18f9   : > { %6523 = vst [vmem:[%s864_s4] sm:$0xff] %v6519_v18 }
0x18fc   : > { %v6506_v13 = vpop.f32.mrf.mxu2  ;;  %v6520_v59 = vpop.f32.mrf.mxu3 }
0x18fd   : > { %v6507_v28 = vadd.f32 %v9571_v53, %v6506_v13 }
0x18ff   : > { %v6521_v25 = vadd.f32 %v6520_v59, %v6507_v28 }
0x1901   : > { %6524 = vst [vmem:[%s864_s4 + $0x8] sm:$0xff] %v6521_v25 }
0x1902 PF: > { %s10940_s25 = sld [smem:[#allocation26_spill]] }
0x1903   : > { %s10941_s30 = sld [smem:[#allocation23_spill]] }
0x1908   : > { %p9485_p5 = scmp.ge.s32.totalorder %s10940_s25, 2 }
0x1909   : > { %s6571_s0 = sand.u32 1, %s10941_s30  }
0x190a   : > { %p9466_p9 = pnand %p9485_p5, %p10202_p6  ;;  %s6572_s24 = scalar_lea.sflag [#allocation4], %s6571_s0 }
0x190c   : > { %p9467_p10 = pneg %p9466_p9 }
0x190e   : > { %10003 = dma.done.wait (%p9467_p10), %s6572_s24, 512  }
0x190f   : > { %10005 = vsyncadd (%p9467_p10), %s6572_s24, 4294966784  ;;  %s10943_s25 = sld [smem:[#allocation27_spill]] }
0x1910   : > { %s10944_s4 = sld [smem:[#allocation24_spill]] }
0x1911   : > { %s10945_s30 = sld [smem:[#allocation25_spill]] }
0x1912   : > { %s10946_s24 = sld [smem:[#allocation28_spill]] }
0x1915   : > { %p39_p11 = scmp.ge.s32.totalorder %s10943_s25, 4  }
0x1917   :  { %41 = sbr.rel (!%p39_p11) target bundleno = 22 (0x16), region = 220 }
0x191c   :  { %6594 = vsyncpa [#allocation3], 1 }
0x191d   :  { %6596 = vsyncpa [#allocation3 + $0x1], 1 }
0x191e   :  { %6597 = vsyncpa [#allocation6], 1 }
0x191f   :  { %6598 = vsyncpa [#allocation9], 1 }
0x1920   :  { %6599 = vsyncpa [#allocation12], 1 }
0x1921   :  { %6600 = vsyncpa [#allocation15], 1 }
0x1922   :  { %6601 = vsyncpa [#allocation4], 1 }
0x1923   :  { %6603 = vsyncpa [#allocation4 + $0x1], 1 }

</bundles_post_ra>
